<compile_context>
chip_gen: v7x
topology: tpu7x:2x2x1
jax: 0.10.0
libtpu: 0.0.40
codegen_flags: <defaults>
</compile_context>

<pallas_src>
import functools
import math

import jax
import jax.numpy as jnp
from jax.experimental import pallas as pl
from jax.experimental.pallas import tpu as pltpu

F32 = jnp.float32
BF16 = jnp.bfloat16

BLOCK_PARAM_NAMES = (
    "ln1_w", "ln1_b", "wq", "bq", "wk", "bk", "wv", "bv",
    "wo", "bo", "ln2_w", "ln2_b", "w1", "b1", "w2", "b2",
)


# ----------------------------------------------------------------------------
# In-kernel helpers (operate on VMEM-resident values)
# ----------------------------------------------------------------------------

def _bdot(a, b):
    """MXU matmul: bf16 operands, f32 accumulation."""
    return jnp.dot(a.astype(BF16), b.astype(BF16), preferred_element_type=F32)


def _ln(x, w, b, eps=1e-5):
    """LayerNorm over the last (feature/channel) dim with affine params."""
    mu = jnp.mean(x, axis=-1, keepdims=True)
    var = jnp.mean(jnp.square(x - mu), axis=-1, keepdims=True)
    return (x - mu) * jax.lax.rsqrt(var + eps) * w + b


def _softmax_rows(s):
    s = s - jnp.max(s, axis=-1, keepdims=True)
    p = jnp.exp(s)
    return p * pl.reciprocal(jnp.sum(p, axis=-1, keepdims=True), approx=True)


def _block_refs(refs, depth):
    return [dict(zip(BLOCK_PARAM_NAMES, refs[d * 16:(d + 1) * 16]))
            for d in range(depth)]


def _transformer_block(x, p, heads, dim_head):
    """Pre-norm MHSA + pre-norm MLP with residuals on an [N, D] token slab.

    Attention weights are stored per-head ([heads, D, dh] / [heads, dh, D]) so
    heads are selected by indexing the leading ref axis -- no lane-dim slicing
    of activations and no [B, heads, N, dh] HBM transposes; everything stays
    in VMEM inside a single kernel.
    """
    scale = 1.0 / math.sqrt(dim_head)
    h = _ln(x, p["ln1_w"][...], p["ln1_b"][...])
    attn = jnp.zeros_like(x)
    for hd in range(heads):
        q = _bdot(h, p["wq"][hd]) + p["bq"][hd]
        k = _bdot(h, p["wk"][hd]) + p["bk"][hd]
        v = _bdot(h, p["wv"][hd]) + p["bv"][hd]
        s = jax.lax.dot_general(
            q.astype(BF16), k.astype(BF16),
            (((1,), (1,)), ((), ())), preferred_element_type=F32) * scale
        pr = _softmax_rows(s)
        # concat(head_outs) @ wo  ==  sum_h head_out_h @ wo[h]
        attn = attn + _bdot(_bdot(pr, v), p["wo"][hd])
    x = x + attn + p["bo"][...]
    h = _ln(x, p["ln2_w"][...], p["ln2_b"][...])
    h = _bdot(h, p["w1"][...]) + p["b1"][...]
    # TODO(synk): PyTorch nn.GELU default is exact erf; tanh approximation used.
    h = jax.nn.gelu(h)
    h = _bdot(h, p["w2"][...]) + p["b2"][...]
    return x + h


# ----------------------------------------------------------------------------
# Pallas kernels
# ----------------------------------------------------------------------------

def _patcher_kernel(x_ref, cnw_ref, cnb_ref, wconv_ref, bconv_ref,
                    wlin_ref, blin_ref, o_ref, *, h, w):
    """Fused Patcher per image: ChannelNorm -> 3x3 'same' conv (9 shifted,
    masked matmuls accumulated in VMEM; no im2col in HBM) -> Linear."""
    hw = h * w
    c = x_ref.shape[-1]
    dmodel = wconv_ref.shape[-1]
    xn = _ln(x_ref[0], cnw_ref[...], cnb_ref[...])            # [hw, c]
    zpad = jnp.zeros((w + 1, c), F32)
    xp = jnp.concatenate([zpad, xn, zpad], axis=0)            # [hw + 2w + 2, c]
    col = jax.lax.broadcasted_iota(jnp.int32, (hw, 1), 0) % w
    acc = jnp.zeros((hw, dmodel), F32)
    k = 0
    for dy in (-1, 0, 1):
        for dx in (-1, 0, 1):
            start = (w + 1) + dy * w + dx
            tap = jax.lax.slice(xp, (start, 0), (start + hw, c))
            valid = jnp.logical_and(col + dx >= 0, col + dx < w)
            tap = jnp.where(valid, tap, 0.0)
            acc = acc + _bdot(tap, wconv_ref[k])
            k += 1
    y = acc + bconv_ref[...]
    o_ref[0] = _bdot(y, wlin_ref[...]) + blin_ref[...]


def _crossprod_cn_kernel(x_ref, wa_ref, ba_ref, wb_ref, bb_ref, g_ref,
                         cnw_ref, cnb_ref, o_ref):
    """CrossProdMean  (g * a * mean(b))  fused with the following ChannelNorm."""
    x = x_ref[...]
    a = _bdot(x, wa_ref[...]) + ba_ref[...]
    b = _bdot(x, wb_ref[...]) + bb_ref[...]
    o = g_ref[...] * a * jnp.mean(b, axis=-1, keepdims=True)
    o_ref[...] = _ln(o, cnw_ref[...], cnb_ref[...])


def _pit_kernel(*refs, heads, dim_head, depth):
    """Fused PiT surrogate per image: patch-embed -> [cls|tok] + pos ->
    transformer block(s) -> cls token -> folded (c h)@vh_proj projection."""
    tok_ref, embw_ref, embb_ref, cls_ref, pos_ref = refs[:5]
    blocks = _block_refs(refs[5:5 + 16 * depth], depth)
    wvh_ref = refs[5 + 16 * depth]
    o_ref = refs[-1]
    x = _bdot(tok_ref[0], embw_ref[...]) + embb_ref[...]
    x = jnp.concatenate([cls_ref[...], x], axis=0) + pos_ref[...]
    for blk in blocks:
        x = _transformer_block(x, blk, heads, dim_head)
    o_ref[0] = _bdot(x[0:1, :], wvh_ref[...])


def _partitioner_head_kernel(*refs, heads, dim_head, depth):
    """Fused Partitioner core + output head, per image:

      patch-embed -> transformer block(s) -> +pos_embed (after the
      transformer, as in the reference) -> folded projection.

    The folded projection W_fold combines the Partitioner "reshape" Linear
    (hid_dim -> E*P^2, columns pre-permuted from (c p) to (p o)-after-head
    layout at init) with the final Linear(E, out_ch).  The cls contribution
    (cls + crops) @ W_head distributes, so it enters through W_cls (the head
    weights tiled along the p axis).  Output layout is (p o) along lanes, so
    the wrapper-side 'b n (c p) -> b (n p) c' rearrange is a free reshape."""
    tok_ref, cls_ref, embw_ref, embb_ref = refs[:4]
    blocks = _block_refs(refs[4:4 + 16 * depth], depth)
    pos_ref, wfold_ref, bfold_ref, wcls_ref = refs[4 + 16 * depth:8 + 16 * depth]
    o_ref = refs[-1]
    x = _bdot(tok_ref[0], embw_ref[...]) + embb_ref[...]
    for blk in blocks:
        x = _transformer_block(x, blk, heads, dim_head)
    x = x + pos_ref[...]
    cls_term = _bdot(cls_ref[0], wcls_ref[...]) + bfold_ref[...]   # [1, P2*oc]
    o_ref[0] = _bdot(x, wfold_ref[...]) + cls_term                 # [Np, P2*oc]


# ----------------------------------------------------------------------------
# pallas_call wrappers
# ----------------------------------------------------------------------------

def _rep_spec(a):
    """Full-array block, replicated across the grid."""
    return pl.BlockSpec(a.shape, lambda *_, n=a.ndim: (0,) * n)


def _parallel(n):
    return pltpu.CompilerParams(dimension_semantics=("parallel",) * n)


def patcher(x_nchw, p):
    B, C, H, W = x_nchw.shape
    x = jnp.transpose(x_nchw, (0, 2, 3, 1)).reshape(B, H * W, C)
    E = p["lin_w"].shape[-1]
    kernel = functools.partial(_patcher_kernel, h=H, w=W)
    return pl.pallas_call(
        kernel,
        out_shape=jax.ShapeDtypeStruct((B, H * W, E), F32),
        grid_spec=pltpu.PrefetchScalarGridSpec(
            num_scalar_prefetch=0,
            grid=(B,),
            in_specs=[pl.BlockSpec((1, H * W, C), lambda b: (b, 0, 0)),
                      _rep_spec(p["cn_w"]), _rep_spec(p["cn_b"]),
                      _rep_spec(p["conv_w"]), _rep_spec(p["conv_b"]),
                      _rep_spec(p["lin_w"]), _rep_spec(p["lin_b"])],
            out_specs=pl.BlockSpec((1, H * W, E), lambda b: (b, 0, 0)),
        ),
        compiler_params=_parallel(1),
    )(x, p["cn_w"], p["cn_b"], p["conv_w"], p["conv_b"], p["lin_w"], p["lin_b"])


def crossprod_channelnorm(x, p):
    B, N, D = x.shape
    Hd = p["wa"].shape[1]
    M = B * N
    tm = M
    for cand in (256, 128):
        if M % cand == 0:
            tm = cand
            break
    out = pl.pallas_call(
        _crossprod_cn_kernel,
        out_shape=jax.ShapeDtypeStruct((M, Hd), F32),
        grid_spec=pltpu.PrefetchScalarGridSpec(
            num_scalar_prefetch=0,
            grid=(M // tm,),
            in_specs=[pl.BlockSpec((tm, D), lambda i: (i, 0)),
                      _rep_spec(p["wa"]), _rep_spec(p["ba"]),
                      _rep_spec(p["wb"]), _rep_spec(p["bb"]),
                      _rep_spec(p["g"]),
                      _rep_spec(p["cn_w"]), _rep_spec(p["cn_b"])],
            out_specs=pl.BlockSpec((tm, Hd), lambda i: (i, 0)),
        ),
        compiler_params=_parallel(1),
    )(x.reshape(M, D), p["wa"], p["ba"], p["wb"], p["bb"], p["g"],
      p["cn_w"], p["cn_b"])
    return out.reshape(B, N, Hd)


def pad_to_multiple(img, patch):
    """Padder: zero-pad H, W up to a multiple of patch (right/bottom)."""
    B, H, W, C = img.shape
    return jnp.pad(img, ((0, 0), (0, (-H) % patch), (0, (-W) % patch), (0, 0)))


def patchify(img, patch):
    """'b (h p1) (w p2) c -> b (h w) (p1 p2 c)'."""
    B, H, W, C = img.shape
    nh, nw = H // patch, W // patch
    x = img.reshape(B, nh, patch, nw, patch, C)
    x = jnp.transpose(x, (0, 1, 3, 2, 4, 5))
    return x.reshape(B, nh * nw, patch * patch * C)


def _flatten_blocks(blocks):
    flat = []
    for blk in blocks:
        flat.extend(blk[name] for name in BLOCK_PARAM_NAMES)
    return flat


def pit_cls(img_nhwc, p, *, patch_size, heads, dim_head):
    # TODO(synk): the reference PiT is a multi-stage pooling transformer with an
    # undisclosed implementation; this is a single-stage cls-token ViT surrogate
    # producing the same [B, 1, embed_dim] contribution (the (c h) @ vh_proj
    # contraction is folded into the kernel via the `wvh` matrix).
    B, H, W, C = img_nhwc.shape
    tok = patchify(img_nhwc, patch_size)                      # [B, Np, p*p*C]
    Np = tok.shape[1]
    E = p["wvh"].shape[1]
    depth = len(p["blocks"])
    kernel = functools.partial(_pit_kernel, heads=heads, dim_head=dim_head,
                               depth=depth)
    args = ([tok, p["emb_w"], p["emb_b"], p["cls"], p["pos_embed"][:Np + 1]]
            + _flatten_blocks(p["blocks"]) + [p["wvh"]])
    in_specs = ([pl.BlockSpec((1, Np, tok.shape[-1]), lambda b: (b, 0, 0))]
                + [_rep_spec(a) for a in args[1:]])
    return pl.pallas_call(
        kernel,
        out_shape=jax.ShapeDtypeStruct((B, 1, E), F32),
        grid_spec=pltpu.PrefetchScalarGridSpec(
            num_scalar_prefetch=0, grid=(B,),
            in_specs=in_specs,
            out_specs=pl.BlockSpec((1, 1, E), lambda b: (b, 0, 0)),
        ),
        compiler_params=_parallel(1),
    )(*args)


def partitioner_with_head(x, cls, p, *, patch_size, heads, dim_head, out_ch):
    """Partitioner (crossprod -> patcher -> transformer -> +pos -> reshape
    Linear) fused with the final output head Linear(E, out_ch); the cls token
    is folded in via distributed weights.  Returns [B, Np*P^2, out_ch]."""
    B, N, D = x.shape
    s = int(math.isqrt(N))
    hcn = crossprod_channelnorm(x, p["front"])                # [B, N, Hd]
    Hd = hcn.shape[-1]
    img = pad_to_multiple(hcn.reshape(B, s, s, Hd), patch_size)
    tok = patchify(img, patch_size)                           # [B, Np, p*p*Hd]
    Np = tok.shape[1]
    P2 = patch_size * patch_size
    depth = len(p["blocks"])
    kernel = functools.partial(_partitioner_head_kernel, heads=heads,
                               dim_head=dim_head, depth=depth)
    args = ([tok, cls, p["emb_w"], p["emb_b"]] + _flatten_blocks(p["blocks"])
            + [p["pos_embed"][:Np], p["w_fold"], p["b_fold"], p["w_cls"]])
    in_specs = ([pl.BlockSpec((1, Np, tok.shape[-1]), lambda b: (b, 0, 0)),
                 pl.BlockSpec((1, 1, cls.shape[-1]), lambda b: (b, 0, 0))]
                + [_rep_spec(a) for a in args[2:]])
    out = pl.pallas_call(
        kernel,
        out_shape=jax.ShapeDtypeStruct((B, Np, P2 * out_ch), F32),
        grid_spec=pltpu.PrefetchScalarGridSpec(
            num_scalar_prefetch=0, grid=(B,),
            in_specs=in_specs,
            out_specs=pl.BlockSpec((1, Np, P2 * out_ch), lambda b: (b, 0, 0)),
        ),
        compiler_params=_parallel(1),
    )(*args)
    # Kernel output lane layout is (p o) -> 'b n (p o) -> b (n p) o' is a
    # zero-cost reshape (no HBM transpose, unlike the (c p) layout).
    return out.reshape(B, Np * P2, out_ch)


def dmap_vit_forward(x_nchw, params, cfg):
    B, C, H, W = x_nchw.shape
    m = H * W
    E = cfg["embed_dim"]

    x = patcher(x_nchw, params["patcher"])                    # [B, m, E]

    # cls branch: ReshapeImage -> PiT surrogate (with vh_proj folded in-kernel)
    img = x.reshape(B, H, W, E)
    cls = pit_cls(img, params["pit"], patch_size=cfg["patch_size"],
                  heads=cfg["heads"], dim_head=cfg["dim_head"])    # [B, 1, E]

    # Partitioner + output head fused (cls enters via folded weights).
    y = partitioner_with_head(
        x, cls, params["partitioner"],
        patch_size=cfg["patch_size"], heads=cfg["heads"],
        dim_head=cfg["dim_head"], out_ch=cfg["out_channels"])      # [B, Np*P2, Co]
    y = y[:, :m]                                                   # [B, m, Co]
    y = y.reshape(B, H, W, -1)
    return jnp.transpose(y, (0, 3, 1, 2))                          # -> NCHW


# ----------------------------------------------------------------------------
# Deterministic parameter init (matmul weights stored bf16)
# ----------------------------------------------------------------------------

def _dense(key, fan_in, fan_out):
    w = (jax.random.normal(key, (fan_in, fan_out), F32)
         / math.sqrt(fan_in)).astype(BF16)
    return w, jnp.zeros((1, fan_out), F32)


def _block_params(key, dim, heads, dim_head, mlp_dim):
    ks = jax.random.split(key, 6)
    inner = heads * dim_head

    def per_head(k, fan_in):
        w = jax.random.normal(k, (fan_in, inner), F32) / math.sqrt(fan_in)
        w = w.reshape(fan_in, heads, dim_head).transpose(1, 0, 2)
        return w.astype(BF16), jnp.zeros((heads, 1, dim_head), F32)

    wq, bq = per_head(ks[0], dim)
    wk, bk = per_head(ks[1], dim)
    wv, bv = per_head(ks[2], dim)
    wo = (jax.random.normal(ks[3], (inner, dim), F32) / math.sqrt(inner)
          ).reshape(heads, dim_head, dim).astype(BF16)
    w1, b1 = _dense(ks[4], dim, mlp_dim)
    w2, b2 = _dense(ks[5], mlp_dim, dim)
    return dict(
        ln1_w=jnp.ones((1, dim), F32), ln1_b=jnp.zeros((1, dim), F32),
        wq=wq, bq=bq, wk=wk, bk=bk, wv=wv, bv=bv,
        wo=wo, bo=jnp.zeros((1, dim), F32),
        ln2_w=jnp.ones((1, dim), F32), ln2_b=jnp.zeros((1, dim), F32),
        w1=w1, b1=b1, w2=w2, b2=b2,
    )


def init_params(key, cfg):
    in_ch, out_ch = cfg["in_channels"], cfg["out_channels"]
    E, Hd, Mmlp = cfg["embed_dim"], cfg["hid_dim"], cfg["mlp_dim"]
    heads, dh, P = cfg["heads"], cfg["dim_head"], cfg["patch_size"]
    vh, blk, depth = cfg["vit_heads"], cfg["blk_size"], cfg["depth"]
    img = cfg["img_size"]
    P2 = P * P
    keys = iter(jax.random.split(key, 40))

    # Patcher: ChannelNorm(in_ch) -> Conv2d(3x3, same) -> Linear(dmodel, E)
    dmodel = E // 2
    conv_w = (jax.random.normal(next(keys), (9, in_ch, dmodel), F32)
              / math.sqrt(9 * in_ch)).astype(BF16)
    lin_w, lin_b = _dense(next(keys), dmodel, E)
    patcher_p = dict(cn_w=jnp.ones((1, in_ch), F32),
                     cn_b=jnp.zeros((1, in_ch), F32),
                     conv_w=conv_w, conv_b=jnp.zeros((1, dmodel), F32),
                     lin_w=lin_w, lin_b=lin_b)

    # Partitioner front: CrossProdMean + ChannelNorm
    wa, ba = _dense(next(keys), E, Hd)
    wb, bb = _dense(next(keys), E, Hd)
    g = jax.random.normal(next(keys), (1, Hd), F32)
    front = dict(wa=wa, ba=ba, wb=wb, bb=bb, g=g,
                 cn_w=jnp.ones((1, Hd), F32), cn_b=jnp.zeros((1, Hd), F32))
    emb_w, emb_b = _dense(next(keys), Hd * P2, Hd)

    # Fold the Partitioner "reshape" Linear(Hd, E*P^2) (PyTorch column layout
    # (c p)) with the output head Linear(E, out_ch).  Rearrange
    # 'b n (c p) -> b (n p) c' followed by a rowwise linear distributes, so:
    #   W_fold[k, p*oc+o] = sum_c out_w[k, c*P2+p] * head_w[c, o]
    #   b_fold[p*oc+o]    = sum_c out_b[c*P2+p]  * head_w[c, o] + head_b[o]
    #   W_cls[c, p*oc+o]  = head_w[c, o]          (cls term, tiled along p)
    # This is weight-only preprocessing done once at init.
    out_w = jax.random.normal(next(keys), (Hd, E * P2), F32) / math.sqrt(Hd)
    out_b = jnp.zeros((E * P2,), F32)
    head_w = jax.random.normal(next(keys), (E, out_ch), F32) / math.sqrt(E)
    head_b = jnp.zeros((out_ch,), F32)
    w_fold = jnp.einsum("kcp,co->kpo", out_w.reshape(Hd, E, P2), head_w
                        ).reshape(Hd, P2 * out_ch).astype(BF16)
    b_fold = (out_b.reshape(E, P2).T @ head_w + head_b[None, :]
              ).reshape(1, P2 * out_ch)
    w_cls = jnp.tile(head_w, (1, P2)).astype(BF16)

    part_p = dict(
        front=front, emb_w=emb_w, emb_b=emb_b,
        blocks=[_block_params(next(keys), Hd, heads, dh, Mmlp)
                for _ in range(depth)],
        pos_embed=jax.random.normal(next(keys), (blk, Hd), F32) * 0.02,
        w_fold=w_fold, b_fold=b_fold, w_cls=w_cls,
    )

    # PiT surrogate (cls branch)
    pit_dim = E * vh
    n_patch = (img // P) ** 2
    pemb_w, pemb_b = _dense(next(keys), E * P2, pit_dim)
    vh_proj = jax.random.normal(next(keys), (vh,), F32)
    # Fold Rearrange('b n (c h) -> b n c h') followed by (@ vh_proj) into a
    # single [pit_dim, E] matrix so it runs inside the PiT kernel (lane-dense).
    wvh = jnp.kron(jnp.eye(E, dtype=F32), vh_proj.reshape(vh, 1)).astype(BF16)
    pit_p = dict(
        emb_w=pemb_w, emb_b=pemb_b,
        cls=jax.random.normal(next(keys), (1, pit_dim), F32) * 0.02,
        pos_embed=jax.random.normal(next(keys), (n_patch + 1, pit_dim),
                                    F32) * 0.02,
        blocks=[_block_params(next(keys), pit_dim, heads, dh, Mmlp)],
        wvh=wvh,
    )

    return dict(patcher=patcher_p, partitioner=part_p, pit=pit_p)


# ----------------------------------------------------------------------------
# Main
# ----------------------------------------------------------------------------

if __name__ == "__main__":
    CFG = dict(
        in_channels=4, out_channels=3,
        embed_dim=8, hid_dim=16, mlp_dim=32,
        depth=1, heads=2, dim_head=8,
        patch_size=4, vit_heads=2, blk_size=16,
        img_size=16,
    )

    key = jax.random.PRNGKey(0)
    k_param, k_input = jax.random.split(key)
    params = init_params(k_param, CFG)
    x = jax.random.normal(k_input, (2, CFG["in_channels"], 16, 16), jnp.float32)

    fwd = jax.jit(lambda inp: dmap_vit_forward(inp, params, CFG))
    out = fwd(x)
    jax.block_until_ready(out)

    assert out.shape == (2, CFG["out_channels"], 16, 16), out.shape
    assert bool(jnp.all(jnp.isfinite(out)))
    print("KERNEL_OK")
</pallas_src>

<mosaic_0001>
module attributes {stable_mosaic.version = 11 : i64} {
  func.func @_patcher_kernel(%arg0: i32, %arg1: memref<1x256x4xf32, #tpu.memory_space<vmem>>, %arg2: memref<1x4xf32, #tpu.memory_space<vmem>>, %arg3: memref<1x4xf32, #tpu.memory_space<vmem>>, %arg4: memref<9x4x4xbf16, #tpu.memory_space<vmem>>, %arg5: memref<1x4xf32, #tpu.memory_space<vmem>>, %arg6: memref<4x8xbf16, #tpu.memory_space<vmem>>, %arg7: memref<1x8xf32, #tpu.memory_space<vmem>>, %arg8: memref<1x256x8xf32, #tpu.memory_space<vmem>>) attributes {dimension_semantics = [#tpu.dimension_semantics<parallel>], iteration_bounds = array<i64: 2>, scalar_prefetch = 0 : i64, scratch_operands = 0 : i64, tpu.core_type = #tpu.core_type<tc>, window_params = [{transform_indices = @transform_0, window_bounds = array<i64: 1, 256, 4>}, {pipeline_mode = #tpu.pipeline_mode<synchronous>, transform_indices = @transform_1, window_bounds = array<i64: 1, 4>}, {pipeline_mode = #tpu.pipeline_mode<synchronous>, transform_indices = @transform_2, window_bounds = array<i64: 1, 4>}, {pipeline_mode = #tpu.pipeline_mode<synchronous>, transform_indices = @transform_3, window_bounds = array<i64: 9, 4, 4>}, {pipeline_mode = #tpu.pipeline_mode<synchronous>, transform_indices = @transform_4, window_bounds = array<i64: 1, 4>}, {pipeline_mode = #tpu.pipeline_mode<synchronous>, transform_indices = @transform_5, window_bounds = array<i64: 4, 8>}, {pipeline_mode = #tpu.pipeline_mode<synchronous>, transform_indices = @transform_6, window_bounds = array<i64: 1, 8>}, {transform_indices = @transform_7, window_bounds = array<i64: 1, 256, 8>}]} {
    %c0 = arith.constant 0 : index
    %c0_0 = arith.constant 0 : index
    %c0_1 = arith.constant 0 : index
    %0 = vector.load %arg1[%c0, %c0_0, %c0_1] : memref<1x256x4xf32, #tpu.memory_space<vmem>>, vector<1x256x4xf32>
    %1 = vector.shape_cast %0 : vector<1x256x4xf32> to vector<256x4xf32>
    %c0_2 = arith.constant 0 : index
    %c0_3 = arith.constant 0 : index
    %2 = vector.load %arg2[%c0_2, %c0_3] : memref<1x4xf32, #tpu.memory_space<vmem>>, vector<1x4xf32>
    %c0_4 = arith.constant 0 : index
    %c0_5 = arith.constant 0 : index
    %3 = vector.load %arg3[%c0_4, %c0_5] : memref<1x4xf32, #tpu.memory_space<vmem>>, vector<1x4xf32>
    %cst = arith.constant dense<0.000000e+00> : vector<256xf32>
    %4 = vector.multi_reduction <add>, %1, %cst [1] : vector<256x4xf32> to vector<256xf32>
    %5 = vector.shape_cast %4 : vector<256xf32> to vector<256x1xf32>
    %cst_6 = arith.constant 4.000000e+00 : f32
    %6 = vector.broadcast %cst_6 : f32 to vector<256x1xf32>
    %7 = arith.divf %5, %6 : vector<256x1xf32>
    %8 = vector.broadcast %7 : vector<256x1xf32> to vector<256x4xf32>
    %9 = arith.subf %1, %8 : vector<256x4xf32>
    %10 = arith.mulf %9, %9 : vector<256x4xf32>
    %cst_7 = arith.constant dense<0.000000e+00> : vector<256xf32>
    %11 = vector.multi_reduction <add>, %10, %cst_7 [1] : vector<256x4xf32> to vector<256xf32>
    %12 = vector.shape_cast %11 : vector<256xf32> to vector<256x1xf32>
    %cst_8 = arith.constant 4.000000e+00 : f32
    %13 = vector.broadcast %cst_8 : f32 to vector<256x1xf32>
    %14 = arith.divf %12, %13 : vector<256x1xf32>
    %15 = vector.broadcast %7 : vector<256x1xf32> to vector<256x4xf32>
    %16 = arith.subf %1, %15 : vector<256x4xf32>
    %cst_9 = arith.constant 9.99999974E-6 : f32
    %17 = vector.broadcast %cst_9 : f32 to vector<256x1xf32>
    %18 = arith.addf %14, %17 : vector<256x1xf32>
    %19 = math.rsqrt %18 : vector<256x1xf32>
    %20 = vector.broadcast %19 : vector<256x1xf32> to vector<256x4xf32>
    %21 = arith.mulf %16, %20 : vector<256x4xf32>
    %22 = vector.broadcast %2 : vector<1x4xf32> to vector<256x4xf32>
    %23 = arith.mulf %21, %22 : vector<256x4xf32>
    %24 = vector.broadcast %3 : vector<1x4xf32> to vector<256x4xf32>
    %25 = arith.addf %23, %24 : vector<256x4xf32>
    %cst_10 = arith.constant 0.000000e+00 : f32
    %26 = vector.broadcast %cst_10 : f32 to vector<17x4xf32>
    %27 = tpu.concatenate %26, %25, %26 in 0 : vector<17x4xf32>, vector<256x4xf32>, vector<17x4xf32> -> vector<290x4xf32>
    %28 = tpu.iota {dimensions = array<i32: 0>} : vector<256x1xi32>
    %c16_i32 = arith.constant 16 : i32
    %c0_i32 = arith.constant 0 : i32
    %29 = arith.cmpi eq, %c16_i32, %c0_i32 : i32
    %c1_i32 = arith.constant 1 : i32
    %30 = arith.select %29, %c1_i32, %c16_i32 : i32
    %31 = vector.broadcast %30 : i32 to vector<256x1xi32>
    %32 = arith.remsi %28, %31 : vector<256x1xi32>
    %c0_i32_11 = arith.constant 0 : i32
    %33 = vector.broadcast %c0_i32_11 : i32 to vector<256x1xi32>
    %34 = arith.cmpi ne, %32, %33 : vector<256x1xi32>
    %c0_i32_12 = arith.constant 0 : i32
    %35 = vector.broadcast %c0_i32_12 : i32 to vector<256x1xi32>
    %36 = arith.cmpi slt, %32, %35 : vector<256x1xi32>
    %c0_i32_13 = arith.constant 0 : i32
    %37 = arith.cmpi slt, %30, %c0_i32_13 : i32
    %38 = vector.broadcast %37 : i1 to vector<256x1xi1>
    %39 = vector.broadcast %38 : vector<256x1xi1> to vector<256x1xi1>
    %40 = arith.xori %36, %39 : vector<256x1xi1>
    %41 = arith.andi %40, %34 : vector<256x1xi1>
    %42 = vector.broadcast %30 : i32 to vector<256x1xi32>
    %43 = arith.addi %32, %42 : vector<256x1xi32>
    %44 = arith.select %41, %43, %32 : vector<256x1xi1>, vector<256x1xi32>
    %cst_14 = arith.constant 0.000000e+00 : f32
    %45 = vector.broadcast %cst_14 : f32 to vector<256x4xf32>
    %46 = vector.extract_strided_slice %27 {offsets = [0, 0], sizes = [256, 4], strides = [1, 1]} : vector<290x4xf32> to vector<256x4xf32>
    %c-1_i32 = arith.constant -1 : i32
    %47 = vector.broadcast %c-1_i32 : i32 to vector<256x1xi32>
    %48 = arith.addi %44, %47 : vector<256x1xi32>
    %c0_i32_15 = arith.constant 0 : i32
    %49 = vector.broadcast %c0_i32_15 : i32 to vector<256x1xi32>
    %50 = arith.cmpi sge, %48, %49 : vector<256x1xi32>
    %c-1_i32_16 = arith.constant -1 : i32
    %51 = vector.broadcast %c-1_i32_16 : i32 to vector<256x1xi32>
    %52 = arith.addi %44, %51 : vector<256x1xi32>
    %c16_i32_17 = arith.constant 16 : i32
    %53 = vector.broadcast %c16_i32_17 : i32 to vector<256x1xi32>
    %54 = arith.cmpi slt, %52, %53 : vector<256x1xi32>
    %55 = arith.andi %50, %54 : vector<256x1xi1>
    %cst_18 = arith.constant 0.000000e+00 : f32
    %56 = vector.shape_cast %55 : vector<256x1xi1> to vector<256x1xi1>
    %57 = vector.broadcast %56 : vector<256x1xi1> to vector<256x4xi1>
    %58 = vector.broadcast %cst_18 : f32 to vector<256x4xf32>
    %59 = arith.select %57, %46, %58 : vector<256x4xi1>, vector<256x4xf32>
    %c0_19 = arith.constant 0 : index
    %c0_20 = arith.constant 0 : index
    %c0_21 = arith.constant 0 : index
    %60 = vector.load %arg4[%c0_19, %c0_20, %c0_21] : memref<9x4x4xbf16, #tpu.memory_space<vmem>>, vector<1x4x4xbf16>
    %61 = vector.shape_cast %60 : vector<1x4x4xbf16> to vector<4x4xbf16>
    %62 = arith.truncf %59 : vector<256x4xf32> to vector<256x4xbf16>
    %cst_22 = arith.constant dense<0.000000e+00> : vector<256x4xf32>
    %63 = tpu.matmul %62, %61, %cst_22 {dimension_numbers = #tpu.dot_dimension_numbers<[1], [0], [0], [1], [0, 0, 1, 1], [], []>} : vector<256x4xbf16>, vector<4x4xbf16>, vector<256x4xf32> -> vector<256x4xf32>
    %64 = arith.addf %45, %63 : vector<256x4xf32>
    %65 = vector.extract_strided_slice %27 {offsets = [1, 0], sizes = [256, 4], strides = [1, 1]} : vector<290x4xf32> to vector<256x4xf32>
    %c0_i32_23 = arith.constant 0 : i32
    %66 = vector.broadcast %c0_i32_23 : i32 to vector<256x1xi32>
    %67 = arith.addi %44, %66 : vector<256x1xi32>
    %c0_i32_24 = arith.constant 0 : i32
    %68 = vector.broadcast %c0_i32_24 : i32 to vector<256x1xi32>
    %69 = arith.cmpi sge, %67, %68 : vector<256x1xi32>
    %c0_i32_25 = arith.constant 0 : i32
    %70 = vector.broadcast %c0_i32_25 : i32 to vector<256x1xi32>
    %71 = arith.addi %44, %70 : vector<256x1xi32>
    %c16_i32_26 = arith.constant 16 : i32
    %72 = vector.broadcast %c16_i32_26 : i32 to vector<256x1xi32>
    %73 = arith.cmpi slt, %71, %72 : vector<256x1xi32>
    %74 = arith.andi %69, %73 : vector<256x1xi1>
    %cst_27 = arith.constant 0.000000e+00 : f32
    %75 = vector.shape_cast %74 : vector<256x1xi1> to vector<256x1xi1>
    %76 = vector.broadcast %75 : vector<256x1xi1> to vector<256x4xi1>
    %77 = vector.broadcast %cst_27 : f32 to vector<256x4xf32>
    %78 = arith.select %76, %65, %77 : vector<256x4xi1>, vector<256x4xf32>
    %c1 = arith.constant 1 : index
    %c0_28 = arith.constant 0 : index
    %c0_29 = arith.constant 0 : index
    %79 = vector.load %arg4[%c1, %c0_28, %c0_29] : memref<9x4x4xbf16, #tpu.memory_space<vmem>>, vector<1x4x4xbf16>
    %80 = vector.shape_cast %79 : vector<1x4x4xbf16> to vector<4x4xbf16>
    %81 = arith.truncf %78 : vector<256x4xf32> to vector<256x4xbf16>
    %cst_30 = arith.constant dense<0.000000e+00> : vector<256x4xf32>
    %82 = tpu.matmul %81, %80, %cst_30 {dimension_numbers = #tpu.dot_dimension_numbers<[1], [0], [0], [1], [0, 0, 1, 1], [], []>} : vector<256x4xbf16>, vector<4x4xbf16>, vector<256x4xf32> -> vector<256x4xf32>
    %83 = arith.addf %64, %82 : vector<256x4xf32>
    %84 = vector.extract_strided_slice %27 {offsets = [2, 0], sizes = [256, 4], strides = [1, 1]} : vector<290x4xf32> to vector<256x4xf32>
    %c1_i32_31 = arith.constant 1 : i32
    %85 = vector.broadcast %c1_i32_31 : i32 to vector<256x1xi32>
    %86 = arith.addi %44, %85 : vector<256x1xi32>
    %c0_i32_32 = arith.constant 0 : i32
    %87 = vector.broadcast %c0_i32_32 : i32 to vector<256x1xi32>
    %88 = arith.cmpi sge, %86, %87 : vector<256x1xi32>
    %c1_i32_33 = arith.constant 1 : i32
    %89 = vector.broadcast %c1_i32_33 : i32 to vector<256x1xi32>
    %90 = arith.addi %44, %89 : vector<256x1xi32>
    %c16_i32_34 = arith.constant 16 : i32
    %91 = vector.broadcast %c16_i32_34 : i32 to vector<256x1xi32>
    %92 = arith.cmpi slt, %90, %91 : vector<256x1xi32>
    %93 = arith.andi %88, %92 : vector<256x1xi1>
    %cst_35 = arith.constant 0.000000e+00 : f32
    %94 = vector.shape_cast %93 : vector<256x1xi1> to vector<256x1xi1>
    %95 = vector.broadcast %94 : vector<256x1xi1> to vector<256x4xi1>
    %96 = vector.broadcast %cst_35 : f32 to vector<256x4xf32>
    %97 = arith.select %95, %84, %96 : vector<256x4xi1>, vector<256x4xf32>
    %c2 = arith.constant 2 : index
    %c0_36 = arith.constant 0 : index
    %c0_37 = arith.constant 0 : index
    %98 = vector.load %arg4[%c2, %c0_36, %c0_37] : memref<9x4x4xbf16, #tpu.memory_space<vmem>>, vector<1x4x4xbf16>
    %99 = vector.shape_cast %98 : vector<1x4x4xbf16> to vector<4x4xbf16>
    %100 = arith.truncf %97 : vector<256x4xf32> to vector<256x4xbf16>
    %cst_38 = arith.constant dense<0.000000e+00> : vector<256x4xf32>
    %101 = tpu.matmul %100, %99, %cst_38 {dimension_numbers = #tpu.dot_dimension_numbers<[1], [0], [0], [1], [0, 0, 1, 1], [], []>} : vector<256x4xbf16>, vector<4x4xbf16>, vector<256x4xf32> -> vector<256x4xf32>
    %102 = arith.addf %83, %101 : vector<256x4xf32>
    %103 = vector.extract_strided_slice %27 {offsets = [16, 0], sizes = [256, 4], strides = [1, 1]} : vector<290x4xf32> to vector<256x4xf32>
    %c-1_i32_39 = arith.constant -1 : i32
    %104 = vector.broadcast %c-1_i32_39 : i32 to vector<256x1xi32>
    %105 = arith.addi %44, %104 : vector<256x1xi32>
    %c0_i32_40 = arith.constant 0 : i32
    %106 = vector.broadcast %c0_i32_40 : i32 to vector<256x1xi32>
    %107 = arith.cmpi sge, %105, %106 : vector<256x1xi32>
    %c-1_i32_41 = arith.constant -1 : i32
    %108 = vector.broadcast %c-1_i32_41 : i32 to vector<256x1xi32>
    %109 = arith.addi %44, %108 : vector<256x1xi32>
    %c16_i32_42 = arith.constant 16 : i32
    %110 = vector.broadcast %c16_i32_42 : i32 to vector<256x1xi32>
    %111 = arith.cmpi slt, %109, %110 : vector<256x1xi32>
    %112 = arith.andi %107, %111 : vector<256x1xi1>
    %cst_43 = arith.constant 0.000000e+00 : f32
    %113 = vector.shape_cast %112 : vector<256x1xi1> to vector<256x1xi1>
    %114 = vector.broadcast %113 : vector<256x1xi1> to vector<256x4xi1>
    %115 = vector.broadcast %cst_43 : f32 to vector<256x4xf32>
    %116 = arith.select %114, %103, %115 : vector<256x4xi1>, vector<256x4xf32>
    %c3 = arith.constant 3 : index
    %c0_44 = arith.constant 0 : index
    %c0_45 = arith.constant 0 : index
    %117 = vector.load %arg4[%c3, %c0_44, %c0_45] : memref<9x4x4xbf16, #tpu.memory_space<vmem>>, vector<1x4x4xbf16>
    %118 = vector.shape_cast %117 : vector<1x4x4xbf16> to vector<4x4xbf16>
    %119 = arith.truncf %116 : vector<256x4xf32> to vector<256x4xbf16>
    %cst_46 = arith.constant dense<0.000000e+00> : vector<256x4xf32>
    %120 = tpu.matmul %119, %118, %cst_46 {dimension_numbers = #tpu.dot_dimension_numbers<[1], [0], [0], [1], [0, 0, 1, 1], [], []>} : vector<256x4xbf16>, vector<4x4xbf16>, vector<256x4xf32> -> vector<256x4xf32>
    %121 = arith.addf %102, %120 : vector<256x4xf32>
    %122 = vector.extract_strided_slice %27 {offsets = [17, 0], sizes = [256, 4], strides = [1, 1]} : vector<290x4xf32> to vector<256x4xf32>
    %c0_i32_47 = arith.constant 0 : i32
    %123 = vector.broadcast %c0_i32_47 : i32 to vector<256x1xi32>
    %124 = arith.addi %44, %123 : vector<256x1xi32>
    %c0_i32_48 = arith.constant 0 : i32
    %125 = vector.broadcast %c0_i32_48 : i32 to vector<256x1xi32>
    %126 = arith.cmpi sge, %124, %125 : vector<256x1xi32>
    %c0_i32_49 = arith.constant 0 : i32
    %127 = vector.broadcast %c0_i32_49 : i32 to vector<256x1xi32>
    %128 = arith.addi %44, %127 : vector<256x1xi32>
    %c16_i32_50 = arith.constant 16 : i32
    %129 = vector.broadcast %c16_i32_50 : i32 to vector<256x1xi32>
    %130 = arith.cmpi slt, %128, %129 : vector<256x1xi32>
    %131 = arith.andi %126, %130 : vector<256x1xi1>
    %cst_51 = arith.constant 0.000000e+00 : f32
    %132 = vector.shape_cast %131 : vector<256x1xi1> to vector<256x1xi1>
    %133 = vector.broadcast %132 : vector<256x1xi1> to vector<256x4xi1>
    %134 = vector.broadcast %cst_51 : f32 to vector<256x4xf32>
    %135 = arith.select %133, %122, %134 : vector<256x4xi1>, vector<256x4xf32>
    %c4 = arith.constant 4 : index
    %c0_52 = arith.constant 0 : index
    %c0_53 = arith.constant 0 : index
    %136 = vector.load %arg4[%c4, %c0_52, %c0_53] : memref<9x4x4xbf16, #tpu.memory_space<vmem>>, vector<1x4x4xbf16>
    %137 = vector.shape_cast %136 : vector<1x4x4xbf16> to vector<4x4xbf16>
    %138 = arith.truncf %135 : vector<256x4xf32> to vector<256x4xbf16>
    %cst_54 = arith.constant dense<0.000000e+00> : vector<256x4xf32>
    %139 = tpu.matmul %138, %137, %cst_54 {dimension_numbers = #tpu.dot_dimension_numbers<[1], [0], [0], [1], [0, 0, 1, 1], [], []>} : vector<256x4xbf16>, vector<4x4xbf16>, vector<256x4xf32> -> vector<256x4xf32>
    %140 = arith.addf %121, %139 : vector<256x4xf32>
    %141 = vector.extract_strided_slice %27 {offsets = [18, 0], sizes = [256, 4], strides = [1, 1]} : vector<290x4xf32> to vector<256x4xf32>
    %c1_i32_55 = arith.constant 1 : i32
    %142 = vector.broadcast %c1_i32_55 : i32 to vector<256x1xi32>
    %143 = arith.addi %44, %142 : vector<256x1xi32>
    %c0_i32_56 = arith.constant 0 : i32
    %144 = vector.broadcast %c0_i32_56 : i32 to vector<256x1xi32>
    %145 = arith.cmpi sge, %143, %144 : vector<256x1xi32>
    %c1_i32_57 = arith.constant 1 : i32
    %146 = vector.broadcast %c1_i32_57 : i32 to vector<256x1xi32>
    %147 = arith.addi %44, %146 : vector<256x1xi32>
    %c16_i32_58 = arith.constant 16 : i32
    %148 = vector.broadcast %c16_i32_58 : i32 to vector<256x1xi32>
    %149 = arith.cmpi slt, %147, %148 : vector<256x1xi32>
    %150 = arith.andi %145, %149 : vector<256x1xi1>
    %cst_59 = arith.constant 0.000000e+00 : f32
    %151 = vector.shape_cast %150 : vector<256x1xi1> to vector<256x1xi1>
    %152 = vector.broadcast %151 : vector<256x1xi1> to vector<256x4xi1>
    %153 = vector.broadcast %cst_59 : f32 to vector<256x4xf32>
    %154 = arith.select %152, %141, %153 : vector<256x4xi1>, vector<256x4xf32>
    %c5 = arith.constant 5 : index
    %c0_60 = arith.constant 0 : index
    %c0_61 = arith.constant 0 : index
    %155 = vector.load %arg4[%c5, %c0_60, %c0_61] : memref<9x4x4xbf16, #tpu.memory_space<vmem>>, vector<1x4x4xbf16>
    %156 = vector.shape_cast %155 : vector<1x4x4xbf16> to vector<4x4xbf16>
    %157 = arith.truncf %154 : vector<256x4xf32> to vector<256x4xbf16>
    %cst_62 = arith.constant dense<0.000000e+00> : vector<256x4xf32>
    %158 = tpu.matmul %157, %156, %cst_62 {dimension_numbers = #tpu.dot_dimension_numbers<[1], [0], [0], [1], [0, 0, 1, 1], [], []>} : vector<256x4xbf16>, vector<4x4xbf16>, vector<256x4xf32> -> vector<256x4xf32>
    %159 = arith.addf %140, %158 : vector<256x4xf32>
    %160 = vector.extract_strided_slice %27 {offsets = [32, 0], sizes = [256, 4], strides = [1, 1]} : vector<290x4xf32> to vector<256x4xf32>
    %c-1_i32_63 = arith.constant -1 : i32
    %161 = vector.broadcast %c-1_i32_63 : i32 to vector<256x1xi32>
    %162 = arith.addi %44, %161 : vector<256x1xi32>
    %c0_i32_64 = arith.constant 0 : i32
    %163 = vector.broadcast %c0_i32_64 : i32 to vector<256x1xi32>
    %164 = arith.cmpi sge, %162, %163 : vector<256x1xi32>
    %c-1_i32_65 = arith.constant -1 : i32
    %165 = vector.broadcast %c-1_i32_65 : i32 to vector<256x1xi32>
    %166 = arith.addi %44, %165 : vector<256x1xi32>
    %c16_i32_66 = arith.constant 16 : i32
    %167 = vector.broadcast %c16_i32_66 : i32 to vector<256x1xi32>
    %168 = arith.cmpi slt, %166, %167 : vector<256x1xi32>
    %169 = arith.andi %164, %168 : vector<256x1xi1>
    %cst_67 = arith.constant 0.000000e+00 : f32
    %170 = vector.shape_cast %169 : vector<256x1xi1> to vector<256x1xi1>
    %171 = vector.broadcast %170 : vector<256x1xi1> to vector<256x4xi1>
    %172 = vector.broadcast %cst_67 : f32 to vector<256x4xf32>
    %173 = arith.select %171, %160, %172 : vector<256x4xi1>, vector<256x4xf32>
    %c6 = arith.constant 6 : index
    %c0_68 = arith.constant 0 : index
    %c0_69 = arith.constant 0 : index
    %174 = vector.load %arg4[%c6, %c0_68, %c0_69] : memref<9x4x4xbf16, #tpu.memory_space<vmem>>, vector<1x4x4xbf16>
    %175 = vector.shape_cast %174 : vector<1x4x4xbf16> to vector<4x4xbf16>
    %176 = arith.truncf %173 : vector<256x4xf32> to vector<256x4xbf16>
    %cst_70 = arith.constant dense<0.000000e+00> : vector<256x4xf32>
    %177 = tpu.matmul %176, %175, %cst_70 {dimension_numbers = #tpu.dot_dimension_numbers<[1], [0], [0], [1], [0, 0, 1, 1], [], []>} : vector<256x4xbf16>, vector<4x4xbf16>, vector<256x4xf32> -> vector<256x4xf32>
    %178 = arith.addf %159, %177 : vector<256x4xf32>
    %179 = vector.extract_strided_slice %27 {offsets = [33, 0], sizes = [256, 4], strides = [1, 1]} : vector<290x4xf32> to vector<256x4xf32>
    %c0_i32_71 = arith.constant 0 : i32
    %180 = vector.broadcast %c0_i32_71 : i32 to vector<256x1xi32>
    %181 = arith.addi %44, %180 : vector<256x1xi32>
    %c0_i32_72 = arith.constant 0 : i32
    %182 = vector.broadcast %c0_i32_72 : i32 to vector<256x1xi32>
    %183 = arith.cmpi sge, %181, %182 : vector<256x1xi32>
    %c0_i32_73 = arith.constant 0 : i32
    %184 = vector.broadcast %c0_i32_73 : i32 to vector<256x1xi32>
    %185 = arith.addi %44, %184 : vector<256x1xi32>
    %c16_i32_74 = arith.constant 16 : i32
    %186 = vector.broadcast %c16_i32_74 : i32 to vector<256x1xi32>
    %187 = arith.cmpi slt, %185, %186 : vector<256x1xi32>
    %188 = arith.andi %183, %187 : vector<256x1xi1>
    %cst_75 = arith.constant 0.000000e+00 : f32
    %189 = vector.shape_cast %188 : vector<256x1xi1> to vector<256x1xi1>
    %190 = vector.broadcast %189 : vector<256x1xi1> to vector<256x4xi1>
    %191 = vector.broadcast %cst_75 : f32 to vector<256x4xf32>
    %192 = arith.select %190, %179, %191 : vector<256x4xi1>, vector<256x4xf32>
    %c7 = arith.constant 7 : index
    %c0_76 = arith.constant 0 : index
    %c0_77 = arith.constant 0 : index
    %193 = vector.load %arg4[%c7, %c0_76, %c0_77] : memref<9x4x4xbf16, #tpu.memory_space<vmem>>, vector<1x4x4xbf16>
    %194 = vector.shape_cast %193 : vector<1x4x4xbf16> to vector<4x4xbf16>
    %195 = arith.truncf %192 : vector<256x4xf32> to vector<256x4xbf16>
    %cst_78 = arith.constant dense<0.000000e+00> : vector<256x4xf32>
    %196 = tpu.matmul %195, %194, %cst_78 {dimension_numbers = #tpu.dot_dimension_numbers<[1], [0], [0], [1], [0, 0, 1, 1], [], []>} : vector<256x4xbf16>, vector<4x4xbf16>, vector<256x4xf32> -> vector<256x4xf32>
    %197 = arith.addf %178, %196 : vector<256x4xf32>
    %198 = vector.extract_strided_slice %27 {offsets = [34, 0], sizes = [256, 4], strides = [1, 1]} : vector<290x4xf32> to vector<256x4xf32>
    %c1_i32_79 = arith.constant 1 : i32
    %199 = vector.broadcast %c1_i32_79 : i32 to vector<256x1xi32>
    %200 = arith.addi %44, %199 : vector<256x1xi32>
    %c0_i32_80 = arith.constant 0 : i32
    %201 = vector.broadcast %c0_i32_80 : i32 to vector<256x1xi32>
    %202 = arith.cmpi sge, %200, %201 : vector<256x1xi32>
    %c1_i32_81 = arith.constant 1 : i32
    %203 = vector.broadcast %c1_i32_81 : i32 to vector<256x1xi32>
    %204 = arith.addi %44, %203 : vector<256x1xi32>
    %c16_i32_82 = arith.constant 16 : i32
    %205 = vector.broadcast %c16_i32_82 : i32 to vector<256x1xi32>
    %206 = arith.cmpi slt, %204, %205 : vector<256x1xi32>
    %207 = arith.andi %202, %206 : vector<256x1xi1>
    %cst_83 = arith.constant 0.000000e+00 : f32
    %208 = vector.shape_cast %207 : vector<256x1xi1> to vector<256x1xi1>
    %209 = vector.broadcast %208 : vector<256x1xi1> to vector<256x4xi1>
    %210 = vector.broadcast %cst_83 : f32 to vector<256x4xf32>
    %211 = arith.select %209, %198, %210 : vector<256x4xi1>, vector<256x4xf32>
    %c8 = arith.constant 8 : index
    %c0_84 = arith.constant 0 : index
    %c0_85 = arith.constant 0 : index
    %212 = vector.load %arg4[%c8, %c0_84, %c0_85] : memref<9x4x4xbf16, #tpu.memory_space<vmem>>, vector<1x4x4xbf16>
    %213 = vector.shape_cast %212 : vector<1x4x4xbf16> to vector<4x4xbf16>
    %214 = arith.truncf %211 : vector<256x4xf32> to vector<256x4xbf16>
    %cst_86 = arith.constant dense<0.000000e+00> : vector<256x4xf32>
    %215 = tpu.matmul %214, %213, %cst_86 {dimension_numbers = #tpu.dot_dimension_numbers<[1], [0], [0], [1], [0, 0, 1, 1], [], []>} : vector<256x4xbf16>, vector<4x4xbf16>, vector<256x4xf32> -> vector<256x4xf32>
    %216 = arith.addf %197, %215 : vector<256x4xf32>
    %c0_87 = arith.constant 0 : index
    %c0_88 = arith.constant 0 : index
    %217 = vector.load %arg5[%c0_87, %c0_88] : memref<1x4xf32, #tpu.memory_space<vmem>>, vector<1x4xf32>
    %218 = vector.broadcast %217 : vector<1x4xf32> to vector<256x4xf32>
    %219 = arith.addf %216, %218 : vector<256x4xf32>
    %c0_89 = arith.constant 0 : index
    %c0_90 = arith.constant 0 : index
    %220 = vector.load %arg6[%c0_89, %c0_90] : memref<4x8xbf16, #tpu.memory_space<vmem>>, vector<4x8xbf16>
    %221 = arith.truncf %219 : vector<256x4xf32> to vector<256x4xbf16>
    %cst_91 = arith.constant dense<0.000000e+00> : vector<256x8xf32>
    %222 = tpu.matmul %221, %220, %cst_91 {dimension_numbers = #tpu.dot_dimension_numbers<[1], [0], [0], [1], [0, 0, 1, 1], [], []>} : vector<256x4xbf16>, vector<4x8xbf16>, vector<256x8xf32> -> vector<256x8xf32>
    %c0_92 = arith.constant 0 : index
    %c0_93 = arith.constant 0 : index
    %223 = vector.load %arg7[%c0_92, %c0_93] : memref<1x8xf32, #tpu.memory_space<vmem>>, vector<1x8xf32>
    %224 = vector.broadcast %223 : vector<1x8xf32> to vector<256x8xf32>
    %225 = arith.addf %222, %224 : vector<256x8xf32>
    %c0_94 = arith.constant 0 : index
    %c0_95 = arith.constant 0 : index
    %c0_96 = arith.constant 0 : index
    %226 = vector.load %arg8[%c0_94, %c0_95, %c0_96] : memref<1x256x8xf32, #tpu.memory_space<vmem>>, vector<1x256x8xf32>
    %227 = vector.shape_cast %226 : vector<1x256x8xf32> to vector<256x8xf32>
    %228 = vector.shape_cast %225 : vector<256x8xf32> to vector<1x256x8xf32>
    tpu.vector_store %arg8[%c0_94, %c0_95, %c0_96], %228 {strides = array<i32>} : memref<1x256x8xf32, #tpu.memory_space<vmem>>, vector<1x256x8xf32>,
    return
  }
  func.func @transform_0(%arg0: i32) -> (i32, i32, i32) {
    %c0_i32 = arith.constant 0 : i32
    %c0_i32_0 = arith.constant 0 : i32
    %c0_i32_1 = arith.constant 0 : i32
    return %arg0, %c0_i32, %c0_i32_0 : i32, i32, i32
  }
  func.func @transform_1(%arg0: i32) -> (i32, i32) {
    %c0_i32 = arith.constant 0 : i32
    %c0_i32_0 = arith.constant 0 : i32
    %c0_i32_1 = arith.constant 0 : i32
    return %c0_i32, %c0_i32_0 : i32, i32
  }
  func.func @transform_2(%arg0: i32) -> (i32, i32) {
    %c0_i32 = arith.constant 0 : i32
    %c0_i32_0 = arith.constant 0 : i32
    %c0_i32_1 = arith.constant 0 : i32
    return %c0_i32, %c0_i32_0 : i32, i32
  }
  func.func @transform_3(%arg0: i32) -> (i32, i32, i32) {
    %c0_i32 = arith.constant 0 : i32
    %c0_i32_0 = arith.constant 0 : i32
    %c0_i32_1 = arith.constant 0 : i32
    %c0_i32_2 = arith.constant 0 : i32
    return %c0_i32, %c0_i32_0, %c0_i32_1 : i32, i32, i32
  }
  func.func @transform_4(%arg0: i32) -> (i32, i32) {
    %c0_i32 = arith.constant 0 : i32
    %c0_i32_0 = arith.constant 0 : i32
    %c0_i32_1 = arith.constant 0 : i32
    return %c0_i32, %c0_i32_0 : i32, i32
  }
  func.func @transform_5(%arg0: i32) -> (i32, i32) {
    %c0_i32 = arith.constant 0 : i32
    %c0_i32_0 = arith.constant 0 : i32
    %c0_i32_1 = arith.constant 0 : i32
    return %c0_i32, %c0_i32_0 : i32, i32
  }
  func.func @transform_6(%arg0: i32) -> (i32, i32) {
    %c0_i32 = arith.constant 0 : i32
    %c0_i32_0 = arith.constant 0 : i32
    %c0_i32_1 = arith.constant 0 : i32
    return %c0_i32, %c0_i32_0 : i32, i32
  }
  func.func @transform_7(%arg0: i32) -> (i32, i32, i32) {
    %c0_i32 = arith.constant 0 : i32
    %c0_i32_0 = arith.constant 0 : i32
    %c0_i32_1 = arith.constant 0 : i32
    return %arg0, %c0_i32, %c0_i32_0 : i32, i32, i32
  }
}

module attributes {stable_mosaic.version = 11 : i64} {
  func.func @_pit_kernel(%arg0: i32, %arg1: memref<1x16x128xf32, #tpu.memory_space<vmem>>, %arg2: memref<128x16xbf16, #tpu.memory_space<vmem>>, %arg3: memref<1x16xf32, #tpu.memory_space<vmem>>, %arg4: memref<1x16xf32, #tpu.memory_space<vmem>>, %arg5: memref<17x16xf32, #tpu.memory_space<vmem>>, %arg6: memref<1x16xf32, #tpu.memory_space<vmem>>, %arg7: memref<1x16xf32, #tpu.memory_space<vmem>>, %arg8: memref<2x16x8xbf16, #tpu.memory_space<vmem>>, %arg9: memref<2x1x8xf32, #tpu.memory_space<vmem>>, %arg10: memref<2x16x8xbf16, #tpu.memory_space<vmem>>, %arg11: memref<2x1x8xf32, #tpu.memory_space<vmem>>, %arg12: memref<2x16x8xbf16, #tpu.memory_space<vmem>>, %arg13: memref<2x1x8xf32, #tpu.memory_space<vmem>>, %arg14: memref<2x8x16xbf16, #tpu.memory_space<vmem>>, %arg15: memref<1x16xf32, #tpu.memory_space<vmem>>, %arg16: memref<1x16xf32, #tpu.memory_space<vmem>>, %arg17: memref<1x16xf32, #tpu.memory_space<vmem>>, %arg18: memref<16x32xbf16, #tpu.memory_space<vmem>>, %arg19: memref<1x32xf32, #tpu.memory_space<vmem>>, %arg20: memref<32x16xbf16, #tpu.memory_space<vmem>>, %arg21: memref<1x16xf32, #tpu.memory_space<vmem>>, %arg22: memref<16x8xbf16, #tpu.memory_space<vmem>>, %arg23: memref<1x1x8xf32, #tpu.memory_space<vmem>>) attributes {dimension_semantics = [#tpu.dimension_semantics<parallel>], iteration_bounds = array<i64: 2>, scalar_prefetch = 0 : i64, scratch_operands = 0 : i64, tpu.core_type = #tpu.core_type<tc>, window_params = [{transform_indices = @transform_0, window_bounds = array<i64: 1, 16, 128>}, {pipeline_mode = #tpu.pipeline_mode<synchronous>, transform_indices = @transform_1, window_bounds = array<i64: 128, 16>}, {pipeline_mode = #tpu.pipeline_mode<synchronous>, transform_indices = @transform_2, window_bounds = array<i64: 1, 16>}, {pipeline_mode = #tpu.pipeline_mode<synchronous>, transform_indices = @transform_3, window_bounds = array<i64: 1, 16>}, {pipeline_mode = #tpu.pipeline_mode<synchronous>, transform_indices = @transform_4, window_bounds = array<i64: 17, 16>}, {pipeline_mode = #tpu.pipeline_mode<synchronous>, transform_indices = @transform_5, window_bounds = array<i64: 1, 16>}, {pipeline_mode = #tpu.pipeline_mode<synchronous>, transform_indices = @transform_6, window_bounds = array<i64: 1, 16>}, {pipeline_mode = #tpu.pipeline_mode<synchronous>, transform_indices = @transform_7, window_bounds = array<i64: 2, 16, 8>}, {pipeline_mode = #tpu.pipeline_mode<synchronous>, transform_indices = @transform_8, window_bounds = array<i64: 2, 1, 8>}, {pipeline_mode = #tpu.pipeline_mode<synchronous>, transform_indices = @transform_9, window_bounds = array<i64: 2, 16, 8>}, {pipeline_mode = #tpu.pipeline_mode<synchronous>, transform_indices = @transform_10, window_bounds = array<i64: 2, 1, 8>}, {pipeline_mode = #tpu.pipeline_mode<synchronous>, transform_indices = @transform_11, window_bounds = array<i64: 2, 16, 8>}, {pipeline_mode = #tpu.pipeline_mode<synchronous>, transform_indices = @transform_12, window_bounds = array<i64: 2, 1, 8>}, {pipeline_mode = #tpu.pipeline_mode<synchronous>, transform_indices = @transform_13, window_bounds = array<i64: 2, 8, 16>}, {pipeline_mode = #tpu.pipeline_mode<synchronous>, transform_indices = @transform_14, window_bounds = array<i64: 1, 16>}, {pipeline_mode = #tpu.pipeline_mode<synchronous>, transform_indices = @transform_15, window_bounds = array<i64: 1, 16>}, {pipeline_mode = #tpu.pipeline_mode<synchronous>, transform_indices = @transform_16, window_bounds = array<i64: 1, 16>}, {pipeline_mode = #tpu.pipeline_mode<synchronous>, transform_indices = @transform_17, window_bounds = array<i64: 16, 32>}, {pipeline_mode = #tpu.pipeline_mode<synchronous>, transform_indices = @transform_18, window_bounds = array<i64: 1, 32>}, {pipeline_mode = #tpu.pipeline_mode<synchronous>, transform_indices = @transform_19, window_bounds = array<i64: 32, 16>}, {pipeline_mode = #tpu.pipeline_mode<synchronous>, transform_indices = @transform_20, window_bounds = array<i64: 1, 16>}, {pipeline_mode = #tpu.pipeline_mode<synchronous>, transform_indices = @transform_21, window_bounds = array<i64: 16, 8>}, {transform_indices = @transform_22, window_bounds = array<i64: 1, 1, 8>}]} {
    %c0 = arith.constant 0 : index
    %c0_0 = arith.constant 0 : index
    %c0_1 = arith.constant 0 : index
    %0 = vector.load %arg1[%c0, %c0_0, %c0_1] : memref<1x16x128xf32, #tpu.memory_space<vmem>>, vector<1x16x128xf32>
    %1 = vector.shape_cast %0 : vector<1x16x128xf32> to vector<16x128xf32>
    %c0_2 = arith.constant 0 : index
    %c0_3 = arith.constant 0 : index
    %2 = vector.load %arg2[%c0_2, %c0_3] : memref<128x16xbf16, #tpu.memory_space<vmem>>, vector<128x16xbf16>
    %3 = arith.truncf %1 : vector<16x128xf32> to vector<16x128xbf16>
    %cst = arith.constant dense<0.000000e+00> : vector<16x16xf32>
    %4 = tpu.matmul %3, %2, %cst {dimension_numbers = #tpu.dot_dimension_numbers<[1], [0], [0], [1], [0, 0, 1, 1], [], []>} : vector<16x128xbf16>, vector<128x16xbf16>, vector<16x16xf32> -> vector<16x16xf32>
    %c0_4 = arith.constant 0 : index
    %c0_5 = arith.constant 0 : index
    %5 = vector.load %arg3[%c0_4, %c0_5] : memref<1x16xf32, #tpu.memory_space<vmem>>, vector<1x16xf32>
    %6 = vector.broadcast %5 : vector<1x16xf32> to vector<16x16xf32>
    %7 = arith.addf %4, %6 : vector<16x16xf32>
    %c0_6 = arith.constant 0 : index
    %c0_7 = arith.constant 0 : index
    %8 = vector.load %arg4[%c0_6, %c0_7] : memref<1x16xf32, #tpu.memory_space<vmem>>, vector<1x16xf32>
    %9 = tpu.concatenate %8, %7 in 0 : vector<1x16xf32>, vector<16x16xf32> -> vector<17x16xf32>
    %c0_8 = arith.constant 0 : index
    %c0_9 = arith.constant 0 : index
    %10 = vector.load %arg5[%c0_8, %c0_9] : memref<17x16xf32, #tpu.memory_space<vmem>>, vector<17x16xf32>
    %11 = arith.addf %9, %10 : vector<17x16xf32>
    %c0_10 = arith.constant 0 : index
    %c0_11 = arith.constant 0 : index
    %12 = vector.load %arg6[%c0_10, %c0_11] : memref<1x16xf32, #tpu.memory_space<vmem>>, vector<1x16xf32>
    %c0_12 = arith.constant 0 : index
    %c0_13 = arith.constant 0 : index
    %13 = vector.load %arg7[%c0_12, %c0_13] : memref<1x16xf32, #tpu.memory_space<vmem>>, vector<1x16xf32>
    %cst_14 = arith.constant dense<0.000000e+00> : vector<17xf32>
    %14 = vector.multi_reduction <add>, %11, %cst_14 [1] : vector<17x16xf32> to vector<17xf32>
    %15 = vector.shape_cast %14 : vector<17xf32> to vector<17x1xf32>
    %cst_15 = arith.constant 1.600000e+01 : f32
    %16 = vector.broadcast %cst_15 : f32 to vector<17x1xf32>
    %17 = arith.divf %15, %16 : vector<17x1xf32>
    %18 = vector.broadcast %17 : vector<17x1xf32> to vector<17x16xf32>
    %19 = arith.subf %11, %18 : vector<17x16xf32>
    %20 = arith.mulf %19, %19 : vector<17x16xf32>
    %cst_16 = arith.constant dense<0.000000e+00> : vector<17xf32>
    %21 = vector.multi_reduction <add>, %20, %cst_16 [1] : vector<17x16xf32> to vector<17xf32>
    %22 = vector.shape_cast %21 : vector<17xf32> to vector<17x1xf32>
    %cst_17 = arith.constant 1.600000e+01 : f32
    %23 = vector.broadcast %cst_17 : f32 to vector<17x1xf32>
    %24 = arith.divf %22, %23 : vector<17x1xf32>
    %25 = vector.broadcast %17 : vector<17x1xf32> to vector<17x16xf32>
    %26 = arith.subf %11, %25 : vector<17x16xf32>
    %cst_18 = arith.constant 9.99999974E-6 : f32
    %27 = vector.broadcast %cst_18 : f32 to vector<17x1xf32>
    %28 = arith.addf %24, %27 : vector<17x1xf32>
    %29 = math.rsqrt %28 : vector<17x1xf32>
    %30 = vector.broadcast %29 : vector<17x1xf32> to vector<17x16xf32>
    %31 = arith.mulf %26, %30 : vector<17x16xf32>
    %32 = vector.broadcast %12 : vector<1x16xf32> to vector<17x16xf32>
    %33 = arith.mulf %31, %32 : vector<17x16xf32>
    %34 = vector.broadcast %13 : vector<1x16xf32> to vector<17x16xf32>
    %35 = arith.addf %33, %34 : vector<17x16xf32>
    %cst_19 = arith.constant 0.000000e+00 : f32
    %36 = vector.broadcast %cst_19 : f32 to vector<17x16xf32>
    %c0_20 = arith.constant 0 : index
    %c0_21 = arith.constant 0 : index
    %c0_22 = arith.constant 0 : index
    %37 = vector.load %arg8[%c0_20, %c0_21, %c0_22] : memref<2x16x8xbf16, #tpu.memory_space<vmem>>, vector<1x16x8xbf16>
    %38 = vector.shape_cast %37 : vector<1x16x8xbf16> to vector<16x8xbf16>
    %39 = arith.truncf %35 : vector<17x16xf32> to vector<17x16xbf16>
    %cst_23 = arith.constant dense<0.000000e+00> : vector<17x8xf32>
    %40 = tpu.matmul %39, %38, %cst_23 {dimension_numbers = #tpu.dot_dimension_numbers<[1], [0], [0], [1], [0, 0, 1, 1], [], []>} : vector<17x16xbf16>, vector<16x8xbf16>, vector<17x8xf32> -> vector<17x8xf32>
    %c0_24 = arith.constant 0 : index
    %c0_25 = arith.constant 0 : index
    %c0_26 = arith.constant 0 : index
    %41 = vector.load %arg9[%c0_24, %c0_25, %c0_26] : memref<2x1x8xf32, #tpu.memory_space<vmem>>, vector<1x1x8xf32>
    %42 = vector.shape_cast %41 : vector<1x1x8xf32> to vector<1x8xf32>
    %43 = vector.broadcast %42 : vector<1x8xf32> to vector<17x8xf32>
    %44 = arith.addf %40, %43 : vector<17x8xf32>
    %c0_27 = arith.constant 0 : index
    %c0_28 = arith.constant 0 : index
    %c0_29 = arith.constant 0 : index
    %45 = vector.load %arg10[%c0_27, %c0_28, %c0_29] : memref<2x16x8xbf16, #tpu.memory_space<vmem>>, vector<1x16x8xbf16>
    %46 = vector.shape_cast %45 : vector<1x16x8xbf16> to vector<16x8xbf16>
    %47 = arith.truncf %35 : vector<17x16xf32> to vector<17x16xbf16>
    %cst_30 = arith.constant dense<0.000000e+00> : vector<17x8xf32>
    %48 = tpu.matmul %47, %46, %cst_30 {dimension_numbers = #tpu.dot_dimension_numbers<[1], [0], [0], [1], [0, 0, 1, 1], [], []>} : vector<17x16xbf16>, vector<16x8xbf16>, vector<17x8xf32> -> vector<17x8xf32>
    %c0_31 = arith.constant 0 : index
    %c0_32 = arith.constant 0 : index
    %c0_33 = arith.constant 0 : index
    %49 = vector.load %arg11[%c0_31, %c0_32, %c0_33] : memref<2x1x8xf32, #tpu.memory_space<vmem>>, vector<1x1x8xf32>
    %50 = vector.shape_cast %49 : vector<1x1x8xf32> to vector<1x8xf32>
    %51 = vector.broadcast %50 : vector<1x8xf32> to vector<17x8xf32>
    %52 = arith.addf %48, %51 : vector<17x8xf32>
    %c0_34 = arith.constant 0 : index
    %c0_35 = arith.constant 0 : index
    %c0_36 = arith.constant 0 : index
    %53 = vector.load %arg12[%c0_34, %c0_35, %c0_36] : memref<2x16x8xbf16, #tpu.memory_space<vmem>>, vector<1x16x8xbf16>
    %54 = vector.shape_cast %53 : vector<1x16x8xbf16> to vector<16x8xbf16>
    %55 = arith.truncf %35 : vector<17x16xf32> to vector<17x16xbf16>
    %cst_37 = arith.constant dense<0.000000e+00> : vector<17x8xf32>
    %56 = tpu.matmul %55, %54, %cst_37 {dimension_numbers = #tpu.dot_dimension_numbers<[1], [0], [0], [1], [0, 0, 1, 1], [], []>} : vector<17x16xbf16>, vector<16x8xbf16>, vector<17x8xf32> -> vector<17x8xf32>
    %c0_38 = arith.constant 0 : index
    %c0_39 = arith.constant 0 : index
    %c0_40 = arith.constant 0 : index
    %57 = vector.load %arg13[%c0_38, %c0_39, %c0_40] : memref<2x1x8xf32, #tpu.memory_space<vmem>>, vector<1x1x8xf32>
    %58 = vector.shape_cast %57 : vector<1x1x8xf32> to vector<1x8xf32>
    %59 = vector.broadcast %58 : vector<1x8xf32> to vector<17x8xf32>
    %60 = arith.addf %56, %59 : vector<17x8xf32>
    %61 = arith.truncf %44 : vector<17x8xf32> to vector<17x8xbf16>
    %62 = arith.truncf %52 : vector<17x8xf32> to vector<17x8xbf16>
    %cst_41 = arith.constant dense<0.000000e+00> : vector<17x17xf32>
    %63 = tpu.matmul %61, %62, %cst_41 {dimension_numbers = #tpu.dot_dimension_numbers<[1], [1], [0], [0], [0, 0, 1, 0], [], []>} : vector<17x8xbf16>, vector<17x8xbf16>, vector<17x17xf32> -> vector<17x17xf32>
    %cst_42 = arith.constant 0.353553385 : f32
    %64 = vector.broadcast %cst_42 : f32 to vector<17x17xf32>
    %65 = arith.mulf %63, %64 : vector<17x17xf32>
    %cst_43 = arith.constant dense<0xFF800000> : vector<17xf32>
    %66 = vector.multi_reduction <maximumf>, %65, %cst_43 [1] : vector<17x17xf32> to vector<17xf32>
    %67 = vector.shape_cast %66 : vector<17xf32> to vector<17x1xf32>
    %68 = vector.broadcast %67 : vector<17x1xf32> to vector<17x17xf32>
    %69 = arith.subf %65, %68 : vector<17x17xf32>
    %70 = math.exp %69 : vector<17x17xf32>
    %cst_44 = arith.constant dense<0.000000e+00> : vector<17xf32>
    %71 = vector.multi_reduction <add>, %70, %cst_44 [1] : vector<17x17xf32> to vector<17xf32>
    %72 = vector.shape_cast %71 : vector<17xf32> to vector<17x1xf32>
    %73 = tpu.reciprocal %72 {approx = true} : vector<17x1xf32> -> vector<17x1xf32>
    %74 = vector.broadcast %73 : vector<17x1xf32> to vector<17x17xf32>
    %75 = arith.mulf %70, %74 : vector<17x17xf32>
    %76 = arith.truncf %75 : vector<17x17xf32> to vector<17x17xbf16>
    %77 = arith.truncf %60 : vector<17x8xf32> to vector<17x8xbf16>
    %cst_45 = arith.constant dense<0.000000e+00> : vector<17x8xf32>
    %78 = tpu.matmul %76, %77, %cst_45 {dimension_numbers = #tpu.dot_dimension_numbers<[1], [0], [0], [1], [0, 0, 1, 1], [], []>} : vector<17x17xbf16>, vector<17x8xbf16>, vector<17x8xf32> -> vector<17x8xf32>
    %c0_46 = arith.constant 0 : index
    %c0_47 = arith.constant 0 : index
    %c0_48 = arith.constant 0 : index
    %79 = vector.load %arg14[%c0_46, %c0_47, %c0_48] : memref<2x8x16xbf16, #tpu.memory_space<vmem>>, vector<1x8x16xbf16>
    %80 = vector.shape_cast %79 : vector<1x8x16xbf16> to vector<8x16xbf16>
    %81 = arith.truncf %78 : vector<17x8xf32> to vector<17x8xbf16>
    %cst_49 = arith.constant dense<0.000000e+00> : vector<17x16xf32>
    %82 = tpu.matmul %81, %80, %cst_49 {dimension_numbers = #tpu.dot_dimension_numbers<[1], [0], [0], [1], [0, 0, 1, 1], [], []>} : vector<17x8xbf16>, vector<8x16xbf16>, vector<17x16xf32> -> vector<17x16xf32>
    %83 = arith.addf %36, %82 : vector<17x16xf32>
    %c1 = arith.constant 1 : index
    %c0_50 = arith.constant 0 : index
    %c0_51 = arith.constant 0 : index
    %84 = vector.load %arg8[%c1, %c0_50, %c0_51] : memref<2x16x8xbf16, #tpu.memory_space<vmem>>, vector<1x16x8xbf16>
    %85 = vector.shape_cast %84 : vector<1x16x8xbf16> to vector<16x8xbf16>
    %86 = arith.truncf %35 : vector<17x16xf32> to vector<17x16xbf16>
    %cst_52 = arith.constant dense<0.000000e+00> : vector<17x8xf32>
    %87 = tpu.matmul %86, %85, %cst_52 {dimension_numbers = #tpu.dot_dimension_numbers<[1], [0], [0], [1], [0, 0, 1, 1], [], []>} : vector<17x16xbf16>, vector<16x8xbf16>, vector<17x8xf32> -> vector<17x8xf32>
    %c1_53 = arith.constant 1 : index
    %c0_54 = arith.constant 0 : index
    %c0_55 = arith.constant 0 : index
    %88 = vector.load %arg9[%c1_53, %c0_54, %c0_55] : memref<2x1x8xf32, #tpu.memory_space<vmem>>, vector<1x1x8xf32>
    %89 = vector.shape_cast %88 : vector<1x1x8xf32> to vector<1x8xf32>
    %90 = vector.broadcast %89 : vector<1x8xf32> to vector<17x8xf32>
    %91 = arith.addf %87, %90 : vector<17x8xf32>
    %c1_56 = arith.constant 1 : index
    %c0_57 = arith.constant 0 : index
    %c0_58 = arith.constant 0 : index
    %92 = vector.load %arg10[%c1_56, %c0_57, %c0_58] : memref<2x16x8xbf16, #tpu.memory_space<vmem>>, vector<1x16x8xbf16>
    %93 = vector.shape_cast %92 : vector<1x16x8xbf16> to vector<16x8xbf16>
    %94 = arith.truncf %35 : vector<17x16xf32> to vector<17x16xbf16>
    %cst_59 = arith.constant dense<0.000000e+00> : vector<17x8xf32>
    %95 = tpu.matmul %94, %93, %cst_59 {dimension_numbers = #tpu.dot_dimension_numbers<[1], [0], [0], [1], [0, 0, 1, 1], [], []>} : vector<17x16xbf16>, vector<16x8xbf16>, vector<17x8xf32> -> vector<17x8xf32>
    %c1_60 = arith.constant 1 : index
    %c0_61 = arith.constant 0 : index
    %c0_62 = arith.constant 0 : index
    %96 = vector.load %arg11[%c1_60, %c0_61, %c0_62] : memref<2x1x8xf32, #tpu.memory_space<vmem>>, vector<1x1x8xf32>
    %97 = vector.shape_cast %96 : vector<1x1x8xf32> to vector<1x8xf32>
    %98 = vector.broadcast %97 : vector<1x8xf32> to vector<17x8xf32>
    %99 = arith.addf %95, %98 : vector<17x8xf32>
    %c1_63 = arith.constant 1 : index
    %c0_64 = arith.constant 0 : index
    %c0_65 = arith.constant 0 : index
    %100 = vector.load %arg12[%c1_63, %c0_64, %c0_65] : memref<2x16x8xbf16, #tpu.memory_space<vmem>>, vector<1x16x8xbf16>
    %101 = vector.shape_cast %100 : vector<1x16x8xbf16> to vector<16x8xbf16>
    %102 = arith.truncf %35 : vector<17x16xf32> to vector<17x16xbf16>
    %cst_66 = arith.constant dense<0.000000e+00> : vector<17x8xf32>
    %103 = tpu.matmul %102, %101, %cst_66 {dimension_numbers = #tpu.dot_dimension_numbers<[1], [0], [0], [1], [0, 0, 1, 1], [], []>} : vector<17x16xbf16>, vector<16x8xbf16>, vector<17x8xf32> -> vector<17x8xf32>
    %c1_67 = arith.constant 1 : index
    %c0_68 = arith.constant 0 : index
    %c0_69 = arith.constant 0 : index
    %104 = vector.load %arg13[%c1_67, %c0_68, %c0_69] : memref<2x1x8xf32, #tpu.memory_space<vmem>>, vector<1x1x8xf32>
    %105 = vector.shape_cast %104 : vector<1x1x8xf32> to vector<1x8xf32>
    %106 = vector.broadcast %105 : vector<1x8xf32> to vector<17x8xf32>
    %107 = arith.addf %103, %106 : vector<17x8xf32>
    %108 = arith.truncf %91 : vector<17x8xf32> to vector<17x8xbf16>
    %109 = arith.truncf %99 : vector<17x8xf32> to vector<17x8xbf16>
    %cst_70 = arith.constant dense<0.000000e+00> : vector<17x17xf32>
    %110 = tpu.matmul %108, %109, %cst_70 {dimension_numbers = #tpu.dot_dimension_numbers<[1], [1], [0], [0], [0, 0, 1, 0], [], []>} : vector<17x8xbf16>, vector<17x8xbf16>, vector<17x17xf32> -> vector<17x17xf32>
    %cst_71 = arith.constant 0.353553385 : f32
    %111 = vector.broadcast %cst_71 : f32 to vector<17x17xf32>
    %112 = arith.mulf %110, %111 : vector<17x17xf32>
    %cst_72 = arith.constant dense<0xFF800000> : vector<17xf32>
    %113 = vector.multi_reduction <maximumf>, %112, %cst_72 [1] : vector<17x17xf32> to vector<17xf32>
    %114 = vector.shape_cast %113 : vector<17xf32> to vector<17x1xf32>
    %115 = vector.broadcast %114 : vector<17x1xf32> to vector<17x17xf32>
    %116 = arith.subf %112, %115 : vector<17x17xf32>
    %117 = math.exp %116 : vector<17x17xf32>
    %cst_73 = arith.constant dense<0.000000e+00> : vector<17xf32>
    %118 = vector.multi_reduction <add>, %117, %cst_73 [1] : vector<17x17xf32> to vector<17xf32>
    %119 = vector.shape_cast %118 : vector<17xf32> to vector<17x1xf32>
    %120 = tpu.reciprocal %119 {approx = true} : vector<17x1xf32> -> vector<17x1xf32>
    %121 = vector.broadcast %120 : vector<17x1xf32> to vector<17x17xf32>
    %122 = arith.mulf %117, %121 : vector<17x17xf32>
    %123 = arith.truncf %122 : vector<17x17xf32> to vector<17x17xbf16>
    %124 = arith.truncf %107 : vector<17x8xf32> to vector<17x8xbf16>
    %cst_74 = arith.constant dense<0.000000e+00> : vector<17x8xf32>
    %125 = tpu.matmul %123, %124, %cst_74 {dimension_numbers = #tpu.dot_dimension_numbers<[1], [0], [0], [1], [0, 0, 1, 1], [], []>} : vector<17x17xbf16>, vector<17x8xbf16>, vector<17x8xf32> -> vector<17x8xf32>
    %c1_75 = arith.constant 1 : index
    %c0_76 = arith.constant 0 : index
    %c0_77 = arith.constant 0 : index
    %126 = vector.load %arg14[%c1_75, %c0_76, %c0_77] : memref<2x8x16xbf16, #tpu.memory_space<vmem>>, vector<1x8x16xbf16>
    %127 = vector.shape_cast %126 : vector<1x8x16xbf16> to vector<8x16xbf16>
    %128 = arith.truncf %125 : vector<17x8xf32> to vector<17x8xbf16>
    %cst_78 = arith.constant dense<0.000000e+00> : vector<17x16xf32>
    %129 = tpu.matmul %128, %127, %cst_78 {dimension_numbers = #tpu.dot_dimension_numbers<[1], [0], [0], [1], [0, 0, 1, 1], [], []>} : vector<17x8xbf16>, vector<8x16xbf16>, vector<17x16xf32> -> vector<17x16xf32>
    %130 = arith.addf %83, %129 : vector<17x16xf32>
    %131 = arith.addf %11, %130 : vector<17x16xf32>
    %c0_79 = arith.constant 0 : index
    %c0_80 = arith.constant 0 : index
    %132 = vector.load %arg15[%c0_79, %c0_80] : memref<1x16xf32, #tpu.memory_space<vmem>>, vector<1x16xf32>
    %133 = vector.broadcast %132 : vector<1x16xf32> to vector<17x16xf32>
    %134 = arith.addf %131, %133 : vector<17x16xf32>
    %c0_81 = arith.constant 0 : index
    %c0_82 = arith.constant 0 : index
    %135 = vector.load %arg16[%c0_81, %c0_82] : memref<1x16xf32, #tpu.memory_space<vmem>>, vector<1x16xf32>
    %c0_83 = arith.constant 0 : index
    %c0_84 = arith.constant 0 : index
    %136 = vector.load %arg17[%c0_83, %c0_84] : memref<1x16xf32, #tpu.memory_space<vmem>>, vector<1x16xf32>
    %cst_85 = arith.constant dense<0.000000e+00> : vector<17xf32>
    %137 = vector.multi_reduction <add>, %134, %cst_85 [1] : vector<17x16xf32> to vector<17xf32>
    %138 = vector.shape_cast %137 : vector<17xf32> to vector<17x1xf32>
    %cst_86 = arith.constant 1.600000e+01 : f32
    %139 = vector.broadcast %cst_86 : f32 to vector<17x1xf32>
    %140 = arith.divf %138, %139 : vector<17x1xf32>
    %141 = vector.broadcast %140 : vector<17x1xf32> to vector<17x16xf32>
    %142 = arith.subf %134, %141 : vector<17x16xf32>
    %143 = arith.mulf %142, %142 : vector<17x16xf32>
    %cst_87 = arith.constant dense<0.000000e+00> : vector<17xf32>
    %144 = vector.multi_reduction <add>, %143, %cst_87 [1] : vector<17x16xf32> to vector<17xf32>
    %145 = vector.shape_cast %144 : vector<17xf32> to vector<17x1xf32>
    %cst_88 = arith.constant 1.600000e+01 : f32
    %146 = vector.broadcast %cst_88 : f32 to vector<17x1xf32>
    %147 = arith.divf %145, %146 : vector<17x1xf32>
    %148 = vector.broadcast %140 : vector<17x1xf32> to vector<17x16xf32>
    %149 = arith.subf %134, %148 : vector<17x16xf32>
    %cst_89 = arith.constant 9.99999974E-6 : f32
    %150 = vector.broadcast %cst_89 : f32 to vector<17x1xf32>
    %151 = arith.addf %147, %150 : vector<17x1xf32>
    %152 = math.rsqrt %151 : vector<17x1xf32>
    %153 = vector.broadcast %152 : vector<17x1xf32> to vector<17x16xf32>
    %154 = arith.mulf %149, %153 : vector<17x16xf32>
    %155 = vector.broadcast %135 : vector<1x16xf32> to vector<17x16xf32>
    %156 = arith.mulf %154, %155 : vector<17x16xf32>
    %157 = vector.broadcast %136 : vector<1x16xf32> to vector<17x16xf32>
    %158 = arith.addf %156, %157 : vector<17x16xf32>
    %c0_90 = arith.constant 0 : index
    %c0_91 = arith.constant 0 : index
    %159 = vector.load %arg18[%c0_90, %c0_91] : memref<16x32xbf16, #tpu.memory_space<vmem>>, vector<16x32xbf16>
    %160 = arith.truncf %158 : vector<17x16xf32> to vector<17x16xbf16>
    %cst_92 = arith.constant dense<0.000000e+00> : vector<17x32xf32>
    %161 = tpu.matmul %160, %159, %cst_92 {dimension_numbers = #tpu.dot_dimension_numbers<[1], [0], [0], [1], [0, 0, 1, 1], [], []>} : vector<17x16xbf16>, vector<16x32xbf16>, vector<17x32xf32> -> vector<17x32xf32>
    %c0_93 = arith.constant 0 : index
    %c0_94 = arith.constant 0 : index
    %162 = vector.load %arg19[%c0_93, %c0_94] : memref<1x32xf32, #tpu.memory_space<vmem>>, vector<1x32xf32>
    %163 = vector.broadcast %162 : vector<1x32xf32> to vector<17x32xf32>
    %164 = arith.addf %161, %163 : vector<17x32xf32>
    %165 = arith.mulf %164, %164 : vector<17x32xf32>
    %166 = arith.mulf %164, %165 : vector<17x32xf32>
    %cst_95 = arith.constant 4.471500e-02 : f32
    %167 = vector.broadcast %cst_95 : f32 to vector<17x32xf32>
    %168 = arith.mulf %167, %166 : vector<17x32xf32>
    %169 = arith.addf %164, %168 : vector<17x32xf32>
    %cst_96 = arith.constant 0.797884583 : f32
    %170 = vector.broadcast %cst_96 : f32 to vector<17x32xf32>
    %171 = arith.mulf %170, %169 : vector<17x32xf32>
    %172 = math.tanh %171 : vector<17x32xf32>
    %cst_97 = arith.constant 1.000000e+00 : f32
    %173 = vector.broadcast %cst_97 : f32 to vector<17x32xf32>
    %174 = arith.addf %173, %172 : vector<17x32xf32>
    %cst_98 = arith.constant 5.000000e-01 : f32
    %175 = vector.broadcast %cst_98 : f32 to vector<17x32xf32>
    %176 = arith.mulf %175, %174 : vector<17x32xf32>
    %177 = arith.mulf %164, %176 : vector<17x32xf32>
    %c0_99 = arith.constant 0 : index
    %c0_100 = arith.constant 0 : index
    %178 = vector.load %arg20[%c0_99, %c0_100] : memref<32x16xbf16, #tpu.memory_space<vmem>>, vector<32x16xbf16>
    %179 = arith.truncf %177 : vector<17x32xf32> to vector<17x32xbf16>
    %cst_101 = arith.constant dense<0.000000e+00> : vector<17x16xf32>
    %180 = tpu.matmul %179, %178, %cst_101 {dimension_numbers = #tpu.dot_dimension_numbers<[1], [0], [0], [1], [0, 0, 1, 1], [], []>} : vector<17x32xbf16>, vector<32x16xbf16>, vector<17x16xf32> -> vector<17x16xf32>
    %c0_102 = arith.constant 0 : index
    %c0_103 = arith.constant 0 : index
    %181 = vector.load %arg21[%c0_102, %c0_103] : memref<1x16xf32, #tpu.memory_space<vmem>>, vector<1x16xf32>
    %182 = vector.broadcast %181 : vector<1x16xf32> to vector<17x16xf32>
    %183 = arith.addf %180, %182 : vector<17x16xf32>
    %184 = arith.addf %134, %183 : vector<17x16xf32>
    %185 = vector.extract_strided_slice %184 {offsets = [0, 0], sizes = [1, 16], strides = [1, 1]} : vector<17x16xf32> to vector<1x16xf32>
    %c0_104 = arith.constant 0 : index
    %c0_105 = arith.constant 0 : index
    %186 = vector.load %arg22[%c0_104, %c0_105] : memref<16x8xbf16, #tpu.memory_space<vmem>>, vector<16x8xbf16>
    %187 = arith.truncf %185 : vector<1x16xf32> to vector<1x16xbf16>
    %cst_106 = arith.constant dense<0.000000e+00> : vector<1x8xf32>
    %188 = tpu.matmul %187, %186, %cst_106 {dimension_numbers = #tpu.dot_dimension_numbers<[1], [0], [0], [1], [0, 0, 1, 1], [], []>} : vector<1x16xbf16>, vector<16x8xbf16>, vector<1x8xf32> -> vector<1x8xf32>
    %c0_107 = arith.constant 0 : index
    %c0_108 = arith.constant 0 : index
    %c0_109 = arith.constant 0 : index
    %189 = vector.load %arg23[%c0_107, %c0_108, %c0_109] : memref<1x1x8xf32, #tpu.memory_space<vmem>>, vector<1x1x8xf32>
    %190 = vector.shape_cast %189 : vector<1x1x8xf32> to vector<1x8xf32>
    %191 = vector.shape_cast %188 : vector<1x8xf32> to vector<1x1x8xf32>
    tpu.vector_store %arg23[%c0_107, %c0_108, %c0_109], %191 {strides = array<i32>} : memref<1x1x8xf32, #tpu.memory_space<vmem>>, vector<1x1x8xf32>,
    return
  }
  func.func @transform_0(%arg0: i32) -> (i32, i32, i32) {
    %c0_i32 = arith.constant 0 : i32
    %c0_i32_0 = arith.constant 0 : i32
    %c0_i32_1 = arith.constant 0 : i32
    return %arg0, %c0_i32, %c0_i32_0 : i32, i32, i32
  }
  func.func @transform_1(%arg0: i32) -> (i32, i32) {
    %c0_i32 = arith.constant 0 : i32
    %c0_i32_0 = arith.constant 0 : i32
    %c0_i32_1 = arith.constant 0 : i32
    return %c0_i32, %c0_i32_0 : i32, i32
  }
  func.func @transform_2(%arg0: i32) -> (i32, i32) {
    %c0_i32 = arith.constant 0 : i32
    %c0_i32_0 = arith.constant 0 : i32
    %c0_i32_1 = arith.constant 0 : i32
    return %c0_i32, %c0_i32_0 : i32, i32
  }
  func.func @transform_3(%arg0: i32) -> (i32, i32) {
    %c0_i32 = arith.constant 0 : i32
    %c0_i32_0 = arith.constant 0 : i32
    %c0_i32_1 = arith.constant 0 : i32
    return %c0_i32, %c0_i32_0 : i32, i32
  }
  func.func @transform_4(%arg0: i32) -> (i32, i32) {
    %c0_i32 = arith.constant 0 : i32
    %c0_i32_0 = arith.constant 0 : i32
    %c0_i32_1 = arith.constant 0 : i32
    return %c0_i32, %c0_i32_0 : i32, i32
  }
  func.func @transform_5(%arg0: i32) -> (i32, i32) {
    %c0_i32 = arith.constant 0 : i32
    %c0_i32_0 = arith.constant 0 : i32
    %c0_i32_1 = arith.constant 0 : i32
    return %c0_i32, %c0_i32_0 : i32, i32
  }
  func.func @transform_6(%arg0: i32) -> (i32, i32) {
    %c0_i32 = arith.constant 0 : i32
    %c0_i32_0 = arith.constant 0 : i32
    %c0_i32_1 = arith.constant 0 : i32
    return %c0_i32, %c0_i32_0 : i32, i32
  }
  func.func @transform_7(%arg0: i32) -> (i32, i32, i32) {
    %c0_i32 = arith.constant 0 : i32
    %c0_i32_0 = arith.constant 0 : i32
    %c0_i32_1 = arith.constant 0 : i32
    %c0_i32_2 = arith.constant 0 : i32
    return %c0_i32, %c0_i32_0, %c0_i32_1 : i32, i32, i32
  }
  func.func @transform_8(%arg0: i32) -> (i32, i32, i32) {
    %c0_i32 = arith.constant 0 : i32
    %c0_i32_0 = arith.constant 0 : i32
    %c0_i32_1 = arith.constant 0 : i32
    %c0_i32_2 = arith.constant 0 : i32
    return %c0_i32, %c0_i32_0, %c0_i32_1 : i32, i32, i32
  }
  func.func @transform_9(%arg0: i32) -> (i32, i32, i32) {
    %c0_i32 = arith.constant 0 : i32
    %c0_i32_0 = arith.constant 0 : i32
    %c0_i32_1 = arith.constant 0 : i32
    %c0_i32_2 = arith.constant 0 : i32
    return %c0_i32, %c0_i32_0, %c0_i32_1 : i32, i32, i32
  }
  func.func @transform_10(%arg0: i32) -> (i32, i32, i32) {
    %c0_i32 = arith.constant 0 : i32
    %c0_i32_0 = arith.constant 0 : i32
    %c0_i32_1 = arith.constant 0 : i32
    %c0_i32_2 = arith.constant 0 : i32
    return %c0_i32, %c0_i32_0, %c0_i32_1 : i32, i32, i32
  }
  func.func @transform_11(%arg0: i32) -> (i32, i32, i32) {
    %c0_i32 = arith.constant 0 : i32
    %c0_i32_0 = arith.constant 0 : i32
    %c0_i32_1 = arith.constant 0 : i32
    %c0_i32_2 = arith.constant 0 : i32
    return %c0_i32, %c0_i32_0, %c0_i32_1 : i32, i32, i32
  }
  func.func @transform_12(%arg0: i32) -> (i32, i32, i32) {
    %c0_i32 = arith.constant 0 : i32
    %c0_i32_0 = arith.constant 0 : i32
    %c0_i32_1 = arith.constant 0 : i32
    %c0_i32_2 = arith.constant 0 : i32
    return %c0_i32, %c0_i32_0, %c0_i32_1 : i32, i32, i32
  }
  func.func @transform_13(%arg0: i32) -> (i32, i32, i32) {
    %c0_i32 = arith.constant 0 : i32
    %c0_i32_0 = arith.constant 0 : i32
    %c0_i32_1 = arith.constant 0 : i32
    %c0_i32_2 = arith.constant 0 : i32
    return %c0_i32, %c0_i32_0, %c0_i32_1 : i32, i32, i32
  }
  func.func @transform_14(%arg0: i32) -> (i32, i32) {
    %c0_i32 = arith.constant 0 : i32
    %c0_i32_0 = arith.constant 0 : i32
    %c0_i32_1 = arith.constant 0 : i32
    return %c0_i32, %c0_i32_0 : i32, i32
  }
  func.func @transform_15(%arg0: i32) -> (i32, i32) {
    %c0_i32 = arith.constant 0 : i32
    %c0_i32_0 = arith.constant 0 : i32
    %c0_i32_1 = arith.constant 0 : i32
    return %c0_i32, %c0_i32_0 : i32, i32
  }
  func.func @transform_16(%arg0: i32) -> (i32, i32) {
    %c0_i32 = arith.constant 0 : i32
    %c0_i32_0 = arith.constant 0 : i32
    %c0_i32_1 = arith.constant 0 : i32
    return %c0_i32, %c0_i32_0 : i32, i32
  }
  func.func @transform_17(%arg0: i32) -> (i32, i32) {
    %c0_i32 = arith.constant 0 : i32
    %c0_i32_0 = arith.constant 0 : i32
    %c0_i32_1 = arith.constant 0 : i32
    return %c0_i32, %c0_i32_0 : i32, i32
  }
  func.func @transform_18(%arg0: i32) -> (i32, i32) {
    %c0_i32 = arith.constant 0 : i32
    %c0_i32_0 = arith.constant 0 : i32
    %c0_i32_1 = arith.constant 0 : i32
    return %c0_i32, %c0_i32_0 : i32, i32
  }
  func.func @transform_19(%arg0: i32) -> (i32, i32) {
    %c0_i32 = arith.constant 0 : i32
    %c0_i32_0 = arith.constant 0 : i32
    %c0_i32_1 = arith.constant 0 : i32
    return %c0_i32, %c0_i32_0 : i32, i32
  }
  func.func @transform_20(%arg0: i32) -> (i32, i32) {
    %c0_i32 = arith.constant 0 : i32
    %c0_i32_0 = arith.constant 0 : i32
    %c0_i32_1 = arith.constant 0 : i32
    return %c0_i32, %c0_i32_0 : i32, i32
  }
  func.func @transform_21(%arg0: i32) -> (i32, i32) {
    %c0_i32 = arith.constant 0 : i32
    %c0_i32_0 = arith.constant 0 : i32
    %c0_i32_1 = arith.constant 0 : i32
    return %c0_i32, %c0_i32_0 : i32, i32
  }
  func.func @transform_22(%arg0: i32) -> (i32, i32, i32) {
    %c0_i32 = arith.constant 0 : i32
    %c0_i32_0 = arith.constant 0 : i32
    %c0_i32_1 = arith.constant 0 : i32
    return %arg0, %c0_i32, %c0_i32_0 : i32, i32, i32
  }
}

module attributes {stable_mosaic.version = 11 : i64} {
  func.func @_crossprod_cn_kernel(%arg0: i32, %arg1: memref<256x8xf32, #tpu.memory_space<vmem>>, %arg2: memref<8x16xbf16, #tpu.memory_space<vmem>>, %arg3: memref<1x16xf32, #tpu.memory_space<vmem>>, %arg4: memref<8x16xbf16, #tpu.memory_space<vmem>>, %arg5: memref<1x16xf32, #tpu.memory_space<vmem>>, %arg6: memref<1x16xf32, #tpu.memory_space<vmem>>, %arg7: memref<1x16xf32, #tpu.memory_space<vmem>>, %arg8: memref<1x16xf32, #tpu.memory_space<vmem>>, %arg9: memref<256x16xf32, #tpu.memory_space<vmem>>) attributes {dimension_semantics = [#tpu.dimension_semantics<parallel>], iteration_bounds = array<i64: 2>, scalar_prefetch = 0 : i64, scratch_operands = 0 : i64, tpu.core_type = #tpu.core_type<tc>, window_params = [{transform_indices = @transform_0, window_bounds = array<i64: 256, 8>}, {pipeline_mode = #tpu.pipeline_mode<synchronous>, transform_indices = @transform_1, window_bounds = array<i64: 8, 16>}, {pipeline_mode = #tpu.pipeline_mode<synchronous>, transform_indices = @transform_2, window_bounds = array<i64: 1, 16>}, {pipeline_mode = #tpu.pipeline_mode<synchronous>, transform_indices = @transform_3, window_bounds = array<i64: 8, 16>}, {pipeline_mode = #tpu.pipeline_mode<synchronous>, transform_indices = @transform_4, window_bounds = array<i64: 1, 16>}, {pipeline_mode = #tpu.pipeline_mode<synchronous>, transform_indices = @transform_5, window_bounds = array<i64: 1, 16>}, {pipeline_mode = #tpu.pipeline_mode<synchronous>, transform_indices = @transform_6, window_bounds = array<i64: 1, 16>}, {pipeline_mode = #tpu.pipeline_mode<synchronous>, transform_indices = @transform_7, window_bounds = array<i64: 1, 16>}, {transform_indices = @transform_8, window_bounds = array<i64: 256, 16>}]} {
    %c0 = arith.constant 0 : index
    %c0_0 = arith.constant 0 : index
    %0 = vector.load %arg1[%c0, %c0_0] : memref<256x8xf32, #tpu.memory_space<vmem>>, vector<256x8xf32>
    %c0_1 = arith.constant 0 : index
    %c0_2 = arith.constant 0 : index
    %1 = vector.load %arg2[%c0_1, %c0_2] : memref<8x16xbf16, #tpu.memory_space<vmem>>, vector<8x16xbf16>
    %2 = arith.truncf %0 : vector<256x8xf32> to vector<256x8xbf16>
    %cst = arith.constant dense<0.000000e+00> : vector<256x16xf32>
    %3 = tpu.matmul %2, %1, %cst {dimension_numbers = #tpu.dot_dimension_numbers<[1], [0], [0], [1], [0, 0, 1, 1], [], []>} : vector<256x8xbf16>, vector<8x16xbf16>, vector<256x16xf32> -> vector<256x16xf32>
    %c0_3 = arith.constant 0 : index
    %c0_4 = arith.constant 0 : index
    %4 = vector.load %arg3[%c0_3, %c0_4] : memref<1x16xf32, #tpu.memory_space<vmem>>, vector<1x16xf32>
    %5 = vector.broadcast %4 : vector<1x16xf32> to vector<256x16xf32>
    %6 = arith.addf %3, %5 : vector<256x16xf32>
    %c0_5 = arith.constant 0 : index
    %c0_6 = arith.constant 0 : index
    %7 = vector.load %arg4[%c0_5, %c0_6] : memref<8x16xbf16, #tpu.memory_space<vmem>>, vector<8x16xbf16>
    %8 = arith.truncf %0 : vector<256x8xf32> to vector<256x8xbf16>
    %cst_7 = arith.constant dense<0.000000e+00> : vector<256x16xf32>
    %9 = tpu.matmul %8, %7, %cst_7 {dimension_numbers = #tpu.dot_dimension_numbers<[1], [0], [0], [1], [0, 0, 1, 1], [], []>} : vector<256x8xbf16>, vector<8x16xbf16>, vector<256x16xf32> -> vector<256x16xf32>
    %c0_8 = arith.constant 0 : index
    %c0_9 = arith.constant 0 : index
    %10 = vector.load %arg5[%c0_8, %c0_9] : memref<1x16xf32, #tpu.memory_space<vmem>>, vector<1x16xf32>
    %11 = vector.broadcast %10 : vector<1x16xf32> to vector<256x16xf32>
    %12 = arith.addf %9, %11 : vector<256x16xf32>
    %c0_10 = arith.constant 0 : index
    %c0_11 = arith.constant 0 : index
    %13 = vector.load %arg6[%c0_10, %c0_11] : memref<1x16xf32, #tpu.memory_space<vmem>>, vector<1x16xf32>
    %14 = vector.broadcast %13 : vector<1x16xf32> to vector<256x16xf32>
    %15 = arith.mulf %14, %6 : vector<256x16xf32>
    %cst_12 = arith.constant dense<0.000000e+00> : vector<256xf32>
    %16 = vector.multi_reduction <add>, %12, %cst_12 [1] : vector<256x16xf32> to vector<256xf32>
    %17 = vector.shape_cast %16 : vector<256xf32> to vector<256x1xf32>
    %cst_13 = arith.constant 1.600000e+01 : f32
    %18 = vector.broadcast %cst_13 : f32 to vector<256x1xf32>
    %19 = arith.divf %17, %18 : vector<256x1xf32>
    %20 = vector.broadcast %19 : vector<256x1xf32> to vector<256x16xf32>
    %21 = arith.mulf %15, %20 : vector<256x16xf32>
    %c0_14 = arith.constant 0 : index
    %c0_15 = arith.constant 0 : index
    %22 = vector.load %arg7[%c0_14, %c0_15] : memref<1x16xf32, #tpu.memory_space<vmem>>, vector<1x16xf32>
    %c0_16 = arith.constant 0 : index
    %c0_17 = arith.constant 0 : index
    %23 = vector.load %arg8[%c0_16, %c0_17] : memref<1x16xf32, #tpu.memory_space<vmem>>, vector<1x16xf32>
    %cst_18 = arith.constant dense<0.000000e+00> : vector<256xf32>
    %24 = vector.multi_reduction <add>, %21, %cst_18 [1] : vector<256x16xf32> to vector<256xf32>
    %25 = vector.shape_cast %24 : vector<256xf32> to vector<256x1xf32>
    %cst_19 = arith.constant 1.600000e+01 : f32
    %26 = vector.broadcast %cst_19 : f32 to vector<256x1xf32>
    %27 = arith.divf %25, %26 : vector<256x1xf32>
    %28 = vector.broadcast %27 : vector<256x1xf32> to vector<256x16xf32>
    %29 = arith.subf %21, %28 : vector<256x16xf32>
    %30 = arith.mulf %29, %29 : vector<256x16xf32>
    %cst_20 = arith.constant dense<0.000000e+00> : vector<256xf32>
    %31 = vector.multi_reduction <add>, %30, %cst_20 [1] : vector<256x16xf32> to vector<256xf32>
    %32 = vector.shape_cast %31 : vector<256xf32> to vector<256x1xf32>
    %cst_21 = arith.constant 1.600000e+01 : f32
    %33 = vector.broadcast %cst_21 : f32 to vector<256x1xf32>
    %34 = arith.divf %32, %33 : vector<256x1xf32>
    %35 = vector.broadcast %27 : vector<256x1xf32> to vector<256x16xf32>
    %36 = arith.subf %21, %35 : vector<256x16xf32>
    %cst_22 = arith.constant 9.99999974E-6 : f32
    %37 = vector.broadcast %cst_22 : f32 to vector<256x1xf32>
    %38 = arith.addf %34, %37 : vector<256x1xf32>
    %39 = math.rsqrt %38 : vector<256x1xf32>
    %40 = vector.broadcast %39 : vector<256x1xf32> to vector<256x16xf32>
    %41 = arith.mulf %36, %40 : vector<256x16xf32>
    %42 = vector.broadcast %22 : vector<1x16xf32> to vector<256x16xf32>
    %43 = arith.mulf %41, %42 : vector<256x16xf32>
    %44 = vector.broadcast %23 : vector<1x16xf32> to vector<256x16xf32>
    %45 = arith.addf %43, %44 : vector<256x16xf32>
    %c0_23 = arith.constant 0 : index
    %c0_24 = arith.constant 0 : index
    %46 = vector.load %arg9[%c0_23, %c0_24] : memref<256x16xf32, #tpu.memory_space<vmem>>, vector<256x16xf32>
    tpu.vector_store %arg9[%c0_23, %c0_24], %45 {strides = array<i32>} : memref<256x16xf32, #tpu.memory_space<vmem>>, vector<256x16xf32>,
    return
  }
  func.func @transform_0(%arg0: i32) -> (i32, i32) {
    %c0_i32 = arith.constant 0 : i32
    %c0_i32_0 = arith.constant 0 : i32
    return %arg0, %c0_i32 : i32, i32
  }
  func.func @transform_1(%arg0: i32) -> (i32, i32) {
    %c0_i32 = arith.constant 0 : i32
    %c0_i32_0 = arith.constant 0 : i32
    %c0_i32_1 = arith.constant 0 : i32
    return %c0_i32, %c0_i32_0 : i32, i32
  }
  func.func @transform_2(%arg0: i32) -> (i32, i32) {
    %c0_i32 = arith.constant 0 : i32
    %c0_i32_0 = arith.constant 0 : i32
    %c0_i32_1 = arith.constant 0 : i32
    return %c0_i32, %c0_i32_0 : i32, i32
  }
  func.func @transform_3(%arg0: i32) -> (i32, i32) {
    %c0_i32 = arith.constant 0 : i32
    %c0_i32_0 = arith.constant 0 : i32
    %c0_i32_1 = arith.constant 0 : i32
    return %c0_i32, %c0_i32_0 : i32, i32
  }
  func.func @transform_4(%arg0: i32) -> (i32, i32) {
    %c0_i32 = arith.constant 0 : i32
    %c0_i32_0 = arith.constant 0 : i32
    %c0_i32_1 = arith.constant 0 : i32
    return %c0_i32, %c0_i32_0 : i32, i32
  }
  func.func @transform_5(%arg0: i32) -> (i32, i32) {
    %c0_i32 = arith.constant 0 : i32
    %c0_i32_0 = arith.constant 0 : i32
    %c0_i32_1 = arith.constant 0 : i32
    return %c0_i32, %c0_i32_0 : i32, i32
  }
  func.func @transform_6(%arg0: i32) -> (i32, i32) {
    %c0_i32 = arith.constant 0 : i32
    %c0_i32_0 = arith.constant 0 : i32
    %c0_i32_1 = arith.constant 0 : i32
    return %c0_i32, %c0_i32_0 : i32, i32
  }
  func.func @transform_7(%arg0: i32) -> (i32, i32) {
    %c0_i32 = arith.constant 0 : i32
    %c0_i32_0 = arith.constant 0 : i32
    %c0_i32_1 = arith.constant 0 : i32
    return %c0_i32, %c0_i32_0 : i32, i32
  }
  func.func @transform_8(%arg0: i32) -> (i32, i32) {
    %c0_i32 = arith.constant 0 : i32
    %c0_i32_0 = arith.constant 0 : i32
    return %arg0, %c0_i32 : i32, i32
  }
}

module attributes {stable_mosaic.version = 11 : i64} {
  func.func @_partitioner_head_kernel(%arg0: i32, %arg1: memref<1x16x256xf32, #tpu.memory_space<vmem>>, %arg2: memref<1x1x8xf32, #tpu.memory_space<vmem>>, %arg3: memref<256x16xbf16, #tpu.memory_space<vmem>>, %arg4: memref<1x16xf32, #tpu.memory_space<vmem>>, %arg5: memref<1x16xf32, #tpu.memory_space<vmem>>, %arg6: memref<1x16xf32, #tpu.memory_space<vmem>>, %arg7: memref<2x16x8xbf16, #tpu.memory_space<vmem>>, %arg8: memref<2x1x8xf32, #tpu.memory_space<vmem>>, %arg9: memref<2x16x8xbf16, #tpu.memory_space<vmem>>, %arg10: memref<2x1x8xf32, #tpu.memory_space<vmem>>, %arg11: memref<2x16x8xbf16, #tpu.memory_space<vmem>>, %arg12: memref<2x1x8xf32, #tpu.memory_space<vmem>>, %arg13: memref<2x8x16xbf16, #tpu.memory_space<vmem>>, %arg14: memref<1x16xf32, #tpu.memory_space<vmem>>, %arg15: memref<1x16xf32, #tpu.memory_space<vmem>>, %arg16: memref<1x16xf32, #tpu.memory_space<vmem>>, %arg17: memref<16x32xbf16, #tpu.memory_space<vmem>>, %arg18: memref<1x32xf32, #tpu.memory_space<vmem>>, %arg19: memref<32x16xbf16, #tpu.memory_space<vmem>>, %arg20: memref<1x16xf32, #tpu.memory_space<vmem>>, %arg21: memref<16x16xf32, #tpu.memory_space<vmem>>, %arg22: memref<16x48xbf16, #tpu.memory_space<vmem>>, %arg23: memref<1x48xf32, #tpu.memory_space<vmem>>, %arg24: memref<8x48xbf16, #tpu.memory_space<vmem>>, %arg25: memref<1x16x48xf32, #tpu.memory_space<vmem>>) attributes {dimension_semantics = [#tpu.dimension_semantics<parallel>], iteration_bounds = array<i64: 2>, scalar_prefetch = 0 : i64, scratch_operands = 0 : i64, tpu.core_type = #tpu.core_type<tc>, window_params = [{transform_indices = @transform_0, window_bounds = array<i64: 1, 16, 256>}, {transform_indices = @transform_1, window_bounds = array<i64: 1, 1, 8>}, {pipeline_mode = #tpu.pipeline_mode<synchronous>, transform_indices = @transform_2, window_bounds = array<i64: 256, 16>}, {pipeline_mode = #tpu.pipeline_mode<synchronous>, transform_indices = @transform_3, window_bounds = array<i64: 1, 16>}, {pipeline_mode = #tpu.pipeline_mode<synchronous>, transform_indices = @transform_4, window_bounds = array<i64: 1, 16>}, {pipeline_mode = #tpu.pipeline_mode<synchronous>, transform_indices = @transform_5, window_bounds = array<i64: 1, 16>}, {pipeline_mode = #tpu.pipeline_mode<synchronous>, transform_indices = @transform_6, window_bounds = array<i64: 2, 16, 8>}, {pipeline_mode = #tpu.pipeline_mode<synchronous>, transform_indices = @transform_7, window_bounds = array<i64: 2, 1, 8>}, {pipeline_mode = #tpu.pipeline_mode<synchronous>, transform_indices = @transform_8, window_bounds = array<i64: 2, 16, 8>}, {pipeline_mode = #tpu.pipeline_mode<synchronous>, transform_indices = @transform_9, window_bounds = array<i64: 2, 1, 8>}, {pipeline_mode = #tpu.pipeline_mode<synchronous>, transform_indices = @transform_10, window_bounds = array<i64: 2, 16, 8>}, {pipeline_mode = #tpu.pipeline_mode<synchronous>, transform_indices = @transform_11, window_bounds = array<i64: 2, 1, 8>}, {pipeline_mode = #tpu.pipeline_mode<synchronous>, transform_indices = @transform_12, window_bounds = array<i64: 2, 8, 16>}, {pipeline_mode = #tpu.pipeline_mode<synchronous>, transform_indices = @transform_13, window_bounds = array<i64: 1, 16>}, {pipeline_mode = #tpu.pipeline_mode<synchronous>, transform_indices = @transform_14, window_bounds = array<i64: 1, 16>}, {pipeline_mode = #tpu.pipeline_mode<synchronous>, transform_indices = @transform_15, window_bounds = array<i64: 1, 16>}, {pipeline_mode = #tpu.pipeline_mode<synchronous>, transform_indices = @transform_16, window_bounds = array<i64: 16, 32>}, {pipeline_mode = #tpu.pipeline_mode<synchronous>, transform_indices = @transform_17, window_bounds = array<i64: 1, 32>}, {pipeline_mode = #tpu.pipeline_mode<synchronous>, transform_indices = @transform_18, window_bounds = array<i64: 32, 16>}, {pipeline_mode = #tpu.pipeline_mode<synchronous>, transform_indices = @transform_19, window_bounds = array<i64: 1, 16>}, {pipeline_mode = #tpu.pipeline_mode<synchronous>, transform_indices = @transform_20, window_bounds = array<i64: 16, 16>}, {pipeline_mode = #tpu.pipeline_mode<synchronous>, transform_indices = @transform_21, window_bounds = array<i64: 16, 48>}, {pipeline_mode = #tpu.pipeline_mode<synchronous>, transform_indices = @transform_22, window_bounds = array<i64: 1, 48>}, {pipeline_mode = #tpu.pipeline_mode<synchronous>, transform_indices = @transform_23, window_bounds = array<i64: 8, 48>}, {transform_indices = @transform_24, window_bounds = array<i64: 1, 16, 48>}]} {
    %c0 = arith.constant 0 : index
    %c0_0 = arith.constant 0 : index
    %c0_1 = arith.constant 0 : index
    %0 = vector.load %arg1[%c0, %c0_0, %c0_1] : memref<1x16x256xf32, #tpu.memory_space<vmem>>, vector<1x16x256xf32>
    %1 = vector.shape_cast %0 : vector<1x16x256xf32> to vector<16x256xf32>
    %c0_2 = arith.constant 0 : index
    %c0_3 = arith.constant 0 : index
    %2 = vector.load %arg3[%c0_2, %c0_3] : memref<256x16xbf16, #tpu.memory_space<vmem>>, vector<256x16xbf16>
    %3 = arith.truncf %1 : vector<16x256xf32> to vector<16x256xbf16>
    %cst = arith.constant dense<0.000000e+00> : vector<16x16xf32>
    %4 = tpu.matmul %3, %2, %cst {dimension_numbers = #tpu.dot_dimension_numbers<[1], [0], [0], [1], [0, 0, 1, 1], [], []>} : vector<16x256xbf16>, vector<256x16xbf16>, vector<16x16xf32> -> vector<16x16xf32>
    %c0_4 = arith.constant 0 : index
    %c0_5 = arith.constant 0 : index
    %5 = vector.load %arg4[%c0_4, %c0_5] : memref<1x16xf32, #tpu.memory_space<vmem>>, vector<1x16xf32>
    %6 = vector.broadcast %5 : vector<1x16xf32> to vector<16x16xf32>
    %7 = arith.addf %4, %6 : vector<16x16xf32>
    %c0_6 = arith.constant 0 : index
    %c0_7 = arith.constant 0 : index
    %8 = vector.load %arg5[%c0_6, %c0_7] : memref<1x16xf32, #tpu.memory_space<vmem>>, vector<1x16xf32>
    %c0_8 = arith.constant 0 : index
    %c0_9 = arith.constant 0 : index
    %9 = vector.load %arg6[%c0_8, %c0_9] : memref<1x16xf32, #tpu.memory_space<vmem>>, vector<1x16xf32>
    %cst_10 = arith.constant dense<0.000000e+00> : vector<16xf32>
    %10 = vector.multi_reduction <add>, %7, %cst_10 [1] : vector<16x16xf32> to vector<16xf32>
    %11 = vector.shape_cast %10 : vector<16xf32> to vector<16x1xf32>
    %cst_11 = arith.constant 1.600000e+01 : f32
    %12 = vector.broadcast %cst_11 : f32 to vector<16x1xf32>
    %13 = arith.divf %11, %12 : vector<16x1xf32>
    %14 = vector.broadcast %13 : vector<16x1xf32> to vector<16x16xf32>
    %15 = arith.subf %7, %14 : vector<16x16xf32>
    %16 = arith.mulf %15, %15 : vector<16x16xf32>
    %cst_12 = arith.constant dense<0.000000e+00> : vector<16xf32>
    %17 = vector.multi_reduction <add>, %16, %cst_12 [1] : vector<16x16xf32> to vector<16xf32>
    %18 = vector.shape_cast %17 : vector<16xf32> to vector<16x1xf32>
    %cst_13 = arith.constant 1.600000e+01 : f32
    %19 = vector.broadcast %cst_13 : f32 to vector<16x1xf32>
    %20 = arith.divf %18, %19 : vector<16x1xf32>
    %21 = vector.broadcast %13 : vector<16x1xf32> to vector<16x16xf32>
    %22 = arith.subf %7, %21 : vector<16x16xf32>
    %cst_14 = arith.constant 9.99999974E-6 : f32
    %23 = vector.broadcast %cst_14 : f32 to vector<16x1xf32>
    %24 = arith.addf %20, %23 : vector<16x1xf32>
    %25 = math.rsqrt %24 : vector<16x1xf32>
    %26 = vector.broadcast %25 : vector<16x1xf32> to vector<16x16xf32>
    %27 = arith.mulf %22, %26 : vector<16x16xf32>
    %28 = vector.broadcast %8 : vector<1x16xf32> to vector<16x16xf32>
    %29 = arith.mulf %27, %28 : vector<16x16xf32>
    %30 = vector.broadcast %9 : vector<1x16xf32> to vector<16x16xf32>
    %31 = arith.addf %29, %30 : vector<16x16xf32>
    %cst_15 = arith.constant 0.000000e+00 : f32
    %32 = vector.broadcast %cst_15 : f32 to vector<16x16xf32>
    %c0_16 = arith.constant 0 : index
    %c0_17 = arith.constant 0 : index
    %c0_18 = arith.constant 0 : index
    %33 = vector.load %arg7[%c0_16, %c0_17, %c0_18] : memref<2x16x8xbf16, #tpu.memory_space<vmem>>, vector<1x16x8xbf16>
    %34 = vector.shape_cast %33 : vector<1x16x8xbf16> to vector<16x8xbf16>
    %35 = arith.truncf %31 : vector<16x16xf32> to vector<16x16xbf16>
    %cst_19 = arith.constant dense<0.000000e+00> : vector<16x8xf32>
    %36 = tpu.matmul %35, %34, %cst_19 {dimension_numbers = #tpu.dot_dimension_numbers<[1], [0], [0], [1], [0, 0, 1, 1], [], []>} : vector<16x16xbf16>, vector<16x8xbf16>, vector<16x8xf32> -> vector<16x8xf32>
    %c0_20 = arith.constant 0 : index
    %c0_21 = arith.constant 0 : index
    %c0_22 = arith.constant 0 : index
    %37 = vector.load %arg8[%c0_20, %c0_21, %c0_22] : memref<2x1x8xf32, #tpu.memory_space<vmem>>, vector<1x1x8xf32>
    %38 = vector.shape_cast %37 : vector<1x1x8xf32> to vector<1x8xf32>
    %39 = vector.broadcast %38 : vector<1x8xf32> to vector<16x8xf32>
    %40 = arith.addf %36, %39 : vector<16x8xf32>
    %c0_23 = arith.constant 0 : index
    %c0_24 = arith.constant 0 : index
    %c0_25 = arith.constant 0 : index
    %41 = vector.load %arg9[%c0_23, %c0_24, %c0_25] : memref<2x16x8xbf16, #tpu.memory_space<vmem>>, vector<1x16x8xbf16>
    %42 = vector.shape_cast %41 : vector<1x16x8xbf16> to vector<16x8xbf16>
    %43 = arith.truncf %31 : vector<16x16xf32> to vector<16x16xbf16>
    %cst_26 = arith.constant dense<0.000000e+00> : vector<16x8xf32>
    %44 = tpu.matmul %43, %42, %cst_26 {dimension_numbers = #tpu.dot_dimension_numbers<[1], [0], [0], [1], [0, 0, 1, 1], [], []>} : vector<16x16xbf16>, vector<16x8xbf16>, vector<16x8xf32> -> vector<16x8xf32>
    %c0_27 = arith.constant 0 : index
    %c0_28 = arith.constant 0 : index
    %c0_29 = arith.constant 0 : index
    %45 = vector.load %arg10[%c0_27, %c0_28, %c0_29] : memref<2x1x8xf32, #tpu.memory_space<vmem>>, vector<1x1x8xf32>
    %46 = vector.shape_cast %45 : vector<1x1x8xf32> to vector<1x8xf32>
    %47 = vector.broadcast %46 : vector<1x8xf32> to vector<16x8xf32>
    %48 = arith.addf %44, %47 : vector<16x8xf32>
    %c0_30 = arith.constant 0 : index
    %c0_31 = arith.constant 0 : index
    %c0_32 = arith.constant 0 : index
    %49 = vector.load %arg11[%c0_30, %c0_31, %c0_32] : memref<2x16x8xbf16, #tpu.memory_space<vmem>>, vector<1x16x8xbf16>
    %50 = vector.shape_cast %49 : vector<1x16x8xbf16> to vector<16x8xbf16>
    %51 = arith.truncf %31 : vector<16x16xf32> to vector<16x16xbf16>
    %cst_33 = arith.constant dense<0.000000e+00> : vector<16x8xf32>
    %52 = tpu.matmul %51, %50, %cst_33 {dimension_numbers = #tpu.dot_dimension_numbers<[1], [0], [0], [1], [0, 0, 1, 1], [], []>} : vector<16x16xbf16>, vector<16x8xbf16>, vector<16x8xf32> -> vector<16x8xf32>
    %c0_34 = arith.constant 0 : index
    %c0_35 = arith.constant 0 : index
    %c0_36 = arith.constant 0 : index
    %53 = vector.load %arg12[%c0_34, %c0_35, %c0_36] : memref<2x1x8xf32, #tpu.memory_space<vmem>>, vector<1x1x8xf32>
    %54 = vector.shape_cast %53 : vector<1x1x8xf32> to vector<1x8xf32>
    %55 = vector.broadcast %54 : vector<1x8xf32> to vector<16x8xf32>
    %56 = arith.addf %52, %55 : vector<16x8xf32>
    %57 = arith.truncf %40 : vector<16x8xf32> to vector<16x8xbf16>
    %58 = arith.truncf %48 : vector<16x8xf32> to vector<16x8xbf16>
    %cst_37 = arith.constant dense<0.000000e+00> : vector<16x16xf32>
    %59 = tpu.matmul %57, %58, %cst_37 {dimension_numbers = #tpu.dot_dimension_numbers<[1], [1], [0], [0], [0, 0, 1, 0], [], []>} : vector<16x8xbf16>, vector<16x8xbf16>, vector<16x16xf32> -> vector<16x16xf32>
    %cst_38 = arith.constant 0.353553385 : f32
    %60 = vector.broadcast %cst_38 : f32 to vector<16x16xf32>
    %61 = arith.mulf %59, %60 : vector<16x16xf32>
    %cst_39 = arith.constant dense<0xFF800000> : vector<16xf32>
    %62 = vector.multi_reduction <maximumf>, %61, %cst_39 [1] : vector<16x16xf32> to vector<16xf32>
    %63 = vector.shape_cast %62 : vector<16xf32> to vector<16x1xf32>
    %64 = vector.broadcast %63 : vector<16x1xf32> to vector<16x16xf32>
    %65 = arith.subf %61, %64 : vector<16x16xf32>
    %66 = math.exp %65 : vector<16x16xf32>
    %cst_40 = arith.constant dense<0.000000e+00> : vector<16xf32>
    %67 = vector.multi_reduction <add>, %66, %cst_40 [1] : vector<16x16xf32> to vector<16xf32>
    %68 = vector.shape_cast %67 : vector<16xf32> to vector<16x1xf32>
    %69 = tpu.reciprocal %68 {approx = true} : vector<16x1xf32> -> vector<16x1xf32>
    %70 = vector.broadcast %69 : vector<16x1xf32> to vector<16x16xf32>
    %71 = arith.mulf %66, %70 : vector<16x16xf32>
    %72 = arith.truncf %71 : vector<16x16xf32> to vector<16x16xbf16>
    %73 = arith.truncf %56 : vector<16x8xf32> to vector<16x8xbf16>
    %cst_41 = arith.constant dense<0.000000e+00> : vector<16x8xf32>
    %74 = tpu.matmul %72, %73, %cst_41 {dimension_numbers = #tpu.dot_dimension_numbers<[1], [0], [0], [1], [0, 0, 1, 1], [], []>} : vector<16x16xbf16>, vector<16x8xbf16>, vector<16x8xf32> -> vector<16x8xf32>
    %c0_42 = arith.constant 0 : index
    %c0_43 = arith.constant 0 : index
    %c0_44 = arith.constant 0 : index
    %75 = vector.load %arg13[%c0_42, %c0_43, %c0_44] : memref<2x8x16xbf16, #tpu.memory_space<vmem>>, vector<1x8x16xbf16>
    %76 = vector.shape_cast %75 : vector<1x8x16xbf16> to vector<8x16xbf16>
    %77 = arith.truncf %74 : vector<16x8xf32> to vector<16x8xbf16>
    %cst_45 = arith.constant dense<0.000000e+00> : vector<16x16xf32>
    %78 = tpu.matmul %77, %76, %cst_45 {dimension_numbers = #tpu.dot_dimension_numbers<[1], [0], [0], [1], [0, 0, 1, 1], [], []>} : vector<16x8xbf16>, vector<8x16xbf16>, vector<16x16xf32> -> vector<16x16xf32>
    %79 = arith.addf %32, %78 : vector<16x16xf32>
    %c1 = arith.constant 1 : index
    %c0_46 = arith.constant 0 : index
    %c0_47 = arith.constant 0 : index
    %80 = vector.load %arg7[%c1, %c0_46, %c0_47] : memref<2x16x8xbf16, #tpu.memory_space<vmem>>, vector<1x16x8xbf16>
    %81 = vector.shape_cast %80 : vector<1x16x8xbf16> to vector<16x8xbf16>
    %82 = arith.truncf %31 : vector<16x16xf32> to vector<16x16xbf16>
    %cst_48 = arith.constant dense<0.000000e+00> : vector<16x8xf32>
    %83 = tpu.matmul %82, %81, %cst_48 {dimension_numbers = #tpu.dot_dimension_numbers<[1], [0], [0], [1], [0, 0, 1, 1], [], []>} : vector<16x16xbf16>, vector<16x8xbf16>, vector<16x8xf32> -> vector<16x8xf32>
    %c1_49 = arith.constant 1 : index
    %c0_50 = arith.constant 0 : index
    %c0_51 = arith.constant 0 : index
    %84 = vector.load %arg8[%c1_49, %c0_50, %c0_51] : memref<2x1x8xf32, #tpu.memory_space<vmem>>, vector<1x1x8xf32>
    %85 = vector.shape_cast %84 : vector<1x1x8xf32> to vector<1x8xf32>
    %86 = vector.broadcast %85 : vector<1x8xf32> to vector<16x8xf32>
    %87 = arith.addf %83, %86 : vector<16x8xf32>
    %c1_52 = arith.constant 1 : index
    %c0_53 = arith.constant 0 : index
    %c0_54 = arith.constant 0 : index
    %88 = vector.load %arg9[%c1_52, %c0_53, %c0_54] : memref<2x16x8xbf16, #tpu.memory_space<vmem>>, vector<1x16x8xbf16>
    %89 = vector.shape_cast %88 : vector<1x16x8xbf16> to vector<16x8xbf16>
    %90 = arith.truncf %31 : vector<16x16xf32> to vector<16x16xbf16>
    %cst_55 = arith.constant dense<0.000000e+00> : vector<16x8xf32>
    %91 = tpu.matmul %90, %89, %cst_55 {dimension_numbers = #tpu.dot_dimension_numbers<[1], [0], [0], [1], [0, 0, 1, 1], [], []>} : vector<16x16xbf16>, vector<16x8xbf16>, vector<16x8xf32> -> vector<16x8xf32>
    %c1_56 = arith.constant 1 : index
    %c0_57 = arith.constant 0 : index
    %c0_58 = arith.constant 0 : index
    %92 = vector.load %arg10[%c1_56, %c0_57, %c0_58] : memref<2x1x8xf32, #tpu.memory_space<vmem>>, vector<1x1x8xf32>
    %93 = vector.shape_cast %92 : vector<1x1x8xf32> to vector<1x8xf32>
    %94 = vector.broadcast %93 : vector<1x8xf32> to vector<16x8xf32>
    %95 = arith.addf %91, %94 : vector<16x8xf32>
    %c1_59 = arith.constant 1 : index
    %c0_60 = arith.constant 0 : index
    %c0_61 = arith.constant 0 : index
    %96 = vector.load %arg11[%c1_59, %c0_60, %c0_61] : memref<2x16x8xbf16, #tpu.memory_space<vmem>>, vector<1x16x8xbf16>
    %97 = vector.shape_cast %96 : vector<1x16x8xbf16> to vector<16x8xbf16>
    %98 = arith.truncf %31 : vector<16x16xf32> to vector<16x16xbf16>
    %cst_62 = arith.constant dense<0.000000e+00> : vector<16x8xf32>
    %99 = tpu.matmul %98, %97, %cst_62 {dimension_numbers = #tpu.dot_dimension_numbers<[1], [0], [0], [1], [0, 0, 1, 1], [], []>} : vector<16x16xbf16>, vector<16x8xbf16>, vector<16x8xf32> -> vector<16x8xf32>
    %c1_63 = arith.constant 1 : index
    %c0_64 = arith.constant 0 : index
    %c0_65 = arith.constant 0 : index
    %100 = vector.load %arg12[%c1_63, %c0_64, %c0_65] : memref<2x1x8xf32, #tpu.memory_space<vmem>>, vector<1x1x8xf32>
    %101 = vector.shape_cast %100 : vector<1x1x8xf32> to vector<1x8xf32>
    %102 = vector.broadcast %101 : vector<1x8xf32> to vector<16x8xf32>
    %103 = arith.addf %99, %102 : vector<16x8xf32>
    %104 = arith.truncf %87 : vector<16x8xf32> to vector<16x8xbf16>
    %105 = arith.truncf %95 : vector<16x8xf32> to vector<16x8xbf16>
    %cst_66 = arith.constant dense<0.000000e+00> : vector<16x16xf32>
    %106 = tpu.matmul %104, %105, %cst_66 {dimension_numbers = #tpu.dot_dimension_numbers<[1], [1], [0], [0], [0, 0, 1, 0], [], []>} : vector<16x8xbf16>, vector<16x8xbf16>, vector<16x16xf32> -> vector<16x16xf32>
    %cst_67 = arith.constant 0.353553385 : f32
    %107 = vector.broadcast %cst_67 : f32 to vector<16x16xf32>
    %108 = arith.mulf %106, %107 : vector<16x16xf32>
    %cst_68 = arith.constant dense<0xFF800000> : vector<16xf32>
    %109 = vector.multi_reduction <maximumf>, %108, %cst_68 [1] : vector<16x16xf32> to vector<16xf32>
    %110 = vector.shape_cast %109 : vector<16xf32> to vector<16x1xf32>
    %111 = vector.broadcast %110 : vector<16x1xf32> to vector<16x16xf32>
    %112 = arith.subf %108, %111 : vector<16x16xf32>
    %113 = math.exp %112 : vector<16x16xf32>
    %cst_69 = arith.constant dense<0.000000e+00> : vector<16xf32>
    %114 = vector.multi_reduction <add>, %113, %cst_69 [1] : vector<16x16xf32> to vector<16xf32>
    %115 = vector.shape_cast %114 : vector<16xf32> to vector<16x1xf32>
    %116 = tpu.reciprocal %115 {approx = true} : vector<16x1xf32> -> vector<16x1xf32>
    %117 = vector.broadcast %116 : vector<16x1xf32> to vector<16x16xf32>
    %118 = arith.mulf %113, %117 : vector<16x16xf32>
    %119 = arith.truncf %118 : vector<16x16xf32> to vector<16x16xbf16>
    %120 = arith.truncf %103 : vector<16x8xf32> to vector<16x8xbf16>
    %cst_70 = arith.constant dense<0.000000e+00> : vector<16x8xf32>
    %121 = tpu.matmul %119, %120, %cst_70 {dimension_numbers = #tpu.dot_dimension_numbers<[1], [0], [0], [1], [0, 0, 1, 1], [], []>} : vector<16x16xbf16>, vector<16x8xbf16>, vector<16x8xf32> -> vector<16x8xf32>
    %c1_71 = arith.constant 1 : index
    %c0_72 = arith.constant 0 : index
    %c0_73 = arith.constant 0 : index
    %122 = vector.load %arg13[%c1_71, %c0_72, %c0_73] : memref<2x8x16xbf16, #tpu.memory_space<vmem>>, vector<1x8x16xbf16>
    %123 = vector.shape_cast %122 : vector<1x8x16xbf16> to vector<8x16xbf16>
    %124 = arith.truncf %121 : vector<16x8xf32> to vector<16x8xbf16>
    %cst_74 = arith.constant dense<0.000000e+00> : vector<16x16xf32>
    %125 = tpu.matmul %124, %123, %cst_74 {dimension_numbers = #tpu.dot_dimension_numbers<[1], [0], [0], [1], [0, 0, 1, 1], [], []>} : vector<16x8xbf16>, vector<8x16xbf16>, vector<16x16xf32> -> vector<16x16xf32>
    %126 = arith.addf %79, %125 : vector<16x16xf32>
    %127 = arith.addf %7, %126 : vector<16x16xf32>
    %c0_75 = arith.constant 0 : index
    %c0_76 = arith.constant 0 : index
    %128 = vector.load %arg14[%c0_75, %c0_76] : memref<1x16xf32, #tpu.memory_space<vmem>>, vector<1x16xf32>
    %129 = vector.broadcast %128 : vector<1x16xf32> to vector<16x16xf32>
    %130 = arith.addf %127, %129 : vector<16x16xf32>
    %c0_77 = arith.constant 0 : index
    %c0_78 = arith.constant 0 : index
    %131 = vector.load %arg15[%c0_77, %c0_78] : memref<1x16xf32, #tpu.memory_space<vmem>>, vector<1x16xf32>
    %c0_79 = arith.constant 0 : index
    %c0_80 = arith.constant 0 : index
    %132 = vector.load %arg16[%c0_79, %c0_80] : memref<1x16xf32, #tpu.memory_space<vmem>>, vector<1x16xf32>
    %cst_81 = arith.constant dense<0.000000e+00> : vector<16xf32>
    %133 = vector.multi_reduction <add>, %130, %cst_81 [1] : vector<16x16xf32> to vector<16xf32>
    %134 = vector.shape_cast %133 : vector<16xf32> to vector<16x1xf32>
    %cst_82 = arith.constant 1.600000e+01 : f32
    %135 = vector.broadcast %cst_82 : f32 to vector<16x1xf32>
    %136 = arith.divf %134, %135 : vector<16x1xf32>
    %137 = vector.broadcast %136 : vector<16x1xf32> to vector<16x16xf32>
    %138 = arith.subf %130, %137 : vector<16x16xf32>
    %139 = arith.mulf %138, %138 : vector<16x16xf32>
    %cst_83 = arith.constant dense<0.000000e+00> : vector<16xf32>
    %140 = vector.multi_reduction <add>, %139, %cst_83 [1] : vector<16x16xf32> to vector<16xf32>
    %141 = vector.shape_cast %140 : vector<16xf32> to vector<16x1xf32>
    %cst_84 = arith.constant 1.600000e+01 : f32
    %142 = vector.broadcast %cst_84 : f32 to vector<16x1xf32>
    %143 = arith.divf %141, %142 : vector<16x1xf32>
    %144 = vector.broadcast %136 : vector<16x1xf32> to vector<16x16xf32>
    %145 = arith.subf %130, %144 : vector<16x16xf32>
    %cst_85 = arith.constant 9.99999974E-6 : f32
    %146 = vector.broadcast %cst_85 : f32 to vector<16x1xf32>
    %147 = arith.addf %143, %146 : vector<16x1xf32>
    %148 = math.rsqrt %147 : vector<16x1xf32>
    %149 = vector.broadcast %148 : vector<16x1xf32> to vector<16x16xf32>
    %150 = arith.mulf %145, %149 : vector<16x16xf32>
    %151 = vector.broadcast %131 : vector<1x16xf32> to vector<16x16xf32>
    %152 = arith.mulf %150, %151 : vector<16x16xf32>
    %153 = vector.broadcast %132 : vector<1x16xf32> to vector<16x16xf32>
    %154 = arith.addf %152, %153 : vector<16x16xf32>
    %c0_86 = arith.constant 0 : index
    %c0_87 = arith.constant 0 : index
    %155 = vector.load %arg17[%c0_86, %c0_87] : memref<16x32xbf16, #tpu.memory_space<vmem>>, vector<16x32xbf16>
    %156 = arith.truncf %154 : vector<16x16xf32> to vector<16x16xbf16>
    %cst_88 = arith.constant dense<0.000000e+00> : vector<16x32xf32>
    %157 = tpu.matmul %156, %155, %cst_88 {dimension_numbers = #tpu.dot_dimension_numbers<[1], [0], [0], [1], [0, 0, 1, 1], [], []>} : vector<16x16xbf16>, vector<16x32xbf16>, vector<16x32xf32> -> vector<16x32xf32>
    %c0_89 = arith.constant 0 : index
    %c0_90 = arith.constant 0 : index
    %158 = vector.load %arg18[%c0_89, %c0_90] : memref<1x32xf32, #tpu.memory_space<vmem>>, vector<1x32xf32>
    %159 = vector.broadcast %158 : vector<1x32xf32> to vector<16x32xf32>
    %160 = arith.addf %157, %159 : vector<16x32xf32>
    %161 = arith.mulf %160, %160 : vector<16x32xf32>
    %162 = arith.mulf %160, %161 : vector<16x32xf32>
    %cst_91 = arith.constant 4.471500e-02 : f32
    %163 = vector.broadcast %cst_91 : f32 to vector<16x32xf32>
    %164 = arith.mulf %163, %162 : vector<16x32xf32>
    %165 = arith.addf %160, %164 : vector<16x32xf32>
    %cst_92 = arith.constant 0.797884583 : f32
    %166 = vector.broadcast %cst_92 : f32 to vector<16x32xf32>
    %167 = arith.mulf %166, %165 : vector<16x32xf32>
    %168 = math.tanh %167 : vector<16x32xf32>
    %cst_93 = arith.constant 1.000000e+00 : f32
    %169 = vector.broadcast %cst_93 : f32 to vector<16x32xf32>
    %170 = arith.addf %169, %168 : vector<16x32xf32>
    %cst_94 = arith.constant 5.000000e-01 : f32
    %171 = vector.broadcast %cst_94 : f32 to vector<16x32xf32>
    %172 = arith.mulf %171, %170 : vector<16x32xf32>
    %173 = arith.mulf %160, %172 : vector<16x32xf32>
    %c0_95 = arith.constant 0 : index
    %c0_96 = arith.constant 0 : index
    %174 = vector.load %arg19[%c0_95, %c0_96] : memref<32x16xbf16, #tpu.memory_space<vmem>>, vector<32x16xbf16>
    %175 = arith.truncf %173 : vector<16x32xf32> to vector<16x32xbf16>
    %cst_97 = arith.constant dense<0.000000e+00> : vector<16x16xf32>
    %176 = tpu.matmul %175, %174, %cst_97 {dimension_numbers = #tpu.dot_dimension_numbers<[1], [0], [0], [1], [0, 0, 1, 1], [], []>} : vector<16x32xbf16>, vector<32x16xbf16>, vector<16x16xf32> -> vector<16x16xf32>
    %c0_98 = arith.constant 0 : index
    %c0_99 = arith.constant 0 : index
    %177 = vector.load %arg20[%c0_98, %c0_99] : memref<1x16xf32, #tpu.memory_space<vmem>>, vector<1x16xf32>
    %178 = vector.broadcast %177 : vector<1x16xf32> to vector<16x16xf32>
    %179 = arith.addf %176, %178 : vector<16x16xf32>
    %180 = arith.addf %130, %179 : vector<16x16xf32>
    %c0_100 = arith.constant 0 : index
    %c0_101 = arith.constant 0 : index
    %181 = vector.load %arg21[%c0_100, %c0_101] : memref<16x16xf32, #tpu.memory_space<vmem>>, vector<16x16xf32>
    %182 = arith.addf %180, %181 : vector<16x16xf32>
    %c0_102 = arith.constant 0 : index
    %c0_103 = arith.constant 0 : index
    %c0_104 = arith.constant 0 : index
    %183 = vector.load %arg2[%c0_102, %c0_103, %c0_104] : memref<1x1x8xf32, #tpu.memory_space<vmem>>, vector<1x1x8xf32>
    %184 = vector.shape_cast %183 : vector<1x1x8xf32> to vector<1x8xf32>
    %c0_105 = arith.constant 0 : index
    %c0_106 = arith.constant 0 : index
    %185 = vector.load %arg24[%c0_105, %c0_106] : memref<8x48xbf16, #tpu.memory_space<vmem>>, vector<8x48xbf16>
    %186 = arith.truncf %184 : vector<1x8xf32> to vector<1x8xbf16>
    %cst_107 = arith.constant dense<0.000000e+00> : vector<1x48xf32>
    %187 = tpu.matmul %186, %185, %cst_107 {dimension_numbers = #tpu.dot_dimension_numbers<[1], [0], [0], [1], [0, 0, 1, 1], [], []>} : vector<1x8xbf16>, vector<8x48xbf16>, vector<1x48xf32> -> vector<1x48xf32>
    %c0_108 = arith.constant 0 : index
    %c0_109 = arith.constant 0 : index
    %188 = vector.load %arg23[%c0_108, %c0_109] : memref<1x48xf32, #tpu.memory_space<vmem>>, vector<1x48xf32>
    %189 = arith.addf %187, %188 : vector<1x48xf32>
    %c0_110 = arith.constant 0 : index
    %c0_111 = arith.constant 0 : index
    %190 = vector.load %arg22[%c0_110, %c0_111] : memref<16x48xbf16, #tpu.memory_space<vmem>>, vector<16x48xbf16>
    %191 = arith.truncf %182 : vector<16x16xf32> to vector<16x16xbf16>
    %cst_112 = arith.constant dense<0.000000e+00> : vector<16x48xf32>
    %192 = tpu.matmul %191, %190, %cst_112 {dimension_numbers = #tpu.dot_dimension_numbers<[1], [0], [0], [1], [0, 0, 1, 1], [], []>} : vector<16x16xbf16>, vector<16x48xbf16>, vector<16x48xf32> -> vector<16x48xf32>
    %193 = vector.broadcast %189 : vector<1x48xf32> to vector<16x48xf32>
    %194 = arith.addf %192, %193 : vector<16x48xf32>
    %c0_113 = arith.constant 0 : index
    %c0_114 = arith.constant 0 : index
    %c0_115 = arith.constant 0 : index
    %195 = vector.load %arg25[%c0_113, %c0_114, %c0_115] : memref<1x16x48xf32, #tpu.memory_space<vmem>>, vector<1x16x48xf32>
    %196 = vector.shape_cast %195 : vector<1x16x48xf32> to vector<16x48xf32>
    %197 = vector.shape_cast %194 : vector<16x48xf32> to vector<1x16x48xf32>
    tpu.vector_store %arg25[%c0_113, %c0_114, %c0_115], %197 {strides = array<i32>} : memref<1x16x48xf32, #tpu.memory_space<vmem>>, vector<1x16x48xf32>,
    return
  }
  func.func @transform_0(%arg0: i32) -> (i32, i32, i32) {
    %c0_i32 = arith.constant 0 : i32
    %c0_i32_0 = arith.constant 0 : i32
    %c0_i32_1 = arith.constant 0 : i32
    return %arg0, %c0_i32, %c0_i32_0 : i32, i32, i32
  }
  func.func @transform_1(%arg0: i32) -> (i32, i32, i32) {
    %c0_i32 = arith.constant 0 : i32
    %c0_i32_0 = arith.constant 0 : i32
    %c0_i32_1 = arith.constant 0 : i32
    return %arg0, %c0_i32, %c0_i32_0 : i32, i32, i32
  }
  func.func @transform_2(%arg0: i32) -> (i32, i32) {
    %c0_i32 = arith.constant 0 : i32
    %c0_i32_0 = arith.constant 0 : i32
    %c0_i32_1 = arith.constant 0 : i32
    return %c0_i32, %c0_i32_0 : i32, i32
  }
  func.func @transform_3(%arg0: i32) -> (i32, i32) {
    %c0_i32 = arith.constant 0 : i32
    %c0_i32_0 = arith.constant 0 : i32
    %c0_i32_1 = arith.constant 0 : i32
    return %c0_i32, %c0_i32_0 : i32, i32
  }
  func.func @transform_4(%arg0: i32) -> (i32, i32) {
    %c0_i32 = arith.constant 0 : i32
    %c0_i32_0 = arith.constant 0 : i32
    %c0_i32_1 = arith.constant 0 : i32
    return %c0_i32, %c0_i32_0 : i32, i32
  }
  func.func @transform_5(%arg0: i32) -> (i32, i32) {
    %c0_i32 = arith.constant 0 : i32
    %c0_i32_0 = arith.constant 0 : i32
    %c0_i32_1 = arith.constant 0 : i32
    return %c0_i32, %c0_i32_0 : i32, i32
  }
  func.func @transform_6(%arg0: i32) -> (i32, i32, i32) {
    %c0_i32 = arith.constant 0 : i32
    %c0_i32_0 = arith.constant 0 : i32
    %c0_i32_1 = arith.constant 0 : i32
    %c0_i32_2 = arith.constant 0 : i32
    return %c0_i32, %c0_i32_0, %c0_i32_1 : i32, i32, i32
  }
  func.func @transform_7(%arg0: i32) -> (i32, i32, i32) {
    %c0_i32 = arith.constant 0 : i32
    %c0_i32_0 = arith.constant 0 : i32
    %c0_i32_1 = arith.constant 0 : i32
    %c0_i32_2 = arith.constant 0 : i32
    return %c0_i32, %c0_i32_0, %c0_i32_1 : i32, i32, i32
  }
  func.func @transform_8(%arg0: i32) -> (i32, i32, i32) {
    %c0_i32 = arith.constant 0 : i32
    %c0_i32_0 = arith.constant 0 : i32
    %c0_i32_1 = arith.constant 0 : i32
    %c0_i32_2 = arith.constant 0 : i32
    return %c0_i32, %c0_i32_0, %c0_i32_1 : i32, i32, i32
  }
  func.func @transform_9(%arg0: i32) -> (i32, i32, i32) {
    %c0_i32 = arith.constant 0 : i32
    %c0_i32_0 = arith.constant 0 : i32
    %c0_i32_1 = arith.constant 0 : i32
    %c0_i32_2 = arith.constant 0 : i32
    return %c0_i32, %c0_i32_0, %c0_i32_1 : i32, i32, i32
  }
  func.func @transform_10(%arg0: i32) -> (i32, i32, i32) {
    %c0_i32 = arith.constant 0 : i32
    %c0_i32_0 = arith.constant 0 : i32
    %c0_i32_1 = arith.constant 0 : i32
    %c0_i32_2 = arith.constant 0 : i32
    return %c0_i32, %c0_i32_0, %c0_i32_1 : i32, i32, i32
  }
  func.func @transform_11(%arg0: i32) -> (i32, i32, i32) {
    %c0_i32 = arith.constant 0 : i32
    %c0_i32_0 = arith.constant 0 : i32
    %c0_i32_1 = arith.constant 0 : i32
    %c0_i32_2 = arith.constant 0 : i32
    return %c0_i32, %c0_i32_0, %c0_i32_1 : i32, i32, i32
  }
  func.func @transform_12(%arg0: i32) -> (i32, i32, i32) {
    %c0_i32 = arith.constant 0 : i32
    %c0_i32_0 = arith.constant 0 : i32
    %c0_i32_1 = arith.constant 0 : i32
    %c0_i32_2 = arith.constant 0 : i32
    return %c0_i32, %c0_i32_0, %c0_i32_1 : i32, i32, i32
  }
  func.func @transform_13(%arg0: i32) -> (i32, i32) {
    %c0_i32 = arith.constant 0 : i32
    %c0_i32_0 = arith.constant 0 : i32
    %c0_i32_1 = arith.constant 0 : i32
    return %c0_i32, %c0_i32_0 : i32, i32
  }
  func.func @transform_14(%arg0: i32) -> (i32, i32) {
    %c0_i32 = arith.constant 0 : i32
    %c0_i32_0 = arith.constant 0 : i32
    %c0_i32_1 = arith.constant 0 : i32
    return %c0_i32, %c0_i32_0 : i32, i32
  }
  func.func @transform_15(%arg0: i32) -> (i32, i32) {
    %c0_i32 = arith.constant 0 : i32
    %c0_i32_0 = arith.constant 0 : i32
    %c0_i32_1 = arith.constant 0 : i32
    return %c0_i32, %c0_i32_0 : i32, i32
  }
  func.func @transform_16(%arg0: i32) -> (i32, i32) {
    %c0_i32 = arith.constant 0 : i32
    %c0_i32_0 = arith.constant 0 : i32
    %c0_i32_1 = arith.constant 0 : i32
    return %c0_i32, %c0_i32_0 : i32, i32
  }
  func.func @transform_17(%arg0: i32) -> (i32, i32) {
    %c0_i32 = arith.constant 0 : i32
    %c0_i32_0 = arith.constant 0 : i32
    %c0_i32_1 = arith.constant 0 : i32
    return %c0_i32, %c0_i32_0 : i32, i32
  }
  func.func @transform_18(%arg0: i32) -> (i32, i32) {
    %c0_i32 = arith.constant 0 : i32
    %c0_i32_0 = arith.constant 0 : i32
    %c0_i32_1 = arith.constant 0 : i32
    return %c0_i32, %c0_i32_0 : i32, i32
  }
  func.func @transform_19(%arg0: i32) -> (i32, i32) {
    %c0_i32 = arith.constant 0 : i32
    %c0_i32_0 = arith.constant 0 : i32
    %c0_i32_1 = arith.constant 0 : i32
    return %c0_i32, %c0_i32_0 : i32, i32
  }
  func.func @transform_20(%arg0: i32) -> (i32, i32) {
    %c0_i32 = arith.constant 0 : i32
    %c0_i32_0 = arith.constant 0 : i32
    %c0_i32_1 = arith.constant 0 : i32
    return %c0_i32, %c0_i32_0 : i32, i32
  }
  func.func @transform_21(%arg0: i32) -> (i32, i32) {
    %c0_i32 = arith.constant 0 : i32
    %c0_i32_0 = arith.constant 0 : i32
    %c0_i32_1 = arith.constant 0 : i32
    return %c0_i32, %c0_i32_0 : i32, i32
  }
  func.func @transform_22(%arg0: i32) -> (i32, i32) {
    %c0_i32 = arith.constant 0 : i32
    %c0_i32_0 = arith.constant 0 : i32
    %c0_i32_1 = arith.constant 0 : i32
    return %c0_i32, %c0_i32_0 : i32, i32
  }
  func.func @transform_23(%arg0: i32) -> (i32, i32) {
    %c0_i32 = arith.constant 0 : i32
    %c0_i32_0 = arith.constant 0 : i32
    %c0_i32_1 = arith.constant 0 : i32
    return %c0_i32, %c0_i32_0 : i32, i32
  }
  func.func @transform_24(%arg0: i32) -> (i32, i32, i32) {
    %c0_i32 = arith.constant 0 : i32
    %c0_i32_0 = arith.constant 0 : i32
    %c0_i32_1 = arith.constant 0 : i32
    return %arg0, %c0_i32, %c0_i32_0 : i32, i32, i32
  }
}

</mosaic_0001>

<bundles_post_ra>
// kernel: _lambda_.6
= control target key start
LH: loop header
LB: loop body
LE: loop exit
PB: predicated region body
PF: predicated region fallthrough
CT: control target
= control target key end

     0   :  { %s1812_s27 = smov 0   ;;  %s2639_s0 = inlined_call_operand.vmem [shape: f32[512,8], index: 0, kind: input, shape index: {}]   ;;  %s2640_s1 = inlined_call_operand.vmem [shape: bf16[8,16], index: 1, kind: input, shape index: {}]   ;;  %s2641_s2 = inlined_call_operand.vmem [shape: f32[1,16], index: 2, kind: input, shape index: {}, may-alias: {2,4,7}]   ;;  %s2642_s3 = inlined_call_operand.vmem [shape: bf16[8,16], index: 3, kind: input, shape index: {}]   ;;  %s2643_s4 = inlined_call_operand.vmem [shape: f32[1,16], index: 4, kind: input, shape index: {}, may-alias: {2,4,7}]   ;;  %s2644_s5 = inlined_call_operand.vmem [shape: f32[1,16], index: 5, kind: input, shape index: {}]   ;;  %s2645_s6 = inlined_call_operand.vmem [shape: f32[1,16], index: 6, kind: input, shape index: {}]   ;;  %s2646_s7 = inlined_call_operand.vmem [shape: f32[1,16], index: 7, kind: input, shape index: {}, may-alias: {2,4,7}]   ;;  %s2647_s8 = inlined_call_operand.vmem [shape: f32[512,16], index: 8, kind: output, shape index: {}]  }
   0x1 LB: > { %s1535_s28 = sadd.s32 4294967295, %s1765_s27   ;;  %p1539_p0 = scmp.ge.s32.totalorder %s1765_s27, 1  ;;  %s1765_s27 = sphi %s1812_s27, %s18_s27  }
   0x2   : > { %p263_p1 = scmp.lt.s32.totalorder %s1765_s27, 3 }
   0x4   : > { %p264_p2 = pnand %p1539_p0, %p263_p1 }
   0x5   : > { %vm415_vm0 = vcmask (!%p264_p2), 1043456   ;;  %v580_v0 = vld [vmem:[%s2642_s3] sm:$0xf] (!%p264_p2)  ;;  %s1540_s9 = sshll.u32 (!%p264_p2), %s1535_s28, 5  ;;  %vm366_vm1 = vcmask (!%p264_p2), 64512   ;;  %vm791_vm2 = vcmask (!%p264_p2), 130048  }
   0x6   : > { %267 = sbr.rel (%p264_p2) target bundleno = 759 (0x2f7), region = 52  ;;  %1686 = vmatprep.subr.msk.bf16.mxu1 (!%p264_p2), %vm415_vm0, %v580_v0  ;;  %v589_v1 = vsel (!%p264_p2), %vm415_vm0, %v580_v0, 0  ;;  %p298_p3 = scmp.lt.s32.totalorder (!%p264_p2), %s1540_s9, 63  ;;  %v342_v2 = vld [vmem:[%s2640_s1] sm:$0xf] (!%p264_p2) }
   0x7   : > { %1652 = vmatpush3.bf16.msra.mxu1 (!%p264_p2), %v589_v1  ;;  %1685 = vmatprep.subr.msk.bf16.mxu0 (!%p264_p2), %vm415_vm0, %v342_v2  ;;  %v417_v3 = vsel (!%p264_p2), %vm415_vm0, %v342_v2, 0  ;;  %v1903_v52 = vld [vmem:[%s2643_s4] ss:$0 sm:$0xff] (!%p264_p2) }
   0x8   : > { %1618 = vmatpush3.bf16.msra.mxu0 (!%p264_p2), %v417_v3 }
   0xd   : > { %s2649_s9 = smov (!%p298_p3, %s1540_s9), 63 }
   0xe   : > { %s1541_s12 = sshll.u32 %s2649_s9, 3 }
   0xf   : > { %s1834_s15 = scalar_lea.vmem %s2639_s0, %s1541_s12  ;;  %s2476_s29 = scalar_lea.vmem %s2647_s8, %s1541_s12 }
  0x10   : > { %v310_v4 = vld [vmem:[%s1834_s15] sm:$0xff]  ;;  %v311_v5 = vld [vmem:[%s1834_s15 + $0x8] sm:$0xff]  ;;  %v312_v6 = vld [vmem:[%s1834_s15 + $0x10] sm:$0xff] }
  0x11   : > { %v343_v7 = vpack.c.bf16 %v311_v5, %v310_v4  ;;  %v313_v8 = vld [vmem:[%s1834_s15 + $0x18] sm:$0xff]  ;;  %v314_v9 = vld [vmem:[%s1834_s15 + $0x20] sm:$0xff]  ;;  %v315_v10 = vld [vmem:[%s1834_s15 + $0x28] sm:$0xff] }
  0x12   : > { %v344_v11 = vpack.c.bf16 %v313_v8, %v312_v6  ;;  %v345_v12 = vpack.c.bf16 %v315_v10, %v314_v9  ;;  %v316_v13 = vld [vmem:[%s1834_s15 + $0x30] sm:$0xff]  ;;  %v317_v14 = vld [vmem:[%s1834_s15 + $0x38] sm:$0xff]  ;;  %v318_v15 = vld [vmem:[%s1834_s15 + $0x40] sm:$0xff] }
  0x13   : > { %1653 = vmatprep.mubr.msk.bf16.mxu1 %vm366_vm1, %v343_v7  ;;  %1619 = vmatprep.mubr.msk.bf16.mxu0 %vm366_vm1, %v343_v7  ;;  %v319_v16 = vld [vmem:[%s1834_s15 + $0x48] sm:$0xff]  ;;  %v346_v17 = vpack.c.bf16 %v317_v14, %v316_v13  ;;  %v320_v19 = vld [vmem:[%s1834_s15 + $0x50] sm:$0xff]  ;;  %v321_v20 = vld [vmem:[%s1834_s15 + $0x58] sm:$0xff] }
  0x14   : > { %1654 = vmatmul.mubr.msk.bf16.vlgmr.msra.gmra.mrb[0].mxu1 %vm366_vm1, %v344_v11  ;;  %1620 = vmatmul.mubr.msk.bf16.vlgmr.msra.gmra.mrb[0].mxu0 %vm366_vm1, %v344_v11  ;;  %v347_v18 = vpack.c.bf16 %v319_v16, %v318_v15  ;;  %v322_v21 = vld [vmem:[%s1834_s15 + $0x60] sm:$0xff]  ;;  %v323_v22 = vld [vmem:[%s1834_s15 + $0x68] sm:$0xff]  ;;  %v348_v23 = vpack.c.bf16 %v321_v20, %v320_v19  ;;  %v324_v25 = vld [vmem:[%s1834_s15 + $0x70] sm:$0xff] }
  0x15   : > { %1657 = vmatprep.mubr.msk.bf16.mxu1 %vm366_vm1, %v345_v12  ;;  %1623 = vmatprep.mubr.msk.bf16.mxu0 %vm366_vm1, %v345_v12  ;;  %v349_v24 = vpack.c.bf16 %v323_v22, %v322_v21  ;;  %v325_v26 = vld [vmem:[%s1834_s15 + $0x78] sm:$0xff]  ;;  %v326_v27 = vld [vmem:[%s1834_s15 + $0x80] sm:$0xff]  ;;  %v327_v28 = vld [vmem:[%s1834_s15 + $0x88] sm:$0xff] }
  0x16   : > { %v350_v29 = vpack.c.bf16 %v325_v26, %v324_v25  ;;  %v351_v30 = vpack.c.bf16 %v327_v28, %v326_v27  ;;  %v328_v31 = vld [vmem:[%s1834_s15 + $0x90] sm:$0xff]  ;;  %v329_v32 = vld [vmem:[%s1834_s15 + $0x98] sm:$0xff]  ;;  %v330_v33 = vld [vmem:[%s1834_s15 + $0xa0] sm:$0xff] }
  0x17   : > { %v331_v34 = vld [vmem:[%s1834_s15 + $0xa8] sm:$0xff]  ;;  %v352_v35 = vpack.c.bf16 %v329_v32, %v328_v31  ;;  %v332_v37 = vld [vmem:[%s1834_s15 + $0xb0] sm:$0xff]  ;;  %v333_v38 = vld [vmem:[%s1834_s15 + $0xb8] sm:$0xff] }
  0x18   : > { %v353_v36 = vpack.c.bf16 %v331_v34, %v330_v33  ;;  %v334_v39 = vld [vmem:[%s1834_s15 + $0xc0] sm:$0xff]  ;;  %v335_v40 = vld [vmem:[%s1834_s15 + $0xc8] sm:$0xff]  ;;  %v354_v41 = vpack.c.bf16 %v333_v38, %v332_v37  ;;  %v336_v43 = vld [vmem:[%s1834_s15 + $0xd0] sm:$0xff] }
  0x19   : > { %v355_v42 = vpack.c.bf16 %v335_v40, %v334_v39  ;;  %v337_v44 = vld [vmem:[%s1834_s15 + $0xd8] sm:$0xff]  ;;  %v338_v45 = vld [vmem:[%s1834_s15 + $0xe0] sm:$0xff]  ;;  %v339_v46 = vld [vmem:[%s1834_s15 + $0xe8] sm:$0xff] }
  0x1a   : > { %v356_v47 = vpack.c.bf16 %v337_v44, %v336_v43  ;;  %v357_v48 = vpack.c.bf16 %v339_v46, %v338_v45  ;;  %v340_v49 = vld [vmem:[%s1834_s15 + $0xf0] sm:$0xff]  ;;  %v341_v50 = vld [vmem:[%s1834_s15 + $0xf8] sm:$0xff] }
  0x1b   : > { %v358_v51 = vpack.c.bf16 %v341_v50, %v340_v49 }
  0x1c   : > { %1658 = vmatmul.mubr.msk.bf16.gmra.mrb[4].mxu1 %vm366_vm1, %v346_v17  ;;  %1624 = vmatmul.mubr.msk.bf16.gmra.mrb[4].mxu0 %vm366_vm1, %v346_v17 }
  0x1d   : > { %1661 = vmatprep.mubr.msk.bf16.mxu1 %vm366_vm1, %v347_v18  ;;  %1627 = vmatprep.mubr.msk.bf16.mxu0 %vm366_vm1, %v347_v18 }
  0x24   : > { %1662 = vmatmul.mubr.msk.bf16.gmra.mrb[8].mxu1 %vm366_vm1, %v348_v23  ;;  %1628 = vmatmul.mubr.msk.bf16.gmra.mrb[8].mxu0 %vm366_vm1, %v348_v23 }
  0x25   : > { %1665 = vmatprep.mubr.msk.bf16.mxu1 %vm366_vm1, %v349_v24  ;;  %1631 = vmatprep.mubr.msk.bf16.mxu0 %vm366_vm1, %v349_v24 }
  0x2c   : > { %1666 = vmatmul.mubr.msk.bf16.gmra.mrb[12].mxu1 %vm366_vm1, %v350_v29  ;;  %1632 = vmatmul.mubr.msk.bf16.gmra.mrb[12].mxu0 %vm366_vm1, %v350_v29 }
  0x2d   : > { %1669 = vmatprep.mubr.msk.bf16.mxu1 %vm366_vm1, %v351_v30  ;;  %1635 = vmatprep.mubr.msk.bf16.mxu0 %vm366_vm1, %v351_v30 }
  0x34   : > { %1670 = vmatmul.mubr.msk.bf16.gmra.mrb[16].mxu1 %vm366_vm1, %v352_v35  ;;  %1636 = vmatmul.mubr.msk.bf16.gmra.mrb[16].mxu0 %vm366_vm1, %v352_v35 }
  0x35   : > { %1673 = vmatprep.mubr.msk.bf16.mxu1 %vm366_vm1, %v353_v36  ;;  %1639 = vmatprep.mubr.msk.bf16.mxu0 %vm366_vm1, %v353_v36 }
  0x3c   : > { %1674 = vmatmul.mubr.msk.bf16.gmra.mrb[20].mxu1 %vm366_vm1, %v354_v41  ;;  %1640 = vmatmul.mubr.msk.bf16.gmra.mrb[20].mxu0 %vm366_vm1, %v354_v41 }
  0x3d   : > { %1677 = vmatprep.mubr.msk.bf16.mxu1 %vm366_vm1, %v355_v42  ;;  %1643 = vmatprep.mubr.msk.bf16.mxu0 %vm366_vm1, %v355_v42 }
  0x44   : > { %1678 = vmatmul.mubr.msk.bf16.gmra.mrb[24].mxu1 %vm366_vm1, %v356_v47  ;;  %1644 = vmatmul.mubr.msk.bf16.gmra.mrb[24].mxu0 %vm366_vm1, %v356_v47 }
  0x45   : > { %1681 = vmatprep.mubr.msk.bf16.mxu1 %vm366_vm1, %v357_v48  ;;  %1647 = vmatprep.mubr.msk.bf16.mxu0 %vm366_vm1, %v357_v48 }
  0x4c   : > { %1682 = vmatmul.mubr.msk.bf16.gmra.mrb[28].mxu1 %vm366_vm1, %v358_v51  ;;  %1648 = vmatmul.mubr.msk.bf16.gmra.mrb[28].mxu0 %vm366_vm1, %v358_v51 }
  0xe7   : > { %v1655_v53 = vpop.f32.mrb[0].mxu1  ;;  %v1905_v54 = vpop.f32.mrb[0].mxu0 }
  0xe8   : > { %v634_v55 = vadd.f32 %v1655_v53, %v1903_v52  ;;  %v625_v56 = vpop.f32.mrb[1].mxu1  ;;  %v1908_v57 = vpop.f32.mrb[1].mxu0 }
  0xe9   : > { %v626_v58 = vadd.f32 %v1903_v52, %v625_v56  ;;  %v1656_v59 = vpop.f32.mrb[2].mxu1  ;;  %v1911_v60 = vpop.f32.mrb[2].mxu0 }
  0xea   : > { %v637_v61 = vadd.f32 %v1656_v59, %v1903_v52  ;;  %v628_v62 = vpop.f32.mrb[3].mxu1  ;;  %v798_v63 = vsel %vm791_vm2, %v634_v55, 0.0  ;;  %v1915_v0 = vpop.f32.mrb[3].mxu0 }
  0xeb   : > { %v629_v1 = vadd.f32 %v1903_v52, %v628_v62  ;;  %799 = vadd.xlane.f32.xlu1 %v798_v63  ;;  %v792_v2 = vsel %vm791_vm2, %v626_v58, 0.0 }
  0xec   : > { %793 = vadd.xlane.f32.xlu0 %v792_v2  ;;  %v801_v3 = vsel %vm791_vm2, %v637_v61, 0.0 }
  0xed   : > { %v795_v5 = vsel %vm791_vm2, %v629_v1, 0.0 }
  0xef   : > { %802 = vadd.xlane.f32.xlu1 %v801_v3  ;;  %v1659_v4 = vpop.f32.mrb[4].mxu1  ;;  %v1935_v27 = vpop.f32.mrb[4].mxu0 }
  0xf0   : > { %v650_v6 = vadd.f32 %v1659_v4, %v1903_v52  ;;  %v641_v7 = vpop.f32.mrb[5].mxu1  ;;  %796 = vadd.xlane.f32.xlu0 %v795_v5  ;;  %v1937_v28 = vpop.f32.mrb[5].mxu0 }
  0xf1   : > { %v1660_v8 = vpop.f32.mrb[6].mxu1  ;;  %v642_v12 = vadd.f32 %v1903_v52, %v641_v7  ;;  %v1939_v29 = vpop.f32.mrb[6].mxu0 }
  0xf2   : > { %v653_v9 = vadd.f32 %v1660_v8, %v1903_v52  ;;  %v644_v10 = vpop.f32.mrb[7].mxu1  ;;  %v810_v11 = vsel %vm791_vm2, %v650_v6, 0.0  ;;  %v1942_v32 = vpop.f32.mrb[7].mxu0 }
  0xf3   : > { %v645_v13 = vadd.f32 %v1903_v52, %v644_v10  ;;  %v804_v16 = vsel %vm791_vm2, %v642_v12, 0.0 }
  0xf4   : > { %811 = vadd.xlane.f32.xlu0 %v810_v11  ;;  %v813_v14 = vsel %vm791_vm2, %v653_v9, 0.0 }
  0xf5   : > { %814 = vadd.xlane.f32.xlu1 %v813_v14  ;;  %v807_v19 = vsel %vm791_vm2, %v645_v13, 0.0 }
  0xf7   : > { %v1663_v15 = vpop.f32.mrb[8].mxu1  ;;  %v1949_v41 = vpop.f32.mrb[8].mxu0 }
  0xf8   : > { %v666_v17 = vadd.f32 %v1663_v15, %v1903_v52  ;;  %v657_v18 = vpop.f32.mrb[9].mxu1  ;;  %805 = vadd.xlane.f32.xlu0 %v804_v16  ;;  %v1953_v44 = vpop.f32.mrb[9].mxu0 }
  0xf9   : > { %v1664_v20 = vpop.f32.mrb[10].mxu1  ;;  %808 = vadd.xlane.f32.xlu1 %v807_v19  ;;  %v658_v24 = vadd.f32 %v1903_v52, %v657_v18  ;;  %v1955_v45 = vpop.f32.mrb[10].mxu0 }
  0xfa   : > { %v669_v21 = vadd.f32 %v1664_v20, %v1903_v52  ;;  %v660_v22 = vpop.f32.mrb[11].mxu1  ;;  %v822_v23 = vsel %vm791_vm2, %v666_v17, 0.0  ;;  %v1958_v48 = vpop.f32.mrb[11].mxu0 }
  0xfb   : > { %v661_v25 = vadd.f32 %v1903_v52, %v660_v22  ;;  %v816_v31 = vsel %vm791_vm2, %v658_v24, 0.0 }
  0xfc   : > { %823 = vadd.xlane.f32.xlu0 %v822_v23  ;;  %v825_v26 = vsel %vm791_vm2, %v669_v21, 0.0 }
  0xfd   : > { %826 = vadd.xlane.f32.xlu1 %v825_v26  ;;  %v819_v35 = vsel %vm791_vm2, %v661_v25, 0.0 }
  0xff   : > { %v1667_v30 = vpop.f32.mrb[12].mxu1  ;;  %v1965_v61 = vpop.f32.mrb[12].mxu0 }
 0x100   : > { %v682_v33 = vadd.f32 %v1667_v30, %v1903_v52  ;;  %v673_v34 = vpop.f32.mrb[13].mxu1  ;;  %817 = vadd.xlane.f32.xlu0 %v816_v31  ;;  %v1969_v1 = vpop.f32.mrb[13].mxu0 }
 0x101   : > { %v1668_v36 = vpop.f32.mrb[14].mxu1  ;;  %820 = vadd.xlane.f32.xlu1 %v819_v35  ;;  %v674_v40 = vadd.f32 %v1903_v52, %v673_v34  ;;  %v1971_v2 = vpop.f32.mrb[14].mxu0 }
 0x102   : > { %v685_v37 = vadd.f32 %v1668_v36, %v1903_v52  ;;  %v676_v38 = vpop.f32.mrb[15].mxu1  ;;  %v834_v39 = vsel %vm791_vm2, %v682_v33, 0.0  ;;  %v1974_v5 = vpop.f32.mrb[15].mxu0 }
 0x103   : > { %v677_v42 = vadd.f32 %v1903_v52, %v676_v38  ;;  %v828_v47 = vsel %vm791_vm2, %v674_v40, 0.0 }
 0x104   : > { %835 = vadd.xlane.f32.xlu0 %v834_v39  ;;  %v837_v43 = vsel %vm791_vm2, %v685_v37, 0.0 }
 0x105   : > { %838 = vadd.xlane.f32.xlu1 %v837_v43  ;;  %v831_v51 = vsel %vm791_vm2, %v677_v42, 0.0 }
 0x107   : > { %v1671_v46 = vpop.f32.mrb[16].mxu1  ;;  %v1981_v14 = vpop.f32.mrb[16].mxu0 }
 0x108   : > { %v698_v49 = vadd.f32 %v1671_v46, %v1903_v52  ;;  %v689_v50 = vpop.f32.mrb[17].mxu1  ;;  %829 = vadd.xlane.f32.xlu0 %v828_v47  ;;  %v1985_v17 = vpop.f32.mrb[17].mxu0 }
 0x109   : > { %v1672_v53 = vpop.f32.mrb[18].mxu1  ;;  %832 = vadd.xlane.f32.xlu1 %v831_v51  ;;  %v690_v59 = vadd.f32 %v1903_v52, %v689_v50  ;;  %v1987_v18 = vpop.f32.mrb[18].mxu0 }
 0x10a   : > { %v701_v55 = vadd.f32 %v1672_v53, %v1903_v52  ;;  %v692_v56 = vpop.f32.mrb[19].mxu1  ;;  %v846_v58 = vsel %vm791_vm2, %v698_v49, 0.0  ;;  %v1990_v21 = vpop.f32.mrb[19].mxu0 }
 0x10b   : > { %v693_v62 = vadd.f32 %v1903_v52, %v692_v56  ;;  %v840_v4 = vsel %vm791_vm2, %v690_v59, 0.0 }
 0x10c   : > { %847 = vadd.xlane.f32.xlu0 %v846_v58  ;;  %v849_v63 = vsel %vm791_vm2, %v701_v55, 0.0 }
 0x10d   : > { %850 = vadd.xlane.f32.xlu1 %v849_v63  ;;  %v843_v8 = vsel %vm791_vm2, %v693_v62, 0.0 }
 0x10f   : > { %v1675_v3 = vpop.f32.mrb[20].mxu1  ;;  %v1997_v34 = vpop.f32.mrb[20].mxu0 }
 0x110   : > { %v714_v6 = vadd.f32 %v1675_v3, %v1903_v52  ;;  %v705_v7 = vpop.f32.mrb[21].mxu1  ;;  %841 = vadd.xlane.f32.xlu0 %v840_v4  ;;  %v2001_v37 = vpop.f32.mrb[21].mxu0 }
 0x111   : > { %v1676_v9 = vpop.f32.mrb[22].mxu1  ;;  %844 = vadd.xlane.f32.xlu1 %v843_v8  ;;  %v706_v13 = vadd.f32 %v1903_v52, %v705_v7  ;;  %v2003_v38 = vpop.f32.mrb[22].mxu0 }
 0x112   : > { %v717_v10 = vadd.f32 %v1676_v9, %v1903_v52  ;;  %v708_v11 = vpop.f32.mrb[23].mxu1  ;;  %v858_v12 = vsel %vm791_vm2, %v714_v6, 0.0  ;;  %v2006_v42 = vpop.f32.mrb[23].mxu0 }
 0x113   : > { %v709_v15 = vadd.f32 %v1903_v52, %v708_v11  ;;  %v852_v20 = vsel %vm791_vm2, %v706_v13, 0.0 }
 0x114   : > { %859 = vadd.xlane.f32.xlu0 %v858_v12  ;;  %v861_v16 = vsel %vm791_vm2, %v717_v10, 0.0  ;;  %v2040_v12 = vld [vmem:[%s2644_s5] ss:$0 sm:$0xff] }
 0x115   : > { %862 = vadd.xlane.f32.xlu1 %v861_v16  ;;  %v855_v24 = vsel %vm791_vm2, %v709_v15, 0.0 }
 0x117   : > { %v1679_v19 = vpop.f32.mrb[24].mxu1  ;;  %v2013_v56 = vpop.f32.mrb[24].mxu0 }
 0x118   : > { %v730_v22 = vadd.f32 %v1679_v19, %v1903_v52  ;;  %v721_v23 = vpop.f32.mrb[25].mxu1  ;;  %853 = vadd.xlane.f32.xlu0 %v852_v20  ;;  %v2017_v62 = vpop.f32.mrb[25].mxu0 }
 0x119   : > { %v1680_v25 = vpop.f32.mrb[26].mxu1  ;;  %856 = vadd.xlane.f32.xlu1 %v855_v24  ;;  %v722_v33 = vadd.f32 %v1903_v52, %v721_v23  ;;  %v2019_v63 = vpop.f32.mrb[26].mxu0 }
 0x11a   : > { %v733_v26 = vadd.f32 %v1680_v25, %v1903_v52  ;;  %v724_v30 = vpop.f32.mrb[27].mxu1  ;;  %v870_v31 = vsel %vm791_vm2, %v730_v22, 0.0  ;;  %v2022_v4 = vpop.f32.mrb[27].mxu0 }
 0x11b   : > { %v725_v35 = vadd.f32 %v1903_v52, %v724_v30  ;;  %v864_v40 = vsel %vm791_vm2, %v722_v33, 0.0 }
 0x11c   : > { %871 = vadd.xlane.f32.xlu0 %v870_v31  ;;  %v873_v36 = vsel %vm791_vm2, %v733_v26, 0.0 }
 0x11d   : > { %874 = vadd.xlane.f32.xlu1 %v873_v36  ;;  %v867_v46 = vsel %vm791_vm2, %v725_v35, 0.0 }
 0x11f   : > { %v1683_v39 = vpop.f32.mrb[28].mxu1  ;;  %v2025_v7 = vpop.f32.mrb[28].mxu0 }
 0x120   : > { %v737_v43 = vpop.f32.mrb[29].mxu1  ;;  %865 = vadd.xlane.f32.xlu0 %v864_v40  ;;  %v746_v51 = vadd.f32 %v1683_v39, %v1903_v52  ;;  %v2027_v8 = vpop.f32.mrb[29].mxu0 }
 0x121   : > { %v738_v47 = vadd.f32 %v1903_v52, %v737_v43  ;;  %v1684_v49 = vpop.f32.mrb[30].mxu1  ;;  %868 = vadd.xlane.f32.xlu1 %v867_v46  ;;  %v1650_v9 = vpop.f32.mrb[30].mxu0 }
 0x122   : > { %v740_v50 = vpop.f32.mrb[31].mxu1  ;;  %v749_v58 = vadd.f32 %v1684_v49, %v1903_v52  ;;  %v882_v3 = vsel %vm791_vm2, %v746_v51, 0.0  ;;  %v2035_v11 = vpop.f32.mrb[31].mxu0 }
 0x123   : > { %v741_v53 = vadd.f32 %v1903_v52, %v740_v50  ;;  %v876_v55 = vsel %vm791_vm2, %v738_v47, 0.0  ;;  %v2032_v52 = vld [vmem:[%s2641_s2] ss:$0 sm:$0xff] }
 0x124   : > { %877 = vadd.xlane.f32.xlu0 %v876_v55  ;;  %v885_v6 = vsel %vm791_vm2, %v749_v58, 0.0  ;;  %v577_v10 = vadd.f32 %v1650_v9, %v2032_v52  ;;  %v462_v15 = vadd.f32 %v1905_v54, %v2032_v52  ;;  %v454_v16 = vadd.f32 %v2032_v52, %v1908_v57 }
 0x125   : > { %v879_v59 = vsel %vm791_vm2, %v741_v53, 0.0  ;;  %v465_v20 = vadd.f32 %v1911_v60, %v2032_v52  ;;  %v457_v30 = vadd.f32 %v2032_v52, %v1915_v0  ;;  %v478_v57 = vadd.f32 %v1935_v27, %v2032_v52 }
 0x126   : > { %880 = vadd.xlane.f32.xlu1 %v879_v59  ;;  %v2043_v13 = vmul.f32 %v2040_v12, %v577_v10  ;;  %v761_v19 = vmul.f32 %v2040_v12, %v462_v15  ;;  %v759_v23 = vmul.f32 %v2040_v12, %v454_v16  ;;  %v481_v39 = vadd.f32 %v1939_v29, %v2032_v52 }
 0x127   : > { %v762_v54 = vmul.f32 %v2040_v12, %v465_v20  ;;  %v760_v0 = vmul.f32 %v2040_v12, %v457_v30  ;;  %v765_v47 = vmul.f32 %v2040_v12, %v478_v57  ;;  %v470_v53 = vadd.f32 %v2032_v52, %v1937_v28 }
 0x128   : > { %883 = vadd.xlane.f32.xlu0 %v882_v3  ;;  %v766_v27 = vmul.f32 %v2040_v12, %v481_v39  ;;  %v473_v59 = vadd.f32 %v2032_v52, %v1942_v32  ;;  %v497_v15 = vadd.f32 %v1955_v45, %v2032_v52 }
 0x12a   : > { %886 = vadd.xlane.f32.xlu1 %v885_v6  ;;  %v494_v6 = vadd.f32 %v1949_v41, %v2032_v52  ;;  %v764_v41 = vmul.f32 %v2040_v12, %v473_v59 }
 0x178   : > { %v800_v22 = vpop.xlane.xlu1 %799 }
 0x179   : > { %v891_v24 = vmul.f32 0.0625, %v800_v22  ;;  %v794_v25 = vpop.xlane.xlu0 %793 }
 0x17a   : > { %v889_v26 = vmul.f32 0.0625, %v794_v25  ;;  %v770_v25 = vmul.f32 %v2040_v12, %v497_v15  ;;  %v502_v15 = vadd.f32 %v2032_v52, %v1969_v1  ;;  %v529_v1 = vadd.f32 %v1987_v18, %v2032_v52 }
 0x17b   : > { %v2055_v31 = vmul.f32 %v891_v24, %v761_v19  ;;  %v763_v19 = vmul.f32 %v2040_v12, %v470_v53  ;;  %v769_v24 = vmul.f32 %v2040_v12, %v494_v6 }
 0x17c   : > { %v803_v33 = vpop.xlane.xlu1 %802  ;;  %v2064_v40 = vmul.f32 %v889_v26, %v759_v23 }
 0x17d   : > { %v892_v35 = vmul.f32 0.0625, %v803_v33  ;;  %v797_v36 = vpop.xlane.xlu0 %796  ;;  %v961_v60 = vsel %vm791_vm2, %v2055_v31, 0.0  ;;  %v486_v33 = vadd.f32 %v2032_v52, %v1953_v44  ;;  %v513_v44 = vadd.f32 %v1971_v2, %v2032_v52 }
 0x17e   : > { %v890_v43 = vmul.f32 0.0625, %v797_v36  ;;  %962 = vadd.xlane.f32.xlu0 %v961_v60  ;;  %v955_v51 = vsel %vm791_vm2, %v2064_v40, 0.0  ;;  %v489_v60 = vadd.f32 %v2032_v52, %v1958_v48 }
 0x17f   : > { %v2067_v46 = vmul.f32 %v892_v35, %v762_v54  ;;  %v774_v59 = vmul.f32 %v2040_v12, %v513_v44  ;;  %v518_v44 = vadd.f32 %v2032_v52, %v1985_v17  ;;  %v545_v17 = vadd.f32 %v2003_v38, %v2032_v52 }
 0x180   : > { %v2075_v29 = vmul.f32 %v890_v43, %v760_v0  ;;  %v510_v43 = vadd.f32 %v1965_v61, %v2032_v52  ;;  %v768_v61 = vmul.f32 %v2040_v12, %v489_v60  ;;  %v778_v60 = vmul.f32 %v2040_v12, %v529_v1 }
 0x181   : > { %v812_v49 = vpop.xlane.xlu0 %811  ;;  %v964_v50 = vsel %vm791_vm2, %v2067_v46, 0.0  ;;  %v534_v1 = vadd.f32 %v2032_v52, %v2001_v37  ;;  %v561_v37 = vadd.f32 %v2019_v63, %v2032_v52 }
 0x182   : > { %v895_v55 = vmul.f32 0.0625, %v812_v49  ;;  %v815_v58 = vpop.xlane.xlu1 %814  ;;  %965 = vadd.xlane.f32.xlu1 %v964_v50  ;;  %956 = vadd.xlane.f32.xlu0 %v955_v51  ;;  %v958_v28 = vsel %vm791_vm2, %v2075_v29, 0.0  ;;  %v767_v50 = vmul.f32 %v2040_v12, %v486_v33 }
 0x183   : > { %v896_v3 = vmul.f32 0.0625, %v815_v58  ;;  %v773_v58 = vmul.f32 %v2040_v12, %v510_v43 }
 0x184   : > { %v2083_v9 = vmul.f32 %v895_v55, %v765_v47 }
 0x185   : > { %v806_v10 = vpop.xlane.xlu0 %805  ;;  %v2089_v16 = vmul.f32 %v896_v3, %v766_v27 }
 0x186   : > { %v893_v20 = vmul.f32 0.0625, %v806_v10  ;;  %v809_v22 = vpop.xlane.xlu1 %808  ;;  %959 = vadd.xlane.f32.xlu1 %v958_v28  ;;  %v973_v32 = vsel %vm791_vm2, %v2083_v9, 0.0 }
 0x187   : > { %v894_v23 = vmul.f32 0.0625, %v809_v22  ;;  %974 = vadd.xlane.f32.xlu0 %v973_v32  ;;  %v976_v30 = vsel %vm791_vm2, %v2089_v16, 0.0  ;;  %v505_v22 = vadd.f32 %v2032_v52, %v1974_v5 }
 0x188   : > { %v2096_v45 = vmul.f32 %v893_v20, %v763_v19 }
 0x189   : > { %v824_v26 = vpop.xlane.xlu0 %823  ;;  %v2101_v54 = vmul.f32 %v894_v23, %v764_v41  ;;  %v526_v41 = vadd.f32 %v1981_v14, %v2032_v52  ;;  %v772_v14 = vmul.f32 %v2040_v12, %v505_v22  ;;  %v782_v22 = vmul.f32 %v2040_v12, %v545_v17 }
 0x18a   : > { %v899_v57 = vmul.f32 0.0625, %v824_v26  ;;  %v827_v35 = vpop.xlane.xlu1 %826  ;;  %977 = vadd.xlane.f32.xlu1 %v976_v30  ;;  %v967_v36 = vsel %vm791_vm2, %v2096_v45, 0.0  ;;  %v771_v30 = vmul.f32 %v2040_v12, %v502_v15  ;;  %v550_v17 = vadd.f32 %v2032_v52, %v2017_v62 }
 0x18b   : > { %v900_v39 = vmul.f32 0.0625, %v827_v35  ;;  %968 = vadd.xlane.f32.xlu0 %v967_v36  ;;  %v970_v27 = vsel %vm791_vm2, %v2101_v54, 0.0  ;;  %v777_v36 = vmul.f32 %v2040_v12, %v526_v41 }
 0x18c   : > { %v2111_v0 = vmul.f32 %v899_v57, %v769_v24 }
 0x18d   : > { %v818_v47 = vpop.xlane.xlu0 %817  ;;  %v2117_v49 = vmul.f32 %v900_v39, %v770_v25 }
 0x18e   : > { %v897_v51 = vmul.f32 0.0625, %v818_v47  ;;  %v821_v48 = vpop.xlane.xlu1 %820  ;;  %971 = vadd.xlane.f32.xlu1 %v970_v27  ;;  %v985_v53 = vsel %vm791_vm2, %v2111_v0, 0.0 }
 0x18f   : > { %v898_v55 = vmul.f32 0.0625, %v821_v48  ;;  %986 = vadd.xlane.f32.xlu0 %v985_v53  ;;  %v988_v6 = vsel %vm791_vm2, %v2117_v49, 0.0  ;;  %v521_v48 = vadd.f32 %v2032_v52, %v1990_v21 }
 0x190   : > { %v2124_v2 = vmul.f32 %v897_v51, %v767_v50 }
 0x191   : > { %v836_v3 = vpop.xlane.xlu0 %835  ;;  %v2129_v10 = vmul.f32 %v898_v55, %v768_v61  ;;  %v542_v61 = vadd.f32 %v1997_v34, %v2032_v52  ;;  %v776_v34 = vmul.f32 %v2040_v12, %v521_v48  ;;  %v786_v48 = vmul.f32 %v2040_v12, %v561_v37 }
 0x192   : > { %v903_v28 = vmul.f32 0.0625, %v836_v3  ;;  %v839_v19 = vpop.xlane.xlu1 %838  ;;  %989 = vadd.xlane.f32.xlu1 %v988_v6  ;;  %v979_v20 = vsel %vm791_vm2, %v2124_v2, 0.0  ;;  %v775_v6 = vmul.f32 %v2040_v12, %v518_v44  ;;  %v574_v37 = vadd.f32 %v2025_v7, %v2032_v52 }
 0x193   : > { %v904_v32 = vmul.f32 0.0625, %v839_v19  ;;  %980 = vadd.xlane.f32.xlu0 %v979_v20  ;;  %v982_v25 = vsel %vm791_vm2, %v2129_v10, 0.0  ;;  %v781_v20 = vmul.f32 %v2040_v12, %v542_v61 }
 0x194   : > { %v2139_v23 = vmul.f32 %v903_v28, %v773_v58 }
 0x195   : > { %v830_v24 = vpop.xlane.xlu0 %829  ;;  %v2145_v26 = vmul.f32 %v904_v32, %v774_v59 }
 0x196   : > { %v901_v33 = vmul.f32 0.0625, %v830_v24  ;;  %v833_v5 = vpop.xlane.xlu1 %832  ;;  %983 = vadd.xlane.f32.xlu1 %v982_v25  ;;  %v997_v57 = vsel %vm791_vm2, %v2139_v23, 0.0 }
 0x197   : > { %v902_v35 = vmul.f32 0.0625, %v833_v5  ;;  %998 = vadd.xlane.f32.xlu0 %v997_v57  ;;  %v1000_v43 = vsel %vm791_vm2, %v2145_v26, 0.0  ;;  %v537_v5 = vadd.f32 %v2032_v52, %v2006_v42 }
 0x198   : > { %v2152_v18 = vmul.f32 %v901_v33, %v771_v30 }
 0x199   : > { %v848_v39 = vpop.xlane.xlu0 %847  ;;  %v2157_v47 = vmul.f32 %v902_v35, %v772_v14  ;;  %v558_v14 = vadd.f32 %v2013_v56, %v2032_v52  ;;  %v780_v56 = vmul.f32 %v2040_v12, %v537_v5 }
 0x19a   : > { %v907_v27 = vmul.f32 0.0625, %v848_v39  ;;  %v851_v50 = vpop.xlane.xlu1 %850  ;;  %1001 = vadd.xlane.f32.xlu1 %v1000_v43  ;;  %v991_v51 = vsel %vm791_vm2, %v2152_v18, 0.0  ;;  %v779_v43 = vmul.f32 %v2040_v12, %v534_v1 }
 0x19b   : > { %v908_v53 = vmul.f32 0.0625, %v851_v50  ;;  %992 = vadd.xlane.f32.xlu0 %v991_v51  ;;  %v994_v59 = vsel %vm791_vm2, %v2157_v47, 0.0  ;;  %v785_v51 = vmul.f32 %v2040_v12, %v558_v14 }
 0x19c   : > { %v2167_v55 = vmul.f32 %v907_v27, %v777_v36 }
 0x19d   : > { %v842_v58 = vpop.xlane.xlu0 %841  ;;  %v2173_v3 = vmul.f32 %v908_v53, %v778_v60 }
 0x19e   : > { %v905_v15 = vmul.f32 0.0625, %v842_v58  ;;  %v845_v21 = vpop.xlane.xlu1 %844  ;;  %995 = vadd.xlane.f32.xlu1 %v994_v59  ;;  %v1009_v28 = vsel %vm791_vm2, %v2167_v55, 0.0 }
 0x19f   : > { %v906_v19 = vmul.f32 0.0625, %v845_v21  ;;  %1010 = vadd.xlane.f32.xlu0 %v1009_v28  ;;  %v1012_v41 = vsel %vm791_vm2, %v2173_v3, 0.0  ;;  %v553_v21 = vadd.f32 %v2032_v52, %v2022_v4 }
 0x1a0   : > { %v2180_v38 = vmul.f32 %v905_v15, %v775_v6 }
 0x1a1   : > { %v860_v32 = vpop.xlane.xlu0 %859  ;;  %v2185_v24 = vmul.f32 %v906_v19, %v776_v34  ;;  %v566_v34 = vadd.f32 %v2032_v52, %v2027_v8 }
 0x1a2   : > { %v911_v25 = vmul.f32 0.0625, %v860_v32  ;;  %v863_v30 = vpop.xlane.xlu1 %862  ;;  %1013 = vadd.xlane.f32.xlu1 %v1012_v41  ;;  %v1003_v33 = vsel %vm791_vm2, %v2180_v38, 0.0  ;;  %v783_v32 = vmul.f32 %v2040_v12, %v550_v17 }
 0x1a3   : > { %v912_v57 = vmul.f32 0.0625, %v863_v30  ;;  %1004 = vadd.xlane.f32.xlu0 %v1003_v33  ;;  %v1006_v60 = vsel %vm791_vm2, %v2185_v24, 0.0  ;;  %v787_v8 = vmul.f32 %v2040_v12, %v566_v34  ;;  %v569_v33 = vadd.f32 %v2032_v52, %v2035_v11 }
 0x1a4   : > { %v2195_v35 = vmul.f32 %v911_v25, %v781_v20  ;;  %v784_v25 = vmul.f32 %v2040_v12, %v553_v21 }
 0x1a5   : > { %v854_v36 = vpop.xlane.xlu0 %853  ;;  %v2201_v39 = vmul.f32 %v912_v57, %v782_v22  ;;  %v788_v11 = vmul.f32 %v2040_v12, %v569_v33 }
 0x1a6   : > { %v909_v44 = vmul.f32 0.0625, %v854_v36  ;;  %v857_v42 = vpop.xlane.xlu1 %856  ;;  %1007 = vadd.xlane.f32.xlu1 %v1006_v60  ;;  %v1021_v27 = vsel %vm791_vm2, %v2195_v35, 0.0 }
 0x1a7   : > { %v910_v50 = vmul.f32 0.0625, %v857_v42  ;;  %1022 = vadd.xlane.f32.xlu0 %v1021_v27  ;;  %v1024_v61 = vsel %vm791_vm2, %v2201_v39, 0.0 }
 0x1a8   : > { %v2208_v63 = vmul.f32 %v909_v44, %v779_v43 }
 0x1a9   : > { %v872_v53 = vpop.xlane.xlu0 %871  ;;  %v2213_v58 = vmul.f32 %v910_v50, %v780_v56 }
 0x1aa   : > { %v915_v59 = vmul.f32 0.0625, %v872_v53  ;;  %v875_v6 = vpop.xlane.xlu1 %874  ;;  %1025 = vadd.xlane.f32.xlu1 %v1024_v61  ;;  %v1015_v15 = vsel %vm791_vm2, %v2208_v63, 0.0 }
 0x1ab   : > { %v916_v28 = vmul.f32 0.0625, %v875_v6  ;;  %1016 = vadd.xlane.f32.xlu0 %v1015_v15  ;;  %v1018_v62 = vsel %vm791_vm2, %v2213_v58, 0.0 }
 0x1ac   : > { %v2223_v19 = vmul.f32 %v915_v59, %v785_v51  ;;  %v789_v51 = vmul.f32 %v2040_v12, %v574_v37 }
 0x1ad   : > { %v866_v20 = vpop.xlane.xlu0 %865  ;;  %v2227_v22 = vmul.f32 %v916_v28, %v786_v48 }
 0x1ae   : > { %v913_v41 = vmul.f32 0.0625, %v866_v20  ;;  %v869_v1 = vpop.xlane.xlu1 %868  ;;  %1019 = vadd.xlane.f32.xlu1 %v1018_v62  ;;  %v1033_v4 = vsel %vm791_vm2, %v2223_v19, 0.0 }
 0x1af   : > { %v914_v30 = vmul.f32 0.0625, %v869_v1  ;;  %1034 = vadd.xlane.f32.xlu0 %v1033_v4  ;;  %v1036_v14 = vsel %vm791_vm2, %v2227_v22, 0.0 }
 0x1b0   : > { %v2236_v5 = vmul.f32 %v913_v41, %v783_v32 }
 0x1b1   : > { %v878_v57 = vpop.xlane.xlu0 %877  ;;  %v2240_v36 = vmul.f32 %v914_v30, %v784_v25 }
 0x1b2   : > { %v917_v60 = vmul.f32 0.0625, %v878_v57  ;;  %1037 = vadd.xlane.f32.xlu1 %v1036_v14  ;;  %v1027_v43 = vsel %vm791_vm2, %v2236_v5, 0.0 }
 0x1b3   : > { %v881_v44 = vpop.xlane.xlu1 %880  ;;  %1028 = vadd.xlane.f32.xlu0 %v1027_v43  ;;  %v1030_v50 = vsel %vm791_vm2, %v2240_v36, 0.0 }
 0x1b4   : > { %v918_v42 = vmul.f32 0.0625, %v881_v44  ;;  %v2247_v27 = vmul.f32 %v917_v60, %v787_v8 }
 0x1b5   : > { %v884_v56 = vpop.xlane.xlu0 %883 }
 0x1b6   : > { %v919_v48 = vmul.f32 0.0625, %v884_v56  ;;  %1031 = vadd.xlane.f32.xlu1 %v1030_v50  ;;  %v1039_v7 = vsel %vm791_vm2, %v2247_v27, 0.0  ;;  %v2254_v52 = vmul.f32 %v918_v42, %v788_v11 }
 0x1b7   : > { %v887_v53 = vpop.xlane.xlu1 %886  ;;  %1040 = vadd.xlane.f32.xlu0 %v1039_v7 }
 0x1b8   : > { %v920_v61 = vmul.f32 0.0625, %v887_v53  ;;  %v1042_v17 = vsel %vm791_vm2, %v2254_v52, 0.0  ;;  %v2258_v59 = vmul.f32 %v919_v48, %v789_v51 }
 0x1ba   : > { %1043 = vadd.xlane.f32.xlu1 %v1042_v17  ;;  %v1045_v6 = vsel %vm791_vm2, %v2258_v59, 0.0  ;;  %v2263_v12 = vmul.f32 %v920_v61, %v2043_v13 }
 0x1bb   : > { %1046 = vadd.xlane.f32.xlu0 %v1045_v6 }
 0x1bc   : > { %v1048_v15 = vsel %vm791_vm2, %v2263_v12, 0.0 }
 0x1be   : > { %1049 = vadd.xlane.f32.xlu1 %v1048_v15 }
 0x20b   : > { %v963_v21 = vpop.xlane.xlu0 %962 }
 0x20c   : > { %v1053_v28 = vmul.f32 0.0625, %v963_v21 }
 0x20e   : > { %v2268_v34 = vsub.f32 %v2055_v31, %v1053_v28 }
 0x20f   : > { %v966_v20 = vpop.xlane.xlu1 %965  ;;  %v957_v62 = vpop.xlane.xlu0 %956 }
 0x210   : > { %v1054_v32 = vmul.f32 0.0625, %v966_v20  ;;  %v1051_v41 = vmul.f32 0.0625, %v957_v62  ;;  %v1117_v1 = vmul.f32 %v2268_v34, %v2268_v34 }
 0x212   : > { %v2273_v13 = vsub.f32 %v2067_v46, %v1054_v32  ;;  %v2276_v4 = vsub.f32 %v2064_v40, %v1051_v41  ;;  %v1153_v25 = vsel %vm791_vm2, %v1117_v1, 0.0 }
 0x213   : > { %v960_v30 = vpop.xlane.xlu1 %959  ;;  %1154 = vadd.xlane.f32.xlu0 %v1153_v25 }
 0x214   : > { %v1052_v8 = vmul.f32 0.0625, %v960_v30  ;;  %v975_v31 = vpop.xlane.xlu0 %974  ;;  %v1118_v33 = vmul.f32 %v2273_v13, %v2273_v13  ;;  %v1115_v57 = vmul.f32 %v2276_v4, %v2276_v4 }
 0x215   : > { %v1057_v14 = vmul.f32 0.0625, %v975_v31 }
 0x216   : > { %v2284_v37 = vsub.f32 %v2075_v29, %v1052_v8  ;;  %v1156_v46 = vsel %vm791_vm2, %v1118_v33, 0.0  ;;  %v1147_v40 = vsel %vm791_vm2, %v1115_v57, 0.0 }
 0x217   : > { %v2289_v60 = vsub.f32 %v2083_v9, %v1057_v14  ;;  %1157 = vadd.xlane.f32.xlu1 %v1156_v46  ;;  %v978_v43 = vpop.xlane.xlu1 %977  ;;  %1148 = vadd.xlane.f32.xlu0 %v1147_v40 }
 0x218   : > { %v1058_v44 = vmul.f32 0.0625, %v978_v43  ;;  %v969_v11 = vpop.xlane.xlu0 %968  ;;  %v1116_v42 = vmul.f32 %v2284_v37, %v2284_v37 }
 0x219   : > { %v1055_v56 = vmul.f32 0.0625, %v969_v11  ;;  %v1121_v29 = vmul.f32 %v2289_v60, %v2289_v60 }
 0x21a   : > { %v2296_v50 = vsub.f32 %v2089_v16, %v1058_v44  ;;  %v1150_v51 = vsel %vm791_vm2, %v1116_v42, 0.0 }
 0x21b   : > { %v2300_v9 = vsub.f32 %v2096_v45, %v1055_v56  ;;  %1151 = vadd.xlane.f32.xlu1 %v1150_v51  ;;  %v972_v48 = vpop.xlane.xlu1 %971  ;;  %v1165_v7 = vsel %vm791_vm2, %v1121_v29, 0.0 }
 0x21c   : > { %v1056_v53 = vmul.f32 0.0625, %v972_v48  ;;  %1166 = vadd.xlane.f32.xlu0 %v1165_v7  ;;  %v987_v61 = vpop.xlane.xlu0 %986  ;;  %v1122_v17 = vmul.f32 %v2296_v50, %v2296_v50 }
 0x21d   : > { %v1061_v6 = vmul.f32 0.0625, %v987_v61  ;;  %v1119_v16 = vmul.f32 %v2300_v9, %v2300_v9 }
 0x21e   : > { %v2308_v15 = vsub.f32 %v2101_v54, %v1056_v53  ;;  %v1168_v45 = vsel %vm791_vm2, %v1122_v17, 0.0 }
 0x21f   : > { %v2312_v21 = vsub.f32 %v2111_v0, %v1061_v6  ;;  %1169 = vadd.xlane.f32.xlu1 %v1168_v45  ;;  %v990_v28 = vpop.xlane.xlu1 %989  ;;  %v1159_v20 = vsel %vm791_vm2, %v1119_v16, 0.0 }
 0x220   : > { %v1062_v62 = vmul.f32 0.0625, %v990_v28  ;;  %1160 = vadd.xlane.f32.xlu0 %v1159_v20  ;;  %v981_v32 = vpop.xlane.xlu0 %980  ;;  %v1120_v41 = vmul.f32 %v2308_v15, %v2308_v15 }
 0x221   : > { %v1059_v1 = vmul.f32 0.0625, %v981_v32  ;;  %v1125_v54 = vmul.f32 %v2312_v21, %v2312_v21 }
 0x222   : > { %v2320_v25 = vsub.f32 %v2117_v49, %v1062_v62  ;;  %v1162_v0 = vsel %vm791_vm2, %v1120_v41, 0.0 }
 0x223   : > { %v2324_v30 = vsub.f32 %v2124_v2, %v1059_v1  ;;  %1163 = vadd.xlane.f32.xlu1 %v1162_v0  ;;  %v984_v8 = vpop.xlane.xlu1 %983  ;;  %v1177_v31 = vsel %vm791_vm2, %v1125_v54, 0.0 }
 0x224   : > { %v1060_v33 = vmul.f32 0.0625, %v984_v8  ;;  %1178 = vadd.xlane.f32.xlu0 %v1177_v31  ;;  %v999_v57 = vpop.xlane.xlu0 %998  ;;  %v1126_v14 = vmul.f32 %v2320_v25, %v2320_v25 }
 0x225   : > { %v1065_v46 = vmul.f32 0.0625, %v999_v57  ;;  %v1123_v49 = vmul.f32 %v2324_v30, %v2324_v30 }
 0x226   : > { %v2332_v40 = vsub.f32 %v2129_v10, %v1060_v33  ;;  %v1180_v2 = vsel %vm791_vm2, %v1126_v14, 0.0 }
 0x227   : > { %v2336_v43 = vsub.f32 %v2139_v23, %v1065_v46  ;;  %1181 = vadd.xlane.f32.xlu1 %v1180_v2  ;;  %v1002_v44 = vpop.xlane.xlu1 %1001  ;;  %v1171_v11 = vsel %vm791_vm2, %v1123_v49, 0.0 }
 0x228   : > { %v1066_v42 = vmul.f32 0.0625, %v1002_v44  ;;  %1172 = vadd.xlane.f32.xlu0 %v1171_v11  ;;  %v993_v56 = vpop.xlane.xlu0 %992  ;;  %v1124_v29 = vmul.f32 %v2332_v40, %v2332_v40 }
 0x229   : > { %v1063_v51 = vmul.f32 0.0625, %v993_v56  ;;  %v1129_v10 = vmul.f32 %v2336_v43, %v2336_v43 }
 0x22a   : > { %v2344_v48 = vsub.f32 %v2145_v26, %v1066_v42  ;;  %v1174_v23 = vsel %vm791_vm2, %v1124_v29, 0.0 }
 0x22b   : > { %v2348_v7 = vsub.f32 %v2152_v18, %v1063_v51  ;;  %1175 = vadd.xlane.f32.xlu1 %v1174_v23  ;;  %v996_v53 = vpop.xlane.xlu1 %995  ;;  %v1189_v61 = vsel %vm791_vm2, %v1129_v10, 0.0 }
 0x22c   : > { %v1064_v17 = vmul.f32 0.0625, %v996_v53  ;;  %1190 = vadd.xlane.f32.xlu0 %v1189_v61  ;;  %v1011_v6 = vpop.xlane.xlu0 %1010  ;;  %v1130_v16 = vmul.f32 %v2344_v48, %v2344_v48 }
 0x22d   : > { %v1069_v45 = vmul.f32 0.0625, %v1011_v6  ;;  %v1127_v26 = vmul.f32 %v2348_v7, %v2348_v7 }
 0x22e   : > { %v2356_v28 = vsub.f32 %v2157_v47, %v1064_v17  ;;  %v1192_v18 = vsel %vm791_vm2, %v1130_v16, 0.0 }
 0x22f   : > { %v2360_v20 = vsub.f32 %v2167_v55, %v1069_v45  ;;  %1193 = vadd.xlane.f32.xlu1 %v1192_v18  ;;  %v1014_v62 = vpop.xlane.xlu1 %1013  ;;  %v1183_v32 = vsel %vm791_vm2, %v1127_v26, 0.0 }
 0x230   : > { %v1070_v41 = vmul.f32 0.0625, %v1014_v62  ;;  %1184 = vadd.xlane.f32.xlu0 %v1183_v32  ;;  %v1005_v1 = vpop.xlane.xlu0 %1004  ;;  %v1128_v54 = vmul.f32 %v2356_v28, %v2356_v28 }
 0x231   : > { %v1067_v0 = vmul.f32 0.0625, %v1005_v1  ;;  %v1133_v47 = vmul.f32 %v2360_v20, %v2360_v20 }
 0x232   : > { %v2368_v8 = vsub.f32 %v2173_v3, %v1070_v41  ;;  %v1186_v55 = vsel %vm791_vm2, %v1128_v54, 0.0 }
 0x233   : > { %v2372_v31 = vsub.f32 %v2180_v38, %v1067_v0  ;;  %1187 = vadd.xlane.f32.xlu1 %v1186_v55  ;;  %v1008_v33 = vpop.xlane.xlu1 %1007  ;;  %v1201_v57 = vsel %vm791_vm2, %v1133_v47, 0.0 }
 0x234   : > { %v1068_v14 = vmul.f32 0.0625, %v1008_v33  ;;  %1202 = vadd.xlane.f32.xlu0 %v1201_v57  ;;  %v1023_v46 = vpop.xlane.xlu0 %1022  ;;  %v1134_v49 = vmul.f32 %v2368_v8, %v2368_v8 }
 0x235   : > { %v1073_v2 = vmul.f32 0.0625, %v1023_v46  ;;  %v1131_v3 = vmul.f32 %v2372_v31, %v2372_v31 }
 0x236   : > { %v2380_v44 = vsub.f32 %v2185_v24, %v1068_v14  ;;  %v1204_v38 = vsel %vm791_vm2, %v1134_v49, 0.0 }
 0x237   : > { %v2384_v11 = vsub.f32 %v2195_v35, %v1073_v2  ;;  %1205 = vadd.xlane.f32.xlu1 %v1204_v38  ;;  %v1026_v42 = vpop.xlane.xlu1 %1025  ;;  %v1195_v56 = vsel %vm791_vm2, %v1131_v3, 0.0 }
 0x238   : > { %v1074_v29 = vmul.f32 0.0625, %v1026_v42  ;;  %1196 = vadd.xlane.f32.xlu0 %v1195_v56  ;;  %v1017_v51 = vpop.xlane.xlu0 %1016  ;;  %v1132_v10 = vmul.f32 %v2380_v44, %v2380_v44 }
 0x239   : > { %v1071_v23 = vmul.f32 0.0625, %v1017_v51  ;;  %v1137_v24 = vmul.f32 %v2384_v11, %v2384_v11 }
 0x23a   : > { %v2392_v53 = vsub.f32 %v2201_v39, %v1074_v29  ;;  %v1198_v35 = vsel %vm791_vm2, %v1132_v10, 0.0 }
 0x23b   : > { %v2396_v61 = vsub.f32 %v2208_v63, %v1071_v23  ;;  %1199 = vadd.xlane.f32.xlu1 %v1198_v35  ;;  %v1020_v17 = vpop.xlane.xlu1 %1019  ;;  %v1213_v6 = vsel %vm791_vm2, %v1137_v24, 0.0 }
 0x23c   : > { %v1072_v16 = vmul.f32 0.0625, %v1020_v17  ;;  %1214 = vadd.xlane.f32.xlu0 %v1213_v6  ;;  %v1035_v45 = vpop.xlane.xlu0 %1034  ;;  %v1138_v26 = vmul.f32 %v2392_v53, %v2392_v53 }
 0x23d   : > { %v1077_v18 = vmul.f32 0.0625, %v1035_v45  ;;  %v1135_v39 = vmul.f32 %v2396_v61, %v2396_v61 }
 0x23e   : > { %v2404_v62 = vsub.f32 %v2213_v58, %v1072_v16  ;;  %v1216_v63 = vsel %vm791_vm2, %v1138_v26, 0.0 }
 0x23f   : > { %v2408_v32 = vsub.f32 %v2223_v19, %v1077_v18  ;;  %1217 = vadd.xlane.f32.xlu1 %v1216_v63  ;;  %v1038_v41 = vpop.xlane.xlu1 %1037  ;;  %v1207_v1 = vsel %vm791_vm2, %v1135_v39, 0.0 }
 0x240   : > { %v1078_v54 = vmul.f32 0.0625, %v1038_v41  ;;  %1208 = vadd.xlane.f32.xlu0 %v1207_v1  ;;  %v1029_v0 = vpop.xlane.xlu0 %1028  ;;  %v1136_v47 = vmul.f32 %v2404_v62, %v2404_v62 }
 0x241   : > { %v1075_v55 = vmul.f32 0.0625, %v1029_v0  ;;  %v1141_v58 = vmul.f32 %v2408_v32, %v2408_v32 }
 0x242   : > { %v2416_v33 = vsub.f32 %v2227_v22, %v1078_v54  ;;  %v1210_v19 = vsel %vm791_vm2, %v1136_v47, 0.0 }
 0x243   : > { %v2420_v57 = vsub.f32 %v2236_v5, %v1075_v55  ;;  %1211 = vadd.xlane.f32.xlu1 %v1210_v19  ;;  %v1032_v14 = vpop.xlane.xlu1 %1031  ;;  %v1225_v46 = vsel %vm791_vm2, %v1141_v58, 0.0 }
 0x244   : > { %v1076_v49 = vmul.f32 0.0625, %v1032_v14  ;;  %1226 = vadd.xlane.f32.xlu0 %v1225_v46  ;;  %v1041_v2 = vpop.xlane.xlu0 %1040  ;;  %v1142_v3 = vmul.f32 %v2416_v33, %v2416_v33 }
 0x245   : > { %v1079_v38 = vmul.f32 0.0625, %v1041_v2  ;;  %v1139_v22 = vmul.f32 %v2420_v57, %v2420_v57 }
 0x246   : > { %v2428_v42 = vsub.f32 %v2240_v36, %v1076_v49  ;;  %v1228_v5 = vsel %vm791_vm2, %v1142_v3, 0.0 }
 0x247   : > { %v2432_v56 = vsub.f32 %v2247_v27, %v1079_v38  ;;  %1229 = vadd.xlane.f32.xlu1 %v1228_v5  ;;  %v1044_v29 = vpop.xlane.xlu1 %1043  ;;  %v1219_v51 = vsel %vm791_vm2, %v1139_v22, 0.0 }
 0x248   : > { %v1080_v10 = vmul.f32 0.0625, %v1044_v29  ;;  %1220 = vadd.xlane.f32.xlu0 %v1219_v51  ;;  %v1047_v23 = vpop.xlane.xlu0 %1046  ;;  %v1140_v24 = vmul.f32 %v2428_v42, %v2428_v42 }
 0x249   : > { %v1081_v35 = vmul.f32 0.0625, %v1047_v23  ;;  %v1143_v36 = vmul.f32 %v2432_v56, %v2432_v56 }
 0x24a   : > { %v2440_v17 = vsub.f32 %v2254_v52, %v1080_v10  ;;  %v1222_v27 = vsel %vm791_vm2, %v1140_v24, 0.0 }
 0x24b   : > { %v2444_v6 = vsub.f32 %v2258_v59, %v1081_v35  ;;  %1223 = vadd.xlane.f32.xlu1 %v1222_v27  ;;  %v1050_v16 = vpop.xlane.xlu1 %1049  ;;  %v1231_v45 = vsel %vm791_vm2, %v1143_v36, 0.0  ;;  %v2462_v35 = vld [vmem:[%s2645_s6] ss:$0 sm:$0xff] }
 0x24c   : > { %v1082_v26 = vmul.f32 0.0625, %v1050_v16  ;;  %1232 = vadd.xlane.f32.xlu0 %v1231_v45  ;;  %v1144_v18 = vmul.f32 %v2440_v17, %v2440_v17 }
 0x24d   : > { %v1145_v39 = vmul.f32 %v2444_v6, %v2444_v6 }
 0x24e   : > { %v2452_v52 = vsub.f32 %v2263_v12, %v1082_v26  ;;  %v1234_v63 = vsel %vm791_vm2, %v1144_v18, 0.0  ;;  %v2468_v26 = vld [vmem:[%s2646_s7] ss:$0 sm:$0xff] }
 0x24f   : > { %1235 = vadd.xlane.f32.xlu1 %v1234_v63  ;;  %v1237_v59 = vsel %vm791_vm2, %v1145_v39, 0.0 }
 0x250   : > { %1238 = vadd.xlane.f32.xlu0 %v1237_v59  ;;  %v1146_v41 = vmul.f32 %v2452_v52, %v2452_v52 }
 0x252   : > { %v1240_v1 = vsel %vm791_vm2, %v1146_v41, 0.0 }
 0x253   : > { %1241 = vadd.xlane.f32.xlu1 %v1240_v1 }
 0x2a0   : > { %v1155_v54 = vpop.xlane.xlu0 %1154 }
 0x2a1   : > { %v1245_v0 = vmul.f32 0.0625, %v1155_v54 }
 0x2a3   : > { %v1277_v47 = vadd.f32 1e-05, %v1245_v0 }
 0x2a4   : > { %v1158_v55 = vpop.xlane.xlu1 %1157  ;;  %v1149_v58 = vpop.xlane.xlu0 %1148 }
 0x2a5   : > { %1695 = vrsqrt.f32 %v1277_v47  ;;  %v1246_v12 = vmul.f32 0.0625, %v1158_v55  ;;  %v1243_v19 = vmul.f32 0.0625, %v1149_v58 }
 0x2a7   : > { %v1278_v14 = vadd.f32 1e-05, %v1246_v12  ;;  %v1275_v46 = vadd.f32 1e-05, %v1243_v19 }
 0x2a8   : > { %v1152_v49 = vpop.xlane.xlu1 %1151 }
 0x2a9   : > { %1697 = vrsqrt.f32 %v1278_v14  ;;  %v1244_v2 = vmul.f32 0.0625, %v1152_v49  ;;  %v1167_v3 = vpop.xlane.xlu0 %1166 }
 0x2aa   : > { %1699 = vrsqrt.f32 %v1275_v46  ;;  %v1249_v38 = vmul.f32 0.0625, %v1167_v3 }
 0x2ab   : > { %v1276_v22 = vadd.f32 1e-05, %v1244_v2 }
 0x2ac   : > { %v1281_v5 = vadd.f32 1e-05, %v1249_v38  ;;  %v1170_v29 = vpop.xlane.xlu1 %1169 }
 0x2ad   : > { %1701 = vrsqrt.f32 %v1276_v22  ;;  %v1250_v51 = vmul.f32 0.0625, %v1170_v29  ;;  %v1161_v10 = vpop.xlane.xlu0 %1160 }
 0x2ae   : > { %1703 = vrsqrt.f32 %v1281_v5  ;;  %v1247_v23 = vmul.f32 0.0625, %v1161_v10 }
 0x2af   : > { %v1696_v24 = vpop.eup %1695  ;;  %v1282_v36 = vadd.f32 1e-05, %v1250_v51 }
 0x2b0   : > { %v1341_v27 = vmul.f32 %v1696_v24, %v2268_v34  ;;  %v1279_v16 = vadd.f32 1e-05, %v1247_v23  ;;  %v1164_v45 = vpop.xlane.xlu1 %1163 }
 0x2b1   : > { %1705 = vrsqrt.f32 %v1282_v36  ;;  %v1248_v18 = vmul.f32 0.0625, %v1164_v45  ;;  %v1179_v39 = vpop.xlane.xlu0 %1178 }
 0x2b2   : > { %v1379_v63 = vmul.f32 %v2462_v35, %v1341_v27  ;;  %1707 = vrsqrt.f32 %v1279_v16  ;;  %v1253_v59 = vmul.f32 0.0625, %v1179_v39 }
 0x2b3   : > { %v1698_v41 = vpop.eup %1697  ;;  %v1280_v34 = vadd.f32 1e-05, %v1248_v18 }
 0x2b4   : > { %v1700_v1 = vpop.eup %1699  ;;  %v1417_v54 = vadd.f32 %v2468_v26, %v1379_v63  ;;  %v1342_v0 = vmul.f32 %v1698_v41, %v2273_v13  ;;  %v1285_v47 = vadd.f32 1e-05, %v1253_v59  ;;  %v1182_v55 = vpop.xlane.xlu1 %1181 }
 0x2b5   : > { %v1339_v58 = vmul.f32 %v1700_v1, %v2276_v4  ;;  %1709 = vrsqrt.f32 %v1280_v34  ;;  %v1254_v12 = vmul.f32 0.0625, %v1182_v55  ;;  %v1173_v19 = vpop.xlane.xlu0 %1172 }
 0x2b6   : > { %1449 = vst.msk [vmem:[%s2476_s29 + $0x10] sm:$0xff] %vm791_vm2, %v1417_v54  ;;  %v1380_v14 = vmul.f32 %v2462_v35, %v1342_v0  ;;  %1711 = vrsqrt.f32 %v1285_v47  ;;  %v1251_v46 = vmul.f32 0.0625, %v1173_v19 }
 0x2b7   : > { %v1702_v49 = vpop.eup %1701  ;;  %v1377_v2 = vmul.f32 %v2462_v35, %v1339_v58  ;;  %v1286_v3 = vadd.f32 1e-05, %v1254_v12 }
 0x2b8   : > { %v1704_v13 = vpop.eup %1703  ;;  %v1418_v38 = vadd.f32 %v2468_v26, %v1380_v14  ;;  %v1340_v4 = vmul.f32 %v1702_v49, %v2284_v37  ;;  %v1283_v22 = vadd.f32 1e-05, %v1251_v46  ;;  %v1176_v5 = vpop.xlane.xlu1 %1175 }
 0x2b9   : > { %v1415_v29 = vadd.f32 %v2468_v26, %v1377_v2  ;;  %v1345_v51 = vmul.f32 %v1704_v13, %v2289_v60  ;;  %1713 = vrsqrt.f32 %v1286_v3  ;;  %v1252_v10 = vmul.f32 0.0625, %v1176_v5  ;;  %v1191_v23 = vpop.xlane.xlu0 %1190 }
 0x2ba   : > { %1450 = vst.msk [vmem:[%s2476_s29 + $0x18] sm:$0xff] %vm791_vm2, %v1418_v38  ;;  %v1378_v24 = vmul.f32 %v2462_v35, %v1340_v4  ;;  %1715 = vrsqrt.f32 %v1283_v22  ;;  %v1257_v36 = vmul.f32 0.0625, %v1191_v23 }
 0x2bb   : > { %v1706_v27 = vpop.eup %1705  ;;  %1447 = vst.msk [vmem:[%s2476_s29] sm:$0xff] %vm791_vm2, %v1415_v29  ;;  %v1383_v37 = vmul.f32 %v2462_v35, %v1345_v51  ;;  %v1284_v16 = vadd.f32 1e-05, %v1252_v10 }
 0x2bc   : > { %v1708_v45 = vpop.eup %1707  ;;  %v1416_v60 = vadd.f32 %v2468_v26, %v1378_v24  ;;  %v1346_v18 = vmul.f32 %v1706_v27, %v2296_v50  ;;  %v1289_v39 = vadd.f32 1e-05, %v1257_v36  ;;  %v1194_v63 = vpop.xlane.xlu1 %1193 }
 0x2bd   : > { %v1421_v59 = vadd.f32 %v2468_v26, %v1383_v37  ;;  %v1343_v41 = vmul.f32 %v1708_v45, %v2300_v9  ;;  %1717 = vrsqrt.f32 %v1284_v16  ;;  %v1258_v34 = vmul.f32 0.0625, %v1194_v63  ;;  %v1185_v1 = vpop.xlane.xlu0 %1184 }
 0x2be   : > { %1448 = vst.msk [vmem:[%s2476_s29 + $0x8] sm:$0xff] %vm791_vm2, %v1416_v60  ;;  %v1384_v54 = vmul.f32 %v2462_v35, %v1346_v18  ;;  %1719 = vrsqrt.f32 %v1289_v39  ;;  %v1255_v0 = vmul.f32 0.0625, %v1185_v1 }
 0x2bf   : > { %v1710_v47 = vpop.eup %1709  ;;  %1453 = vst.msk [vmem:[%s2476_s29 + $0x30] sm:$0xff] %vm791_vm2, %v1421_v59  ;;  %v1381_v50 = vmul.f32 %v2462_v35, %v1343_v41  ;;  %v1290_v55 = vadd.f32 1e-05, %v1258_v34 }
 0x2c0   : > { %v1712_v58 = vpop.eup %1711  ;;  %v1422_v9 = vadd.f32 %v2468_v26, %v1384_v54  ;;  %v1344_v12 = vmul.f32 %v1710_v47, %v2308_v15  ;;  %v1287_v19 = vadd.f32 1e-05, %v1255_v0  ;;  %v1188_v14 = vpop.xlane.xlu1 %1187 }
 0x2c1   : > { %v1419_v46 = vadd.f32 %v2468_v26, %v1381_v50  ;;  %v1349_v49 = vmul.f32 %v1712_v58, %v2312_v21  ;;  %1721 = vrsqrt.f32 %v1290_v55  ;;  %v1256_v2 = vmul.f32 0.0625, %v1188_v14  ;;  %v1203_v3 = vpop.xlane.xlu0 %1202 }
 0x2c2   : > { %1454 = vst.msk [vmem:[%s2476_s29 + $0x38] sm:$0xff] %vm791_vm2, %v1422_v9  ;;  %v1382_v13 = vmul.f32 %v2462_v35, %v1344_v12  ;;  %1723 = vrsqrt.f32 %v1287_v19  ;;  %v1261_v38 = vmul.f32 0.0625, %v1203_v3 }
 0x2c3   : > { %v1714_v4 = vpop.eup %1713  ;;  %1451 = vst.msk [vmem:[%s2476_s29 + $0x20] sm:$0xff] %vm791_vm2, %v1419_v46  ;;  %v1387_v15 = vmul.f32 %v2462_v35, %v1349_v49  ;;  %v1288_v22 = vadd.f32 1e-05, %v1256_v2 }
 0x2c4   : > { %v1716_v5 = vpop.eup %1715  ;;  %v1420_v21 = vadd.f32 %v2468_v26, %v1382_v13  ;;  %v1350_v29 = vmul.f32 %v1714_v4, %v2320_v25  ;;  %v1293_v51 = vadd.f32 1e-05, %v1261_v38  ;;  %v1206_v10 = vpop.xlane.xlu1 %1205 }
 0x2c5   : > { %v1425_v23 = vadd.f32 %v2468_v26, %v1387_v15  ;;  %v1347_v24 = vmul.f32 %v1716_v5, %v2324_v30  ;;  %1725 = vrsqrt.f32 %v1288_v22  ;;  %v1262_v36 = vmul.f32 0.0625, %v1206_v10  ;;  %v1197_v27 = vpop.xlane.xlu0 %1196 }
 0x2c6   : > { %1452 = vst.msk [vmem:[%s2476_s29 + $0x28] sm:$0xff] %vm791_vm2, %v1420_v21  ;;  %v1388_v37 = vmul.f32 %v2462_v35, %v1350_v29  ;;  %1727 = vrsqrt.f32 %v1293_v51  ;;  %v1259_v16 = vmul.f32 0.0625, %v1197_v27 }
 0x2c7   : > { %v1718_v45 = vpop.eup %1717  ;;  %1457 = vst.msk [vmem:[%s2476_s29 + $0x50] sm:$0xff] %vm791_vm2, %v1425_v23  ;;  %v1385_v25 = vmul.f32 %v2462_v35, %v1347_v24  ;;  %v1294_v60 = vadd.f32 1e-05, %v1262_v36 }
 0x2c8   : > { %v1720_v18 = vpop.eup %1719  ;;  %v1426_v30 = vadd.f32 %v2468_v26, %v1388_v37  ;;  %v1348_v39 = vmul.f32 %v1718_v45, %v2332_v40  ;;  %v1291_v63 = vadd.f32 1e-05, %v1259_v16  ;;  %v1200_v59 = vpop.xlane.xlu1 %1199 }
 0x2c9   : > { %v1423_v41 = vadd.f32 %v2468_v26, %v1385_v25  ;;  %v1353_v34 = vmul.f32 %v1720_v18, %v2336_v43  ;;  %1729 = vrsqrt.f32 %v1294_v60  ;;  %v1260_v1 = vmul.f32 0.0625, %v1200_v59  ;;  %v1215_v54 = vpop.xlane.xlu0 %1214 }
 0x2ca   : > { %1458 = vst.msk [vmem:[%s2476_s29 + $0x58] sm:$0xff] %vm791_vm2, %v1426_v30  ;;  %v1386_v0 = vmul.f32 %v2462_v35, %v1348_v39  ;;  %1731 = vrsqrt.f32 %v1291_v63  ;;  %v1265_v47 = vmul.f32 0.0625, %v1215_v54 }
 0x2cb   : > { %v1722_v50 = vpop.eup %1721  ;;  %1455 = vst.msk [vmem:[%s2476_s29 + $0x40] sm:$0xff] %vm791_vm2, %v1423_v41  ;;  %v1391_v40 = vmul.f32 %v2462_v35, %v1353_v34  ;;  %v1292_v55 = vadd.f32 1e-05, %v1260_v1 }
 0x2cc   : > { %v1724_v58 = vpop.eup %1723  ;;  %v1424_v43 = vadd.f32 %v2468_v26, %v1386_v0  ;;  %v1354_v9 = vmul.f32 %v1722_v50, %v2344_v48  ;;  %v1297_v12 = vadd.f32 1e-05, %v1265_v47  ;;  %v1218_v19 = vpop.xlane.xlu1 %1217 }
 0x2cd   : > { %v1429_v14 = vadd.f32 %v2468_v26, %v1391_v40  ;;  %v1351_v46 = vmul.f32 %v1724_v58, %v2348_v7  ;;  %1733 = vrsqrt.f32 %v1292_v55  ;;  %v1266_v49 = vmul.f32 0.0625, %v1218_v19  ;;  %v1209_v2 = vpop.xlane.xlu0 %1208 }
 0x2ce   : > { %1456 = vst.msk [vmem:[%s2476_s29 + $0x48] sm:$0xff] %vm791_vm2, %v1424_v43  ;;  %v1392_v3 = vmul.f32 %v2462_v35, %v1354_v9  ;;  %1735 = vrsqrt.f32 %v1297_v12  ;;  %v1263_v13 = vmul.f32 0.0625, %v1209_v2 }
 0x2cf   : > { %v1726_v38 = vpop.eup %1725  ;;  %1461 = vst.msk [vmem:[%s2476_s29 + $0x70] sm:$0xff] %vm791_vm2, %v1429_v14  ;;  %v1389_v48 = vmul.f32 %v2462_v35, %v1351_v46  ;;  %v1298_v4 = vadd.f32 1e-05, %v1266_v49 }
 0x2d0   : > { %v1728_v15 = vpop.eup %1727  ;;  %v1430_v7 = vadd.f32 %v2468_v26, %v1392_v3  ;;  %v1352_v22 = vmul.f32 %v1726_v38, %v2356_v28  ;;  %v1295_v5 = vadd.f32 1e-05, %v1263_v13  ;;  %v1212_v21 = vpop.xlane.xlu1 %1211 }
 0x2d1   : > { %v1427_v29 = vadd.f32 %v2468_v26, %v1389_v48  ;;  %v1357_v51 = vmul.f32 %v1728_v15, %v2360_v20  ;;  %1737 = vrsqrt.f32 %v1298_v4  ;;  %v1264_v10 = vmul.f32 0.0625, %v1212_v21  ;;  %v1227_v23 = vpop.xlane.xlu0 %1226 }
 0x2d2   : > { %1462 = vst.msk [vmem:[%s2476_s29 + $0x78] sm:$0xff] %vm791_vm2, %v1430_v7  ;;  %v1390_v24 = vmul.f32 %v2462_v35, %v1352_v22  ;;  %1739 = vrsqrt.f32 %v1295_v5  ;;  %v1269_v36 = vmul.f32 0.0625, %v1227_v23 }
 0x2d3   : > { %v1730_v27 = vpop.eup %1729  ;;  %1459 = vst.msk [vmem:[%s2476_s29 + $0x60] sm:$0xff] %vm791_vm2, %v1427_v29  ;;  %v1395_v28 = vmul.f32 %v2462_v35, %v1357_v51  ;;  %v1296_v37 = vadd.f32 1e-05, %v1264_v10 }
 0x2d4   : > { %v1732_v16 = vpop.eup %1731  ;;  %v1428_v20 = vadd.f32 %v2468_v26, %v1390_v24  ;;  %v1358_v45 = vmul.f32 %v1730_v27, %v2368_v8  ;;  %v1301_v25 = vadd.f32 1e-05, %v1269_v36  ;;  %v1230_v60 = vpop.xlane.xlu1 %1229 }
 0x2d5   : > { %v1433_v18 = vadd.f32 %v2468_v26, %v1395_v28  ;;  %v1355_v30 = vmul.f32 %v1732_v16, %v2372_v31  ;;  %1741 = vrsqrt.f32 %v1296_v37  ;;  %v1270_v39 = vmul.f32 0.0625, %v1230_v60  ;;  %v1221_v63 = vpop.xlane.xlu0 %1220 }
 0x2d6   : > { %1460 = vst.msk [vmem:[%s2476_s29 + $0x68] sm:$0xff] %vm791_vm2, %v1428_v20  ;;  %v1396_v59 = vmul.f32 %v2462_v35, %v1358_v45  ;;  %1743 = vrsqrt.f32 %v1301_v25  ;;  %v1267_v41 = vmul.f32 0.0625, %v1221_v63 }
 0x2d7   : > { %v1734_v34 = vpop.eup %1733  ;;  %1465 = vst.msk [vmem:[%s2476_s29 + $0x90] sm:$0xff] %vm791_vm2, %v1433_v18  ;;  %v1393_v8 = vmul.f32 %v2462_v35, %v1355_v30  ;;  %v1302_v1 = vadd.f32 1e-05, %v1270_v39 }
 0x2d8   : > { %v1736_v54 = vpop.eup %1735  ;;  %v1434_v31 = vadd.f32 %v2468_v26, %v1396_v59  ;;  %v1356_v0 = vmul.f32 %v1734_v34, %v2380_v44  ;;  %v1299_v47 = vadd.f32 1e-05, %v1267_v41  ;;  %v1224_v50 = vpop.xlane.xlu1 %1223 }
 0x2d9   : > { %v1431_v40 = vadd.f32 %v2468_v26, %v1393_v8  ;;  %v1361_v55 = vmul.f32 %v1736_v54, %v2384_v11  ;;  %1745 = vrsqrt.f32 %v1302_v1  ;;  %v1268_v58 = vmul.f32 0.0625, %v1224_v50  ;;  %v1233_v43 = vpop.xlane.xlu0 %1232 }
 0x2da   : > { %1466 = vst.msk [vmem:[%s2476_s29 + $0x98] sm:$0xff] %vm791_vm2, %v1434_v31  ;;  %v1394_v9 = vmul.f32 %v2462_v35, %v1356_v0  ;;  %1747 = vrsqrt.f32 %v1299_v47  ;;  %v1271_v12 = vmul.f32 0.0625, %v1233_v43 }
 0x2db   : > { %v1738_v19 = vpop.eup %1737  ;;  %1463 = vst.msk [vmem:[%s2476_s29 + $0x80] sm:$0xff] %vm791_vm2, %v1431_v40  ;;  %v1399_v44 = vmul.f32 %v2462_v35, %v1361_v55  ;;  %v1300_v14 = vadd.f32 1e-05, %v1268_v58 }
 0x2dc   : > { %v1740_v46 = vpop.eup %1739  ;;  %v1432_v11 = vadd.f32 %v2468_v26, %v1394_v9  ;;  %v1362_v49 = vmul.f32 %v1738_v19, %v2392_v53  ;;  %v1303_v2 = vadd.f32 1e-05, %v1271_v12  ;;  %v1236_v3 = vpop.xlane.xlu1 %1235 }
 0x2dd   : > { %v1437_v13 = vadd.f32 %v2468_v26, %v1399_v44  ;;  %v1359_v38 = vmul.f32 %v1740_v46, %v2396_v61  ;;  %1749 = vrsqrt.f32 %v1300_v14  ;;  %v1272_v48 = vmul.f32 0.0625, %v1236_v3  ;;  %v1239_v4 = vpop.xlane.xlu0 %1238 }
 0x2de   : > { %1464 = vst.msk [vmem:[%s2476_s29 + $0x88] sm:$0xff] %vm791_vm2, %v1432_v11  ;;  %v1400_v15 = vmul.f32 %v2462_v35, %v1362_v49  ;;  %1751 = vrsqrt.f32 %v1303_v2  ;;  %v1273_v7 = vmul.f32 0.0625, %v1239_v4 }
 0x2df   : > { %v1742_v22 = vpop.eup %1741  ;;  %1469 = vst.msk [vmem:[%s2476_s29 + $0xb0] sm:$0xff] %vm791_vm2, %v1437_v13  ;;  %v1397_v53 = vmul.f32 %v2462_v35, %v1359_v38  ;;  %v1304_v5 = vadd.f32 1e-05, %v1272_v48 }
 0x2e0   : > { %v1744_v21 = vpop.eup %1743  ;;  %v1438_v61 = vadd.f32 %v2468_v26, %v1400_v15  ;;  %v1360_v29 = vmul.f32 %v1742_v22, %v2404_v62  ;;  %v1305_v51 = vadd.f32 1e-05, %v1273_v7  ;;  %v1242_v10 = vpop.xlane.xlu1 %1241 }
 0x2e1   : > { %v1435_v23 = vadd.f32 %v2468_v26, %v1397_v53  ;;  %v1365_v24 = vmul.f32 %v1744_v21, %v2408_v32  ;;  %1753 = vrsqrt.f32 %v1304_v5  ;;  %v1274_v36 = vmul.f32 0.0625, %v1242_v10 }
 0x2e2   : > { %1470 = vst.msk [vmem:[%s2476_s29 + $0xb8] sm:$0xff] %vm791_vm2, %v1438_v61  ;;  %v1398_v27 = vmul.f32 %v2462_v35, %v1360_v29  ;;  %1755 = vrsqrt.f32 %v1305_v51 }
 0x2e3   : > { %v1746_v28 = vpop.eup %1745  ;;  %1467 = vst.msk [vmem:[%s2476_s29 + $0xa0] sm:$0xff] %vm791_vm2, %v1435_v23  ;;  %v1403_v62 = vmul.f32 %v2462_v35, %v1365_v24  ;;  %v1306_v37 = vadd.f32 1e-05, %v1274_v36 }
 0x2e4   : > { %v1748_v16 = vpop.eup %1747  ;;  %v1436_v20 = vadd.f32 %v2468_v26, %v1398_v27  ;;  %v1366_v32 = vmul.f32 %v1746_v28, %v2416_v33 }
 0x2e5   : > { %v1441_v45 = vadd.f32 %v2468_v26, %v1403_v62  ;;  %v1363_v25 = vmul.f32 %v1748_v16, %v2420_v57  ;;  %1757 = vrsqrt.f32 %v1306_v37 }
 0x2e6   : > { %1468 = vst.msk [vmem:[%s2476_s29 + $0xa8] sm:$0xff] %vm791_vm2, %v1436_v20  ;;  %v1404_v60 = vmul.f32 %v2462_v35, %v1366_v32 }
 0x2e7   : > { %v1750_v18 = vpop.eup %1749  ;;  %1473 = vst.msk [vmem:[%s2476_s29 + $0xd0] sm:$0xff] %vm791_vm2, %v1441_v45  ;;  %v1401_v30 = vmul.f32 %v2462_v35, %v1363_v25 }
 0x2e8   : > { %v1752_v39 = vpop.eup %1751  ;;  %v1442_v63 = vadd.f32 %v2468_v26, %v1404_v60  ;;  %v1364_v33 = vmul.f32 %v1750_v18, %v2428_v42 }
 0x2e9   : > { %v1439_v59 = vadd.f32 %v2468_v26, %v1401_v30  ;;  %v1367_v57 = vmul.f32 %v1752_v39, %v2432_v56 }
 0x2ea   : > { %1474 = vst.msk [vmem:[%s2476_s29 + $0xd8] sm:$0xff] %vm791_vm2, %v1442_v63  ;;  %v1402_v41 = vmul.f32 %v2462_v35, %v1364_v33 }
 0x2eb   : > { %v1754_v34 = vpop.eup %1753  ;;  %1471 = vst.msk [vmem:[%s2476_s29 + $0xc0] sm:$0xff] %vm791_vm2, %v1439_v59  ;;  %v1405_v8 = vmul.f32 %v2462_v35, %v1367_v57 }
 0x2ec   : > { %v1756_v1 = vpop.eup %1755  ;;  %v1440_v54 = vadd.f32 %v2468_v26, %v1402_v41  ;;  %v1368_v42 = vmul.f32 %v1754_v34, %v2440_v17 }
 0x2ed   : > { %v1443_v31 = vadd.f32 %v2468_v26, %v1405_v8  ;;  %v1369_v56 = vmul.f32 %v1756_v1, %v2444_v6 }
 0x2ee   : > { %1472 = vst.msk [vmem:[%s2476_s29 + $0xc8] sm:$0xff] %vm791_vm2, %v1440_v54  ;;  %v1406_v0 = vmul.f32 %v2462_v35, %v1368_v42 }
 0x2ef   : > { %v1758_v47 = vpop.eup %1757  ;;  %1475 = vst.msk [vmem:[%s2476_s29 + $0xe0] sm:$0xff] %vm791_vm2, %v1443_v31  ;;  %v1407_v50 = vmul.f32 %v2462_v35, %v1369_v56 }
 0x2f0   : > { %v1444_v40 = vadd.f32 %v2468_v26, %v1406_v0  ;;  %v1370_v55 = vmul.f32 %v1758_v47, %v2452_v52 }
 0x2f1   : > { %v1445_v58 = vadd.f32 %v2468_v26, %v1407_v50 }
 0x2f2   : > { %1476 = vst.msk [vmem:[%s2476_s29 + $0xe8] sm:$0xff] %vm791_vm2, %v1444_v40  ;;  %v1408_v17 = vmul.f32 %v2462_v35, %v1370_v55 }
 0x2f3   : > { %1477 = vst.msk [vmem:[%s2476_s29 + $0xf0] sm:$0xff] %vm791_vm2, %v1445_v58 }
 0x2f4   : > { %v1446_v6 = vadd.f32 %v2468_v26, %v1408_v17 }
 0x2f6   : > { %1478 = vst.msk [vmem:[%s2476_s29 + $0xf8] sm:$0xff] %vm791_vm2, %v1446_v6 }
 0x2f7 PF: > { %s18_s27 = sadd.s32 1, %s1765_s27  }
 0x2f8   : > { %p15_p4 = scmp.ge.s32.totalorder %s18_s27, 4  }
 0x2fa   :  { %17 = sbr.rel (!%p15_p4) target bundleno = 1 (0x1), region = 82 }

// kernel: _lambda_.5
= control target key start
LH: loop header
LB: loop body
LE: loop exit
PB: predicated region body
PF: predicated region fallthrough
CT: control target
= control target key end

     0   :  { %s2782_s0 = inlined_call_operand.vmem [shape: f32[2,16,128], index: 0, kind: input, shape index: {}]   ;;  %s2783_s1 = inlined_call_operand.vmem [shape: bf16[128,16], index: 1, kind: input, shape index: {}]   ;;  %s2784_s2 = inlined_call_operand.vmem [shape: f32[1,16], index: 2, kind: input, shape index: {}, may-alias: {2,6,14,16,20}]   ;;  %s2785_s3 = inlined_call_operand.vmem [shape: f32[1,16], index: 3, kind: input, shape index: {}]   ;;  %s2786_s4 = inlined_call_operand.vmem [shape: f32[17,16], index: 4, kind: input, shape index: {}]   ;;  %s2787_s5 = inlined_call_operand.vmem [shape: f32[1,16], index: 5, kind: input, shape index: {}, may-alias: {5,15}]   ;;  %s2788_s6 = inlined_call_operand.vmem [shape: f32[1,16], index: 6, kind: input, shape index: {}, may-alias: {2,6,14,16,20}]   ;;  %s2789_s7 = inlined_call_operand.vmem [shape: bf16[2,16,8], index: 7, kind: input, shape index: {}]   ;;  %s2790_s8 = inlined_call_operand.vmem [shape: f32[2,1,8], index: 8, kind: input, shape index: {}, may-alias: {8,10,12}]   ;;  %s2791_s9 = inlined_call_operand.vmem [shape: bf16[2,16,8], index: 9, kind: input, shape index: {}]   ;;  %s2792_s10 = inlined_call_operand.vmem [shape: f32[2,1,8], index: 10, kind: input, shape index: {}, may-alias: {8,10,12}]   ;;  %s2793_s11 = inlined_call_operand.vmem [shape: bf16[2,16,8], index: 11, kind: input, shape index: {}]   ;;  %s2794_s12 = inlined_call_operand.vmem [shape: f32[2,1,8], index: 12, kind: input, shape index: {}, may-alias: {8,10,12}]   ;;  %s2795_s13 = inlined_call_operand.vmem [shape: bf16[2,8,16], index: 13, kind: input, shape index: {}]   ;;  %s2796_s14 = inlined_call_operand.vmem [shape: f32[1,16], index: 14, kind: input, shape index: {}, may-alias: {2,6,14,16,20}]   ;;  %s2797_s15 = inlined_call_operand.vmem [shape: f32[1,16], index: 15, kind: input, shape index: {}, may-alias: {5,15}]   ;;  %s2798_s16 = inlined_call_operand.vmem [shape: f32[1,16], index: 16, kind: input, shape index: {}, may-alias: {2,6,14,16,20}]   ;;  %s2799_s17 = inlined_call_operand.vmem [shape: bf16[16,32], index: 17, kind: input, shape index: {}]   ;;  %s2800_s18 = inlined_call_operand.vmem [shape: f32[1,32], index: 18, kind: input, shape index: {}]   ;;  %s2801_s19 = inlined_call_operand.vmem [shape: bf16[32,16], index: 19, kind: input, shape index: {}]   ;;  %s2802_s20 = inlined_call_operand.vmem [shape: f32[1,16], index: 20, kind: input, shape index: {}, may-alias: {2,6,14,16,20}]   ;;  %s2803_s21 = inlined_call_operand.vmem [shape: bf16[16,8], index: 21, kind: input, shape index: {}]   ;;  %s2804_s22 = inlined_call_operand.vmem [shape: f32[2,1,8], index: 22, kind: output, shape index: {}]  }
   0x1   :  { %2807 = sst [smem:[#allocation2_spill]] %s2782_s0 }
   0x2   :  { %2808 = sst [smem:[#allocation3_spill]] %s2783_s1 }
   0x3   :  { %2809 = sst [smem:[#allocation4_spill]] %s2784_s2 }
   0x4   :  { %2810 = sst [smem:[#allocation5_spill]] %s2785_s3  ;;  %s2528_s3 = smov 0  }
   0x5   :  { %2811 = sst [smem:[#allocation6_spill]] %s2786_s4 }
   0x6   :  { %2812 = sst [smem:[#allocation7_spill]] %s2787_s5 }
   0x7   :  { %2813 = sst [smem:[#allocation8_spill]] %s2788_s6 }
   0x8 LB: > { %s2066_s28 = sadd.s32 4294967295, %s2408_s3   ;;  %p2070_p0 = scmp.ge.s32.totalorder %s2408_s3, 1  ;;  %s2408_s3 = sphi %s2528_s3, %s32_s3  }
   0x9   : > { %p612_p1 = scmp.lt.s32.totalorder %s2408_s3, 3 }
   0xb   : > { %p613_p2 = pnand %p2070_p0, %p612_p1 }
   0xc   : > { %s2814_s4 = sld [smem:[#allocation3_spill]] (!%p613_p2)  ;;  %v2410_v1 = vmov (!%p613_p2), 0.0   ;;  %vm2411_vm0 = vmmov (!%p613_p2), 0   ;;  %p672_p3 = scmp.lt.s32.totalorder (!%p613_p2), %s2066_s28, 1  ;;  %vm799_vm1 = vcmask (!%p613_p2), 1040384   ;;  %vm815_vm2 = vcmask (!%p613_p2), 130048  }
   0xd   : > { %616 = sbr.rel (%p613_p2) target bundleno = 3583 (0xdff), region = 108  ;;  %2205 = vmatprep.subr.bf16.mxu0 (!%p613_p2), %v2410_v1  ;;  %2221 = vmatprep.mubr.msk.bf16.mxu0 (!%p613_p2), %vm2411_vm0, %v2410_v1  ;;  %s2815_s5 = sld [smem:[#allocation2_spill]] (!%p613_p2)  ;;  %vm822_vm3 = vcmask (!%p613_p2), 122880   ;;  %v2350_v48 = vld [vmem:[%s2789_s7] sm:$0xff] (!%p613_p2)   ;;  %vm1076_vm4 = vcmask (!%p613_p2), 64512   ;;  %vm1140_vm5 = vcmask (!%p613_p2), 138240  }
   0xe   : > { %s2816_s27 = sld [smem:[#allocation4_spill]] (!%p613_p2)  ;;  %s2817_s0 = sld [smem:[#allocation5_spill]] (!%p613_p2)  ;;  %2225 = vmatprep.subr.bf16.mxu1 (!%p613_p2), %v2350_v48  ;;  %v2351_v49 = vld [vmem:[%s2791_s9] sm:$0xff] (!%p613_p2)   ;;  %vm1147_vm6 = vcmask (!%p613_p2), 131072   ;;  %vm1607_vm7 = vcmask (!%p613_p2), 1043456   ;;  %vm1911_vm8 = vcmask (!%p613_p2), 261120  }
   0xf   : > { %2226 = vmatpush3.bf16.msra.mxu1 (!%p613_p2), %v2350_v48  ;;  %s2819_s1 = sld [smem:[#allocation7_spill]] (!%p613_p2)  ;;  %s2820_s25 = sld [smem:[#allocation8_spill]] (!%p613_p2)  ;;  %vm2017_vm9 = vcmask (!%p613_p2), 57344  }
  0x10   : > { %2231 = vmatprep.subr.bf16.mxu1 (!%p613_p2), %v2351_v49 }
  0x12   : > { %v2342_v0 = vld [vmem:[%s2814_s4] sm:$0xff] (!%p613_p2)   ;;  %v2343_v2 = vld [vmem:[%s2814_s4 + $0x8] sm:$0xff] (!%p613_p2)   ;;  %v2344_v3 = vld [vmem:[%s2814_s4 + $0x10] sm:$0xff] (!%p613_p2)  }
  0x13   : > { %2206 = vmatpush3.bf16.msra.mxu0 (!%p613_p2), %v2342_v0  ;;  %v2345_v4 = vld [vmem:[%s2814_s4 + $0x18] sm:$0xff] (!%p613_p2)   ;;  %v2346_v5 = vld [vmem:[%s2814_s4 + $0x20] sm:$0xff] (!%p613_p2)   ;;  %v2347_v6 = vld [vmem:[%s2814_s4 + $0x28] sm:$0xff] (!%p613_p2)  }
  0x14   : > { %2207 = vmatprep.subr.bf16.mxu0 %v2410_v1  ;;  %s2822_s28 = smov (!%p672_p3, %s2066_s28), 1  ;;  %v2348_v7 = vld [vmem:[%s2814_s4 + $0x30] sm:$0xff]   ;;  %v2349_v8 = vld [vmem:[%s2814_s4 + $0x38] sm:$0xff]   ;;  %v2073_v12 = vld [vmem:[%s2816_s27] ss:$0 sm:$0xff] }
  0x15   : > { %s2146_s29 = sshll.u32 %s2822_s28, 4  ;;  %v796_v17 = vld [vmem:[%s2817_s0] sm:$0x1]  ;;  %s679_s26 = scalar_lea.vmem %s2804_s22, %s2822_s28 }
  0x16   : > { %s676_s24 = scalar_lea.vmem %s2815_s5, %s2146_s29  ;;  %s2818_s5 = sld [smem:[#allocation6_spill]]  ;;  %v2082_v61 = vld [vmem:[%s2819_s1] ss:$0 sm:$0xff] }
  0x17   : > { %2208 = vmatpush3.bf16.msra.mxu0 %v2343_v2  ;;  %v681_v9 = vld [vmem:[%s676_s24] sm:$0xff]  ;;  %v682_v10 = vld [vmem:[%s676_s24 + $0x8] sm:$0xff] }
  0x18   : > { %2209 = vmatprep.subr.bf16.mxu0 %v2410_v1  ;;  %v699_v11 = vpack.c.bf16 %v682_v10, %v681_v9 }
  0x1b   : > { %2210 = vmatpush3.bf16.msra.mxu0 %v2344_v3 }
  0x1c   : > { %2211 = vmatprep.subr.bf16.mxu0 %v2410_v1  ;;  %v807_v21 = vld [vmem:[%s2818_s5] sm:$0xff]  ;;  %v809_v22 = vld [vmem:[%s2818_s5 + $0x10] sm:$0x1]  ;;  %v808_v25 = vld [vmem:[%s2818_s5 + $0x8] sm:$0xff] }
  0x1f   : > { %2212 = vmatpush3.bf16.msra.mxu0 %v2345_v4  ;;  %v2083_v4 = vld [vmem:[%s2820_s25] ss:$0 sm:$0xff] }
  0x20   : > { %2213 = vmatprep.subr.bf16.mxu0 %v2410_v1 }
  0x23   : > { %2214 = vmatpush3.bf16.msra.mxu0 %v2346_v5 }
  0x24   : > { %2215 = vmatprep.subr.bf16.mxu0 %v2410_v1 }
  0x27   : > { %2216 = vmatpush3.bf16.msra.mxu0 %v2347_v6 }
  0x28   : > { %2217 = vmatprep.subr.bf16.mxu0 %v2410_v1 }
  0x2b   : > { %2218 = vmatpush3.bf16.msra.mxu0 %v2348_v7 }
  0x2c   : > { %2219 = vmatprep.subr.bf16.mxu0 %v2410_v1 }
  0x2f   : > { %2220 = vmatpush3.bf16.msra.mxu0 %v2349_v8 }
  0x32   : > { %2222 = vmatmul.mubr.bf16.vlgmr.msra.gmra.mrb[0].mxu0 %v699_v11 }
 0x105   : > { %v789_v13 = vpop.f32.mrb[0].mxu0 }
 0x106   : > { %v790_v14 = vadd.f32 %v2073_v12, %v789_v13  ;;  %v2223_v15 = vpop.f32.mrb[1].mxu0 }
 0x107   : > { %v792_v16 = vpop.f32.mrb[2].mxu0 }
 0x108   : > { %v800_v18 = vrot.slane %v790_v14, 7  ;;  %v793_v19 = vadd.f32 %v2073_v12, %v792_v16  ;;  %v2224_v20 = vpop.f32.mrb[3].mxu0  ;;  %v2352_v12 = vld [vmem:[%s2793_s11] sm:$0xff]  }
 0x109   : > { %v2084_v14 = vld [vmem:[%s2790_s8] ss:$0 sm:$0xff] }
 0x10a   : > { %v801_v23 = vrot.slane %v793_v19, 7  ;;  %v806_v24 = vsel %vm799_vm1, %v796_v17, %v800_v18 }
 0x10b   : > { %v2592_v26 = vadd.f32 %v807_v21, %v806_v24 }
 0x10c   : > { %v802_v27 = vsel %vm799_vm1, %v800_v18, %v801_v23  ;;  %v2595_v28 = vadd.f32 %v809_v22, %v801_v23  ;;  %v2088_v22 = vld [vmem:[%s2792_s10] ss:$0 sm:$0xff] }
 0x10d   : > { %v816_v29 = vsel %vm815_vm2, %v2592_v26, 0.0  ;;  %v2599_v30 = vadd.f32 %v808_v25, %v802_v27 }
 0x10e   : > { %817 = vadd.xlane.f32.xlu0 %v816_v29  ;;  %v823_v31 = vsel %vm822_vm3, %v2595_v28, 0.0 }
 0x10f   : > { %824 = vadd.xlane.f32.xlu1 %v823_v31  ;;  %v819_v32 = vsel %vm815_vm2, %v2599_v30, 0.0 }
 0x112   : > { %820 = vadd.xlane.f32.xlu0 %v819_v32 }
 0x19b   : > { %v818_v33 = vpop.xlane.xlu0 %817 }
 0x19c   : > { %v827_v34 = vmul.f32 0.0625, %v818_v33  ;;  %v825_v35 = vpop.xlane.xlu1 %824  ;;  %v2092_v33 = vld [vmem:[%s2794_s12] ss:$0 sm:$0xff] }
 0x19d   : > { %v829_v36 = vmul.f32 0.0625, %v825_v35 }
 0x19e   : > { %v830_v37 = vsub.f32 %v2592_v26, %v827_v34 }
 0x19f   : > { %v832_v38 = vsub.f32 %v2595_v28, %v829_v36  ;;  %v821_v39 = vpop.xlane.xlu0 %820 }
 0x1a0   : > { %v828_v40 = vmul.f32 0.0625, %v821_v39  ;;  %v833_v41 = vmul.f32 %v830_v37, %v830_v37 }
 0x1a1   : > { %v835_v44 = vmul.f32 %v832_v38, %v832_v38 }
 0x1a2   : > { %v831_v42 = vsub.f32 %v2599_v30, %v828_v40  ;;  %v836_v43 = vsel %vm815_vm2, %v833_v41, 0.0 }
 0x1a3   : > { %837 = vadd.xlane.f32.xlu1 %v836_v43  ;;  %v842_v46 = vsel %vm822_vm3, %v835_v44, 0.0  ;;  %v2412_v44 = vmov 0  }
 0x1a4   : > { %v834_v45 = vmul.f32 %v831_v42, %v831_v42 }
 0x1a6   : > { %v839_v47 = vsel %vm815_vm2, %v834_v45, 0.0  ;;  %v1186_v45 = vsel %vm799_vm1, 65535, %v2412_v44 }
 0x1a7   : > { %843 = vadd.xlane.f32.xlu1 %v842_v46  ;;  %840 = vadd.xlane.f32.xlu0 %v839_v47  ;;  %v2353_v47 = vld [vmem:[%s2789_s7 + $0x8] sm:$0xff]  }
 0x230   : > { %v838_v50 = vpop.xlane.xlu1 %837 }
 0x231   : > { %v845_v51 = vmul.f32 0.0625, %v838_v50 }
 0x233   : > { %v848_v52 = vadd.f32 1e-05, %v845_v51 }
 0x234   : > { %v844_v53 = vpop.xlane.xlu1 %843  ;;  %v841_v54 = vpop.xlane.xlu0 %840 }
 0x235   : > { %2360 = vrsqrt.f32 %v848_v52  ;;  %v847_v55 = vmul.f32 0.0625, %v844_v53  ;;  %v846_v56 = vmul.f32 0.0625, %v841_v54  ;;  %v2354_v52 = vld [vmem:[%s2793_s11 + $0x8] sm:$0xff]  }
 0x237   : > { %v850_v57 = vadd.f32 1e-05, %v847_v55  ;;  %v849_v58 = vadd.f32 1e-05, %v846_v56 }
 0x239   : > { %2362 = vrsqrt.f32 %v850_v57 }
 0x23a   : > { %2364 = vrsqrt.f32 %v849_v58 }
 0x23f   : > { %v2361_v59 = vpop.eup %2360 }
 0x240   : > { %v854_v60 = vmul.f32 %v2361_v59, %v830_v37 }
 0x242   : > { %v863_v2 = vmul.f32 %v2082_v61, %v854_v60 }
 0x243   : > { %v2363_v62 = vpop.eup %2362 }
 0x244   : > { %v2365_v63 = vpop.eup %2364  ;;  %v856_v0 = vmul.f32 %v2363_v62, %v832_v38  ;;  %v872_v8 = vadd.f32 %v2083_v4, %v863_v2  ;;  %v2103_v62 = vld [vmem:[%s2790_s8 + $0x1] ss:$0 sm:$0xff] }
 0x245   : > { %v855_v3 = vmul.f32 %v2365_v63, %v831_v42 }
 0x246   : > { %v865_v5 = vmul.f32 %v2082_v61, %v856_v0 }
 0x247   : > { %v864_v6 = vmul.f32 %v2082_v61, %v855_v3 }
 0x248   : > { %v874_v7 = vadd.f32 %v2083_v4, %v865_v5 }
 0x249   : > { %v873_v9 = vadd.f32 %v2083_v4, %v864_v6 }
 0x24a   : > { %v2623_v10 = vpack.c.bf16 %v874_v7, %v874_v7 }
 0x24b   : > { %v2625_v11 = vpack.c.bf16 %v873_v9, %v872_v8  ;;  %v2117_v9 = vld [vmem:[%s2794_s12 + $0x1] ss:$0 sm:$0xff] }
 0x24d   : > { %2227 = vmatprep.mubr.msk.bf16.mxu1 %vm815_vm2, %v2625_v11 }
 0x24e   : > { %2228 = vmatmul.mubr.msk.bf16.vlgmr.msra.gmra.mrb[0].mxu1 %vm815_vm2, %v2623_v10 }
 0x24f   : > { %2232 = vmatpush3.bf16.msra.mxu1 %v2351_v49  ;;  %2233 = vmatprep.mubr.msk.bf16.mxu1 %vm815_vm2, %v2625_v11 }
 0x250   : > { %2237 = vmatprep.subr.bf16.mxu1 %v2352_v12 }
 0x256   : > { %2234 = vmatmul.mubr.msk.bf16.vlgmr.msra.gmra.mrb[4].mxu1 %vm815_vm2, %v2623_v10 }
 0x257   : > { %2239 = vmatprep.mubr.msk.bf16.mxu1 %vm815_vm2, %v2625_v11  ;;  %2238 = vmatpush3.bf16.msra.mxu1 %v2352_v12 }
 0x25e   : > { %2240 = vmatmul.mubr.msk.bf16.vlgmr.msra.gmra.mrb[8].mxu1 %vm815_vm2, %v2623_v10 }
 0x321   : > { %v2229_v13 = vpop.f32.mrb[0].mxu1 }
 0x322   : > { %v932_v15 = vpop.f32.mrb[1].mxu1  ;;  %v941_v50 = vadd.f32 %v2229_v13, %v2084_v14 }
 0x323   : > { %v2230_v16 = vpop.f32.mrb[2].mxu1  ;;  %v933_v18 = vadd.f32 %v2084_v14, %v932_v15 }
 0x324   : > { %v935_v17 = vpop.f32.mrb[3].mxu1  ;;  %v1073_v51 = vpack.c.bf16 %v941_v50, %v941_v50 }
 0x325   : > { %v936_v19 = vadd.f32 %v2084_v14, %v935_v17 }
 0x327   : > { %v1072_v20 = vpack.c.bf16 %v936_v19, %v933_v18 }
 0x329   : > { %v2235_v21 = vpop.f32.mrb[4].mxu1  ;;  %2247 = vmatprep.mubr.msk.bf16.mxu1 %vm1076_vm4, %v1072_v20 }
 0x32a   : > { %v995_v23 = vpop.f32.mrb[5].mxu1  ;;  %v1004_v27 = vadd.f32 %v2235_v21, %v2088_v22 }
 0x32b   : > { %v2236_v24 = vpop.f32.mrb[6].mxu1  ;;  %v996_v29 = vadd.f32 %v2088_v22, %v995_v23 }
 0x32c   : > { %v998_v25 = vpop.f32.mrb[7].mxu1  ;;  %v1075_v34 = vpack.c.bf16 %v1004_v27, %v1004_v27 }
 0x32d   : > { %v999_v31 = vadd.f32 %v2088_v22, %v998_v25 }
 0x32e   : > { %v1087_v48 = vsel %vm1076_vm4, %v1075_v34, 0 }
 0x32f   : > { %v1074_v32 = vpack.c.bf16 %v999_v31, %v996_v29 }
 0x331   : > { %v2241_v35 = vpop.f32.mrb[8].mxu1  ;;  %2325 = vmatprep.subr.msk.bf16.mxu1 %vm1076_vm4, %v1074_v32  ;;  %v1084_v36 = vsel %vm1076_vm4, %v1074_v32, 0 }
 0x332   : > { %v1067_v37 = vadd.f32 %v2241_v35, %v2092_v33  ;;  %v1058_v38 = vpop.f32.mrb[9].mxu1  ;;  %2244 = vmatpush3.bf16.xpose.msra.mxu1 %v1084_v36 }
 0x333   : > { %v2242_v39 = vpop.f32.mrb[10].mxu1  ;;  %2326 = vmatprep.subr.msk.bf16.mxu1 %vm1076_vm4, %v1075_v34  ;;  %v1059_v42 = vadd.f32 %v2092_v33, %v1058_v38 }
 0x334   : > { %v1061_v40 = vpop.f32.mrb[11].mxu1  ;;  %v1178_v41 = vpack.c.bf16 %v1067_v37, %v1067_v37 }
 0x335   : > { %v1062_v43 = vadd.f32 %v2092_v33, %v1061_v40  ;;  %v2355_v40 = vld [vmem:[%s2791_s9 + $0x8] sm:$0xff]  }
 0x336   : > { %v1188_v49 = vand.u32 %v1186_v45, %v1178_v41 }
 0x337   : > { %v1177_v46 = vpack.c.bf16 %v1062_v43, %v1059_v42 }
 0x339   : > { %2251 = vmatprep.subr.bf16.mxu0 %v1177_v46 }
 0x33a   : > { %2246 = vmatpush3.bf16.xpose.msra.mxu1 %v1087_v48  ;;  %2252 = vmatpush3.bf16.msra.mxu0 %v1177_v46 }
 0x33b   : > { %2253 = vmatprep.subr.bf16.mxu0 %v1188_v49  ;;  %2259 = vmatprep.subr.bf16.mxu1 %v2353_v47 }
 0x33e   : > { %2254 = vmatpush3.bf16.msra.mxu0 %v1188_v49 }
 0x33f   : > { %2265 = vmatprep.subr.bf16.mxu0 %v2355_v40 }
 0x341   : > { %2248 = vmatmul.mubr.msk.bf16.vlgmr.msra.gmra.mrb[12].mxu1 %vm1076_vm4, %v1073_v51 }
 0x342   : > { %2261 = vmatprep.mubr.msk.bf16.mxu1 %vm815_vm2, %v2625_v11  ;;  %2260 = vmatpush3.bf16.msra.mxu1 %v2353_v47 }
 0x343   : > { %2271 = vmatprep.subr.bf16.mxu1 %v2354_v52 }
 0x349   : > { %2262 = vmatmul.mubr.msk.bf16.vlgmr.msra.gmra.mrb[16].mxu1 %vm815_vm2, %v2623_v10 }
 0x34a   : > { %2273 = vmatprep.mubr.msk.bf16.mxu1 %vm815_vm2, %v2625_v11  ;;  %2272 = vmatpush3.bf16.msra.mxu1 %v2354_v52 }
 0x351   : > { %2274 = vmatmul.mubr.msk.bf16.vlgmr.msra.gmra.mrb[20].mxu1 %vm815_vm2, %v2623_v10 }
 0x414   : > { %v2249_v53 = vpop.f32.mrb[12].mxu1 }
 0x415   : > { %v1123_v54 = vpop.f32.mrb[13].mxu1  ;;  %v1139_v58 = vmul.f32 0.35355338, %v2249_v53 }
 0x416   : > { %v1137_v55 = vmul.f32 0.35355338, %v1123_v54  ;;  %v2250_v56 = vpop.f32.mrb[14].mxu1 }
 0x417   : > { %v1126_v57 = vpop.f32.mrb[15].mxu1  ;;  %v1148_v0 = vsel %vm1147_vm6, %v1139_v58, -inf }
 0x418   : > { %v1138_v59 = vmul.f32 0.35355338, %v1126_v57  ;;  %v1141_v60 = vsel %vm1140_vm5, %v1137_v55, -inf }
 0x419   : > { %1142 = vmax.xlane.f32.xlu0 %v1141_v60 }
 0x41a   : > { %v1144_v61 = vsel %vm1140_vm5, %v1138_v59, -inf }
 0x41b   : > { %1145 = vmax.xlane.f32.xlu1 %v1144_v61 }
 0x41c   : > { %v2263_v63 = vpop.f32.mrb[16].mxu1 }
 0x41d   : > { %v2678_v2 = vadd.f32 %v2263_v63, %v2103_v62  ;;  %1149 = vmax.xlane.f32.xlu0 %v1148_v0  ;;  %v1292_v3 = vpop.f32.mrb[17].mxu1 }
 0x41e   : > { %v2264_v4 = vpop.f32.mrb[18].mxu1  ;;  %v1293_v6 = vadd.f32 %v2103_v62, %v1292_v3 }
 0x41f   : > { %v1295_v5 = vpop.f32.mrb[19].mxu1  ;;  %v1238_v4 = vld [vmem:[%s2795_s13] sm:$0xf] }
 0x420   : > { %v1296_v7 = vadd.f32 %v2103_v62, %v1295_v5 }
 0x422   : > { %v1436_v8 = vpack.c.bf16 %v1296_v7, %v1293_v6  ;;  %v1437_v6 = vpack.c.bf16 %v2678_v2, %v2678_v2  ;;  %v1666_v7 = vsel %vm1607_vm7, %v1238_v4, 0 }
 0x424   : > { %v2275_v12 = vpop.f32.mrb[20].mxu1 }
 0x425   : > { %v1431_v13 = vadd.f32 %v2275_v12, %v2117_v9  ;;  %v1422_v14 = vpop.f32.mrb[21].mxu1 }
 0x426   : > { %v2276_v15 = vpop.f32.mrb[22].mxu1  ;;  %v1423_v18 = vadd.f32 %v2117_v9, %v1422_v14 }
 0x427   : > { %v1425_v16 = vpop.f32.mrb[23].mxu1  ;;  %v1539_v17 = vpack.c.bf16 %v1431_v13, %v1431_v13 }
 0x428   : > { %v1426_v19 = vadd.f32 %v2117_v9, %v1425_v16 }
 0x429   : > { %v1547_v21 = vand.u32 %v1539_v17, %v1186_v45 }
 0x42a   : > { %v1538_v20 = vpack.c.bf16 %v1426_v19, %v1423_v18 }
 0x42c   : > { %2285 = vmatprep.subr.bf16.mxu1 %v1538_v20 }
 0x42d   : > { %2286 = vmatpush3.bf16.msra.mxu1 %v1538_v20 }
 0x42e   : > { %2287 = vmatprep.subr.bf16.mxu1 %v1547_v21 }
 0x431   : > { %2288 = vmatpush3.bf16.msra.mxu1 %v1547_v21 }
 0x4a6   : > { %v1143_v22 = vpop.xlane.xlu0 %1142 }
 0x4a7   : > { %v1151_v23 = vsub.f32 %v1137_v55, %v1143_v22 }
 0x4a8   : > { %v1146_v24 = vpop.xlane.xlu1 %1145 }
 0x4a9   : > { %v1154_v25 = vmul.f32 1.442695, %v1151_v23  ;;  %v1152_v27 = vsub.f32 %v1138_v59, %v1146_v24 }
 0x4aa   : > { %v1150_v29 = vpop.xlane.xlu0 %1149 }
 0x4ab   : > { %2366 = vpow2.f32 %v1154_v25  ;;  %v1156_v31 = vmul.f32 1.442695, %v1152_v27  ;;  %v1153_v32 = vsub.f32 %v1139_v58, %v1150_v29  ;;  %v2110_v58 = vld [vmem:[%s2792_s10 + $0x1] ss:$0 sm:$0xff] }
 0x4ad   : > { %2368 = vpow2.f32 %v1156_v31  ;;  %v1158_v33 = vmul.f32 1.442695, %v1153_v32 }
 0x4af   : > { %2370 = vpow2.f32 %v1158_v33 }
 0x4b5   : > { %v2367_v34 = vpop.eup %2366 }
 0x4b6   : > { %v1160_v35 = vsel %vm1140_vm5, %v2367_v34, 0.0 }
 0x4b7   : > { %v2369_v36 = vpop.eup %2368  ;;  %1161 = vadd.xlane.f32.xlu1 %v1160_v35 }
 0x4b8   : > { %v1163_v37 = vsel %vm1140_vm5, %v2369_v36, 0.0 }
 0x4b9   : > { %v2371_v38 = vpop.eup %2370  ;;  %1164 = vadd.xlane.f32.xlu0 %v1163_v37 }
 0x4ba   : > { %v1166_v39 = vsel %vm1147_vm6, %v2371_v38, 0.0 }
 0x4bb   : > { %1167 = vadd.xlane.f32.xlu1 %v1166_v39 }
 0x544   : > { %v1162_v41 = vpop.xlane.xlu1 %1161 }
 0x545   : > { %2372 = vrcp.f32 %v1162_v41 }
 0x546   : > { %v1165_v42 = vpop.xlane.xlu0 %1164 }
 0x547   : > { %2374 = vrcp.f32 %v1165_v42  ;;  %v2125_v42 = vld [vmem:[%s2795_s13 + $0x4] sm:$0xf] }
 0x548   : > { %v1168_v43 = vpop.xlane.xlu1 %1167  ;;  %2329 = vmatprep.subr.msk.bf16.mxu1 %vm1607_vm7, %v2125_v42 }
 0x549   : > { %2376 = vrcp.f32 %v1168_v43 }
 0x54f   : > { %v2373_v44 = vpop.eup %2372 }
 0x550   : > { %v1172_v46 = vmul.f32 %v2373_v44, %v2367_v34 }
 0x551   : > { %v2375_v45 = vpop.eup %2374 }
 0x552   : > { %v1173_v47 = vmul.f32 %v2375_v45, %v2369_v36 }
 0x553   : > { %v2377_v48 = vpop.eup %2376 }
 0x554   : > { %v1174_v49 = vmul.f32 %v2377_v48, %v2371_v38  ;;  %v1175_v50 = vpack.c.bf16 %v1173_v47, %v1172_v46 }
 0x556   : > { %2255 = vmatprep.mubr.msk.bf16.mxu0 %vm1140_vm5, %v1175_v50  ;;  %v1176_v51 = vpack.c.bf16 %v1174_v49, %v1174_v49 }
 0x558   : > { %2256 = vmatmul.mubr.msk.bf16.vlgmr.msra.gmra.mrb[4].mxu0 %vm1140_vm5, %v1176_v51 }
 0x559   : > { %2266 = vmatpush3.bf16.msra.mxu0 %v2355_v40  ;;  %2267 = vmatprep.mubr.msk.bf16.mxu0 %vm815_vm2, %v2625_v11 }
 0x560   : > { %2268 = vmatmul.mubr.msk.bf16.vlgmr.msra.gmra.mrb[8].mxu0 %vm815_vm2, %v2623_v10 }
 0x561   : > { %2281 = vmatprep.mubr.msk.bf16.mxu0 %vm1076_vm4, %v1436_v8 }
 0x62b   : > { %v2257_v52 = vpop.f32.mrb[4].mxu0 }
 0x62c   : > { %v1224_v53 = vpop.f32.mrb[5].mxu0  ;;  %v1240_v8 = vpack.c.bf16 %v2257_v52, %v2257_v52 }
 0x62d   : > { %v2258_v54 = vpop.f32.mrb[6].mxu0 }
 0x62e   : > { %v1227_v55 = vpop.f32.mrb[7].mxu0  ;;  %v1609_v54 = vsel %vm1607_vm7, %v2125_v42, 0 }
 0x62f   : > { %v1239_v56 = vpack.c.bf16 %v1227_v55, %v1224_v53 }
 0x633   : > { %v2269_v57 = vpop.f32.mrb[8].mxu0 }
 0x634   : > { %v1357_v59 = vpop.f32.mrb[9].mxu0  ;;  %v1366_v62 = vadd.f32 %v2269_v57, %v2110_v58 }
 0x635   : > { %v2270_v60 = vpop.f32.mrb[10].mxu0  ;;  %v1358_v11 = vadd.f32 %v2110_v58, %v1357_v59 }
 0x636   : > { %v1360_v61 = vpop.f32.mrb[11].mxu0  ;;  %v1439_v10 = vpack.c.bf16 %v1366_v62, %v1366_v62 }
 0x637   : > { %v1361_v63 = vadd.f32 %v2110_v58, %v1360_v61 }
 0x638   : > { %v1450_v5 = vsel %vm1076_vm4, %v1439_v10, 0 }
 0x639   : > { %v1438_v0 = vpack.c.bf16 %v1361_v63, %v1358_v11 }
 0x63b   : > { %2327 = vmatprep.subr.msk.bf16.mxu0 %vm1076_vm4, %v1438_v0  ;;  %v1447_v3 = vsel %vm1076_vm4, %v1438_v0, 0 }
 0x63c   : > { %2278 = vmatpush3.bf16.xpose.msra.mxu0 %v1447_v3 }
 0x63d   : > { %2328 = vmatprep.subr.msk.bf16.mxu0 %vm1076_vm4, %v1439_v10  ;;  %v2130_v10 = vld [vmem:[%s2796_s14] ss:$0 sm:$0xff] }
 0x644   : > { %2280 = vmatpush3.bf16.xpose.msra.mxu0 %v1450_v5 }
 0x645   : > { %2330 = vmatprep.subr.msk.bf16.mxu0 %vm1607_vm7, %v1238_v4 }
 0x64b   : > { %2282 = vmatmul.mubr.msk.bf16.vlgmr.msra.gmra.mrb[12].mxu0 %vm1076_vm4, %v1437_v6 }
 0x64c   : > { %2301 = vmatprep.mubr.msk.bf16.mxu0 %vm1076_vm4, %v1239_v56  ;;  %2300 = vmatpush3.bf16.msra.mxu0 %v1666_v7 }
 0x653   : > { %2302 = vmatmul.mubr.msk.bf16.vlgmr.msra.gmra.mrb[16].mxu0 %vm1076_vm4, %v1240_v8 }
 0x71e   : > { %v2283_v9 = vpop.f32.mrb[12].mxu0 }
 0x71f   : > { %v1486_v12 = vpop.f32.mrb[13].mxu0  ;;  %v1502_v16 = vmul.f32 0.35355338, %v2283_v9 }
 0x720   : > { %v1500_v13 = vmul.f32 0.35355338, %v1486_v12  ;;  %v2284_v14 = vpop.f32.mrb[14].mxu0 }
 0x721   : > { %v1489_v15 = vpop.f32.mrb[15].mxu0  ;;  %v1509_v20 = vsel %vm1147_vm6, %v1502_v16, -inf }
 0x722   : > { %v1501_v17 = vmul.f32 0.35355338, %v1489_v15  ;;  %v1503_v18 = vsel %vm1140_vm5, %v1500_v13, -inf }
 0x723   : > { %1504 = vmax.xlane.f32.xlu0 %v1503_v18 }
 0x724   : > { %v1506_v2 = vsel %vm1140_vm5, %v1501_v17, -inf }
 0x725   : > { %1507 = vmax.xlane.f32.xlu1 %v1506_v2 }
 0x726   : > { %v2303_v19 = vpop.f32.mrb[16].mxu0 }
 0x727   : > { %1510 = vmax.xlane.f32.xlu0 %v1509_v20  ;;  %v1702_v21 = vpop.f32.mrb[17].mxu0 }
 0x728   : > { %v2304_v22 = vpop.f32.mrb[18].mxu0 }
 0x729   : > { %v1705_v23 = vpop.f32.mrb[19].mxu0 }
 0x7b0   : > { %v1505_v24 = vpop.xlane.xlu0 %1504 }
 0x7b1   : > { %v1512_v25 = vsub.f32 %v1500_v13, %v1505_v24 }
 0x7b2   : > { %v1508_v27 = vpop.xlane.xlu1 %1507 }
 0x7b3   : > { %v1515_v29 = vmul.f32 1.442695, %v1512_v25  ;;  %v1513_v31 = vsub.f32 %v1501_v17, %v1508_v27 }
 0x7b4   : > { %v1511_v32 = vpop.xlane.xlu0 %1510 }
 0x7b5   : > { %2378 = vpow2.f32 %v1515_v29  ;;  %v1517_v33 = vmul.f32 1.442695, %v1513_v31  ;;  %v1514_v34 = vsub.f32 %v1502_v16, %v1511_v32  ;;  %v2356_v29 = vld [vmem:[%s2799_s17] sm:$0xff]  }
 0x7b7   : > { %2380 = vpow2.f32 %v1517_v33  ;;  %v1519_v35 = vmul.f32 1.442695, %v1514_v34 }
 0x7b9   : > { %2382 = vpow2.f32 %v1519_v35 }
 0x7bf   : > { %v2379_v36 = vpop.eup %2378 }
 0x7c0   : > { %v1521_v37 = vsel %vm1140_vm5, %v2379_v36, 0.0 }
 0x7c1   : > { %v2381_v38 = vpop.eup %2380  ;;  %1522 = vadd.xlane.f32.xlu1 %v1521_v37 }
 0x7c2   : > { %v1524_v39 = vsel %vm1140_vm5, %v2381_v38, 0.0 }
 0x7c3   : > { %v2383_v40 = vpop.eup %2382  ;;  %1525 = vadd.xlane.f32.xlu0 %v1524_v39 }
 0x7c4   : > { %v1527_v41 = vsel %vm1147_vm6, %v2383_v40, 0.0 }
 0x7c5   : > { %1528 = vadd.xlane.f32.xlu1 %v1527_v41  ;;  %v2131_v41 = vld [vmem:[%s2797_s15] ss:$0 sm:$0xff] }
 0x84e   : > { %v1523_v43 = vpop.xlane.xlu1 %1522 }
 0x84f   : > { %2384 = vrcp.f32 %v1523_v43 }
 0x850   : > { %v1526_v44 = vpop.xlane.xlu0 %1525 }
 0x851   : > { %2386 = vrcp.f32 %v1526_v44 }
 0x852   : > { %v1529_v45 = vpop.xlane.xlu1 %1528 }
 0x853   : > { %2388 = vrcp.f32 %v1529_v45 }
 0x859   : > { %v2385_v46 = vpop.eup %2384 }
 0x85a   : > { %v1533_v48 = vmul.f32 %v2385_v46, %v2379_v36 }
 0x85b   : > { %v2387_v47 = vpop.eup %2386 }
 0x85c   : > { %v1534_v49 = vmul.f32 %v2387_v47, %v2381_v38  ;;  %v2132_v47 = vld [vmem:[%s2798_s16] ss:$0 sm:$0xff] }
 0x85d   : > { %v2389_v50 = vpop.eup %2388 }
 0x85e   : > { %v1535_v51 = vmul.f32 %v2389_v50, %v2383_v40  ;;  %v1536_v52 = vpack.c.bf16 %v1534_v49, %v1533_v48 }
 0x860   : > { %2289 = vmatprep.mubr.msk.bf16.mxu1 %vm1140_vm5, %v1536_v52  ;;  %v1537_v53 = vpack.c.bf16 %v1535_v51, %v1535_v51 }
 0x862   : > { %2290 = vmatmul.mubr.msk.bf16.vlgmr.msra.gmra.mrb[24].mxu1 %vm1140_vm5, %v1537_v53 }
 0x863   : > { %2294 = vmatpush3.bf16.msra.mxu1 %v1609_v54 }
 0x864   : > { %2305 = vmatprep.subr.bf16.mxu1 %v2356_v29 }
 0x935   : > { %v2291_v55 = vpop.f32.mrb[24].mxu1 }
 0x936   : > { %v1583_v56 = vpop.f32.mrb[25].mxu1  ;;  %v1600_v60 = vpack.c.bf16 %v2291_v55, %v2291_v55 }
 0x937   : > { %v2292_v57 = vpop.f32.mrb[26].mxu1 }
 0x938   : > { %v1586_v58 = vpop.f32.mrb[27].mxu1  ;;  %v2358_v57 = vld [vmem:[%s2801_s19 + $0x8] sm:$0xff]  }
 0x939   : > { %v1599_v59 = vpack.c.bf16 %v1586_v58, %v1583_v56  ;;  %v2357_v56 = vld [vmem:[%s2801_s19] sm:$0xff]  }
 0x93a   : > { %2311 = vmatprep.subr.bf16.mxu0 %v2357_v56  ;;  %v2133_v58 = vld [vmem:[%s2800_s18] ss:$0 sm:$0xff] }
 0x93b   : > { %2295 = vmatprep.mubr.msk.bf16.mxu1 %vm1076_vm4, %v1599_v59  ;;  %2312 = vmatpush3.bf16.msra.mxu0 %v2357_v56 }
 0x93c   : > { %2296 = vmatmul.mubr.msk.bf16.vlgmr.msra.gmra.mrb[28].mxu1 %vm1076_vm4, %v1600_v60  ;;  %2313 = vmatprep.subr.bf16.mxu0 %v2358_v57 }
 0x93d   : > { %2306 = vmatpush3.bf16.msra.mxu1 %v2356_v29 }
 0x93e   : > { %2319 = vmatprep.subr.bf16.mxu1 %v2410_v1 }
 0x93f   : > { %2314 = vmatpush3.bf16.msra.mxu0 %v2358_v57 }
 0xa0f   : > { %v2297_v61 = vpop.f32.mrb[28].mxu1 }
 0xa10   : > { %v1711_v62 = vadd.f32 %v2303_v19, %v2297_v61  ;;  %v1645_v11 = vpop.f32.mrb[29].mxu1 }
 0xa11   : > { %v1703_v63 = vadd.f32 %v1702_v21, %v1645_v11  ;;  %v2298_v0 = vpop.f32.mrb[30].mxu1 }
 0xa12   : > { %v1648_v3 = vpop.f32.mrb[31].mxu1  ;;  %v1718_v4 = vadd.f32 %v1711_v62, %v2595_v28 }
 0xa13   : > { %v1716_v5 = vadd.f32 %v1703_v63, %v2592_v26  ;;  %v1706_v6 = vadd.f32 %v1705_v23, %v1648_v3 }
 0xa14   : > { %v1728_v13 = vadd.f32 %v2130_v10, %v1718_v4 }
 0xa15   : > { %v2733_v7 = vadd.f32 %v2130_v10, %v1716_v5  ;;  %v1717_v8 = vadd.f32 %v1706_v6, %v2599_v30 }
 0xa16   : > { %v1737_v15 = vsel %vm822_vm3, %v1728_v13, 0.0 }
 0xa17   : > { %v1731_v9 = vsel %vm815_vm2, %v2733_v7, 0.0  ;;  %v1727_v12 = vadd.f32 %v2130_v10, %v1717_v8 }
 0xa18   : > { %1732 = vadd.xlane.f32.xlu0 %v1731_v9 }
 0xa19   : > { %v1734_v14 = vsel %vm815_vm2, %v1727_v12, 0.0 }
 0xa1a   : > { %1735 = vadd.xlane.f32.xlu1 %v1734_v14 }
 0xa1c   : > { %1738 = vadd.xlane.f32.xlu0 %v1737_v15 }
 0xaa5   : > { %v1733_v28 = vpop.xlane.xlu0 %1732 }
 0xaa6   : > { %v1740_v16 = vmul.f32 0.0625, %v1733_v28 }
 0xaa7   : > { %v1736_v26 = vpop.xlane.xlu1 %1735 }
 0xaa8   : > { %v1743_v17 = vsub.f32 %v2733_v7, %v1740_v16  ;;  %v1741_v18 = vmul.f32 0.0625, %v1736_v26 }
 0xaa9   : > { %v1739_v2 = vpop.xlane.xlu0 %1738 }
 0xaaa   : > { %v1744_v30 = vsub.f32 %v1727_v12, %v1741_v18  ;;  %v1742_v19 = vmul.f32 0.0625, %v1739_v2  ;;  %v1746_v20 = vmul.f32 %v1743_v17, %v1743_v17 }
 0xaac   : > { %v1745_v21 = vsub.f32 %v1728_v13, %v1742_v19  ;;  %v1749_v22 = vsel %vm815_vm2, %v1746_v20, 0.0  ;;  %v1747_v23 = vmul.f32 %v1744_v30, %v1744_v30 }
 0xaad   : > { %1750 = vadd.xlane.f32.xlu1 %v1749_v22 }
 0xaae   : > { %v1752_v24 = vsel %vm815_vm2, %v1747_v23, 0.0  ;;  %v1748_v25 = vmul.f32 %v1745_v21, %v1745_v21 }
 0xaaf   : > { %1753 = vadd.xlane.f32.xlu0 %v1752_v24 }
 0xab0   : > { %v1755_v27 = vsel %vm822_vm3, %v1748_v25, 0.0 }
 0xab1   : > { %1756 = vadd.xlane.f32.xlu1 %v1755_v27 }
 0xb3a   : > { %v1751_v31 = vpop.xlane.xlu1 %1750 }
 0xb3b   : > { %v1758_v32 = vmul.f32 0.0625, %v1751_v31 }
 0xb3c   : > { %v1754_v33 = vpop.xlane.xlu0 %1753 }
 0xb3d   : > { %v1761_v34 = vadd.f32 1e-05, %v1758_v32  ;;  %v1759_v35 = vmul.f32 0.0625, %v1754_v33  ;;  %v2359_v32 = vld [vmem:[%s2803_s21] sm:$0xff]  }
 0xb3e   : > { %v1757_v36 = vpop.xlane.xlu1 %1756  ;;  %v2137_v33 = vld [vmem:[%s2802_s20] ss:$0 sm:$0xff] }
 0xb3f   : > { %2390 = vrsqrt.f32 %v1761_v34  ;;  %v1762_v37 = vadd.f32 1e-05, %v1759_v35  ;;  %v1760_v38 = vmul.f32 0.0625, %v1757_v36 }
 0xb41   : > { %2392 = vrsqrt.f32 %v1762_v37  ;;  %v1763_v39 = vadd.f32 1e-05, %v1760_v38 }
 0xb43   : > { %2394 = vrsqrt.f32 %v1763_v39 }
 0xb49   : > { %v2391_v40 = vpop.eup %2390 }
 0xb4a   : > { %v1767_v42 = vmul.f32 %v2391_v40, %v1743_v17 }
 0xb4b   : > { %v2393_v43 = vpop.eup %2392 }
 0xb4c   : > { %v1768_v44 = vmul.f32 %v2393_v43, %v1744_v30  ;;  %v1776_v45 = vmul.f32 %v2131_v41, %v1767_v42 }
 0xb4d   : > { %v2395_v46 = vpop.eup %2394 }
 0xb4e   : > { %v1769_v48 = vmul.f32 %v2395_v46, %v1745_v21  ;;  %v1777_v49 = vmul.f32 %v2131_v41, %v1768_v44  ;;  %v1785_v51 = vadd.f32 %v2132_v47, %v1776_v45 }
 0xb50   : > { %v1778_v50 = vmul.f32 %v2131_v41, %v1769_v48  ;;  %v1786_v52 = vadd.f32 %v2132_v47, %v1777_v49 }
 0xb52   : > { %v1790_v53 = vpack.c.bf16 %v1786_v52, %v1785_v51  ;;  %v1787_v54 = vadd.f32 %v2132_v47, %v1778_v50 }
 0xb54   : > { %2307 = vmatprep.mubr.msk.bf16.mxu1 %vm815_vm2, %v1790_v53  ;;  %v1791_v55 = vpack.c.bf16 %v1787_v54, %v1787_v54 }
 0xb56   : > { %2308 = vmatmul.mubr.msk.bf16.vlgmr.msra.gmra.mrb[32].mxu1 %vm815_vm2, %v1791_v55 }
 0xb57   : > { %2321 = vmatprep.mubr.msk.bf16.mxu1 %vm2411_vm0, %v2410_v1  ;;  %2320 = vmatpush3.bf16.msra.mxu1 %v2359_v32 }
 0xc29   : > { %v2309_v59 = vpop.f32.mrb[32].mxu1 }
 0xc2a   : > { %v1854_v60 = vadd.f32 %v2309_v59, %v2133_v58  ;;  %v1845_v61 = vpop.f32.mrb[33].mxu1 }
 0xc2b   : > { %v1846_v1 = vadd.f32 %v2133_v58, %v1845_v61  ;;  %v2310_v62 = vpop.f32.mrb[34].mxu1 }
 0xc2c   : > { %v1861_v11 = vmul.f32 %v1854_v60, %v1854_v60  ;;  %v1848_v63 = vpop.f32.mrb[35].mxu1 }
 0xc2d   : > { %v1859_v0 = vmul.f32 %v1846_v1, %v1846_v1  ;;  %v1849_v10 = vadd.f32 %v2133_v58, %v1848_v63 }
 0xc2e   : > { %v1864_v3 = vmul.f32 %v1861_v11, %v1854_v60 }
 0xc2f   : > { %v1862_v4 = vmul.f32 %v1859_v0, %v1846_v1  ;;  %v1860_v5 = vmul.f32 %v1849_v10, %v1849_v10 }
 0xc30   : > { %v1867_v6 = vmul.f32 0.044715, %v1864_v3 }
 0xc31   : > { %v1865_v8 = vmul.f32 0.044715, %v1862_v4  ;;  %v1863_v9 = vmul.f32 %v1860_v5, %v1849_v10 }
 0xc32   : > { %v1870_v12 = vadd.f32 %v1867_v6, %v1854_v60 }
 0xc33   : > { %v1868_v13 = vadd.f32 %v1865_v8, %v1846_v1  ;;  %v1866_v14 = vmul.f32 0.044715, %v1863_v9 }
 0xc34   : > { %v1873_v15 = vmul.f32 0.7978846, %v1870_v12 }
 0xc35   : > { %v1871_v28 = vmul.f32 0.7978846, %v1868_v13  ;;  %v1869_v16 = vadd.f32 %v1866_v14, %v1849_v10 }
 0xc36   : > { %2396 = vtanh.f32 %v1873_v15 }
 0xc37   : > { %2398 = vtanh.f32 %v1871_v28  ;;  %v1872_v26 = vmul.f32 0.7978846, %v1869_v16 }
 0xc39   : > { %2400 = vtanh.f32 %v1872_v26 }
 0xc40   : > { %v2397_v17 = vpop.eup %2396 }
 0xc41   : > { %v2399_v18 = vpop.eup %2398  ;;  %v1879_v2 = vadd.f32 1.0, %v2397_v17 }
 0xc42   : > { %v1877_v30 = vadd.f32 1.0, %v2399_v18 }
 0xc43   : > { %v2401_v19 = vpop.eup %2400  ;;  %v1882_v20 = vmul.f32 0.5, %v1879_v2 }
 0xc44   : > { %v1880_v21 = vmul.f32 0.5, %v1877_v30  ;;  %v1878_v22 = vadd.f32 1.0, %v2401_v19 }
 0xc45   : > { %v1885_v24 = vmul.f32 %v1882_v20, %v1854_v60 }
 0xc46   : > { %v1881_v23 = vmul.f32 0.5, %v1878_v22  ;;  %v1883_v25 = vmul.f32 %v1880_v21, %v1846_v1 }
 0xc47   : > { %v1891_v31 = vpack.c.bf16 %v1885_v24, %v1885_v24 }
 0xc48   : > { %v1884_v27 = vmul.f32 %v1881_v23, %v1849_v10 }
 0xc4a   : > { %v1890_v29 = vpack.c.bf16 %v1884_v27, %v1883_v25 }
 0xc4c   : > { %2315 = vmatprep.mubr.msk.bf16.mxu0 %vm1911_vm8, %v1890_v29 }
 0xc4d   : > { %2316 = vmatmul.mubr.msk.bf16.vlgmr.msra.gmra.mrb[20].mxu0 %vm1911_vm8, %v1891_v31 }
 0xd20   : > { %v2317_v34 = vpop.f32.mrb[20].mxu0 }
 0xd21   : > { %v1952_v35 = vpop.f32.mrb[21].mxu0 }
 0xd22   : > { %v1953_v36 = vadd.f32 %v2137_v33, %v1952_v35  ;;  %v2318_v37 = vpop.f32.mrb[22].mxu0 }
 0xd23   : > { %v1955_v38 = vpop.f32.mrb[23].mxu0 }
 0xd24   : > { %v1964_v39 = vadd.f32 %v1953_v36, %v2733_v7 }
 0xd26   : > { %v1967_v40 = vpack.c.bf16 %v1964_v39, %v1964_v39 }
 0xd28   : > { %2322 = vmatmul.mubr.msk.bf16.vlgmr.msra.gmra.mrb[36].mxu1 %vm815_vm2, %v1967_v40 }
 0xdfb   : > { %v2011_v41 = vpop.f32.mrb[36].mxu1 }
 0xdfc   : > { %2018 = vst.msk [vmem:[%s679_s26] sm:$0x1] %vm2017_vm9, %v2011_v41  ;;  %v2323_v42 = vpop.f32.mrb[37].mxu1 }
 0xdfd   : > { %v2014_v43 = vpop.f32.mrb[38].mxu1 }
 0xdfe   : > { %v2324_v44 = vpop.f32.mrb[39].mxu1 }
 0xdff PF: > { %s32_s3 = sadd.s32 1, %s2408_s3  }
 0xe00   : > { %p29_p4 = scmp.ge.s32.totalorder %s32_s3, 4  }
 0xe02   :  { %31 = sbr.rel (!%p29_p4) target bundleno = 8 (0x8), region = 145 }

// kernel: _lambda_.4
= control target key start
LH: loop header
LB: loop body
LE: loop exit
PB: predicated region body
PF: predicated region fallthrough
CT: control target
= control target key end

     0   :  { %s6139_s24 = smov 0   ;;  %s8370_s0 = inlined_call_operand.vmem [shape: f32[2,256,4], index: 0, kind: input, shape index: {}]   ;;  %s8371_s1 = inlined_call_operand.vmem [shape: f32[1,4], index: 1, kind: input, shape index: {}]   ;;  %s8372_s2 = inlined_call_operand.vmem [shape: f32[1,4], index: 2, kind: input, shape index: {}, may-alias: {2,4}]   ;;  %s8373_s3 = inlined_call_operand.vmem [shape: bf16[9,4,4], index: 3, kind: input, shape index: {}]   ;;  %s8374_s4 = inlined_call_operand.vmem [shape: f32[1,4], index: 4, kind: input, shape index: {}, may-alias: {2,4}]   ;;  %s8375_s5 = inlined_call_operand.vmem [shape: bf16[4,8], index: 5, kind: input, shape index: {}]   ;;  %s8376_s6 = inlined_call_operand.vmem [shape: f32[1,8], index: 6, kind: input, shape index: {}]   ;;  %s8377_s7 = inlined_call_operand.vmem [shape: f32[2,256,8], index: 7, kind: output, shape index: {}]  }
   0x1 LB: > { %s5055_s25 = sadd.s32 4294967295, %s6095_s24   ;;  %p5059_p0 = scmp.ge.s32.totalorder %s6095_s24, 1  ;;  %s6095_s24 = sphi %s6139_s24, %s17_s24  }
   0x2   : > { %p237_p1 = scmp.lt.s32.totalorder %s6095_s24, 3 }
   0x4   : > { %p238_p2 = pnand %p5059_p0, %p237_p1 }
   0x6   : > { %241 = sbr.rel (%p238_p2) target bundleno = 1130 (0x46a), region = 48 }
   0xd   : > { %p269_p3 = scmp.lt.s32.totalorder %s5055_s25, 1  ;;  %vm314_vm0 = vcmask 31744   ;;  %vm8490_vm1 = vcmask 1041408   ;;  %vm840_vm2 = vcmask 1040384   ;;  %vm8436_vm3 = vcmask 1046528  }
   0xe   : > { %vm2521_vm4 = vcmask 1045504  }
   0xf   : > { %s8911_s25 = smov (!%p269_p3, %s5055_s25), 1 }
  0x10   : > { %s5237_s26 = sshll.u32 %s8911_s25, 8 }
  0x11   : > { %s6155_s29 = scalar_lea.vmem %s8370_s0, %s5237_s26  ;;  %s8269_s17 = scalar_lea.vmem %s8377_s7, %s5237_s26 }
  0x12   : > { %v6158_v0 = vld [vmem:[%s6155_s29] sm:$0xff]  ;;  %v6161_v1 = vld [vmem:[%s6155_s29 + $0x10] sm:$0xff]  ;;  %v6164_v2 = vld [vmem:[%s6155_s29 + $0x8] sm:$0xff] }
  0x13   : > { %v315_v3 = vsel %vm314_vm0, %v6158_v0, 0.0  ;;  %v321_v4 = vsel %vm314_vm0, %v6161_v1, 0.0  ;;  %v6171_v5 = vld [vmem:[%s6155_s29 + $0x18] sm:$0xff]  ;;  %v318_v6 = vsel %vm314_vm0, %v6164_v2, 0.0  ;;  %v6178_v8 = vld [vmem:[%s6155_s29 + $0x20] sm:$0xff]  ;;  %v6181_v9 = vld [vmem:[%s6155_s29 + $0x28] sm:$0xff] }
  0x14   : > { %316 = vadd.xlane.f32.xlu0 %v315_v3  ;;  %322 = vadd.xlane.f32.xlu1 %v321_v4  ;;  %v324_v7 = vsel %vm314_vm0, %v6171_v5, 0.0  ;;  %v327_v10 = vsel %vm314_vm0, %v6178_v8, 0.0  ;;  %v330_v11 = vsel %vm314_vm0, %v6181_v9, 0.0  ;;  %v6188_v12 = vld [vmem:[%s6155_s29 + $0x30] sm:$0xff]  ;;  %v6191_v13 = vld [vmem:[%s6155_s29 + $0x38] sm:$0xff]  ;;  %v6198_v16 = vld [vmem:[%s6155_s29 + $0x40] sm:$0xff] }
  0x15   : > { %v333_v14 = vsel %vm314_vm0, %v6188_v12, 0.0  ;;  %v336_v15 = vsel %vm314_vm0, %v6191_v13, 0.0  ;;  %v6201_v17 = vld [vmem:[%s6155_s29 + $0x48] sm:$0xff]  ;;  %v339_v18 = vsel %vm314_vm0, %v6198_v16, 0.0  ;;  %v6208_v20 = vld [vmem:[%s6155_s29 + $0x50] sm:$0xff]  ;;  %v6211_v21 = vld [vmem:[%s6155_s29 + $0x58] sm:$0xff] }
  0x16   : > { %v342_v19 = vsel %vm314_vm0, %v6201_v17, 0.0  ;;  %v345_v22 = vsel %vm314_vm0, %v6208_v20, 0.0  ;;  %v348_v23 = vsel %vm314_vm0, %v6211_v21, 0.0  ;;  %v6218_v24 = vld [vmem:[%s6155_s29 + $0x60] sm:$0xff]  ;;  %v6221_v25 = vld [vmem:[%s6155_s29 + $0x68] sm:$0xff]  ;;  %v6228_v28 = vld [vmem:[%s6155_s29 + $0x70] sm:$0xff] }
  0x17   : > { %v351_v26 = vsel %vm314_vm0, %v6218_v24, 0.0  ;;  %v354_v27 = vsel %vm314_vm0, %v6221_v25, 0.0  ;;  %v6231_v29 = vld [vmem:[%s6155_s29 + $0x78] sm:$0xff]  ;;  %v357_v30 = vsel %vm314_vm0, %v6228_v28, 0.0  ;;  %v6238_v32 = vld [vmem:[%s6155_s29 + $0x80] sm:$0xff]  ;;  %v6241_v33 = vld [vmem:[%s6155_s29 + $0x88] sm:$0xff] }
  0x18   : > { %319 = vadd.xlane.f32.xlu0 %v318_v6  ;;  %325 = vadd.xlane.f32.xlu1 %v324_v7  ;;  %v360_v31 = vsel %vm314_vm0, %v6231_v29, 0.0  ;;  %v363_v34 = vsel %vm314_vm0, %v6238_v32, 0.0  ;;  %v366_v35 = vsel %vm314_vm0, %v6241_v33, 0.0  ;;  %v6248_v36 = vld [vmem:[%s6155_s29 + $0x90] sm:$0xff]  ;;  %v6251_v37 = vld [vmem:[%s6155_s29 + $0x98] sm:$0xff]  ;;  %v6258_v40 = vld [vmem:[%s6155_s29 + $0xa0] sm:$0xff] }
  0x19   : > { %v369_v38 = vsel %vm314_vm0, %v6248_v36, 0.0  ;;  %v372_v39 = vsel %vm314_vm0, %v6251_v37, 0.0  ;;  %v6261_v41 = vld [vmem:[%s6155_s29 + $0xa8] sm:$0xff]  ;;  %v375_v42 = vsel %vm314_vm0, %v6258_v40, 0.0  ;;  %v6268_v44 = vld [vmem:[%s6155_s29 + $0xb0] sm:$0xff]  ;;  %v6271_v45 = vld [vmem:[%s6155_s29 + $0xb8] sm:$0xff] }
  0x1a   : > { %v378_v43 = vsel %vm314_vm0, %v6261_v41, 0.0  ;;  %v381_v46 = vsel %vm314_vm0, %v6268_v44, 0.0  ;;  %v384_v47 = vsel %vm314_vm0, %v6271_v45, 0.0  ;;  %v6278_v48 = vld [vmem:[%s6155_s29 + $0xc0] sm:$0xff]  ;;  %v6281_v49 = vld [vmem:[%s6155_s29 + $0xc8] sm:$0xff]  ;;  %v6288_v52 = vld [vmem:[%s6155_s29 + $0xd0] sm:$0xff] }
  0x1b   : > { %v387_v50 = vsel %vm314_vm0, %v6278_v48, 0.0  ;;  %v390_v51 = vsel %vm314_vm0, %v6281_v49, 0.0  ;;  %v6291_v53 = vld [vmem:[%s6155_s29 + $0xd8] sm:$0xff]  ;;  %v393_v54 = vsel %vm314_vm0, %v6288_v52, 0.0  ;;  %v6298_v56 = vld [vmem:[%s6155_s29 + $0xe0] sm:$0xff]  ;;  %v6301_v57 = vld [vmem:[%s6155_s29 + $0xe8] sm:$0xff] }
  0x1c   : > { %328 = vadd.xlane.f32.xlu0 %v327_v10  ;;  %331 = vadd.xlane.f32.xlu1 %v330_v11  ;;  %v396_v55 = vsel %vm314_vm0, %v6291_v53, 0.0  ;;  %v399_v58 = vsel %vm314_vm0, %v6298_v56, 0.0  ;;  %v402_v59 = vsel %vm314_vm0, %v6301_v57, 0.0  ;;  %v6308_v60 = vld [vmem:[%s6155_s29 + $0xf0] sm:$0xff]  ;;  %v6311_v61 = vld [vmem:[%s6155_s29 + $0xf8] sm:$0xff] }
  0x1d   : > { %v405_v62 = vsel %vm314_vm0, %v6308_v60, 0.0  ;;  %v408_v63 = vsel %vm314_vm0, %v6311_v61, 0.0 }
  0x20   : > { %334 = vadd.xlane.f32.xlu0 %v333_v14  ;;  %337 = vadd.xlane.f32.xlu1 %v336_v15 }
  0x24   : > { %340 = vadd.xlane.f32.xlu0 %v339_v18  ;;  %343 = vadd.xlane.f32.xlu1 %v342_v19 }
  0x28   : > { %346 = vadd.xlane.f32.xlu0 %v345_v22  ;;  %349 = vadd.xlane.f32.xlu1 %v348_v23 }
  0x2c   : > { %352 = vadd.xlane.f32.xlu0 %v351_v26  ;;  %355 = vadd.xlane.f32.xlu1 %v354_v27 }
  0x30   : > { %358 = vadd.xlane.f32.xlu0 %v357_v30  ;;  %361 = vadd.xlane.f32.xlu1 %v360_v31 }
  0x34   : > { %364 = vadd.xlane.f32.xlu0 %v363_v34  ;;  %367 = vadd.xlane.f32.xlu1 %v366_v35 }
  0x38   : > { %370 = vadd.xlane.f32.xlu0 %v369_v38  ;;  %373 = vadd.xlane.f32.xlu1 %v372_v39 }
  0x3c   : > { %376 = vadd.xlane.f32.xlu0 %v375_v42  ;;  %379 = vadd.xlane.f32.xlu1 %v378_v43 }
  0x40   : > { %382 = vadd.xlane.f32.xlu0 %v381_v46  ;;  %385 = vadd.xlane.f32.xlu1 %v384_v47 }
  0x44   : > { %388 = vadd.xlane.f32.xlu0 %v387_v50  ;;  %391 = vadd.xlane.f32.xlu1 %v390_v51 }
  0x48   : > { %394 = vadd.xlane.f32.xlu0 %v393_v54  ;;  %397 = vadd.xlane.f32.xlu1 %v396_v55 }
  0x4c   : > { %400 = vadd.xlane.f32.xlu0 %v399_v58  ;;  %403 = vadd.xlane.f32.xlu1 %v402_v59 }
  0x50   : > { %406 = vadd.xlane.f32.xlu0 %v405_v62  ;;  %409 = vadd.xlane.f32.xlu1 %v408_v63 }
  0xa1   : > { %v317_v3 = vpop.xlane.xlu0 %316  ;;  %v323_v4 = vpop.xlane.xlu1 %322 }
  0xa2   : > { %v412_v6 = vmul.f32 0.25, %v317_v3  ;;  %v414_v7 = vmul.f32 0.25, %v323_v4 }
  0xa4   : > { %v6318_v10 = vsub.f32 %v6158_v0, %v412_v6  ;;  %v6321_v11 = vsub.f32 %v6161_v1, %v414_v7 }
  0xa5   : > { %v320_v14 = vpop.xlane.xlu0 %319  ;;  %v326_v15 = vpop.xlane.xlu1 %325 }
  0xa6   : > { %v413_v18 = vmul.f32 0.25, %v320_v14  ;;  %v415_v19 = vmul.f32 0.25, %v326_v15  ;;  %v476_v22 = vmul.f32 %v6318_v10, %v6318_v10  ;;  %v478_v23 = vmul.f32 %v6321_v11, %v6321_v11 }
  0xa8   : > { %v6328_v26 = vsub.f32 %v6164_v2, %v413_v18  ;;  %v6331_v27 = vsub.f32 %v6171_v5, %v415_v19  ;;  %v508_v0 = vsel %vm314_vm0, %v476_v22, 0.0  ;;  %v514_v31 = vsel %vm314_vm0, %v478_v23, 0.0 }
  0xa9   : > { %509 = vadd.xlane.f32.xlu0 %v508_v0  ;;  %v329_v1 = vpop.xlane.xlu0 %328  ;;  %v332_v30 = vpop.xlane.xlu1 %331 }
  0xaa   : > { %v416_v34 = vmul.f32 0.25, %v329_v1  ;;  %v417_v35 = vmul.f32 0.25, %v332_v30  ;;  %v477_v38 = vmul.f32 %v6328_v26, %v6328_v26  ;;  %v479_v39 = vmul.f32 %v6331_v27, %v6331_v27 }
  0xac   : > { %v6340_v2 = vsub.f32 %v6178_v8, %v416_v34  ;;  %v6343_v5 = vsub.f32 %v6181_v9, %v417_v35  ;;  %v511_v42 = vsel %vm314_vm0, %v477_v38, 0.0  ;;  %v517_v47 = vsel %vm314_vm0, %v479_v39, 0.0 }
  0xad   : > { %515 = vadd.xlane.f32.xlu0 %v514_v31  ;;  %512 = vadd.xlane.f32.xlu1 %v511_v42  ;;  %v335_v43 = vpop.xlane.xlu0 %334  ;;  %v338_v46 = vpop.xlane.xlu1 %337 }
  0xae   : > { %v418_v50 = vmul.f32 0.25, %v335_v43  ;;  %v419_v51 = vmul.f32 0.25, %v338_v46  ;;  %v480_v54 = vmul.f32 %v6340_v2, %v6340_v2  ;;  %v481_v8 = vmul.f32 %v6343_v5, %v6343_v5 }
  0xb0   : > { %v6352_v55 = vsub.f32 %v6188_v12, %v418_v50  ;;  %v6355_v9 = vsub.f32 %v6191_v13, %v419_v51  ;;  %v520_v58 = vsel %vm314_vm0, %v480_v54, 0.0  ;;  %v523_v63 = vsel %vm314_vm0, %v481_v8, 0.0 }
  0xb1   : > { %518 = vadd.xlane.f32.xlu1 %v517_v47  ;;  %521 = vadd.xlane.f32.xlu0 %v520_v58  ;;  %v341_v59 = vpop.xlane.xlu0 %340  ;;  %v344_v62 = vpop.xlane.xlu1 %343 }
  0xb2   : > { %v420_v3 = vmul.f32 0.25, %v341_v59  ;;  %v421_v4 = vmul.f32 0.25, %v344_v62  ;;  %v482_v6 = vmul.f32 %v6352_v55, %v6352_v55  ;;  %v483_v12 = vmul.f32 %v6355_v9, %v6355_v9 }
  0xb4   : > { %v6364_v7 = vsub.f32 %v6198_v16, %v420_v3  ;;  %v6367_v13 = vsub.f32 %v6201_v17, %v421_v4  ;;  %v526_v14 = vsel %vm314_vm0, %v482_v6, 0.0  ;;  %v529_v19 = vsel %vm314_vm0, %v483_v12, 0.0 }
  0xb5   : > { %524 = vadd.xlane.f32.xlu1 %v523_v63  ;;  %527 = vadd.xlane.f32.xlu0 %v526_v14  ;;  %v347_v15 = vpop.xlane.xlu0 %346  ;;  %v350_v18 = vpop.xlane.xlu1 %349 }
  0xb6   : > { %v422_v22 = vmul.f32 0.25, %v347_v15  ;;  %v423_v23 = vmul.f32 0.25, %v350_v18  ;;  %v484_v0 = vmul.f32 %v6364_v7, %v6364_v7  ;;  %v485_v16 = vmul.f32 %v6367_v13, %v6367_v13 }
  0xb8   : > { %v6376_v1 = vsub.f32 %v6208_v20, %v422_v22  ;;  %v6379_v17 = vsub.f32 %v6211_v21, %v423_v23  ;;  %v532_v30 = vsel %vm314_vm0, %v484_v0, 0.0  ;;  %v535_v35 = vsel %vm314_vm0, %v485_v16, 0.0 }
  0xb9   : > { %530 = vadd.xlane.f32.xlu1 %v529_v19  ;;  %533 = vadd.xlane.f32.xlu0 %v532_v30  ;;  %v353_v31 = vpop.xlane.xlu0 %352  ;;  %v356_v34 = vpop.xlane.xlu1 %355 }
  0xba   : > { %v424_v38 = vmul.f32 0.25, %v353_v31  ;;  %v425_v39 = vmul.f32 0.25, %v356_v34  ;;  %v486_v42 = vmul.f32 %v6376_v1, %v6376_v1  ;;  %v487_v20 = vmul.f32 %v6379_v17, %v6379_v17 }
  0xbc   : > { %v6388_v43 = vsub.f32 %v6218_v24, %v424_v38  ;;  %v6391_v21 = vsub.f32 %v6221_v25, %v425_v39  ;;  %v538_v46 = vsel %vm314_vm0, %v486_v42, 0.0  ;;  %v541_v51 = vsel %vm314_vm0, %v487_v20, 0.0 }
  0xbd   : > { %536 = vadd.xlane.f32.xlu1 %v535_v35  ;;  %539 = vadd.xlane.f32.xlu0 %v538_v46  ;;  %v359_v47 = vpop.xlane.xlu0 %358  ;;  %v362_v50 = vpop.xlane.xlu1 %361 }
  0xbe   : > { %v426_v54 = vmul.f32 0.25, %v359_v47  ;;  %v427_v8 = vmul.f32 0.25, %v362_v50  ;;  %v488_v58 = vmul.f32 %v6388_v43, %v6388_v43  ;;  %v489_v24 = vmul.f32 %v6391_v21, %v6391_v21 }
  0xc0   : > { %v6400_v59 = vsub.f32 %v6228_v28, %v426_v54  ;;  %v6403_v25 = vsub.f32 %v6231_v29, %v427_v8  ;;  %v544_v62 = vsel %vm314_vm0, %v488_v58, 0.0  ;;  %v547_v4 = vsel %vm314_vm0, %v489_v24, 0.0 }
  0xc1   : > { %542 = vadd.xlane.f32.xlu1 %v541_v51  ;;  %545 = vadd.xlane.f32.xlu0 %v544_v62  ;;  %v365_v63 = vpop.xlane.xlu0 %364  ;;  %v368_v3 = vpop.xlane.xlu1 %367 }
  0xc2   : > { %v428_v6 = vmul.f32 0.25, %v365_v63  ;;  %v429_v12 = vmul.f32 0.25, %v368_v3  ;;  %v490_v14 = vmul.f32 %v6400_v59, %v6400_v59  ;;  %v491_v28 = vmul.f32 %v6403_v25, %v6403_v25 }
  0xc4   : > { %v6412_v15 = vsub.f32 %v6238_v32, %v428_v6  ;;  %v6415_v29 = vsub.f32 %v6241_v33, %v429_v12  ;;  %v550_v18 = vsel %vm314_vm0, %v490_v14, 0.0  ;;  %v553_v23 = vsel %vm314_vm0, %v491_v28, 0.0 }
  0xc5   : > { %548 = vadd.xlane.f32.xlu1 %v547_v4  ;;  %551 = vadd.xlane.f32.xlu0 %v550_v18  ;;  %v371_v19 = vpop.xlane.xlu0 %370  ;;  %v374_v22 = vpop.xlane.xlu1 %373 }
  0xc6   : > { %v430_v0 = vmul.f32 0.25, %v371_v19  ;;  %v431_v16 = vmul.f32 0.25, %v374_v22  ;;  %v492_v30 = vmul.f32 %v6412_v15, %v6412_v15  ;;  %v493_v32 = vmul.f32 %v6415_v29, %v6415_v29 }
  0xc8   : > { %v6424_v31 = vsub.f32 %v6248_v36, %v430_v0  ;;  %v6427_v33 = vsub.f32 %v6251_v37, %v431_v16  ;;  %v556_v34 = vsel %vm314_vm0, %v492_v30, 0.0  ;;  %v559_v39 = vsel %vm314_vm0, %v493_v32, 0.0 }
  0xc9   : > { %554 = vadd.xlane.f32.xlu1 %v553_v23  ;;  %557 = vadd.xlane.f32.xlu0 %v556_v34  ;;  %v377_v35 = vpop.xlane.xlu0 %376  ;;  %v380_v38 = vpop.xlane.xlu1 %379  ;;  %v5066_v23 = vld [vmem:[%s8373_s3 + $0x2] sm:$0x3] }
  0xca   : > { %v432_v42 = vmul.f32 0.25, %v377_v35  ;;  %v433_v20 = vmul.f32 0.25, %v380_v38  ;;  %v494_v46 = vmul.f32 %v6424_v31, %v6424_v31  ;;  %v495_v36 = vmul.f32 %v6427_v33, %v6427_v33  ;;  %6005 = vmatprep.subr.msk.bf16.mxu1 %vm8490_vm1, %v5066_v23 }
  0xcc   : > { %v6436_v47 = vsub.f32 %v6258_v40, %v432_v42  ;;  %v6439_v37 = vsub.f32 %v6261_v41, %v433_v20  ;;  %v562_v50 = vsel %vm314_vm0, %v494_v46, 0.0  ;;  %v565_v8 = vsel %vm314_vm0, %v495_v36, 0.0 }
  0xcd   : > { %560 = vadd.xlane.f32.xlu1 %v559_v39  ;;  %563 = vadd.xlane.f32.xlu0 %v562_v50  ;;  %v383_v51 = vpop.xlane.xlu0 %382  ;;  %v386_v54 = vpop.xlane.xlu1 %385 }
  0xce   : > { %v434_v58 = vmul.f32 0.25, %v383_v51  ;;  %v435_v24 = vmul.f32 0.25, %v386_v54  ;;  %v496_v62 = vmul.f32 %v6436_v47, %v6436_v47  ;;  %v497_v40 = vmul.f32 %v6439_v37, %v6439_v37 }
  0xcf   : > { %v1954_v54 = vsel %vm8490_vm1, %v5066_v23, 0 }
  0xd0   : > { %v6448_v63 = vsub.f32 %v6268_v44, %v434_v58  ;;  %v6451_v41 = vsub.f32 %v6271_v45, %v435_v24  ;;  %v568_v3 = vsel %vm314_vm0, %v496_v62, 0.0  ;;  %v571_v12 = vsel %vm314_vm0, %v497_v40, 0.0  ;;  %5410 = vmatpush3.bf16.msra.mxu1 %v1954_v54 }
  0xd1   : > { %566 = vadd.xlane.f32.xlu1 %v565_v8  ;;  %569 = vadd.xlane.f32.xlu0 %v568_v3  ;;  %v389_v4 = vpop.xlane.xlu0 %388  ;;  %v392_v6 = vpop.xlane.xlu1 %391 }
  0xd2   : > { %v436_v14 = vmul.f32 0.25, %v389_v4  ;;  %v437_v28 = vmul.f32 0.25, %v392_v6  ;;  %v498_v18 = vmul.f32 %v6448_v63, %v6448_v63  ;;  %v499_v44 = vmul.f32 %v6451_v41, %v6451_v41 }
  0xd4   : > { %v6460_v19 = vsub.f32 %v6278_v48, %v436_v14  ;;  %v6463_v45 = vsub.f32 %v6281_v49, %v437_v28  ;;  %v574_v22 = vsel %vm314_vm0, %v498_v18, 0.0  ;;  %v577_v30 = vsel %vm314_vm0, %v499_v44, 0.0 }
  0xd5   : > { %572 = vadd.xlane.f32.xlu1 %v571_v12  ;;  %575 = vadd.xlane.f32.xlu0 %v574_v22  ;;  %v395_v0 = vpop.xlane.xlu0 %394  ;;  %v398_v16 = vpop.xlane.xlu1 %397 }
  0xd6   : > { %v438_v32 = vmul.f32 0.25, %v395_v0  ;;  %v439_v34 = vmul.f32 0.25, %v398_v16  ;;  %v500_v48 = vmul.f32 %v6460_v19, %v6460_v19  ;;  %v501_v49 = vmul.f32 %v6463_v45, %v6463_v45  ;;  %v5149_v0 = vld [vmem:[%s8373_s3 + $0xa] sm:$0x3]  ;;  %v6526_v16 = vld [vmem:[%s8373_s3] sm:$0x3] }
  0xd7   : > { %6006 = vmatprep.subr.msk.bf16.mxu1 %vm8490_vm1, %v6526_v16 }
  0xd8   : > { %v6476_v35 = vsub.f32 %v6288_v52, %v438_v32  ;;  %v6479_v38 = vsub.f32 %v6291_v53, %v439_v34  ;;  %v580_v39 = vsel %vm314_vm0, %v500_v48, 0.0  ;;  %v583_v46 = vsel %vm314_vm0, %v501_v49, 0.0 }
  0xd9   : > { %578 = vadd.xlane.f32.xlu1 %v577_v30  ;;  %581 = vadd.xlane.f32.xlu0 %v580_v39  ;;  %v401_v42 = vpop.xlane.xlu0 %400  ;;  %v404_v20 = vpop.xlane.xlu1 %403  ;;  %v939_v30 = vlaneseq }
  0xda   : > { %v440_v36 = vmul.f32 0.25, %v401_v42  ;;  %v441_v50 = vmul.f32 0.25, %v404_v20  ;;  %v502_v51 = vmul.f32 %v6476_v35, %v6476_v35  ;;  %v503_v52 = vmul.f32 %v6479_v38, %v6479_v38 }
  0xdb   : > { %v6530_v48 = vshrl.u32 %v939_v30, 7 }
  0xdc   : > { %v6489_v53 = vsub.f32 %v6298_v56, %v440_v36  ;;  %v6492_v8 = vsub.f32 %v6301_v57, %v441_v50  ;;  %v586_v58 = vsel %vm314_vm0, %v502_v51, 0.0  ;;  %v589_v40 = vsel %vm314_vm0, %v503_v52, 0.0  ;;  %v5132_v57 = vld [vmem:[%s8373_s3 + $0x8] sm:$0x3] }
  0xdd   : > { %584 = vadd.xlane.f32.xlu1 %v583_v46  ;;  %587 = vadd.xlane.f32.xlu0 %v586_v58  ;;  %v407_v24 = vpop.xlane.xlu0 %406  ;;  %v410_v62 = vpop.xlane.xlu1 %409  ;;  %v3312_v18 = vsel %vm8490_vm1, %v5132_v57, 0  ;;  %v942_v36 = vadd.s32 16, %v6530_v48  ;;  %v941_v58 = vadd.s32 8, %v6530_v48 }
  0xde   : > { %v442_v3 = vmul.f32 0.25, %v407_v24  ;;  %v443_v4 = vmul.f32 0.25, %v410_v62  ;;  %v504_v6 = vmul.f32 %v6489_v53, %v6489_v53  ;;  %v505_v56 = vmul.f32 %v6492_v8, %v6492_v8  ;;  %6009 = vmatprep.subr.msk.bf16.mxu0 %vm8490_vm1, %v5132_v57 }
  0xdf   : > { %5546 = vmatpush3.bf16.msra.mxu0 %v3312_v18  ;;  %v943_v24 = vadd.s32 24, %v6530_v48  ;;  %v946_v57 = vadd.s32 48, %v6530_v48 }
  0xe0   : > { %v6505_v12 = vsub.f32 %v6308_v60, %v442_v3  ;;  %v6508_v14 = vsub.f32 %v6311_v61, %v443_v4  ;;  %v592_v28 = vsel %vm314_vm0, %v504_v6, 0.0  ;;  %v595_v44 = vsel %vm314_vm0, %v505_v56, 0.0  ;;  %6010 = vmatprep.subr.msk.bf16.mxu0 %vm8490_vm1, %v5149_v0 }
  0xe1   : > { %590 = vadd.xlane.f32.xlu1 %v589_v40  ;;  %593 = vadd.xlane.f32.xlu0 %v592_v28  ;;  %v990_v3 = vand.u32 15, %v942_v36  ;;  %v944_v56 = vadd.s32 32, %v6530_v48 }
  0xe2   : > { %v506_v22 = vmul.f32 %v6505_v12, %v6505_v12  ;;  %v507_v23 = vmul.f32 %v6508_v14, %v6508_v14 }
  0xe3   : > { %v6542_v30 = vadd.s32 4294967295, %v990_v3 }
  0xe4   : > { %v598_v60 = vsel %vm314_vm0, %v506_v22, 0.0  ;;  %v601_v61 = vsel %vm314_vm0, %v507_v23, 0.0  ;;  %v997_v22 = vand.u32 15, %v943_v24 }
  0xe5   : > { %596 = vadd.xlane.f32.xlu1 %v595_v44  ;;  %599 = vadd.xlane.f32.xlu0 %v598_v60  ;;  %v983_v44 = vand.u32 15, %v941_v58  ;;  %8555 = vst [vmem:[#allocation2_spill] sm:$0xff] %v6542_v30  ;;  %vm8447_vm7 = vcmp.ge.s32.totalorder %v6542_v30, 0 }
  0xe6   : > { %v6552_v24 = vadd.s32 1, %v997_v22 }
  0xe7   : > { %v6550_v58 = vadd.s32 1, %v983_v44 }
  0xe8   : > { %vm2396_vm5 = vcmp.lt.s32.totalorder %v6552_v24, 16 }
  0xe9   : > { %602 = vadd.xlane.f32.xlu1 %v601_v61  ;;  %v6540_v61 = vld [vmem:[%s8371_s1] ss:$0 sm:$0xff]  ;;  %8557 = vst [vmem:[#allocation4_spill] sm:$0xff] %v6550_v58  ;;  %vm2394_vm6 = vcmp.lt.s32.totalorder %v6550_v58, 16 }
 0x136   : > { %v510_v32 = vpop.xlane.xlu0 %509 }
 0x137   : > { %v604_v34 = vmul.f32 0.25, %v510_v32  ;;  %v945_v32 = vadd.s32 40, %v6530_v48 }
 0x139   : > { %v636_v49 = vadd.f32 1e-05, %v604_v34  ;;  %v948_v34 = vadd.s32 64, %v6530_v48 }
 0x13a   : > { %v513_v39 = vpop.xlane.xlu1 %512  ;;  %v516_v42 = vpop.xlane.xlu0 %515 }
 0x13b   : > { %6025 = vrsqrt.f32 %v636_v49  ;;  %v605_v20 = vmul.f32 0.25, %v513_v39  ;;  %v606_v46 = vmul.f32 0.25, %v516_v42 }
 0x13d   : > { %v637_v50 = vadd.f32 1e-05, %v605_v20  ;;  %v638_v51 = vadd.f32 1e-05, %v606_v46  ;;  %v1004_v20 = vand.u32 15, %v944_v56  ;;  %v1018_v46 = vand.u32 15, %v946_v57 }
 0x13e   : > { %v519_v52 = vpop.xlane.xlu1 %518  ;;  %v522_v54 = vpop.xlane.xlu0 %521  ;;  %v1032_v56 = vand.u32 15, %v948_v34 }
 0x13f   : > { %6027 = vrsqrt.f32 %v637_v50  ;;  %v607_v62 = vmul.f32 0.25, %v519_v52  ;;  %v608_v40 = vmul.f32 0.25, %v522_v54  ;;  %v8378_v52 = vmov 0.0  }
 0x140   : > { %6029 = vrsqrt.f32 %v638_v51  ;;  %v6548_v54 = vrot.slane %v8378_v52, 1  ;;  %v6563_v44 = vadd.s32 4294967295, %v1004_v20  ;;  %v6565_v22 = vadd.s32 4294967295, %v1018_v46 }
 0x141   : > { %v639_v4 = vadd.f32 1e-05, %v607_v62  ;;  %v640_v6 = vadd.f32 1e-05, %v608_v40  ;;  %v6557_v62 = vld [vmem:[%s8372_s2] ss:$0 sm:$0xff] }
 0x142   : > { %v525_v28 = vpop.xlane.xlu1 %524  ;;  %v528_v18 = vpop.xlane.xlu0 %527  ;;  %8556 = vst [vmem:[#allocation3_spill] sm:$0xff] %v6548_v54  ;;  %8558 = vst [vmem:[#allocation5_spill] sm:$0xff] %v6563_v44  ;;  %vm8437_vm8 = vcmp.ge.s32.totalorder %v6563_v44, 0 }
 0x143   : > { %6031 = vrsqrt.f32 %v639_v4  ;;  %v609_v23 = vmul.f32 0.25, %v525_v28  ;;  %v610_v60 = vmul.f32 0.25, %v528_v18  ;;  %8559 = vst [vmem:[#allocation6_spill] sm:$0xff] %v6565_v22 }
 0x144   : > { %6033 = vrsqrt.f32 %v640_v6  ;;  %v1011_v6 = vand.u32 15, %v945_v32  ;;  %v6573_v32 = vadd.s32 80, %v6530_v48 }
 0x145   : > { %v6026_v49 = vpop.eup %6025  ;;  %v641_v39 = vadd.f32 1e-05, %v609_v23  ;;  %v642_v42 = vadd.f32 1e-05, %v610_v60 }
 0x146   : > { %v700_v36 = vmul.f32 %v6026_v49, %v6318_v10  ;;  %v531_v50 = vpop.xlane.xlu1 %530  ;;  %v534_v51 = vpop.xlane.xlu0 %533  ;;  %v6560_v10 = vsel %vm8490_vm1, %v5149_v0, 0 }
 0x147   : > { %6035 = vrsqrt.f32 %v641_v39  ;;  %v611_v40 = vmul.f32 0.25, %v531_v50  ;;  %v612_v3 = vmul.f32 0.25, %v534_v51  ;;  %v6570_v50 = vadd.s32 56, %v6530_v48 }
 0x148   : > { %v738_v4 = vmul.f32 %v6540_v61, %v700_v36  ;;  %6037 = vrsqrt.f32 %v642_v42  ;;  %v6577_v36 = vadd.s32 1, %v1011_v6 }
 0x149   : > { %v6028_v57 = vpop.eup %6027  ;;  %v643_v28 = vadd.f32 1e-05, %v611_v40  ;;  %v644_v18 = vadd.f32 1e-05, %v612_v3 }
 0x14a   : > { %v6030_v23 = vpop.eup %6029  ;;  %v701_v60 = vmul.f32 %v6028_v57, %v6328_v26  ;;  %v537_v49 = vpop.xlane.xlu1 %536  ;;  %v776_v0 = vadd.f32 %v6557_v62, %v738_v4  ;;  %8560 = vst [vmem:[#allocation7_spill] sm:$0xff] %v6577_v36  ;;  %v6579_v26 = vadd.s32 4294967295, %v1032_v56 }
 0x14b   : > { %v540_v39 = vpop.xlane.xlu0 %539  ;;  %v702_v34 = vmul.f32 %v6030_v23, %v6321_v11  ;;  %6039 = vrsqrt.f32 %v643_v28  ;;  %v613_v42 = vmul.f32 0.25, %v537_v49 }
 0x14c   : > { %v614_v20 = vmul.f32 0.25, %v540_v39  ;;  %v739_v46 = vmul.f32 %v6540_v61, %v701_v60  ;;  %6041 = vrsqrt.f32 %v644_v18  ;;  %8561 = vst [vmem:[#allocation8_spill] sm:$0xff] %v6579_v26  ;;  %v841_v57 = vrot.slane %v776_v0, 7 }
 0x14d   : > { %v6032_v51 = vpop.eup %6031  ;;  %v740_v40 = vmul.f32 %v6540_v61, %v702_v34  ;;  %v645_v3 = vadd.f32 1e-05, %v613_v42 }
 0x14e   : > { %v646_v4 = vadd.f32 1e-05, %v614_v20  ;;  %v6034_v52 = vpop.eup %6033  ;;  %v6583_v11 = vadd.f32 %v6557_v62, %v739_v46  ;;  %v703_v28 = vmul.f32 %v6032_v51, %v6331_v27  ;;  %v543_v23 = vpop.xlane.xlu1 %542  ;;  %v6596_v51 = vsel %vm840_vm2, 0.0, %v841_v57 }
 0x14f   : > { %v546_v60 = vpop.xlane.xlu0 %545  ;;  %v6589_v18 = vadd.f32 %v6557_v62, %v740_v40  ;;  %v704_v49 = vmul.f32 %v6034_v52, %v6340_v2  ;;  %6043 = vrsqrt.f32 %v645_v3  ;;  %v615_v39 = vmul.f32 0.25, %v543_v23  ;;  %8562 = vst [vmem:[#allocation9_spill] sm:$0xff] %v6596_v51 }
 0x150   : > { %v842_v0 = vrot.slane %v6583_v11, 7  ;;  %v741_v34 = vmul.f32 %v6540_v61, %v703_v28  ;;  %6045 = vrsqrt.f32 %v646_v4  ;;  %v616_v42 = vmul.f32 0.25, %v546_v60 }
 0x151   : > { %v6036_v27 = vpop.eup %6035  ;;  %v742_v20 = vmul.f32 %v6540_v61, %v704_v49  ;;  %v647_v46 = vadd.f32 1e-05, %v615_v39  ;;  %v6600_v40 = vsel %vm8490_vm1, %v6526_v16, 0 }
 0x152   : > { %v6038_v2 = vpop.eup %6037  ;;  %v6604_v3 = vadd.f32 %v6557_v62, %v741_v34  ;;  %v705_v4 = vmul.f32 %v6036_v27, %v6343_v5  ;;  %v648_v11 = vadd.f32 1e-05, %v616_v42  ;;  %v549_v28 = vpop.xlane.xlu1 %548  ;;  %v6613_v6 = vsel %vm840_vm2, %v841_v57, %v842_v0 }
 0x153   : > { %v552_v23 = vpop.xlane.xlu0 %551  ;;  %v6608_v60 = vadd.f32 %v6557_v62, %v742_v20  ;;  %v706_v49 = vmul.f32 %v6038_v2, %v6352_v55  ;;  %6047 = vrsqrt.f32 %v647_v46  ;;  %v617_v39 = vmul.f32 0.25, %v549_v28  ;;  %8563 = vst [vmem:[#allocation10_spill] sm:$0xff] %v6613_v6  ;;  %v8662_v58 = vld [vmem:[#allocation8_spill] sm:$0xff] }
 0x154   : > { %v743_v16 = vmul.f32 %v6540_v61, %v705_v4  ;;  %6049 = vrsqrt.f32 %v648_v11  ;;  %v618_v56 = vmul.f32 0.25, %v552_v23  ;;  %v1760_v4 = vrot.slane %v6596_v51, 1 }
 0x155   : > { %v6040_v34 = vpop.eup %6039  ;;  %v744_v27 = vmul.f32 %v6540_v61, %v706_v49  ;;  %v649_v20 = vadd.f32 1e-05, %v617_v39  ;;  %v8566_v36 = vrot.slane %v6604_v3, 7  ;;  %vm8441_vm11 = vcmp.ge.s32.totalorder %v8662_v58, 0 }
 0x156   : > { %v6042_v52 = vpop.eup %6041  ;;  %v6619_v55 = vadd.f32 %v6557_v62, %v743_v16  ;;  %v707_v46 = vmul.f32 %v6040_v34, %v6355_v9  ;;  %v650_v2 = vadd.f32 1e-05, %v618_v56  ;;  %v555_v11 = vpop.xlane.xlu1 %554  ;;  %v1761_v9 = vsel %vm8436_vm3, %v6548_v54, %v1760_v4 }
 0x157   : > { %v558_v57 = vpop.xlane.xlu0 %557  ;;  %v6624_v28 = vadd.f32 %v6557_v62, %v744_v27  ;;  %v708_v23 = vmul.f32 %v6042_v52, %v6364_v7  ;;  %6051 = vrsqrt.f32 %v649_v20  ;;  %v619_v42 = vmul.f32 0.25, %v555_v11 }
 0x158   : > { %v745_v39 = vmul.f32 %v6540_v61, %v707_v46  ;;  %6053 = vrsqrt.f32 %v650_v2  ;;  %v1888_v27 = vpack.c.bf16 %v1761_v9, %v6548_v54  ;;  %v620_v20 = vmul.f32 0.25, %v558_v57 }
 0x159   : > { %v6044_v56 = vpop.eup %6043  ;;  %v746_v34 = vmul.f32 %v6540_v61, %v708_v23  ;;  %v651_v5 = vadd.f32 1e-05, %v619_v42  ;;  %v8564_v46 = vrot.slane %v6589_v18, 7  ;;  %v1762_v42 = vrot.slane %v6613_v6, 1 }
 0x15a   : > { %v6046_v26 = vpop.eup %6045  ;;  %v6635_v7 = vadd.f32 %v6557_v62, %v745_v39  ;;  %v709_v52 = vmul.f32 %v6044_v56, %v6367_v13  ;;  %v561_v11 = vpop.xlane.xlu1 %560  ;;  %5411 = vmatprep.mubr.msk.bf16.mxu1 %vm314_vm0, %v1888_v27  ;;  %v652_v39 = vadd.f32 1e-05, %v620_v20 }
 0x15b   : > { %v6641_v2 = vsel %vm840_vm2, %v842_v0, %v8564_v46  ;;  %v564_v49 = vpop.xlane.xlu0 %563  ;;  %v6644_v16 = vadd.f32 %v6557_v62, %v746_v34  ;;  %v710_v23 = vmul.f32 %v6046_v26, %v6376_v1  ;;  %6055 = vrsqrt.f32 %v651_v5 }
 0x15c   : > { %8565 = vst [vmem:[#allocation11_spill] sm:$0xff] %v6641_v2  ;;  %v747_v57 = vmul.f32 %v6540_v61, %v709_v52  ;;  %v1764_v0 = vrot.slane %v6641_v2, 1  ;;  %v1763_v46 = vsel %vm8436_vm3, %v1760_v4, %v1762_v42  ;;  %v621_v1 = vmul.f32 0.25, %v561_v11 }
 0x15d   : > { %v6048_v9 = vpop.eup %6047  ;;  %v748_v34 = vmul.f32 %v6540_v61, %v710_v23  ;;  %6057 = vrsqrt.f32 %v652_v39 }
 0x15e   : > { %v6050_v26 = vpop.eup %6049  ;;  %v6656_v5 = vadd.f32 %v6557_v62, %v747_v57  ;;  %v711_v27 = vmul.f32 %v6048_v9, %v6379_v17  ;;  %v1765_v52 = vsel %vm8436_vm3, %v1762_v42, %v1764_v0  ;;  %v567_v20 = vpop.xlane.xlu1 %566  ;;  %v653_v23 = vadd.f32 1e-05, %v621_v1 }
 0x15f   : > { %v6661_v13 = vadd.f32 %v6557_v62, %v748_v34  ;;  %v712_v56 = vmul.f32 %v6050_v26, %v6388_v43  ;;  %v1889_v54 = vpack.c.bf16 %v1765_v52, %v1763_v46  ;;  %v570_v22 = vpop.xlane.xlu0 %569  ;;  %v622_v57 = vmul.f32 0.25, %v564_v49 }
 0x160   : > { %v858_v4 = vrot.slane %v6656_v5, 7  ;;  %v749_v11 = vmul.f32 %v6540_v61, %v711_v27  ;;  %v8567_v17 = vrot.slane %v6589_v18, 7  ;;  %6059 = vrsqrt.f32 %v653_v23 }
 0x161   : > { %v6052_v39 = vpop.eup %6051  ;;  %v750_v43 = vmul.f32 %v6540_v61, %v712_v56  ;;  %5412 = vmatmul.mubr.msk.bf16.vlgmr.msra.gmra.mrb[0].mxu1 %vm314_vm0, %v1889_v54  ;;  %5547 = vmatprep.mubr.msk.bf16.mxu0 %vm314_vm0, %v1889_v54  ;;  %v8569_v34 = vrot.slane %v6608_v60, 7  ;;  %v8570_v49 = vmov %v8566_v36  ;;  %v654_v26 = vadd.f32 1e-05, %v622_v57 }
 0x162   : > { %v6671_v42 = vsel %vm840_vm2, %v8567_v17, %v8566_v36  ;;  %v6054_v18 = vpop.eup %6053  ;;  %v6685_v36 = vadd.f32 %v6557_v62, %v749_v11  ;;  %v713_v1 = vmul.f32 %v6052_v39, %v6391_v21  ;;  %v573_v27 = vpop.xlane.xlu1 %572  ;;  %5444 = vmatpush3.bf16.msra.mxu1 %v6600_v40  ;;  %v623_v23 = vmul.f32 0.25, %v567_v20 }
 0x163   : > { %8568 = vst [vmem:[#allocation12_spill] sm:$0xff] %v6671_v42  ;;  %v6682_v46 = vsel %vm840_vm2, %v8570_v49, %v8569_v34  ;;  %v1766_v56 = vrot.slane %v6671_v42, 1  ;;  %v6691_v54 = vadd.f32 %v6557_v62, %v750_v43  ;;  %v714_v3 = vmul.f32 %v6054_v18, %v6400_v59  ;;  %v576_v49 = vpop.xlane.xlu0 %575  ;;  %v6704_v59 = vld [vmem:[%s8373_s3 + $0x4] sm:$0x3] }
 0x164   : > { %8571 = vst [vmem:[#allocation13_spill] sm:$0xff] %v6682_v46  ;;  %v1768_v52 = vrot.slane %v6682_v46, 1  ;;  %v751_v11 = vmul.f32 %v6540_v61, %v713_v1  ;;  %6061 = vrsqrt.f32 %v654_v26  ;;  %v655_v34 = vadd.f32 1e-05, %v623_v23  ;;  %6007 = vmatprep.subr.msk.bf16.mxu1 %vm8490_vm1, %v6704_v59 }
 0x165   : > { %v1767_v21 = vsel %vm8436_vm3, %v1764_v0, %v1766_v56  ;;  %v6056_v57 = vpop.eup %6055  ;;  %v752_v40 = vmul.f32 %v6540_v61, %v714_v3  ;;  %v624_v1 = vmul.f32 0.25, %v570_v22  ;;  %v8574_v3 = vrot.slane %v6608_v60, 7 }
 0x166   : > { %v1769_v43 = vsel %vm8436_vm3, %v1766_v56, %v1768_v52  ;;  %v6707_v20 = vadd.f32 %v6557_v62, %v751_v11  ;;  %v715_v18 = vmul.f32 %v6056_v57, %v6403_v25  ;;  %6063 = vrsqrt.f32 %v655_v34  ;;  %v579_v34 = vpop.xlane.xlu1 %578 }
 0x167   : > { %v6710_v0 = vpack.c.bf16 %v1769_v43, %v1767_v21  ;;  %v6715_v26 = vadd.f32 %v6557_v62, %v752_v40  ;;  %v8573_v56 = vrot.slane %v6619_v55, 7  ;;  %v8576_v11 = vrot.slane %v6624_v28, 7  ;;  %v6734_v21 = vld [vmem:[%s8373_s3 + $0xc] sm:$0x3]  ;;  %v6058_v57 = vpop.eup %6057 }
 0x168   : > { %v753_v60 = vmul.f32 %v6540_v61, %v715_v18  ;;  %v656_v55 = vadd.f32 1e-05, %v624_v1  ;;  %v626_v39 = vmul.f32 0.25, %v576_v49 }
 0x169   : > { %8572 = vst [vmem:[#allocation14_spill] sm:$0xff] %v6710_v0  ;;  %v6722_v23 = vsel %vm840_vm2, %v8574_v3, %v8573_v56  ;;  %v8577_v25 = vmov %v8573_v56  ;;  %5415 = vmatprep.mubr.msk.bf16.mxu1 %vm314_vm0, %v6710_v0  ;;  %5548 = vmatmul.mubr.msk.bf16.vlgmr.msra.gmra.mrb[0].mxu0 %vm314_vm0, %v6710_v0  ;;  %v716_v3 = vmul.f32 %v6058_v57, %v6412_v15 }
 0x16a   : > { %8575 = vst [vmem:[#allocation15_spill] sm:$0xff] %v6722_v23  ;;  %v6729_v22 = vsel %vm840_vm2, %v8577_v25, %v8576_v11  ;;  %v1770_v43 = vrot.slane %v6722_v23, 1  ;;  %5580 = vmatpush3.bf16.msra.mxu0 %v6560_v10  ;;  %v625_v25 = vmul.f32 0.25, %v573_v27  ;;  %v6748_v18 = vadd.f32 %v6557_v62, %v753_v60  ;;  %v6060_v1 = vpop.eup %6059 }
 0x16b   : > { %8578 = vst [vmem:[#allocation16_spill] sm:$0xff] %v6729_v22  ;;  %v1772_v11 = vrot.slane %v6729_v22, 1  ;;  %6065 = vrsqrt.f32 %v656_v55  ;;  %6011 = vmatprep.subr.msk.bf16.mxu0 %vm8490_vm1, %v6734_v21  ;;  %v754_v56 = vmul.f32 %v6540_v61, %v716_v3  ;;  %v8579_v10 = vrot.slane %v6635_v7, 7  ;;  %v582_v55 = vpop.xlane.xlu0 %581 }
 0x16c   : > { %v1771_v40 = vsel %vm8436_vm3, %v1768_v52, %v1770_v43  ;;  %v657_v57 = vadd.f32 1e-05, %v625_v25  ;;  %v8580_v27 = vrot.slane %v6624_v28, 7  ;;  %v717_v49 = vmul.f32 %v6060_v1, %v6415_v29 }
 0x16d   : > { %v1773_v15 = vsel %vm8436_vm3, %v1770_v43, %v1772_v11  ;;  %v658_v9 = vadd.f32 1e-05, %v626_v39  ;;  %v6767_v3 = vadd.f32 %v6557_v62, %v754_v56  ;;  %v8583_v43 = vrot.slane %v6644_v16, 7 }
 0x16e   : > { %v6760_v60 = vsel %vm840_vm2, %v8580_v27, %v8579_v10  ;;  %v6764_v17 = vpack.c.bf16 %v1773_v15, %v1771_v40  ;;  %6067 = vrsqrt.f32 %v657_v57  ;;  %v8584_v25 = vmov %v8579_v10  ;;  %v6062_v27 = vpop.eup %6061  ;;  %v585_v40 = vpop.xlane.xlu1 %584 }
 0x16f   : > { %8581 = vst [vmem:[#allocation17_spill] sm:$0xff] %v6760_v60  ;;  %v6774_v28 = vsel %vm840_vm2, %v8584_v25, %v8583_v43  ;;  %v1774_v10 = vrot.slane %v6760_v60, 1  ;;  %v755_v52 = vmul.f32 %v6540_v61, %v717_v49  ;;  %6069 = vrsqrt.f32 %v658_v9 }
 0x170   : > { %8582 = vst [vmem:[#allocation18_spill] sm:$0xff] %v6764_v17  ;;  %8585 = vst [vmem:[#allocation19_spill] sm:$0xff] %v6774_v28  ;;  %5416 = vmatmul.mubr.msk.bf16.gmra.mrb[4].mxu1 %vm314_vm0, %v6764_v17  ;;  %5551 = vmatprep.mubr.msk.bf16.mxu0 %vm314_vm0, %v6764_v17  ;;  %v1776_v29 = vrot.slane %v6774_v28, 1  ;;  %v627_v39 = vmul.f32 0.25, %v579_v34  ;;  %v718_v56 = vmul.f32 %v6062_v27, %v6424_v31  ;;  %v628_v15 = vmul.f32 0.25, %v582_v55  ;;  %v6064_v25 = vpop.eup %6063 }
 0x171   : > { %v1775_v1 = vsel %vm8436_vm3, %v1772_v11, %v1774_v10  ;;  %v6787_v57 = vadd.f32 %v6557_v62, %v755_v52  ;;  %v8586_v9 = vrot.slane %v6644_v16, 7  ;;  %v8589_v55 = vrot.slane %v6661_v13, 7 }
 0x172   : > { %v1777_v49 = vsel %vm8436_vm3, %v1774_v10, %v1776_v29  ;;  %v659_v43 = vadd.f32 1e-05, %v627_v39  ;;  %v756_v7 = vmul.f32 %v6540_v61, %v718_v56  ;;  %v660_v11 = vadd.f32 1e-05, %v628_v15  ;;  %v588_v10 = vpop.xlane.xlu0 %587 }
 0x173   : > { %v6795_v34 = vsel %vm840_vm2, %v8586_v9, %v858_v4  ;;  %v6798_v31 = vpack.c.bf16 %v1777_v49, %v1775_v1  ;;  %v6805_v52 = vsel %vm840_vm2, %v858_v4, %v8589_v55  ;;  %v719_v16 = vmul.f32 %v6064_v25, %v6427_v33  ;;  %v591_v25 = vpop.xlane.xlu1 %590 }
 0x174   : > { %8587 = vst [vmem:[#allocation20_spill] sm:$0xff] %v6795_v34  ;;  %8590 = vst [vmem:[#allocation22_spill] sm:$0xff] %v6805_v52  ;;  %6071 = vrsqrt.f32 %v659_v43  ;;  %v1778_v39 = vrot.slane %v6795_v34, 1  ;;  %v6811_v56 = vadd.f32 %v6557_v62, %v756_v7  ;;  %v1780_v5 = vrot.slane %v6805_v52, 1 }
 0x175   : > { %8588 = vst [vmem:[#allocation21_spill] sm:$0xff] %v6798_v31  ;;  %5419 = vmatprep.mubr.msk.bf16.mxu1 %vm314_vm0, %v6798_v31  ;;  %5552 = vmatmul.mubr.msk.bf16.gmra.mrb[4].mxu0 %vm314_vm0, %v6798_v31  ;;  %6073 = vrsqrt.f32 %v660_v11  ;;  %v629_v4 = vmul.f32 0.25, %v585_v40  ;;  %v6066_v1 = vpop.eup %6065  ;;  %v757_v15 = vmul.f32 %v6540_v61, %v719_v16  ;;  %v630_v49 = vmul.f32 0.25, %v588_v10 }
 0x176   : > { %v1779_v33 = vsel %vm8436_vm3, %v1776_v29, %v1778_v39  ;;  %v8591_v43 = vrot.slane %v6685_v36, 7  ;;  %v8592_v7 = vmov %v8589_v55  ;;  %v720_v11 = vmul.f32 %v6066_v1, %v6436_v47 }
 0x177   : > { %v1781_v40 = vsel %vm8436_vm3, %v1778_v39, %v1780_v5  ;;  %v661_v27 = vadd.f32 1e-05, %v629_v4  ;;  %v6831_v16 = vadd.f32 %v6557_v62, %v757_v15  ;;  %v662_v10 = vadd.f32 1e-05, %v630_v49  ;;  %v594_v4 = vpop.xlane.xlu0 %593  ;;  %v597_v15 = vpop.xlane.xlu1 %596 }
 0x178   : > { %v6825_v9 = vsel %vm840_vm2, %v8592_v7, %v8591_v43  ;;  %v6833_v29 = vpack.c.bf16 %v1781_v40, %v1779_v33  ;;  %v8595_v31 = vrot.slane %v6691_v54, 7  ;;  %v8596_v13 = vmov %v8591_v43  ;;  %v6068_v7 = vpop.eup %6067 }
 0x179   : > { %8593 = vst [vmem:[#allocation23_spill] sm:$0xff] %v6825_v9  ;;  %v758_v55 = vmul.f32 %v6540_v61, %v720_v11  ;;  %6075 = vrsqrt.f32 %v661_v27  ;;  %v1782_v47 = vrot.slane %v6825_v9, 1  ;;  %v6070_v1 = vpop.eup %6069  ;;  %v721_v33 = vmul.f32 %v6068_v7, %v6439_v37 }
 0x17a   : > { %8594 = vst [vmem:[#allocation24_spill] sm:$0xff] %v6833_v29  ;;  %v6840_v43 = vsel %vm840_vm2, %v8596_v13, %v8595_v31  ;;  %5420 = vmatmul.mubr.msk.bf16.gmra.mrb[8].mxu1 %vm314_vm0, %v6833_v29  ;;  %5555 = vmatprep.mubr.msk.bf16.mxu0 %vm314_vm0, %v6833_v29  ;;  %6077 = vrsqrt.f32 %v662_v10  ;;  %v631_v36 = vmul.f32 0.25, %v591_v25  ;;  %v722_v27 = vmul.f32 %v6070_v1, %v6448_v63 }
 0x17b   : > { %8597 = vst [vmem:[#allocation25_spill] sm:$0xff] %v6840_v43  ;;  %v1784_v39 = vrot.slane %v6840_v43, 1  ;;  %v6852_v31 = vadd.f32 %v6557_v62, %v758_v55  ;;  %v1783_v49 = vsel %vm8436_vm3, %v1780_v5, %v1782_v47  ;;  %v759_v40 = vmul.f32 %v6540_v61, %v721_v33 }
 0x17c   : > { %v663_v13 = vadd.f32 1e-05, %v631_v36  ;;  %v632_v7 = vmul.f32 0.25, %v594_v4  ;;  %v760_v25 = vmul.f32 %v6540_v61, %v722_v27  ;;  %v8599_v55 = vrot.slane %v6707_v20, 7 }
 0x17d   : > { %v1785_v11 = vsel %vm8436_vm3, %v1782_v47, %v1784_v39  ;;  %v8600_v10 = vrot.slane %v6691_v54, 7  ;;  %v8602_v5 = vrot.slane %v6715_v26, 7  ;;  %v6877_v33 = vadd.f32 %v6557_v62, %v759_v40 }
 0x17e   : > { %v6858_v37 = vpack.c.bf16 %v1785_v11, %v1783_v49  ;;  %v8603_v47 = vmov %v8599_v55  ;;  %v6072_v4 = vpop.eup %6071  ;;  %6079 = vrsqrt.f32 %v663_v13  ;;  %v664_v54 = vadd.f32 1e-05, %v632_v7 }
 0x17f   : > { %v6867_v63 = vsel %vm840_vm2, %v8600_v10, %v8599_v55  ;;  %v6874_v1 = vsel %vm840_vm2, %v8603_v47, %v8602_v5  ;;  %v6074_v27 = vpop.eup %6073  ;;  %v6885_v20 = vadd.f32 %v6557_v62, %v760_v25  ;;  %v723_v49 = vmul.f32 %v6072_v4, %v6451_v41  ;;  %v600_v55 = vpop.xlane.xlu0 %599 }
 0x180   : > { %8598 = vst [vmem:[#allocation26_spill] sm:$0xff] %v6858_v37  ;;  %8601 = vst [vmem:[#allocation27_spill] sm:$0xff] %v6867_v63  ;;  %5423 = vmatprep.mubr.msk.bf16.mxu1 %vm314_vm0, %v6858_v37  ;;  %5556 = vmatmul.mubr.msk.bf16.gmra.mrb[8].mxu0 %vm314_vm0, %v6858_v37  ;;  %v1786_v36 = vrot.slane %v6867_v63, 1  ;;  %v1788_v11 = vrot.slane %v6874_v1, 1  ;;  %v633_v40 = vmul.f32 0.25, %v597_v15  ;;  %v724_v5 = vmul.f32 %v6074_v27, %v6460_v19 }
 0x181   : > { %8604 = vst [vmem:[#allocation28_spill] sm:$0xff] %v6874_v1  ;;  %6081 = vrsqrt.f32 %v664_v54  ;;  %v761_v47 = vmul.f32 %v6540_v61, %v723_v49  ;;  %v634_v15 = vmul.f32 0.25, %v600_v55  ;;  %v8606_v37 = vrot.slane %v6748_v18, 7 }
 0x182   : > { %v1787_v13 = vsel %vm8436_vm3, %v1784_v39, %v1786_v36  ;;  %v1789_v25 = vsel %vm8436_vm3, %v1786_v36, %v1788_v11  ;;  %v665_v29 = vadd.f32 1e-05, %v633_v40  ;;  %v762_v41 = vmul.f32 %v6540_v61, %v724_v5  ;;  %v603_v39 = vpop.xlane.xlu1 %602 }
 0x183   : > { %v6896_v4 = vpack.c.bf16 %v1789_v25, %v1787_v13  ;;  %v8607_v10 = vrot.slane %v6715_v26, 7  ;;  %v6076_v54 = vpop.eup %6075  ;;  %v6906_v27 = vadd.f32 %v6557_v62, %v761_v47  ;;  %v8609_v36 = vrot.slane %v6767_v3, 7 }
 0x184   : > { %6083 = vrsqrt.f32 %v665_v29  ;;  %v8610_v49 = vmov %v8606_v37  ;;  %v6078_v5 = vpop.eup %6077  ;;  %v6917_v26 = vadd.f32 %v6557_v62, %v762_v41  ;;  %v666_v29 = vadd.f32 1e-05, %v634_v15 }
 0x185   : > { %8605 = vst [vmem:[#allocation29_spill] sm:$0xff] %v6896_v4  ;;  %v6903_v19 = vsel %vm840_vm2, %v8607_v10, %v8606_v37  ;;  %v6913_v40 = vsel %vm840_vm2, %v8610_v49, %v8609_v36  ;;  %v725_v37 = vmul.f32 %v6076_v54, %v6463_v45  ;;  %5424 = vmatmul.mubr.msk.bf16.gmra.mrb[12].mxu1 %vm314_vm0, %v6896_v4  ;;  %v886_v10 = vrot.slane %v6906_v27, 7 }
 0x186   : > { %8608 = vst [vmem:[#allocation30_spill] sm:$0xff] %v6903_v19  ;;  %8611 = vst [vmem:[#allocation31_spill] sm:$0xff] %v6913_v40  ;;  %v1790_v55 = vrot.slane %v6903_v19, 1  ;;  %5559 = vmatprep.mubr.msk.bf16.mxu0 %vm314_vm0, %v6896_v4  ;;  %v1792_v18 = vrot.slane %v6913_v40, 1  ;;  %v726_v13 = vmul.f32 %v6078_v5, %v6476_v35  ;;  %v635_v25 = vmul.f32 0.25, %v603_v39 }
 0x187   : > { %v888_v41 = vrot.slane %v6917_v26, 7  ;;  %v763_v45 = vmul.f32 %v6540_v61, %v725_v37  ;;  %6085 = vrsqrt.f32 %v666_v29  ;;  %v8613_v7 = vrot.slane %v6787_v57, 7 }
 0x188   : > { %v1791_v47 = vsel %vm8436_vm3, %v1788_v11, %v1790_v55  ;;  %v1793_v54 = vsel %vm8436_vm3, %v1790_v55, %v1792_v18  ;;  %v764_v36 = vmul.f32 %v6540_v61, %v726_v13  ;;  %v667_v15 = vadd.f32 1e-05, %v635_v25  ;;  %v6080_v11 = vpop.eup %6079 }
 0x189   : > { %v6932_v49 = vpack.c.bf16 %v1793_v54, %v1791_v47  ;;  %v8614_v27 = vrot.slane %v6767_v3, 7  ;;  %v801_v39 = vadd.f32 %v6557_v62, %v763_v45  ;;  %v8616_v5 = vrot.slane %v6811_v56, 7 }
 0x18a   : > { %v8617_v26 = vmov %v8613_v7  ;;  %v8619_v29 = vrot.slane %v6831_v16, 7  ;;  %v727_v47 = vmul.f32 %v6080_v11, %v6479_v38  ;;  %6087 = vrsqrt.f32 %v667_v15 }
 0x18b   : > { %8612 = vst [vmem:[#allocation32_spill] sm:$0xff] %v6932_v49  ;;  %v6939_v35 = vsel %vm840_vm2, %v8614_v27, %v8613_v7  ;;  %v6947_v55 = vsel %vm840_vm2, %v8617_v26, %v8616_v5  ;;  %v8620_v13 = vmov %v8616_v5  ;;  %v802_v7 = vadd.f32 %v6557_v62, %v764_v36  ;;  %5427 = vmatprep.mubr.msk.bf16.mxu1 %vm314_vm0, %v6932_v49  ;;  %v6082_v25 = vpop.eup %6081 }
 0x18c   : > { %8615 = vst [vmem:[#allocation33_spill] sm:$0xff] %v6939_v35  ;;  %8618 = vst [vmem:[#allocation34_spill] sm:$0xff] %v6947_v55  ;;  %v1794_v37 = vrot.slane %v6939_v35, 1  ;;  %v6955_v3 = vsel %vm840_vm2, %v8620_v13, %v8619_v29  ;;  %5560 = vmatmul.mubr.msk.bf16.gmra.mrb[12].mxu0 %vm314_vm0, %v6932_v49  ;;  %v1796_v57 = vrot.slane %v6947_v55, 1  ;;  %v890_v45 = vrot.slane %v801_v39, 7 }
 0x18d   : > { %8621 = vst [vmem:[#allocation35_spill] sm:$0xff] %v6955_v3  ;;  %v8622_v54 = vrot.slane %v6852_v31, 7  ;;  %v8623_v27 = vmov %v8619_v29  ;;  %v1798_v38 = vrot.slane %v6955_v3, 1  ;;  %v892_v11 = vrot.slane %v802_v7, 7 }
 0x18e   : > { %v1795_v56 = vsel %vm8436_vm3, %v1792_v18, %v1794_v37  ;;  %v765_v5 = vmul.f32 %v6540_v61, %v727_v47  ;;  %v728_v15 = vmul.f32 %v6082_v25, %v6489_v53  ;;  %v1797_v26 = vsel %vm8436_vm3, %v1794_v37, %v1796_v57  ;;  %v6084_v7 = vpop.eup %6083 }
 0x18f   : > { %v6970_v36 = vsel %vm840_vm2, %v8623_v27, %v8622_v54  ;;  %v6976_v29 = vpack.c.bf16 %v1797_v26, %v1795_v56  ;;  %v1799_v18 = vsel %vm8436_vm3, %v1796_v57, %v1798_v38  ;;  %v8626_v16 = vrot.slane %v6877_v33, 7 }
 0x190   : > { %8624 = vst [vmem:[#allocation36_spill] sm:$0xff] %v6970_v36  ;;  %v1800_v39 = vrot.slane %v6970_v36, 1  ;;  %v8627_v13 = vmov %v8622_v54  ;;  %v803_v47 = vadd.f32 %v6557_v62, %v765_v5  ;;  %v766_v53 = vmul.f32 %v6540_v61, %v728_v15 }
 0x191   : > { %8625 = vst [vmem:[#allocation37_spill] sm:$0xff] %v6976_v29  ;;  %v6985_v54 = vsel %vm840_vm2, %v8627_v13, %v8626_v16  ;;  %v8629_v37 = vrot.slane %v6885_v20, 7  ;;  %v8630_v25 = vmov %v8626_v16  ;;  %v729_v27 = vmul.f32 %v6084_v7, %v6492_v8  ;;  %5428 = vmatmul.mubr.msk.bf16.gmra.mrb[16].mxu1 %vm314_vm0, %v6976_v29  ;;  %5563 = vmatprep.mubr.msk.bf16.mxu0 %vm314_vm0, %v6976_v29  ;;  %v6086_v7 = vpop.eup %6085 }
 0x192   : > { %8628 = vst [vmem:[#allocation38_spill] sm:$0xff] %v6985_v54  ;;  %v1802_v56 = vrot.slane %v6985_v54, 1  ;;  %v1801_v31 = vsel %vm8436_vm3, %v1798_v38, %v1800_v39  ;;  %v894_v26 = vrot.slane %v803_v47, 7  ;;  %v804_v16 = vadd.f32 %v6557_v62, %v766_v53 }
 0x193   : > { %v6994_v57 = vsel %vm840_vm2, %v8630_v25, %v8629_v37  ;;  %v8632_v15 = vmov %v8629_v37  ;;  %v7010_v13 = vpack.c.bf16 %v1801_v31, %v1799_v18  ;;  %v767_v37 = vmul.f32 %v6540_v61, %v729_v27 }
 0x194   : > { %8631 = vst [vmem:[#allocation39_spill] sm:$0xff] %v6994_v57  ;;  %v1804_v5 = vrot.slane %v6994_v57, 1  ;;  %v7007_v33 = vsel %vm840_vm2, %v8632_v15, %v886_v10  ;;  %v1803_v8 = vsel %vm8436_vm3, %v1800_v39, %v1802_v56  ;;  %v7016_v38 = vsel %vm840_vm2, %v886_v10, %v888_v41 }
 0x195   : > { %8633 = vst [vmem:[#allocation40_spill] sm:$0xff] %v7007_v33  ;;  %8634 = vst [vmem:[#allocation41_spill] sm:$0xff] %v7010_v13  ;;  %v1806_v20 = vrot.slane %v7007_v33, 1  ;;  %v896_v29 = vrot.slane %v804_v16, 7  ;;  %v730_v15 = vmul.f32 %v6086_v7, %v6505_v12  ;;  %5431 = vmatprep.mubr.msk.bf16.mxu1 %vm314_vm0, %v7010_v13  ;;  %5564 = vmatmul.mubr.msk.bf16.gmra.mrb[16].mxu0 %vm314_vm0, %v7010_v13  ;;  %v1808_v39 = vrot.slane %v7016_v38, 1  ;;  %v6088_v12 = vpop.eup %6087 }
 0x196   : > { %v1805_v25 = vsel %vm8436_vm3, %v1802_v56, %v1804_v5  ;;  %8635 = vst [vmem:[#allocation42_spill] sm:$0xff] %v7016_v38  ;;  %v805_v47 = vadd.f32 %v6557_v62, %v767_v37  ;;  %v7030_v53 = vsel %vm840_vm2, %v888_v41, %v890_v45  ;;  %v7033_v56 = vsel %vm840_vm2, %v890_v45, %v892_v11 }
 0x197   : > { %v7024_v18 = vpack.c.bf16 %v1805_v25, %v1803_v8  ;;  %v1807_v10 = vsel %vm8436_vm3, %v1804_v5, %v1806_v20  ;;  %8637 = vst [vmem:[#allocation44_spill] sm:$0xff] %v7030_v53  ;;  %v768_v27 = vmul.f32 %v6540_v61, %v730_v15  ;;  %v1809_v31 = vsel %vm8436_vm3, %v1806_v20, %v1808_v39 }
 0x198   : > { %v1810_v16 = vrot.slane %v7030_v53, 1  ;;  %v1812_v8 = vrot.slane %v7033_v56, 1  ;;  %v898_v41 = vrot.slane %v805_v47, 7  ;;  %v731_v5 = vmul.f32 %v6088_v12, %v6508_v14 }
 0x199   : > { %8636 = vst [vmem:[#allocation43_spill] sm:$0xff] %v7024_v18  ;;  %5567 = vmatprep.mubr.msk.bf16.mxu0 %vm314_vm0, %v7024_v18  ;;  %v7043_v45 = vpack.c.bf16 %v1809_v31, %v1807_v10  ;;  %v7046_v7 = vsel %vm840_vm2, %v892_v11, %v894_v26  ;;  %v806_v37 = vadd.f32 %v6557_v62, %v768_v27  ;;  %v958_v17 = vadd.s32 144, %v6530_v48 }
 0x19a   : > { %v1811_v25 = vsel %vm8436_vm3, %v1808_v39, %v1810_v16  ;;  %v1813_v20 = vsel %vm8436_vm3, %v1810_v16, %v1812_v8  ;;  %v7052_v15 = vsel %vm840_vm2, %v894_v26, %v896_v29  ;;  %v769_v13 = vmul.f32 %v6540_v61, %v731_v5  ;;  %5432 = vmatmul.mubr.msk.bf16.gmra.mrb[20].mxu1 %vm314_vm0, %v7024_v18 }
 0x19b   : > { %8638 = vst [vmem:[#allocation45_spill] sm:$0xff] %v7043_v45  ;;  %v7057_v14 = vpack.c.bf16 %v1813_v20, %v1811_v25  ;;  %v1814_v47 = vrot.slane %v7046_v7, 1  ;;  %v1816_v11 = vrot.slane %v7052_v15, 1  ;;  %v900_v10 = vrot.slane %v806_v37, 7  ;;  %5435 = vmatprep.mubr.msk.bf16.mxu1 %vm314_vm0, %v7043_v45 }
 0x19c   : > { %v7064_v39 = vsel %vm840_vm2, %v896_v29, %v898_v41  ;;  %v2526_v26 = vrot.slane %v6613_v6, 2  ;;  %v949_v61 = vadd.s32 72, %v6530_v48  ;;  %v807_v12 = vadd.f32 %v6557_v62, %v769_v13 }
 0x19d   : > { %8639 = vst [vmem:[#allocation46_spill] sm:$0xff] %v7057_v14  ;;  %8640 = vst [vmem:[#allocation47_spill] sm:$0xff] %v7064_v39  ;;  %v1815_v27 = vsel %vm8436_vm3, %v1812_v8, %v1814_v47  ;;  %v1817_v31 = vsel %vm8436_vm3, %v1814_v47, %v1816_v11  ;;  %v1818_v16 = vrot.slane %v7064_v39, 1  ;;  %5568 = vmatmul.mubr.msk.bf16.gmra.mrb[20].mxu0 %vm314_vm0, %v7043_v45  ;;  %v952_v37 = vadd.s32 96, %v6530_v48 }
 0x19e   : > { %v7075_v5 = vsel %vm840_vm2, %v898_v41, %v900_v10  ;;  %v951_v25 = vadd.s32 88, %v6530_v48  ;;  %v902_v20 = vrot.slane %v807_v12, 7  ;;  %5571 = vmatprep.mubr.msk.bf16.mxu0 %vm314_vm0, %v7057_v14  ;;  %v8642_v8 = vand.u32 15, %v6570_v50 }
 0x19f   : > { %8641 = vst [vmem:[#allocation48_spill] sm:$0xff] %v7075_v5  ;;  %v1820_v62 = vrot.slane %v7075_v5, 1  ;;  %v7088_v41 = vpack.c.bf16 %v1817_v31, %v1815_v27  ;;  %v1819_v29 = vsel %vm8436_vm3, %v1816_v11, %v1818_v16  ;;  %v8644_v45 = vrot.slane %v6641_v2, 2 }
 0x1a0   : > { %v7086_v47 = vadd.s32 1, %v8642_v8  ;;  %v1039_v12 = vand.u32 15, %v949_v61  ;;  %v7096_v4 = vsel %vm840_vm2, %v900_v10, %v902_v20  ;;  %v7099_v13 = vsel %vm840_vm2, %v902_v20, 0.0 }
 0x1a1   : > { %8643 = vst [vmem:[#allocation49_spill] sm:$0xff] %v7088_v41  ;;  %v2529_v18 = vsel %vm2521_vm4, %v2526_v26, %v8644_v45  ;;  %v1821_v49 = vsel %vm8436_vm3, %v1818_v16, %v1820_v62  ;;  %8645 = vst [vmem:[#allocation50_spill] sm:$0xff] %v7096_v4  ;;  %v8647_v50 = vrot.slane %v6596_v51, 2  ;;  %v2534_v11 = vrot.slane %v6722_v23, 2 }
 0x1a2   : > { %8646 = vst [vmem:[#allocation51_spill] sm:$0xff] %v7099_v13  ;;  %v1060_v31 = vand.u32 15, %v952_v37  ;;  %v1053_v45 = vand.u32 15, %v951_v25  ;;  %v954_v61 = vadd.s32 112, %v6530_v48  ;;  %5436 = vmatmul.mubr.msk.bf16.gmra.mrb[24].mxu1 %vm314_vm0, %v7057_v14  ;;  %v7111_v10 = vpack.c.bf16 %v1821_v49, %v1819_v29 }
 0x1a3   : > { %v7105_v27 = vsel %vm2521_vm4, %v8647_v50, %v2526_v26  ;;  %v3207_v16 = vrot.slane %v7096_v4, 1  ;;  %v7117_v8 = vsel %vm2396_vm5, %v2529_v18, 0.0  ;;  %5439 = vmatprep.mubr.msk.bf16.mxu1 %vm314_vm0, %v7088_v41  ;;  %v2532_v26 = vrot.slane %v6682_v46, 2 }
 0x1a4   : > { %8648 = vst [vmem:[#allocation52_spill] sm:$0xff] %v7105_v27  ;;  %8649 = vst [vmem:[#allocation53_spill] sm:$0xff] %v7111_v10  ;;  %v953_v25 = vadd.s32 104, %v6530_v48  ;;  %v956_v49 = vadd.s32 128, %v6530_v48  ;;  %v8651_v50 = vand.u32 15, %v6573_v32  ;;  %v955_v14 = vadd.s32 120, %v6530_v48 }
 0x1a5   : > { %8650 = vst [vmem:[#allocation54_spill] sm:$0xff] %v7117_v8  ;;  %5572 = vmatmul.mubr.msk.bf16.gmra.mrb[24].mxu0 %vm314_vm0, %v7088_v41  ;;  %v7138_v37 = vsel %vm2521_vm4, %v2532_v26, %v2534_v11  ;;  %v7140_v0 = vadd.s32 1, %v1039_v12  ;;  %v7142_v8 = vadd.s32 4294967295, %v1060_v31  ;;  %v3208_v32 = vsel %vm8436_vm3, %v1820_v62, %v3207_v16  ;;  %v8658_v62 = vld [vmem:[#allocation7_spill] sm:$0xff] }
 0x1a6   : > { %v7130_v20 = vadd.s32 4294967295, %v8651_v50  ;;  %8653 = vst [vmem:[#allocation56_spill] sm:$0xff] %v7138_v37  ;;  %5575 = vmatprep.mubr.msk.bf16.mxu0 %vm314_vm0, %v7111_v10  ;;  %v8655_v50 = vrot.slane %v7099_v13, 1  ;;  %v8656_v41 = vrot.slane %v6729_v22, 2  ;;  %v1074_v33 = vand.u32 15, %v954_v61 }
 0x1a7   : > { %8654 = vst [vmem:[#allocation57_spill] sm:$0xff] %v7142_v8  ;;  %v7160_v31 = vadd.s32 1, %v1053_v45  ;;  %v1067_v38 = vand.u32 15, %v953_v25  ;;  %v1088_v5 = vand.u32 15, %v956_v49  ;;  %vm2398_vm9 = vcmp.lt.s32.totalorder %v8658_v62, 16 }
 0x1a8   : > { %8652 = vst [vmem:[#allocation55_spill] sm:$0xff] %v7130_v20  ;;  %v3210_v29 = vsel %vm8436_vm3, %v3207_v16, %v8655_v50  ;;  %v7153_v4 = vsel %vm2521_vm4, %v2534_v11, %v8656_v41  ;;  %v1081_v50 = vand.u32 15, %v955_v14  ;;  %v957_v13 = vadd.s32 136, %v6530_v48 }
 0x1a9   : > { %v7158_v12 = vsel %vm2396_vm5, %v7153_v4, 0.0  ;;  %v1102_v41 = vand.u32 15, %v958_v17  ;;  %v7166_v11 = vpack.c.bf16 %v3210_v29, %v3208_v32  ;;  %v2530_v61 = vrot.slane %v6671_v42, 2 }
 0x1aa   : > { %8657 = vst [vmem:[#allocation58_spill] sm:$0xff] %v7158_v12  ;;  %v3514_v36 = vsel %vm2394_vm6, %v2529_v18, 0.0  ;;  %v960_v45 = vadd.s32 160, %v6530_v48  ;;  %5440 = vmatmul.mubr.msk.bf16.gmra.mrb[28].mxu1 %vm314_vm0, %v7111_v10  ;;  %v7174_v25 = vadd.s32 4294967295, %v1074_v33  ;;  %v959_v49 = vadd.s32 152, %v6530_v48  ;;  %v8661_v10 = vld [vmem:[#allocation6_spill] sm:$0xff] }
 0x1ab   : > { %8659 = vst [vmem:[#allocation7_spill] sm:$0xff] %v7166_v11  ;;  %v961_v14 = vadd.s32 168, %v6530_v48  ;;  %v962_v17 = vadd.s32 176, %v6530_v48  ;;  %v6098_v29 = vmov 0.0|0.0   ;;  %v3905_v32 = vsel %vm8490_vm1, %v6734_v21, 0 }
 0x1ac   : > { %8660 = vst [vmem:[#allocation59_spill] sm:$0xff] %v7174_v25  ;;  %5445 = vmatprep.mubr.bf16.mxu1 %v6098_v29  ;;  %v964_v18 = vadd.s32 192, %v6530_v48  ;;  %v963_v16 = vadd.s32 184, %v6530_v48  ;;  %v966_v12 = vadd.s32 208, %v6530_v48  ;;  %v3547_v33 = vpack.c.bf16 %v3514_v36, %v7105_v27 }
 0x1ad   : > { %vm8442_vm10 = vcmp.ge.s32.totalorder %v8661_v10, 0  ;;  %v7187_v53 = vadd.s32 1, %v1067_v38  ;;  %v7189_v3 = vadd.s32 4294967295, %v1088_v5  ;;  %v7191_v29 = vadd.s32 1, %v1081_v50  ;;  %5576 = vmatmul.mubr.msk.bf16.gmra.mrb[28].mxu0 %vm314_vm0, %v7166_v11 }
 0x1ae   : > { %v7196_v21 = vsel %vm2521_vm4, %v2530_v61, %v2532_v26  ;;  %v1095_v57 = vand.u32 15, %v957_v13  ;;  %v7198_v54 = vadd.s32 4294967295, %v1102_v41  ;;  %v1116_v36 = vand.u32 15, %v960_v45  ;;  %5581 = vmatprep.mubr.msk.bf16.mxu0 %vm314_vm0, %v3547_v33 }
 0x1af   : > { %8663 = vst [vmem:[#allocation60_spill] sm:$0xff] %v7189_v3  ;;  %8664 = vst [vmem:[#allocation61_spill] sm:$0xff] %v7191_v29  ;;  %v1109_v27 = vand.u32 15, %v959_v49  ;;  %v1123_v39 = vand.u32 15, %v961_v14  ;;  %v1130_v38 = vand.u32 15, %v962_v17  ;;  %v967_v5 = vadd.s32 216, %v6530_v48 }
 0x1b0   : > { %8665 = vst [vmem:[#allocation62_spill] sm:$0xff] %v7198_v54  ;;  %v1548_v50 = vsel %vm8447_vm7, %v6596_v51, 0.0  ;;  %vm2400_vm12 = vcmp.lt.s32.totalorder %v7086_v47, 16  ;;  %v1144_v11 = vand.u32 15, %v964_v18  ;;  %v1137_v26 = vand.u32 15, %v963_v16 }
 0x1b1   : > { %v1158_v55 = vand.u32 15, %v966_v12  ;;  %v1580_v13 = vpack.c.bf16 %v6613_v6, %v1548_v50  ;;  %v8666_v41 = vrot.slane %v6641_v2, 2  ;;  %v3516_v49 = vsel %vm2396_vm5, %v7196_v21, 0.0 }
 0x1b2   : > { %v1550_v14 = vsel %vm8437_vm8, %v6641_v2, 0.0  ;;  %vm8469_vm13 = vcmp.lt.s32.totalorder %v7140_v0, 16  ;;  %v3518_v12 = vsel %vm2398_vm9, %v7153_v4, 0.0  ;;  %v2538_v17 = vrot.slane %v6760_v60, 2 }
 0x1b3   : > { %v7210_v45 = vsel %vm2521_vm4, %v8666_v41, %v2530_v61  ;;  %v1581_v16 = vpack.c.bf16 %v6671_v42, %v1550_v14  ;;  %v2540_v61 = vrot.slane %v6774_v28, 2  ;;  %vm8468_vm14 = vcmp.ge.s32.totalorder %v7130_v20, 0  ;;  %5446 = vmatmul.mubr.msk.bf16.vlgmr.msra.gmra.mrb[0].mxu1 %vm314_vm0, %v1580_v13 }
 0x1b4   : > { %8667 = vst [vmem:[#allocation63_spill] sm:$0xff] %v7210_v45  ;;  %v2542_v24 = vrot.slane %v6795_v34, 2  ;;  %vm8456_vm15 = vcmp.ge.s32.totalorder %v7142_v8, 0  ;;  %v7231_v33 = vadd.s32 200, %v6530_v48  ;;  %v1165_v50 = vand.u32 15, %v967_v5 }
 0x1b5   : > { %v3548_v41 = vpack.c.bf16 %v3516_v49, %v7210_v45  ;;  %5449 = vmatprep.mubr.msk.bf16.mxu1 %vm314_vm0, %v1581_v16  ;;  %vm8467_vm2 = vcmp.ge.s32.totalorder %v7174_v25, 0  ;;  %v7236_v14 = vadd.s32 1, %v1095_v57  ;;  %v7238_v6 = vadd.s32 4294967295, %v1116_v36  ;;  %v7252_v5 = vld [vmem:[%s8373_s3 + $0xe] sm:$0x3] }
 0x1b6   : > { %v7240_v13 = vadd.s32 1, %v1109_v27  ;;  %v3549_v18 = vpack.c.bf16 %v3518_v12, %v7138_v37  ;;  %v7243_v44 = vadd.s32 1, %v1123_v39  ;;  %v7245_v30 = vadd.s32 4294967295, %v1130_v38  ;;  %8672 = vst [vmem:[#allocation68_spill] sm:$0xff] %v7252_v5 }
 0x1b7   : > { %8668 = vst [vmem:[#allocation64_spill] sm:$0xff] %v7236_v14  ;;  %8669 = vst [vmem:[#allocation65_spill] sm:$0xff] %v7238_v6  ;;  %v7247_v42 = vadd.s32 4294967295, %v1144_v11  ;;  %5582 = vmatmul.mubr.msk.bf16.vlgmr.msra.gmra.mrb[0].mxu0 %vm314_vm0, %v3548_v41  ;;  %v7256_v57 = vsel %vm2521_vm4, %v2538_v17, %v2540_v61  ;;  %vm8501_vm5 = vcmp.lt.s32.totalorder %v7160_v31, 16  ;;  %v7259_v27 = vadd.s32 1, %v1137_v26 }
 0x1b8   : > { %8670 = vst [vmem:[#allocation66_spill] sm:$0xff] %v7243_v44  ;;  %v7261_v39 = vadd.s32 4294967295, %v1158_v55  ;;  %v7264_v36 = vadd.s32 224, %v6530_v48  ;;  %5614 = vmatpush3.bf16.msra.mxu0 %v3905_v32  ;;  %5585 = vmatprep.mubr.msk.bf16.mxu0 %vm314_vm0, %v3549_v18  ;;  %v8673_v11 = vrot.slane %v6805_v52, 2  ;;  %vm8489_vm3 = vcmp.ge.s32.totalorder %v7189_v3, 0 }
 0x1b9   : > { %8671 = vst [vmem:[#allocation67_spill] sm:$0xff] %v7247_v42  ;;  %v7274_v16 = vadd.s32 1, %v1165_v50  ;;  %v970_v55 = vadd.s32 240, %v6530_v48  ;;  %v1552_v26 = vsel %vm8442_vm10, %v6682_v46, 0.0  ;;  %v1554_v32 = vsel %vm8441_vm11, %v6729_v22, 0.0  ;;  %6012 = vmatprep.subr.msk.bf16.mxu0 %vm8490_vm1, %v7252_v5 }
 0x1ba   : > { %v7270_v38 = vsel %vm2521_vm4, %v2542_v24, %v8673_v11  ;;  %v2546_v12 = vrot.slane %v6825_v9, 2  ;;  %v2548_v18 = vrot.slane %v6840_v43, 2  ;;  %vm8470_vm8 = vcmp.lt.s32.totalorder %v7187_v53, 16 }
 0x1bb   : > { %8674 = vst [vmem:[#allocation69_spill] sm:$0xff] %v7274_v16  ;;  %v1582_v50 = vpack.c.bf16 %v6722_v23, %v1552_v26  ;;  %v1583_v41 = vpack.c.bf16 %v6760_v60, %v1554_v32  ;;  %v8675_v11 = vrot.slane %v6729_v22, 2  ;;  %v3520_v58 = vsel %vm2400_vm12, %v7256_v57, 0.0 }
 0x1bc   : > { %v7299_v10 = vsel %vm2521_vm4, %v2540_v61, %v2542_v24  ;;  %v3522_v5 = vsel %vm8469_vm13, %v7270_v38, 0.0  ;;  %v2550_v26 = vrot.slane %v6867_v63, 2  ;;  %v2552_v32 = vrot.slane %v6874_v1, 2 }
 0x1bd   : > { %v7293_v49 = vsel %vm2521_vm4, %v8675_v11, %v2538_v17  ;;  %8677 = vst [vmem:[#allocation71_spill] sm:$0xff] %v7299_v10  ;;  %vm8487_vm11 = vcmp.ge.s32.totalorder %v7198_v54, 0  ;;  %5450 = vmatmul.mubr.msk.bf16.gmra.mrb[4].mxu1 %vm314_vm0, %v1582_v50  ;;  %vm8482_vm10 = vcmp.ge.s32.totalorder %v7238_v6, 0  ;;  %v1172_v11 = vand.u32 15, %v7264_v36  ;;  %v8696_v54 = vld [vmem:[#allocation44_spill] sm:$0xff] }
 0x1be   : > { %8676 = vst [vmem:[#allocation70_spill] sm:$0xff] %v7293_v49  ;;  %v2578_v61 = vrot.slane %v7046_v7, 2  ;;  %5453 = vmatprep.mubr.msk.bf16.mxu1 %vm314_vm0, %v1583_v41  ;;  %v3550_v60 = vpack.c.bf16 %v3520_v58, %v7293_v49  ;;  %v7316_v22 = vsel %vm2521_vm4, %v2546_v12, %v2548_v18  ;;  %vm2420_vm7 = vcmp.lt.s32.totalorder %v7274_v16, 16  ;;  %v8773_v62 = vld [vmem:[#allocation68_spill] sm:$0xff] }
 0x1bf   : > { %v7320_v50 = vadd.s32 232, %v6530_v48  ;;  %v3551_v17 = vpack.c.bf16 %v3522_v5, %v7299_v10  ;;  %v1556_v36 = vsel %vm8468_vm14, %v6774_v28, 0.0  ;;  %v8678_v24 = vrot.slane %v7033_v56, 2 }
 0x1c0   : > { %v8680_v58 = vrot.slane %v7052_v15, 2  ;;  %5586 = vmatmul.mubr.msk.bf16.gmra.mrb[4].mxu0 %vm314_vm0, %v3550_v60  ;;  %v1558_v5 = vsel %vm8456_vm15, %v6805_v52, 0.0  ;;  %v7341_v46 = vsel %vm2521_vm4, %v2550_v26, %v2552_v32  ;;  %v3524_v60 = vsel %vm8501_vm5, %v7316_v22, 0.0 }
 0x1c1   : > { %v7329_v41 = vsel %vm2521_vm4, %v8678_v24, %v2578_v61  ;;  %v1186_v24 = vand.u32 15, %v970_v55  ;;  %5589 = vmatprep.mubr.msk.bf16.mxu0 %vm314_vm0, %v3551_v17  ;;  %v1560_v8 = vsel %vm8467_vm2, %v6840_v43, 0.0  ;;  %vm8512_vm15 = vcmp.lt.s32.totalorder %v7191_v29, 16 }
 0x1c2   : > { %8679 = vst [vmem:[#allocation72_spill] sm:$0xff] %v7329_v41  ;;  %v7334_v23 = vsel %vm2521_vm4, %v2578_v61, %v8680_v58  ;;  %v8683_v61 = vrot.slane %v6805_v52, 2  ;;  %v1584_v17 = vpack.c.bf16 %v6795_v34, %v1556_v36  ;;  %v1585_v52 = vpack.c.bf16 %v6825_v9, %v1558_v5 }
 0x1c3   : > { %8681 = vst [vmem:[#allocation73_spill] sm:$0xff] %v7334_v23  ;;  %v7346_v20 = vsel %vm2420_vm7, %v7334_v23, 0.0  ;;  %v7369_v28 = vsel %vm2521_vm4, %v2548_v18, %v2550_v26  ;;  %v3526_v25 = vsel %vm8470_vm8, %v7341_v46, 0.0  ;;  %v2554_v43 = vrot.slane %v6903_v19, 2  ;;  %v7388_v26 = vld [vmem:[%s8373_s3 + $0x6] sm:$0x3] }
 0x1c4   : > { %8682 = vst [vmem:[#allocation74_spill] sm:$0xff] %v7346_v20  ;;  %v7352_v58 = vsel %vm2521_vm4, %v8683_v61, %v2546_v12  ;;  %v1586_v12 = vpack.c.bf16 %v6867_v63, %v1560_v8  ;;  %v7366_v61 = vadd.s32 4294967295, %v1186_v24  ;;  %v2556_v2 = vrot.slane %v6913_v40, 2  ;;  %8685 = vst [vmem:[#allocation76_spill] sm:$0xff] %v7388_v26  ;;  %v8686_v24 = vld [vmem:[#allocation34_spill] sm:$0xff]  ;;  %v8688_v63 = vld [vmem:[#allocation47_spill] sm:$0xff] }
 0x1c5   : > { %8684 = vst [vmem:[#allocation75_spill] sm:$0xff] %v7352_v58  ;;  %vm8510_vm2 = vcmp.lt.s32.totalorder %v7236_v14, 16  ;;  %vm2412_vm14 = vcmp.lt.s32.totalorder %v7240_v13, 16  ;;  %v3552_v36 = vpack.c.bf16 %v3524_v60, %v7352_v58  ;;  %v1562_v8 = vsel %vm8489_vm3, %v6874_v1, 0.0  ;;  %5454 = vmatmul.mubr.msk.bf16.gmra.mrb[8].mxu1 %vm314_vm0, %v1584_v17  ;;  %v8702_v14 = vld [vmem:[#allocation42_spill] sm:$0xff] }
 0x1c6   : > { %vm1418_vm13 = vcmp.ge.s32.totalorder %v7366_v61, 0  ;;  %v2717_v18 = vsel %vm8490_vm1, %v6704_v59, 0  ;;  %v2558_v5 = vrot.slane %v6939_v35, 2  ;;  %v2560_v60 = vrot.slane %v8686_v24, 2  ;;  %5457 = vmatprep.mubr.msk.bf16.mxu1 %vm314_vm0, %v1585_v52 }
 0x1c7   : > { %vm2416_vm8 = vcmp.lt.s32.totalorder %v7259_v27, 16  ;;  %v7397_v55 = vsel %vm1418_vm13, %v7052_v15, 0.0  ;;  %v971_v59 = vadd.s32 248, %v6530_v48  ;;  %v3553_v3 = vpack.c.bf16 %v3526_v25, %v7369_v28  ;;  %5478 = vmatpush3.bf16.msra.mxu1 %v2717_v18 }
 0x1c8   : > { %8687 = vst [vmem:[#allocation77_spill] sm:$0xff] %v7397_v55  ;;  %v1587_v1 = vpack.c.bf16 %v6903_v19, %v1562_v8  ;;  %v7403_v17 = vadd.s32 4294967295, %v1172_v11  ;;  %v7408_v34 = vsel %vm2521_vm4, %v2552_v32, %v2554_v43  ;;  %v7411_v20 = vsel %vm2521_vm4, %v2554_v43, %v2556_v2  ;;  %6008 = vmatprep.subr.msk.bf16.mxu1 %vm8490_vm1, %v7388_v26  ;;  %v8690_v11 = vld [vmem:[#allocation38_spill] sm:$0xff]  ;;  %v8691_v8 = vld [vmem:[#allocation39_spill] sm:$0xff] }
 0x1c9   : > { %8689 = vst [vmem:[#allocation47_spill] sm:$0xff] %v7408_v34  ;;  %v7416_v52 = vsel %vm8487_vm11, %v6913_v40, 0.0  ;;  %v1179_v25 = vand.u32 15, %v7320_v50  ;;  %5590 = vmatmul.mubr.msk.bf16.gmra.mrb[8].mxu0 %vm314_vm0, %v3552_v36  ;;  %v7425_v32 = vsel %vm8482_vm10, %v8686_v24, 0.0  ;;  %v2566_v43 = vrot.slane %v8690_v11, 2 }
 0x1ca   : > { %v7432_v9 = vsel %vm2400_vm12, %v7153_v4, 0.0  ;;  %5593 = vmatprep.mubr.msk.bf16.mxu0 %vm314_vm0, %v3553_v3  ;;  %v7436_v50 = vsel %vm2521_vm4, %v2556_v2, %v2558_v5  ;;  %v7439_v36 = vsel %vm2521_vm4, %v2558_v5, %v2560_v60  ;;  %vm1412_vm10 = vcmp.ge.s32.totalorder %v7247_v42, 0  ;;  %v8694_v3 = vld [vmem:[#allocation35_spill] sm:$0xff]  ;;  %v8744_v13 = vld [vmem:[#allocation73_spill] sm:$0xff] }
 0x1cb   : > { %8692 = vst [vmem:[#allocation38_spill] sm:$0xff] %v7432_v9  ;;  %8693 = vst [vmem:[#allocation39_spill] sm:$0xff] %v7436_v50  ;;  %v1193_v6 = vand.u32 15, %v971_v59  ;;  %v3528_v18 = vsel %vm8512_vm15, %v7411_v20, 0.0  ;;  %v1588_v4 = vpack.c.bf16 %v6939_v35, %v7416_v52  ;;  %v1589_v2 = vpack.c.bf16 %v8694_v3, %v7425_v32  ;;  %v8697_v35 = vld [vmem:[#allocation36_spill] sm:$0xff] }
 0x1cc   : > { %v7454_v5 = vsel %vm8501_vm5, %v7270_v38, 0.0  ;;  %v2562_v59 = vrot.slane %v8694_v3, 2  ;;  %vm2414_vm11 = vcmp.lt.s32.totalorder %v7243_v44, 16  ;;  %v2574_v24 = vrot.slane %v8696_v54, 2  ;;  %v8700_v52 = vld [vmem:[#allocation48_spill] sm:$0xff] }
 0x1cd   : > { %8695 = vst [vmem:[#allocation78_spill] sm:$0xff] %v7454_v5  ;;  %vm1414_vm3 = vcmp.ge.s32.totalorder %v7261_v39, 0  ;;  %vm1416_vm1 = vcmp.ge.s32.totalorder %v7403_v17, 0  ;;  %v7461_v40 = vadd.s32 1, %v1179_v25  ;;  %v3530_v32 = vsel %vm8510_vm2, %v7439_v36, 0.0  ;;  %5458 = vmatmul.mubr.msk.bf16.gmra.mrb[12].mxu1 %vm314_vm0, %v1586_v12 }
 0x1ce   : > { %v2564_v19 = vrot.slane %v8697_v35, 2  ;;  %v8698_v3 = vrot.slane %v8691_v8, 2  ;;  %v7477_v9 = vsel %vm8512_vm15, %v7341_v46, 0.0  ;;  %vm1410_vm5 = vcmp.ge.s32.totalorder %v7245_v30, 0  ;;  %5461 = vmatprep.mubr.msk.bf16.mxu1 %vm314_vm0, %v1587_v1 }
 0x1cf   : > { %8699 = vst [vmem:[#allocation44_spill] sm:$0xff] %v7477_v9  ;;  %v2582_v25 = vrot.slane %v8688_v63, 2  ;;  %v7483_v26 = vadd.s32 1, %v1193_v6  ;;  %v2572_v12 = vrot.slane %v8702_v14, 2  ;;  %v7496_v29 = vsel %vm2412_vm14, %v7439_v36, 0.0  ;;  %v8706_v9 = vld [vmem:[#allocation40_spill] sm:$0xff] }
 0x1d0   : > { %v7472_v37 = vsel %vm2521_vm4, %v2566_v43, %v8698_v3  ;;  %v3554_v3 = vpack.c.bf16 %v3528_v18, %v7408_v34  ;;  %v7490_v51 = vsel %vm2521_vm4, %v2564_v19, %v2566_v43  ;;  %8703 = vst [vmem:[#allocation48_spill] sm:$0xff] %v7496_v29  ;;  %v3555_v6 = vpack.c.bf16 %v3530_v32, %v7436_v50 }
 0x1d1   : > { %8701 = vst [vmem:[#allocation36_spill] sm:$0xff] %v7483_v26  ;;  %v8704_v5 = vrot.slane %v7033_v56, 2  ;;  %vm2422_vm2 = vcmp.lt.s32.totalorder %v7461_v40, 16  ;;  %v7509_v43 = vsel %vm2521_vm4, %v2560_v60, %v2562_v59  ;;  %v7512_v18 = vsel %vm2521_vm4, %v2562_v59, %v2564_v19 }
 0x1d2   : > { %5594 = vmatmul.mubr.msk.bf16.gmra.mrb[12].mxu0 %vm314_vm0, %v3554_v3  ;;  %v7515_v32 = vsel %vm2521_vm4, %v2572_v12, %v2574_v24  ;;  %v2570_v1 = vrot.slane %v8706_v9, 2  ;;  %v8707_v3 = vrot.slane %v8700_v52, 2  ;;  %vm8529_vm15 = vcmp.lt.s32.totalorder %v7483_v26, 16 }
 0x1d3   : > { %v7502_v55 = vsel %vm2521_vm4, %v2574_v24, %v8704_v5  ;;  %v7520_v5 = vsel %vm2416_vm8, %v7472_v37, 0.0  ;;  %5597 = vmatprep.mubr.msk.bf16.mxu0 %vm314_vm0, %v3555_v6  ;;  %v8708_v24 = vrot.slane %v7052_v15, 2  ;;  %v7540_v6 = vsel %vm1412_vm10, %v7033_v56, 0.0 }
 0x1d4   : > { %8705 = vst [vmem:[#allocation42_spill] sm:$0xff] %v7520_v5  ;;  %v7527_v60 = vsel %vm2521_vm4, %v2582_v25, %v8707_v3  ;;  %8709 = vst [vmem:[#allocation40_spill] sm:$0xff] %v7540_v6  ;;  %v7545_v3 = vsel %vm2420_vm7, %v7502_v55, 0.0  ;;  %v7550_v29 = vsel %vm2422_vm2, %v7334_v23, 0.0  ;;  %v3534_v16 = vsel %vm2414_vm11, %v7472_v37, 0.0 }
 0x1d5   : > { %v7535_v59 = vsel %vm2521_vm4, %v8708_v24, %v2582_v25  ;;  %8710 = vst [vmem:[#allocation79_spill] sm:$0xff] %v7545_v3  ;;  %8711 = vst [vmem:[#allocation80_spill] sm:$0xff] %v7550_v29  ;;  %v3532_v25 = vsel %vm2412_vm14, %v7512_v18, 0.0  ;;  %v7567_v23 = vsel %vm1414_vm3, %v7052_v15, 0.0  ;;  %v7572_v50 = vsel %vm1416_vm1, %v8700_v52, 0.0  ;;  %5462 = vmatmul.mubr.msk.bf16.gmra.mrb[16].mxu1 %vm314_vm0, %v1588_v4  ;;  %v8716_v3 = vld [vmem:[#allocation50_spill] sm:$0xff] }
 0x1d6   : > { %8712 = vst [vmem:[#allocation81_spill] sm:$0xff] %v7567_v23  ;;  %8713 = vst [vmem:[#allocation82_spill] sm:$0xff] %v7572_v50  ;;  %v7577_v19 = vsel %vm8529_vm15, %v7527_v60, 0.0  ;;  %v8715_v5 = vand.u32 15, %v7231_v33  ;;  %5465 = vmatprep.mubr.msk.bf16.mxu1 %vm314_vm0, %v1589_v2  ;;  %v3556_v26 = vpack.c.bf16 %v3532_v25, %v7509_v43  ;;  %v7593_v44 = vsel %vm2521_vm4, %v2570_v1, %v2572_v12  ;;  %v8717_v4 = vld [vmem:[#allocation51_spill] sm:$0xff] }
 0x1d7   : > { %8714 = vst [vmem:[#allocation83_spill] sm:$0xff] %v7577_v19  ;;  %v7598_v33 = vsel %vm1418_vm13, %v8717_v4, 0.0  ;;  %v8719_v29 = vmov 0.0   ;;  %v1568_v2 = vsel %vm1410_vm5, %v8697_v35, 0.0  ;;  %v8720_v41 = vrot.slane %v8691_v8, 2 }
 0x1d8   : > { %v7582_v24 = vadd.s32 1, %v8715_v5  ;;  %8718 = vst [vmem:[#allocation50_spill] sm:$0xff] %v7598_v33  ;;  %v3557_v5 = vpack.c.bf16 %v3534_v16, %v7490_v51  ;;  %v7602_v23 = vrot.slane %v8719_v29, 2  ;;  %v1590_v12 = vpack.c.bf16 %v8690_v11, %v1568_v2  ;;  %v8753_v27 = vld [vmem:[#allocation36_spill] sm:$0xff] }
 0x1d9   : > { %v7614_v6 = vsel %vm2521_vm4, %v8720_v41, %v2570_v1  ;;  %v3536_v16 = vsel %vm2416_vm8, %v7593_v44, 0.0  ;;  %v1572_v2 = vsel %vm1414_vm3, %v8702_v14, 0.0  ;;  %v3507_v41 = vrot.slane %v8716_v3, 2 }
 0x1da   : > { %5598 = vmatmul.mubr.msk.bf16.gmra.mrb[16].mxu0 %vm314_vm0, %v3556_v26  ;;  %vm2418_vm15 = vcmp.lt.s32.totalorder %v7582_v24, 16  ;;  %v1570_v26 = vsel %vm1412_vm10, %v8691_v8, 0.0  ;;  %v1592_v25 = vpack.c.bf16 %v8696_v54, %v1572_v2  ;;  %v1574_v29 = vsel %vm1416_vm1, %v7033_v56, 0.0 }
 0x1db   : > { %5601 = vmatprep.mubr.msk.bf16.mxu0 %vm314_vm0, %v3557_v5  ;;  %v3538_v5 = vsel %vm2418_vm15, %v7502_v55, 0.0  ;;  %v1591_v1 = vpack.c.bf16 %v8706_v9, %v1570_v26  ;;  %v3509_v42 = vrot.slane %v8717_v4, 2  ;;  %v3558_v33 = vpack.c.bf16 %v3536_v16, %v7614_v6  ;;  %v8822_v24 = vld [vmem:[#allocation40_spill] sm:$0xff] }
 0x1dc   : > { %v1593_v19 = vpack.c.bf16 %v7046_v7, %v1574_v29  ;;  %v7641_v50 = vsel %vm1414_vm3, %v7033_v56, 0.0  ;;  %v7646_v26 = vsel %vm1416_vm1, %v7052_v15, 0.0  ;;  %v3559_v2 = vpack.c.bf16 %v3538_v5, %v7515_v32 }
 0x1dd   : > { %5466 = vmatmul.mubr.msk.bf16.gmra.mrb[20].mxu1 %vm314_vm0, %v1590_v12  ;;  %v3542_v16 = vsel %vm2422_vm2, %v7527_v60, 0.0  ;;  %v8721_v39 = vrot.slane %v8700_v52, 2  ;;  %v7666_v17 = vsel %vm1418_vm13, %v8700_v52, 0.0  ;;  %v7671_v5 = vsel %vm2394_vm6, %v7196_v21, 0.0 }
 0x1de   : > { %5469 = vmatprep.mubr.msk.bf16.mxu1 %vm314_vm0, %v1591_v1  ;;  %8724 = vst [vmem:[#allocation4_spill] sm:$0xff] %v7671_v5  ;;  %v7676_v56 = vsel %vm2398_vm9, %v7256_v57, 0.0  ;;  %v3510_v1 = vsel %vm2521_vm4, %v3507_v41, %v3509_v42  ;;  %v7689_v29 = vsel %vm2400_vm12, %v7270_v38, 0.0  ;;  %vm8727_vm1 = vcmp.lt.s32.totalorder %v7140_v0, 16 }
 0x1df   : > { %v7661_v15 = vsel %vm2521_vm4, %v8721_v39, %v3507_v41  ;;  %8725 = vst [vmem:[#allocation84_spill] sm:$0xff] %v7676_v56  ;;  %8726 = vst [vmem:[#allocation85_spill] sm:$0xff] %v7689_v29  ;;  %v7694_v41 = vsel %vm8727_vm1, %v7316_v22, 0.0  ;;  %vm8729_vm3 = vcmp.lt.s32.totalorder %v7160_v31, 16  ;;  %vm8731_vm13 = vcmp.lt.s32.totalorder %v7187_v53, 16  ;;  %v8733_v31 = vld [vmem:[#allocation61_spill] sm:$0xff] }
 0x1e0   : > { %8722 = vst [vmem:[#allocation51_spill] sm:$0xff] %v7661_v15  ;;  %8728 = vst [vmem:[#allocation86_spill] sm:$0xff] %v7694_v41  ;;  %v7699_v39 = vsel %vm8729_vm3, %v7341_v46, 0.0  ;;  %v7704_v52 = vsel %vm8731_vm13, %v7411_v20, 0.0  ;;  %vm8734_vm12 = vcmp.lt.s32.totalorder %v8733_v31, 16  ;;  %v8736_v56 = vld [vmem:[#allocation64_spill] sm:$0xff]  ;;  %v8860_v30 = vpack.c.bf16 %v7046_v7, %v7641_v50 }
 0x1e1   : > { %8730 = vst [vmem:[#allocation87_spill] sm:$0xff] %v7699_v39  ;;  %8732 = vst [vmem:[#allocation88_spill] sm:$0xff] %v7704_v52  ;;  %v7718_v61 = vsel %vm8734_vm12, %v7439_v36, 0.0  ;;  %vm8737_vm1 = vcmp.lt.s32.totalorder %v8736_v56, 16  ;;  %v7728_v38 = vsel %vm2412_vm14, %v7472_v37, 0.0  ;;  %v7733_v47 = vsel %vm2414_vm11, %v7593_v44, 0.0 }
 0x1e2   : > { %5602 = vmatmul.mubr.msk.bf16.gmra.mrb[20].mxu0 %vm314_vm0, %v3558_v33  ;;  %8735 = vst [vmem:[#allocation61_spill] sm:$0xff] %v7718_v61  ;;  %8739 = vst [vmem:[#allocation89_spill] sm:$0xff] %v7728_v38  ;;  %v8742_v46 = vld [vmem:[#allocation39_spill] sm:$0xff]  ;;  %v7746_v37 = vsel %vm2416_vm8, %v7502_v55, 0.0  ;;  %v7751_v41 = vsel %vm2418_vm15, %v8744_v13, 0.0  ;;  %v7756_v36 = vsel %vm2420_vm7, %v7527_v60, 0.0  ;;  %v3561_v13 = vpack.c.bf16 %v3542_v16, %v7535_v59 }
 0x1e3   : > { %5605 = vmatprep.mubr.msk.bf16.mxu0 %vm314_vm0, %v3559_v2  ;;  %v7723_v2 = vsel %vm8737_vm1, %v7512_v18, 0.0  ;;  %8741 = vst [vmem:[#allocation66_spill] sm:$0xff] %v7733_v47  ;;  %8743 = vst [vmem:[#allocation39_spill] sm:$0xff] %v7746_v37  ;;  %v7760_v52 = vsel %vm2422_vm2, %v3510_v1, 0.0  ;;  %v8749_v55 = vld [vmem:[#allocation72_spill] sm:$0xff]  ;;  %v8750_v60 = vld [vmem:[#allocation9_spill] sm:$0xff] }
 0x1e4   : > { %8738 = vst [vmem:[#allocation64_spill] sm:$0xff] %v7723_v2  ;;  %8745 = vst [vmem:[#allocation73_spill] sm:$0xff] %v7751_v41  ;;  %v8751_v40 = vrot.slane %v8750_v60, 2  ;;  %vm8754_vm7 = vcmp.lt.s32.totalorder %v8753_v27, 16  ;;  %v8760_v31 = vld [vmem:[#allocation77_spill] sm:$0xff]  ;;  %vm8779_vm3 = vcmp.lt.s32.totalorder %v7140_v0, 16 }
 0x1e5   : > { %8747 = vst [vmem:[#allocation69_spill] sm:$0xff] %v7756_v36  ;;  %8748 = vst [vmem:[#allocation90_spill] sm:$0xff] %v7760_v52  ;;  %5470 = vmatmul.mubr.msk.bf16.gmra.mrb[24].mxu1 %vm314_vm0, %v1592_v25  ;;  %v7778_v25 = vsel %vm2521_vm4, %v3509_v42, %v7602_v23  ;;  %v7783_v39 = vsel %vm8754_vm7, %v7602_v23, 0.0  ;;  %v8788_v0 = vld [vmem:[#allocation22_spill] sm:$0xff]  ;;  %v8791_v38 = vld [vmem:[#allocation23_spill] sm:$0xff] }
 0x1e6   : > { %5473 = vmatprep.mubr.msk.bf16.mxu1 %vm314_vm0, %v1593_v19  ;;  %v2525_v47 = vsel %vm2521_vm4, %v7602_v23, %v8751_v40  ;;  %8752 = vst [vmem:[#allocation72_spill] sm:$0xff] %v7778_v25  ;;  %8755 = vst [vmem:[#allocation9_spill] sm:$0xff] %v7783_v39  ;;  %v8756_v19 = vld [vmem:[#allocation74_spill] sm:$0xff]  ;;  %v8758_v40 = vand.u32 15, %v6530_v48  ;;  %v8761_v25 = vpack.c.bf16 %v8688_v63, %v8760_v31  ;;  %v8778_v39 = vld [vmem:[#allocation17_spill] sm:$0xff] }
 0x1e7   : > { %v8757_v52 = vpack.c.bf16 %v8756_v19, %v8749_v55  ;;  %v2619_v42 = vsel %vm2394_vm6, %v2525_v47, 0.0  ;;  %vm8759_vm4 = vmmov %vm8754_vm7  ;;  %v8763_v47 = vld [vmem:[#allocation12_spill] sm:$0xff]  ;;  %vm8765_vm6 = vcmask 1041408   ;;  %v8766_v31 = vld [vmem:[#allocation54_spill] sm:$0xff]  ;;  %vm8792_vm7 = vcmp.lt.s32.totalorder %v7187_v53, 16 }
 0x1e8   : > { %v7797_v36 = vadd.s32 4294967295, %v8758_v40  ;;  %v3544_v16 = vsel %vm8759_vm4, %v3510_v1, 0.0  ;;  %v2652_v41 = vpack.c.bf16 %v2619_v42, %v7602_v23  ;;  %v2623_v23 = vsel %vm2398_vm9, %v7196_v21, 0.0  ;;  %v8764_v1 = vld [vmem:[#allocation76_spill] sm:$0xff]  ;;  %v8769_v42 = vld [vmem:[#allocation13_spill] sm:$0xff]  ;;  %v8770_v40 = vld [vmem:[#allocation2_spill] sm:$0xff] }
 0x1e9   : > { %v3562_v12 = vpack.c.bf16 %v3544_v16, %v7661_v15  ;;  %vm8771_vm14 = vcmp.ge.s32.totalorder %v8770_v40, 0  ;;  %vm8774_vm9 = vmmov %vm8765_vm6  ;;  %v8785_v15 = vld [vmem:[#allocation6_spill] sm:$0xff]  ;;  %v8796_v61 = vld [vmem:[#allocation55_spill] sm:$0xff] }
 0x1ea   : > { %5606 = vmatmul.mubr.msk.bf16.gmra.mrb[24].mxu0 %vm314_vm0, %v8757_v52  ;;  %vm1388_vm8 = vcmp.ge.s32.totalorder %v7797_v36, 0  ;;  %v8762_v52 = vld [vmem:[#allocation11_spill] sm:$0xff]  ;;  %v3809_v16 = vsel %vm8771_vm14, %v8769_v42, 0.0  ;;  %v4201_v21 = vsel %vm8774_vm9, %v8773_v62, 0  ;;  %vm8780_vm13 = vmmov %vm8765_vm6  ;;  %vm8786_vm12 = vcmp.ge.s32.totalorder %v8785_v15, 0  ;;  %v8868_v50 = vld [vmem:[#allocation4_spill] sm:$0xff] }
 0x1eb   : > { %5609 = vmatprep.mubr.msk.bf16.mxu0 %vm314_vm0, %v3561_v13  ;;  %v3807_v48 = vsel %vm1388_vm8, %v8762_v52, 0.0  ;;  %v3011_v13 = vsel %vm8765_vm6, %v8764_v1, 0  ;;  %v8776_v1 = vld [vmem:[#allocation5_spill] sm:$0xff]  ;;  %vm8797_vm4 = vcmp.ge.s32.totalorder %v8796_v61, 0  ;;  %vm8803_vm14 = vcmp.lt.s32.totalorder %v8736_v56, 16 }
 0x1ec   : > { %v3840_v27 = vpack.c.bf16 %v8763_v47, %v3807_v48  ;;  %vm8777_vm2 = vcmp.ge.s32.totalorder %v8776_v1, 0 }
 0x1ed   : > { %5474 = vmatmul.mubr.msk.bf16.gmra.mrb[28].mxu1 %vm314_vm0, %v8761_v25  ;;  %v8767_v25 = vld [vmem:[#allocation52_spill] sm:$0xff] }
 0x1ee   : > { %5479 = vmatprep.mubr.msk.bf16.mxu1 %vm314_vm0, %v2652_v41  ;;  %v2654_v41 = vpack.c.bf16 %v2623_v23, %v7210_v45  ;;  %v8768_v19 = vpack.c.bf16 %v8766_v31, %v8767_v25  ;;  %v7839_v25 = vld [vmem:[%s8373_s3 + $0x10] sm:$0x3] }
 0x1ef   : > { %v8811_v45 = vld [vmem:[#allocation60_spill] sm:$0xff] }
 0x1f2   : > { %5610 = vmatmul.mubr.msk.bf16.gmra.mrb[28].mxu0 %vm314_vm0, %v3562_v12  ;;  %v8772_v12 = vld [vmem:[#allocation15_spill] sm:$0xff] }
 0x1f3   : > { %5615 = vmatprep.mubr.msk.bf16.mxu0 %vm314_vm0, %v3840_v27  ;;  %v3841_v48 = vpack.c.bf16 %v8772_v12, %v3809_v16  ;;  %v8775_v27 = vld [vmem:[#allocation16_spill] sm:$0xff] }
 0x1f4   : > { %v3811_v23 = vsel %vm8777_vm2, %v8775_v27, 0.0  ;;  %v8782_v16 = vld [vmem:[#allocation56_spill] sm:$0xff]  ;;  %vm8812_vm2 = vcmp.ge.s32.totalorder %v8811_v45, 0 }
 0x1f5   : > { %5480 = vmatmul.mubr.msk.bf16.vlgmr.msra.gmra.mrb[0].mxu1 %vm314_vm0, %v8768_v19  ;;  %v3842_v31 = vpack.c.bf16 %v8778_v39, %v3811_v23  ;;  %v8781_v19 = vld [vmem:[#allocation38_spill] sm:$0xff]  ;;  %v8784_v23 = vld [vmem:[#allocation19_spill] sm:$0xff] }
 0x1f6   : > { %5483 = vmatprep.mubr.msk.bf16.mxu1 %vm314_vm0, %v2654_v41  ;;  %5512 = vmatpush3.bf16.msra.mxu1 %v3011_v13  ;;  %v2627_v41 = vsel %vm8779_vm3, %v7256_v57, 0.0  ;;  %v8783_v62 = vpack.c.bf16 %v8781_v19, %v8782_v16  ;;  %v8789_v57 = vld [vmem:[#allocation8_spill] sm:$0xff] }
 0x1f7   : > { %v2656_v13 = vpack.c.bf16 %v2627_v41, %v7293_v49  ;;  %vm8790_vm1 = vcmp.ge.s32.totalorder %v8789_v57, 0  ;;  %v2631_v41 = vsel %vm8792_vm7, %v7316_v22, 0.0  ;;  %v8800_v49 = vld [vmem:[#allocation57_spill] sm:$0xff]  ;;  %v8802_v22 = vld [vmem:[#allocation30_spill] sm:$0xff]  ;;  %vm8845_vm7 = vmmov %vm8797_vm4 }
 0x1f8   : > { %v3815_v37 = vsel %vm8790_vm1, %v8788_v0, 0.0  ;;  %v2658_v19 = vpack.c.bf16 %v2631_v41, %v7352_v58  ;;  %vm8801_vm6 = vcmp.ge.s32.totalorder %v8800_v49, 0  ;;  %v2635_v41 = vsel %vm8803_vm14, %v7411_v20, 0.0  ;;  %v8807_v58 = vld [vmem:[#allocation59_spill] sm:$0xff]  ;;  %v8848_v57 = vld [vmem:[#allocation32_spill] sm:$0xff]  ;;  %vm8850_vm14 = vmmov %vm8812_vm2 }
 0x1f9   : > { %v3844_v2 = vpack.c.bf16 %v8791_v38, %v3815_v37  ;;  %v8798_v37 = vld [vmem:[#allocation27_spill] sm:$0xff]  ;;  %vm8808_vm9 = vcmp.ge.s32.totalorder %v8807_v58, 0  ;;  %v2922_v15 = vsel %vm8845_vm7, %v8788_v0, 0.0 }
 0x1fa   : > { %5616 = vmatmul.mubr.msk.bf16.vlgmr.msra.gmra.mrb[0].mxu0 %vm314_vm0, %v3841_v48  ;;  %v3813_v48 = vsel %vm8786_vm12, %v8784_v23, 0.0  ;;  %v8813_v20 = vld [vmem:[#allocation35_spill] sm:$0xff] }
 0x1fb   : > { %5648 = vmatpush3.bf16.msra.mxu0 %v4201_v21  ;;  %5619 = vmatprep.mubr.msk.bf16.mxu0 %vm314_vm0, %v3842_v31  ;;  %v8787_v21 = vld [vmem:[#allocation20_spill] sm:$0xff] }
 0x1fc   : > { %6013 = vmatprep.subr.msk.bf16.mxu0 %vm8780_vm13, %v7839_v25  ;;  %v3843_v31 = vpack.c.bf16 %v8787_v21, %v3813_v48  ;;  %v8795_v48 = vld [vmem:[#allocation25_spill] sm:$0xff] }
 0x1fd   : > { %5484 = vmatmul.mubr.msk.bf16.gmra.mrb[4].mxu1 %vm314_vm0, %v8783_v62  ;;  %v8793_v62 = vld [vmem:[#allocation78_spill] sm:$0xff]  ;;  %v3817_v29 = vsel %vm8797_vm4, %v8795_v48, 0.0  ;;  %vm8846_vm4 = vmmov %vm8801_vm6 }
 0x1fe   : > { %5487 = vmatprep.mubr.msk.bf16.mxu1 %vm314_vm0, %v2656_v13  ;;  %v8794_v13 = vpack.c.bf16 %v8793_v62, %v7299_v10  ;;  %v2660_v62 = vpack.c.bf16 %v2635_v41, %v7408_v34  ;;  %v2639_v41 = vsel %vm2414_vm11, %v7512_v18, 0.0  ;;  %vm8838_vm11 = vcmp.ge.s32.totalorder %v8770_v40, 0 }
 0x1ff   : > { %v2914_v36 = vsel %vm8838_vm11, %v8762_v52, 0.0  ;;  %v8842_v52 = vld [vmem:[#allocation21_spill] sm:$0xff]  ;;  %v2920_v40 = vsel %vm8790_vm1, %v8784_v23, 0.0 }
 0x202   : > { %5620 = vmatmul.mubr.msk.bf16.gmra.mrb[4].mxu0 %vm314_vm0, %v3843_v31  ;;  %v3845_v31 = vpack.c.bf16 %v8798_v37, %v3817_v29  ;;  %v8806_v29 = vld [vmem:[#allocation31_spill] sm:$0xff] }
 0x203   : > { %5623 = vmatprep.mubr.msk.bf16.mxu0 %vm314_vm0, %v3844_v2  ;;  %v8799_v2 = vld [vmem:[#allocation28_spill] sm:$0xff]  ;;  %v3821_v10 = vsel %vm8808_vm9, %v8806_v29, 0.0  ;;  %v2928_v49 = vsel %vm8850_vm14, %v8806_v29, 0.0  ;;  %v8855_v29 = vld [vmem:[#allocation43_spill] sm:$0xff] }
 0x204   : > { %v3819_v53 = vsel %vm8801_vm6, %v8799_v2, 0.0  ;;  %vm8849_vm6 = vmmov %vm8808_vm9 }
 0x205   : > { %5488 = vmatmul.mubr.msk.bf16.gmra.mrb[8].mxu1 %vm314_vm0, %v8794_v13  ;;  %v3846_v16 = vpack.c.bf16 %v8802_v22, %v3819_v53  ;;  %v8804_v13 = vld [vmem:[#allocation44_spill] sm:$0xff]  ;;  %v2926_v61 = vsel %vm8849_vm6, %v8799_v2, 0.0 }
 0x206   : > { %5491 = vmatprep.mubr.msk.bf16.mxu1 %vm314_vm0, %v2658_v19  ;;  %v8805_v19 = vpack.c.bf16 %v8804_v13, %v7369_v28  ;;  %v2662_v13 = vpack.c.bf16 %v2639_v41, %v7509_v43 }
 0x20a   : > { %5624 = vmatmul.mubr.msk.bf16.gmra.mrb[8].mxu0 %vm314_vm0, %v3845_v31  ;;  %v8809_v31 = vld [vmem:[#allocation33_spill] sm:$0xff] }
 0x20b   : > { %5627 = vmatprep.mubr.msk.bf16.mxu0 %vm314_vm0, %v3846_v16  ;;  %v3847_v53 = vpack.c.bf16 %v8809_v31, %v3821_v10  ;;  %v8810_v16 = vld [vmem:[#allocation34_spill] sm:$0xff]  ;;  %v2954_v0 = vpack.c.bf16 %v8809_v31, %v2928_v49  ;;  %v8856_v31 = vld [vmem:[#allocation45_spill] sm:$0xff] }
 0x20c   : > { %v3823_v56 = vsel %vm8812_vm2, %v8810_v16, 0.0  ;;  %v8816_v10 = vld [vmem:[#allocation62_spill] sm:$0xff] }
 0x20d   : > { %5492 = vmatmul.mubr.msk.bf16.gmra.mrb[12].mxu1 %vm314_vm0, %v8805_v19  ;;  %v3848_v5 = vpack.c.bf16 %v8813_v20, %v3823_v56  ;;  %v8814_v19 = vld [vmem:[#allocation48_spill] sm:$0xff]  ;;  %vm8817_vm3 = vcmp.ge.s32.totalorder %v8816_v10, 0  ;;  %v2643_v56 = vsel %vm2418_vm15, %v7593_v44, 0.0  ;;  %v8823_v44 = vpack.c.bf16 %v7046_v7, %v8822_v24  ;;  %v8832_v24 = vld [vmem:[#allocation10_spill] sm:$0xff] }
 0x20e   : > { %5495 = vmatprep.mubr.msk.bf16.mxu1 %vm314_vm0, %v2660_v62  ;;  %v8815_v62 = vpack.c.bf16 %v8814_v19, %v8742_v46  ;;  %v3825_v34 = vsel %vm8817_vm3, %v8697_v35, 0.0  ;;  %v2664_v41 = vpack.c.bf16 %v2643_v56, %v7614_v6  ;;  %v8820_v19 = vld [vmem:[#allocation42_spill] sm:$0xff]  ;;  %vm8839_vm15 = vcmp.ge.s32.totalorder %v8776_v1, 0  ;;  %v8843_v1 = vld [vmem:[#allocation24_spill] sm:$0xff]  ;;  %vm8853_vm9 = vmmov %vm8817_vm3 }
 0x20f   : > { %v2930_v58 = vsel %vm8853_vm9, %v8810_v16, 0.0  ;;  %v2934_v16 = vsel %vm1410_vm5, %v8691_v8, 0.0  ;;  %v8867_v7 = vpack.c.bf16 %v8716_v3, %v7666_v17  ;;  %v8878_v17 = vld [vmem:[#allocation71_spill] sm:$0xff] }
 0x210   : > { %v2955_v2 = vpack.c.bf16 %v8813_v20, %v2930_v58  ;;  %v2957_v20 = vpack.c.bf16 %v8706_v9, %v2934_v16  ;;  %v8907_v58 = vld [vmem:[#allocation9_spill] sm:$0xff] }
 0x212   : > { %5628 = vmatmul.mubr.msk.bf16.gmra.mrb[12].mxu0 %vm314_vm0, %v3847_v53  ;;  %v3849_v53 = vpack.c.bf16 %v8690_v11, %v3825_v34  ;;  %v3829_v34 = vsel %vm1410_vm5, %v8702_v14, 0.0 }
 0x213   : > { %5631 = vmatprep.mubr.msk.bf16.mxu0 %vm314_vm0, %v3848_v5  ;;  %v8818_v5 = vld [vmem:[#allocation65_spill] sm:$0xff] }
 0x214   : > { %vm8819_vm13 = vcmp.ge.s32.totalorder %v8818_v5, 0  ;;  %v8858_v5 = vld [vmem:[#allocation46_spill] sm:$0xff] }
 0x215   : > { %5496 = vmatmul.mubr.msk.bf16.gmra.mrb[16].mxu1 %vm314_vm0, %v8815_v62  ;;  %v3827_v33 = vsel %vm8819_vm13, %v8691_v8, 0.0  ;;  %v3851_v62 = vpack.c.bf16 %v8696_v54, %v3829_v34  ;;  %vm8854_vm2 = vmmov %vm8819_vm13  ;;  %v8864_v8 = vld [vmem:[#allocation3_spill] sm:$0xff]  ;;  %vm4967_vm13 = vcmask 64512  }
 0x216   : > { %5499 = vmatprep.mubr.msk.bf16.mxu1 %vm314_vm0, %v2662_v13  ;;  %v3850_v18 = vpack.c.bf16 %v8706_v9, %v3827_v33  ;;  %v8821_v13 = vpack.c.bf16 %v8820_v19, %v7490_v51  ;;  %v2932_v45 = vsel %vm8854_vm2, %v8697_v35, 0.0  ;;  %v8861_v9 = vpack.c.bf16 %v8688_v63, %v7646_v26  ;;  %v8869_v26 = vld [vmem:[#allocation63_spill] sm:$0xff] }
 0x21a   : > { %5632 = vmatmul.mubr.msk.bf16.gmra.mrb[16].mxu0 %vm314_vm0, %v3849_v53  ;;  %v8824_v53 = vld [vmem:[#allocation79_spill] sm:$0xff] }
 0x21b   : > { %5635 = vmatprep.mubr.msk.bf16.mxu0 %vm314_vm0, %v3850_v18  ;;  %v8825_v33 = vpack.c.bf16 %v8824_v53, %v7515_v32  ;;  %v8826_v18 = vld [vmem:[#allocation80_spill] sm:$0xff]  ;;  %v8833_v53 = vld [vmem:[#allocation83_spill] sm:$0xff] }
 0x21c   : > { %v8827_v56 = vpack.c.bf16 %v8826_v18, %v8749_v55  ;;  %v8835_v18 = vld [vmem:[#allocation50_spill] sm:$0xff] }
 0x21d   : > { %5500 = vmatmul.mubr.msk.bf16.gmra.mrb[20].mxu1 %vm314_vm0, %v8821_v13  ;;  %v8830_v13 = vld [vmem:[#allocation82_spill] sm:$0xff] }
 0x21e   : > { %5503 = vmatprep.mubr.msk.bf16.mxu1 %vm314_vm0, %v2664_v41  ;;  %v8828_v41 = vld [vmem:[#allocation81_spill] sm:$0xff]  ;;  %v8831_v34 = vpack.c.bf16 %v8716_v3, %v8830_v13  ;;  %v2916_v13 = vsel %vm8839_vm15, %v8769_v42, 0.0 }
 0x21f   : > { %v8829_v19 = vpack.c.bf16 %v8688_v63, %v8828_v41  ;;  %v8877_v3 = vld [vmem:[#allocation85_spill] sm:$0xff] }
 0x222   : > { %5636 = vmatmul.mubr.msk.bf16.gmra.mrb[20].mxu0 %vm314_vm0, %v3851_v62  ;;  %v2912_v62 = vsel %vm1388_vm8, %v8750_v60, 0.0  ;;  %v2947_v60 = vpack.c.bf16 %v8763_v47, %v2914_v36  ;;  %vm8840_vm8 = vcmask 1041408   ;;  %v2918_v47 = vsel %vm8786_vm12, %v8775_v27, 0.0  ;;  %v8875_v36 = vld [vmem:[#allocation70_spill] sm:$0xff] }
 0x223   : > { %5639 = vmatprep.mubr.msk.bf16.mxu0 %vm314_vm0, %v8823_v44  ;;  %v2946_v44 = vpack.c.bf16 %v8832_v24, %v2912_v62  ;;  %v4497_v62 = vsel %vm8840_vm8, %v7839_v25, 0  ;;  %v8841_v24 = vld [vmem:[#allocation18_spill] sm:$0xff]  ;;  %v2949_v42 = vpack.c.bf16 %v8778_v39, %v2918_v47  ;;  %v2951_v39 = vpack.c.bf16 %v8791_v38, %v2922_v15  ;;  %v8890_v15 = vld [vmem:[#allocation64_spill] sm:$0xff]  ;;  %vm8892_vm5 = vmmov %vm8840_vm8 }
 0x224   : > { %v8844_v25 = vld [vmem:[#allocation26_spill] sm:$0xff]  ;;  %v2924_v27 = vsel %vm8846_vm4, %v8795_v48, 0.0  ;;  %v2953_v38 = vpack.c.bf16 %v8802_v22, %v2926_v61  ;;  %v8851_v48 = vld [vmem:[#allocation37_spill] sm:$0xff]  ;;  %v2956_v22 = vpack.c.bf16 %v8690_v11, %v2932_v45  ;;  %v2936_v11 = vsel %vm1412_vm10, %v8702_v14, 0.0  ;;  %v8863_v14 = vld [vmem:[#allocation7_spill] sm:$0xff] }
 0x225   : > { %5504 = vmatmul.mubr.msk.bf16.gmra.mrb[24].mxu1 %vm314_vm0, %v8825_v33  ;;  %v8834_v33 = vpack.c.bf16 %v8833_v53, %v7535_v59  ;;  %v2952_v23 = vpack.c.bf16 %v8798_v37, %v2924_v27  ;;  %v8852_v37 = vld [vmem:[#allocation41_spill] sm:$0xff]  ;;  %v2958_v10 = vpack.c.bf16 %v8696_v54, %v2936_v11  ;;  %v8865_v53 = vrot.slane %v8717_v4, 1  ;;  %v8874_v4 = vld [vmem:[#allocation84_spill] sm:$0xff]  ;;  %vm8893_vm3 = vmmov %vm8892_vm5 }
 0x226   : > { %5507 = vmatprep.mubr.msk.bf16.mxu1 %vm314_vm0, %v8827_v56  ;;  %v8836_v56 = vmov 0.0   ;;  %v8862_v54 = vld [vmem:[#allocation53_spill] sm:$0xff]  ;;  %vm8866_vm10 = vcmask 1046528  }
 0x227   : > { %v3855_v41 = vpack.c.bf16 %v8836_v56, %v8835_v18  ;;  %v8870_v18 = vpack.c.bf16 %v8868_v50, %v8869_v26  ;;  %v8871_v56 = vld [vmem:[#allocation58_spill] sm:$0xff] }
 0x22a   : > { %5640 = vmatmul.mubr.msk.bf16.gmra.mrb[24].mxu0 %vm314_vm0, %v8829_v19  ;;  %v8837_v19 = vld [vmem:[#allocation14_spill] sm:$0xff] }
 0x22b   : > { %5643 = vmatprep.mubr.msk.bf16.mxu0 %vm314_vm0, %v8831_v34  ;;  %v2948_v34 = vpack.c.bf16 %v8772_v12, %v2916_v13  ;;  %v2950_v12 = vpack.c.bf16 %v8787_v21, %v2920_v40  ;;  %v8847_v21 = vld [vmem:[#allocation29_spill] sm:$0xff]  ;;  %v8879_v13 = vpack.c.bf16 %v8877_v3, %v8878_v17  ;;  %v8886_v40 = vld [vmem:[#allocation47_spill] sm:$0xff] }
 0x22d   : > { %5508 = vmatmul.mubr.msk.bf16.gmra.mrb[28].mxu1 %vm314_vm0, %v8834_v33  ;;  %v4100_v33 = vsel %vm8866_vm10, %v8865_v53, %v8864_v8 }
 0x22e   : > { %5513 = vmatprep.mubr.msk.bf16.mxu1 %vm314_vm0, %v2946_v44  ;;  %v8859_v44 = vld [vmem:[#allocation49_spill] sm:$0xff]  ;;  %v4151_v63 = vpack.c.bf16 %v8864_v8, %v4100_v33 }
 0x232   : > { %5644 = vmatmul.mubr.msk.bf16.gmra.mrb[28].mxu0 %vm314_vm0, %v3855_v41  ;;  %v8872_v41 = vld [vmem:[#allocation56_spill] sm:$0xff] }
 0x233   : > { %5649 = vmatprep.mubr.msk.bf16.mxu0 %vm314_vm0, %v8837_v19  ;;  %v8873_v19 = vpack.c.bf16 %v8871_v56, %v8872_v41 }
 0x235   : > { %5514 = vmatmul.mubr.msk.bf16.vlgmr.msra.gmra.mrb[0].mxu1 %vm314_vm0, %v2947_v60  ;;  %v8876_v60 = vpack.c.bf16 %v8874_v4, %v8875_v36 }
 0x236   : > { %5517 = vmatprep.mubr.msk.bf16.mxu1 %vm314_vm0, %v2948_v34  ;;  %v8880_v34 = vld [vmem:[#allocation86_spill] sm:$0xff] }
 0x23a   : > { %5650 = vmatmul.mubr.msk.bf16.vlgmr.msra.gmra.mrb[0].mxu0 %vm314_vm0, %v8841_v24 }
 0x23b   : > { %5682 = vmatpush3.bf16.msra.mxu0 %v4497_v62  ;;  %5653 = vmatprep.mubr.msk.bf16.mxu0 %vm314_vm0, %v8842_v52  ;;  %v8881_v62 = vld [vmem:[#allocation75_spill] sm:$0xff] }
 0x23c   : > { %v8882_v24 = vpack.c.bf16 %v8880_v34, %v8881_v62  ;;  %v8883_v52 = vld [vmem:[#allocation87_spill] sm:$0xff]  ;;  %v8189_v62 = vld [vmem:[%s8374_s4] ss:$0 sm:$0xff] }
 0x23d   : > { %5518 = vmatmul.mubr.msk.bf16.gmra.mrb[4].mxu1 %vm314_vm0, %v2949_v42  ;;  %v8884_v47 = vpack.c.bf16 %v8883_v52, %v7369_v28  ;;  %v8885_v42 = vld [vmem:[#allocation88_spill] sm:$0xff]  ;;  %v4731_v28 = vld [vmem:[%s8375_s5] sm:$0x3] }
 0x23e   : > { %5521 = vmatprep.mubr.msk.bf16.mxu1 %vm314_vm0, %v2950_v12  ;;  %v8887_v12 = vpack.c.bf16 %v8885_v42, %v8886_v40  ;;  %6014 = vmatprep.subr.msk.bf16.mxu1 %vm8892_vm5, %v4731_v28  ;;  %v4804_v27 = vsel %vm8893_vm3, %v4731_v28, 0 }
 0x23f   : > { %5716 = vmatpush3.bf16.msra.mxu1 %v4804_v27 }
 0x242   : > { %5654 = vmatmul.mubr.msk.bf16.gmra.mrb[4].mxu0 %vm314_vm0, %v8843_v1  ;;  %v8888_v1 = vld [vmem:[#allocation61_spill] sm:$0xff] }
 0x243   : > { %5657 = vmatprep.mubr.msk.bf16.mxu0 %vm314_vm0, %v8844_v25  ;;  %v8889_v25 = vpack.c.bf16 %v8888_v1, %v8742_v46  ;;  %v8896_v46 = vld [vmem:[#allocation66_spill] sm:$0xff] }
 0x245   : > { %5522 = vmatmul.mubr.msk.bf16.gmra.mrb[8].mxu1 %vm314_vm0, %v2951_v39  ;;  %v8891_v39 = vpack.c.bf16 %v8890_v15, %v7509_v43  ;;  %v8898_v43 = vld [vmem:[#allocation39_spill] sm:$0xff] }
 0x246   : > { %5525 = vmatprep.mubr.msk.bf16.mxu1 %vm314_vm0, %v2952_v23  ;;  %v8894_v23 = vld [vmem:[#allocation89_spill] sm:$0xff]  ;;  %v8899_v61 = vpack.c.bf16 %v8898_v43, %v7515_v32 }
 0x24a   : > { %5658 = vmatmul.mubr.msk.bf16.gmra.mrb[8].mxu0 %vm314_vm0, %v8847_v21  ;;  %v8895_v21 = vpack.c.bf16 %v8894_v23, %v7490_v51 }
 0x24b   : > { %5661 = vmatprep.mubr.msk.bf16.mxu0 %vm314_vm0, %v8848_v57  ;;  %v8897_v57 = vpack.c.bf16 %v8896_v46, %v7614_v6 }
 0x24d   : > { %5526 = vmatmul.mubr.msk.bf16.gmra.mrb[12].mxu1 %vm314_vm0, %v2953_v38  ;;  %v8900_v38 = vld [vmem:[#allocation73_spill] sm:$0xff] }
 0x24e   : > { %5529 = vmatprep.mubr.msk.bf16.mxu1 %vm314_vm0, %v2954_v0  ;;  %v8901_v49 = vpack.c.bf16 %v8900_v38, %v8749_v55  ;;  %v8902_v0 = vld [vmem:[#allocation69_spill] sm:$0xff] }
 0x24f   : > { %v8903_v51 = vpack.c.bf16 %v8902_v0, %v7535_v59 }
 0x252   : > { %5662 = vmatmul.mubr.msk.bf16.gmra.mrb[12].mxu0 %vm314_vm0, %v8851_v48  ;;  %v8904_v48 = vld [vmem:[#allocation90_spill] sm:$0xff] }
 0x253   : > { %5665 = vmatprep.mubr.msk.bf16.mxu0 %vm314_vm0, %v8852_v37  ;;  %v8905_v37 = vld [vmem:[#allocation51_spill] sm:$0xff] }
 0x254   : > { %v8906_v6 = vpack.c.bf16 %v8904_v48, %v8905_v37 }
 0x255   : > { %5530 = vmatmul.mubr.msk.bf16.gmra.mrb[16].mxu1 %vm314_vm0, %v2955_v2  ;;  %v8908_v2 = vld [vmem:[#allocation72_spill] sm:$0xff] }
 0x256   : > { %5533 = vmatprep.mubr.msk.bf16.mxu1 %vm314_vm0, %v2956_v22  ;;  %v8909_v32 = vpack.c.bf16 %v8907_v58, %v8908_v2 }
 0x25a   : > { %5666 = vmatmul.mubr.msk.bf16.gmra.mrb[16].mxu0 %vm314_vm0, %v8855_v29 }
 0x25b   : > { %5669 = vmatprep.mubr.msk.bf16.mxu0 %vm314_vm0, %v8856_v31 }
 0x25d   : > { %5534 = vmatmul.mubr.msk.bf16.gmra.mrb[20].mxu1 %vm314_vm0, %v2957_v20 }
 0x25e   : > { %5537 = vmatprep.mubr.msk.bf16.mxu1 %vm314_vm0, %v2958_v10 }
 0x262   : > { %5670 = vmatmul.mubr.msk.bf16.gmra.mrb[20].mxu0 %vm314_vm0, %v8858_v5 }
 0x263   : > { %5673 = vmatprep.mubr.msk.bf16.mxu0 %vm314_vm0, %v8859_v44 }
 0x265   : > { %5538 = vmatmul.mubr.msk.bf16.gmra.mrb[24].mxu1 %vm314_vm0, %v8860_v30 }
 0x266   : > { %5541 = vmatprep.mubr.msk.bf16.mxu1 %vm314_vm0, %v8861_v9 }
 0x26a   : > { %5674 = vmatmul.mubr.msk.bf16.gmra.mrb[24].mxu0 %vm314_vm0, %v8862_v54 }
 0x26b   : > { %5677 = vmatprep.mubr.msk.bf16.mxu0 %vm314_vm0, %v8863_v14 }
 0x26d   : > { %5542 = vmatmul.mubr.msk.bf16.gmra.mrb[28].mxu1 %vm314_vm0, %v8867_v7 }
 0x272   : > { %5678 = vmatmul.mubr.msk.bf16.gmra.mrb[28].mxu0 %vm314_vm0, %v4151_v63 }
 0x273   : > { %5683 = vmatprep.mubr.msk.bf16.mxu0 %vm314_vm0, %v8870_v18 }
 0x27a   : > { %5684 = vmatmul.mubr.msk.bf16.vlgmr.msra.gmra.mrb[0].mxu0 %vm314_vm0, %v8873_v19 }
 0x27b   : > { %5687 = vmatprep.mubr.msk.bf16.mxu0 %vm314_vm0, %v8876_v60 }
 0x282   : > { %5688 = vmatmul.mubr.msk.bf16.gmra.mrb[4].mxu0 %vm314_vm0, %v8879_v13 }
 0x283   : > { %5691 = vmatprep.mubr.msk.bf16.mxu0 %vm314_vm0, %v8882_v24 }
 0x28a   : > { %5692 = vmatmul.mubr.msk.bf16.gmra.mrb[8].mxu0 %vm314_vm0, %v8884_v47 }
 0x28b   : > { %5695 = vmatprep.mubr.msk.bf16.mxu0 %vm314_vm0, %v8887_v12 }
 0x292   : > { %5696 = vmatmul.mubr.msk.bf16.gmra.mrb[12].mxu0 %vm314_vm0, %v8889_v25 }
 0x293   : > { %5699 = vmatprep.mubr.msk.bf16.mxu0 %vm314_vm0, %v8891_v39 }
 0x29a   : > { %5700 = vmatmul.mubr.msk.bf16.gmra.mrb[16].mxu0 %vm314_vm0, %v8895_v21 }
 0x29b   : > { %5703 = vmatprep.mubr.msk.bf16.mxu0 %vm314_vm0, %v8897_v57 }
 0x2a2   : > { %5704 = vmatmul.mubr.msk.bf16.gmra.mrb[20].mxu0 %vm314_vm0, %v8899_v61 }
 0x2a3   : > { %5707 = vmatprep.mubr.msk.bf16.mxu0 %vm314_vm0, %v8901_v49 }
 0x2aa   : > { %5708 = vmatmul.mubr.msk.bf16.gmra.mrb[24].mxu0 %vm314_vm0, %v8903_v51 }
 0x2ab   : > { %5711 = vmatprep.mubr.msk.bf16.mxu0 %vm314_vm0, %v8906_v6 }
 0x2b2   : > { %5712 = vmatmul.mubr.msk.bf16.gmra.mrb[28].mxu0 %vm314_vm0, %v8909_v32 }
 0x308   : > { %v5515_v45 = vpop.f32.mrb[0].mxu1 }
 0x309   : > { %v3047_v22 = vpop.f32.mrb[1].mxu1 }
 0x30a   : > { %v5516_v55 = vpop.f32.mrb[2].mxu1 }
 0x30b   : > { %v3050_v29 = vpop.f32.mrb[3].mxu1 }
 0x310   : > { %v5519_v31 = vpop.f32.mrb[4].mxu1 }
 0x311   : > { %v3063_v16 = vpop.f32.mrb[5].mxu1 }
 0x312   : > { %v5520_v20 = vpop.f32.mrb[6].mxu1 }
 0x313   : > { %v3066_v59 = vpop.f32.mrb[7].mxu1 }
 0x318   : > { %v5523_v35 = vpop.f32.mrb[8].mxu1 }
 0x319   : > { %v3079_v11 = vpop.f32.mrb[9].mxu1 }
 0x31a   : > { %v5524_v10 = vpop.f32.mrb[10].mxu1 }
 0x31b   : > { %v3082_v5 = vpop.f32.mrb[11].mxu1 }
 0x320   : > { %v8146_v44 = vpop.f32.mrb[12].mxu1 }
 0x321   : > { %v8148_v30 = vpop.f32.mrb[13].mxu1 }
 0x322   : > { %v8150_v9 = vpop.f32.mrb[14].mxu1 }
 0x323   : > { %v8152_v54 = vpop.f32.mrb[15].mxu1 }
 0x328   : > { %v8154_v14 = vpop.f32.mrb[16].mxu1 }
 0x329   : > { %v8156_v8 = vpop.f32.mrb[17].mxu1 }
 0x32a   : > { %v8158_v53 = vpop.f32.mrb[18].mxu1 }
 0x32b   : > { %v8160_v33 = vpop.f32.mrb[19].mxu1 }
 0x330   : > { %v8162_v7 = vpop.f32.mrb[20].mxu1 }
 0x331   : > { %v8164_v63 = vpop.f32.mrb[21].mxu1 }
 0x332   : > { %v8166_v50 = vpop.f32.mrb[22].mxu1 }
 0x333   : > { %v8168_v26 = vpop.f32.mrb[23].mxu1 }
 0x338   : > { %v8170_v18 = vpop.f32.mrb[24].mxu1 }
 0x339   : > { %v8172_v56 = vpop.f32.mrb[25].mxu1 }
 0x33a   : > { %v8174_v41 = vpop.f32.mrb[26].mxu1 }
 0x33b   : > { %v8176_v19 = vpop.f32.mrb[27].mxu1 }
 0x340   : > { %v8178_v4 = vpop.f32.mrb[28].mxu1 }
 0x341   : > { %v8180_v36 = vpop.f32.mrb[29].mxu1 }
 0x342   : > { %v8182_v60 = vpop.f32.mrb[30].mxu1 }
 0x343   : > { %v8184_v3 = vpop.f32.mrb[31].mxu1 }
 0x34d   : > { %v5685_v17 = vpop.f32.mrb[0].mxu0 }
 0x34e   : > { %v5749_v13 = vadd.f32 %v5685_v17, %v5515_v45  ;;  %v4533_v34 = vpop.f32.mrb[1].mxu0 }
 0x34f   : > { %v5750_v24 = vadd.f32 %v4533_v34, %v3047_v22  ;;  %v5686_v52 = vpop.f32.mrb[2].mxu0 }
 0x350   : > { %v5751_v47 = vadd.f32 %v5686_v52, %v5516_v55  ;;  %v4536_v42 = vpop.f32.mrb[3].mxu0  ;;  %v4701_v12 = vadd.f32 %v5749_v13, %v8189_v62 }
 0x351   : > { %v5752_v40 = vadd.f32 %v4536_v42, %v3050_v29  ;;  %v4699_v25 = vadd.f32 %v5750_v24, %v8189_v62 }
 0x352   : > { %v4702_v1 = vadd.f32 %v5751_v47, %v8189_v62 }
 0x353   : > { %v4700_v15 = vadd.f32 %v5752_v40, %v8189_v62 }
 0x354   : > { %v4733_v39 = vpack.c.bf16 %v4702_v1, %v4701_v12 }
 0x355   : > { %v4732_v28 = vpack.c.bf16 %v4700_v15, %v4699_v25  ;;  %v5689_v27 = vpop.f32.mrb[4].mxu0 }
 0x356   : > { %v5753_v23 = vadd.f32 %v5689_v27, %v5519_v31  ;;  %v4549_v21 = vpop.f32.mrb[5].mxu0 }
 0x357   : > { %v5754_v46 = vadd.f32 %v4549_v21, %v3063_v16  ;;  %v5690_v57 = vpop.f32.mrb[6].mxu0  ;;  %5717 = vmatprep.mubr.msk.bf16.mxu1 %vm314_vm0, %v4732_v28 }
 0x358   : > { %v5755_v43 = vadd.f32 %v5690_v57, %v5520_v20  ;;  %v4552_v61 = vpop.f32.mrb[7].mxu0  ;;  %5718 = vmatmul.mubr.msk.bf16.vlgmr.msra.gmra.mrb[32].mxu1 %vm314_vm0, %v4733_v39  ;;  %v4705_v49 = vadd.f32 %v5753_v23, %v8189_v62 }
 0x359   : > { %v5756_v38 = vadd.f32 %v4552_v61, %v3066_v59  ;;  %v4703_v51 = vadd.f32 %v5754_v46, %v8189_v62 }
 0x35a   : > { %v4706_v0 = vadd.f32 %v5755_v43, %v8189_v62 }
 0x35b   : > { %v4704_v48 = vadd.f32 %v5756_v38, %v8189_v62 }
 0x35c   : > { %v4735_v37 = vpack.c.bf16 %v4706_v0, %v4705_v49 }
 0x35d   : > { %v4734_v6 = vpack.c.bf16 %v4704_v48, %v4703_v51  ;;  %v5693_v58 = vpop.f32.mrb[8].mxu0 }
 0x35e   : > { %v5757_v2 = vadd.f32 %v5693_v58, %v5523_v35  ;;  %v4565_v32 = vpop.f32.mrb[9].mxu0 }
 0x35f   : > { %v5758_v45 = vadd.f32 %v4565_v32, %v3079_v11  ;;  %v5694_v22 = vpop.f32.mrb[10].mxu0  ;;  %5721 = vmatprep.mubr.msk.bf16.mxu1 %vm314_vm0, %v4734_v6 }
 0x360   : > { %v5759_v55 = vadd.f32 %v5694_v22, %v5524_v10  ;;  %v4568_v29 = vpop.f32.mrb[11].mxu0  ;;  %5722 = vmatmul.mubr.msk.bf16.gmra.mrb[36].mxu1 %vm314_vm0, %v4735_v37  ;;  %v4709_v16 = vadd.f32 %v5757_v2, %v8189_v62 }
 0x361   : > { %v5760_v31 = vadd.f32 %v4568_v29, %v3082_v5  ;;  %v4707_v59 = vadd.f32 %v5758_v45, %v8189_v62 }
 0x362   : > { %v4710_v20 = vadd.f32 %v5759_v55, %v8189_v62 }
 0x363   : > { %v4708_v17 = vadd.f32 %v5760_v31, %v8189_v62 }
 0x364   : > { %v4737_v13 = vpack.c.bf16 %v4710_v20, %v4709_v16 }
 0x365   : > { %v4736_v35 = vpack.c.bf16 %v4708_v17, %v4707_v59  ;;  %v5697_v34 = vpop.f32.mrb[12].mxu0 }
 0x366   : > { %v5761_v11 = vadd.f32 %v5697_v34, %v8146_v44  ;;  %v4581_v24 = vpop.f32.mrb[13].mxu0 }
 0x367   : > { %v5762_v10 = vadd.f32 %v4581_v24, %v8148_v30  ;;  %v5698_v52 = vpop.f32.mrb[14].mxu0  ;;  %5725 = vmatprep.mubr.msk.bf16.mxu1 %vm314_vm0, %v4736_v35 }
 0x368   : > { %v5763_v5 = vadd.f32 %v5698_v52, %v8150_v9  ;;  %v4584_v47 = vpop.f32.mrb[15].mxu0  ;;  %5726 = vmatmul.mubr.msk.bf16.gmra.mrb[40].mxu1 %vm314_vm0, %v4737_v13  ;;  %v4713_v40 = vadd.f32 %v5761_v11, %v8189_v62 }
 0x369   : > { %v5764_v42 = vadd.f32 %v4584_v47, %v8152_v54  ;;  %v4711_v1 = vadd.f32 %v5762_v10, %v8189_v62 }
 0x36a   : > { %v4714_v12 = vadd.f32 %v5763_v5, %v8189_v62 }
 0x36b   : > { %v4712_v44 = vadd.f32 %v5764_v42, %v8189_v62 }
 0x36c   : > { %v4739_v25 = vpack.c.bf16 %v4714_v12, %v4713_v40 }
 0x36d   : > { %v4738_v30 = vpack.c.bf16 %v4712_v44, %v4711_v1  ;;  %v5701_v15 = vpop.f32.mrb[16].mxu0 }
 0x36e   : > { %v5765_v39 = vadd.f32 %v5701_v15, %v8154_v14  ;;  %v4597_v28 = vpop.f32.mrb[17].mxu0 }
 0x36f   : > { %v5766_v9 = vadd.f32 %v4597_v28, %v8156_v8  ;;  %v5702_v27 = vpop.f32.mrb[18].mxu0  ;;  %5729 = vmatprep.mubr.msk.bf16.mxu1 %vm314_vm0, %v4738_v30 }
 0x370   : > { %v5767_v54 = vadd.f32 %v5702_v27, %v8158_v53  ;;  %v4600_v23 = vpop.f32.mrb[19].mxu0  ;;  %5730 = vmatmul.mubr.msk.bf16.gmra.mrb[44].mxu1 %vm314_vm0, %v4739_v25  ;;  %v4717_v46 = vadd.f32 %v5765_v39, %v8189_v62 }
 0x371   : > { %v5768_v21 = vadd.f32 %v4600_v23, %v8160_v33  ;;  %v4715_v43 = vadd.f32 %v5766_v9, %v8189_v62 }
 0x372   : > { %v4718_v57 = vadd.f32 %v5767_v54, %v8189_v62 }
 0x373   : > { %v4716_v14 = vadd.f32 %v5768_v21, %v8189_v62 }
 0x374   : > { %v4741_v61 = vpack.c.bf16 %v4718_v57, %v4717_v46 }
 0x375   : > { %v4740_v8 = vpack.c.bf16 %v4716_v14, %v4715_v43  ;;  %v5705_v38 = vpop.f32.mrb[20].mxu0 }
 0x376   : > { %v5769_v49 = vadd.f32 %v5705_v38, %v8162_v7  ;;  %v4613_v0 = vpop.f32.mrb[21].mxu0 }
 0x377   : > { %v5770_v53 = vadd.f32 %v4613_v0, %v8164_v63  ;;  %v5706_v51 = vpop.f32.mrb[22].mxu0  ;;  %5733 = vmatprep.mubr.msk.bf16.mxu1 %vm314_vm0, %v4740_v8 }
 0x378   : > { %v5771_v33 = vadd.f32 %v5706_v51, %v8166_v50  ;;  %v4616_v48 = vpop.f32.mrb[23].mxu0  ;;  %5734 = vmatmul.mubr.msk.bf16.gmra.mrb[48].mxu1 %vm314_vm0, %v4741_v61  ;;  %v4721_v6 = vadd.f32 %v5769_v49, %v8189_v62 }
 0x379   : > { %v5772_v37 = vadd.f32 %v4616_v48, %v8168_v26  ;;  %v4719_v2 = vadd.f32 %v5770_v53, %v8189_v62 }
 0x37a   : > { %v4722_v58 = vadd.f32 %v5771_v33, %v8189_v62 }
 0x37b   : > { %v4720_v7 = vadd.f32 %v5772_v37, %v8189_v62 }
 0x37c   : > { %v4743_v32 = vpack.c.bf16 %v4722_v58, %v4721_v6 }
 0x37d   : > { %v4742_v63 = vpack.c.bf16 %v4720_v7, %v4719_v2  ;;  %v5709_v45 = vpop.f32.mrb[24].mxu0 }
 0x37e   : > { %v5773_v22 = vadd.f32 %v5709_v45, %v8170_v18  ;;  %v4629_v55 = vpop.f32.mrb[25].mxu0 }
 0x37f   : > { %v5774_v50 = vadd.f32 %v4629_v55, %v8172_v56  ;;  %v5710_v29 = vpop.f32.mrb[26].mxu0  ;;  %5737 = vmatprep.mubr.msk.bf16.mxu1 %vm314_vm0, %v4742_v63 }
 0x380   : > { %v5775_v26 = vadd.f32 %v5710_v29, %v8174_v41  ;;  %v4632_v31 = vpop.f32.mrb[27].mxu0  ;;  %5738 = vmatmul.mubr.msk.bf16.gmra.mrb[52].mxu1 %vm314_vm0, %v4743_v32  ;;  %v4725_v20 = vadd.f32 %v5773_v22, %v8189_v62 }
 0x381   : > { %v5776_v16 = vadd.f32 %v4632_v31, %v8176_v19  ;;  %v4723_v17 = vadd.f32 %v5774_v50, %v8189_v62 }
 0x382   : > { %v4726_v59 = vadd.f32 %v5775_v26, %v8189_v62 }
 0x383   : > { %v4724_v18 = vadd.f32 %v5776_v16, %v8189_v62 }
 0x384   : > { %v4745_v13 = vpack.c.bf16 %v4726_v59, %v4725_v20 }
 0x385   : > { %v4744_v56 = vpack.c.bf16 %v4724_v18, %v4723_v17  ;;  %v5713_v35 = vpop.f32.mrb[28].mxu0 }
 0x386   : > { %v5777_v34 = vadd.f32 %v5713_v35, %v8178_v4  ;;  %v4645_v11 = vpop.f32.mrb[29].mxu0 }
 0x387   : > { %v5778_v41 = vadd.f32 %v4645_v11, %v8180_v36  ;;  %v5714_v24 = vpop.f32.mrb[30].mxu0  ;;  %5741 = vmatprep.mubr.msk.bf16.mxu1 %vm314_vm0, %v4744_v56 }
 0x388   : > { %v5779_v19 = vadd.f32 %v5714_v24, %v8182_v60  ;;  %v4648_v10 = vpop.f32.mrb[31].mxu0  ;;  %5742 = vmatmul.mubr.msk.bf16.gmra.mrb[56].mxu1 %vm314_vm0, %v4745_v13  ;;  %v4729_v5 = vadd.f32 %v5777_v34, %v8189_v62  ;;  %v8262_v60 = vld [vmem:[%s8376_s6] ss:$0 sm:$0xff] }
 0x389   : > { %v5780_v52 = vadd.f32 %v4648_v10, %v8184_v3  ;;  %v4727_v4 = vadd.f32 %v5778_v41, %v8189_v62 }
 0x38a   : > { %v4730_v47 = vadd.f32 %v5779_v19, %v8189_v62 }
 0x38b   : > { %v4728_v42 = vadd.f32 %v5780_v52, %v8189_v62 }
 0x38c   : > { %v4747_v36 = vpack.c.bf16 %v4730_v47, %v4729_v5 }
 0x38d   : > { %v4746_v40 = vpack.c.bf16 %v4728_v42, %v4727_v4 }
 0x38f   : > { %5745 = vmatprep.mubr.msk.bf16.mxu1 %vm314_vm0, %v4746_v40 }
 0x390   : > { %5746 = vmatmul.mubr.msk.bf16.gmra.mrb[60].mxu1 %vm314_vm0, %v4747_v36 }
 0x42b   : > { %v5719_v3 = vpop.f32.mrb[32].mxu1 }
 0x42c   : > { %v4849_v62 = vadd.f32 %v5719_v3, %v8262_v60  ;;  %v4840_v12 = vpop.f32.mrb[33].mxu1 }
 0x42d   : > { %v4841_v1 = vadd.f32 %v8262_v60, %v4840_v12  ;;  %v5720_v44 = vpop.f32.mrb[34].mxu1 }
 0x42e   : > { %4970 = vst.msk [vmem:[%s8269_s17 + $0x10] sm:$0xff] %vm4967_vm13, %v4849_v62  ;;  %v4852_v25 = vadd.f32 %v5720_v44, %v8262_v60  ;;  %v4843_v30 = vpop.f32.mrb[35].mxu1 }
 0x42f   : > { %4968 = vst.msk [vmem:[%s8269_s17] sm:$0xff] %vm4967_vm13, %v4841_v1  ;;  %v4844_v15 = vadd.f32 %v8262_v60, %v4843_v30 }
 0x430   : > { %4971 = vst.msk [vmem:[%s8269_s17 + $0x18] sm:$0xff] %vm4967_vm13, %v4852_v25 }
 0x431   : > { %4969 = vst.msk [vmem:[%s8269_s17 + $0x8] sm:$0xff] %vm4967_vm13, %v4844_v15 }
 0x433   : > { %v5723_v39 = vpop.f32.mrb[36].mxu1 }
 0x434   : > { %v4865_v28 = vadd.f32 %v5723_v39, %v8262_v60  ;;  %v4856_v9 = vpop.f32.mrb[37].mxu1 }
 0x435   : > { %v4857_v27 = vadd.f32 %v8262_v60, %v4856_v9  ;;  %v5724_v54 = vpop.f32.mrb[38].mxu1 }
 0x436   : > { %4974 = vst.msk [vmem:[%s8269_s17 + $0x30] sm:$0xff] %vm4967_vm13, %v4865_v28  ;;  %v4868_v23 = vadd.f32 %v5724_v54, %v8262_v60  ;;  %v4859_v21 = vpop.f32.mrb[39].mxu1 }
 0x437   : > { %4972 = vst.msk [vmem:[%s8269_s17 + $0x20] sm:$0xff] %vm4967_vm13, %v4857_v27  ;;  %v4860_v46 = vadd.f32 %v8262_v60, %v4859_v21 }
 0x438   : > { %4975 = vst.msk [vmem:[%s8269_s17 + $0x38] sm:$0xff] %vm4967_vm13, %v4868_v23 }
 0x439   : > { %4973 = vst.msk [vmem:[%s8269_s17 + $0x28] sm:$0xff] %vm4967_vm13, %v4860_v46 }
 0x43b   : > { %v5727_v57 = vpop.f32.mrb[40].mxu1 }
 0x43c   : > { %v4881_v43 = vadd.f32 %v5727_v57, %v8262_v60  ;;  %v4872_v14 = vpop.f32.mrb[41].mxu1 }
 0x43d   : > { %v4873_v61 = vadd.f32 %v8262_v60, %v4872_v14  ;;  %v5728_v8 = vpop.f32.mrb[42].mxu1 }
 0x43e   : > { %4978 = vst.msk [vmem:[%s8269_s17 + $0x50] sm:$0xff] %vm4967_vm13, %v4881_v43  ;;  %v4884_v38 = vadd.f32 %v5728_v8, %v8262_v60  ;;  %v4875_v49 = vpop.f32.mrb[43].mxu1 }
 0x43f   : > { %4976 = vst.msk [vmem:[%s8269_s17 + $0x40] sm:$0xff] %vm4967_vm13, %v4873_v61  ;;  %v4876_v0 = vadd.f32 %v8262_v60, %v4875_v49 }
 0x440   : > { %4979 = vst.msk [vmem:[%s8269_s17 + $0x58] sm:$0xff] %vm4967_vm13, %v4884_v38 }
 0x441   : > { %4977 = vst.msk [vmem:[%s8269_s17 + $0x48] sm:$0xff] %vm4967_vm13, %v4876_v0 }
 0x443   : > { %v5731_v53 = vpop.f32.mrb[44].mxu1 }
 0x444   : > { %v4897_v51 = vadd.f32 %v5731_v53, %v8262_v60  ;;  %v4888_v33 = vpop.f32.mrb[45].mxu1 }
 0x445   : > { %v4889_v48 = vadd.f32 %v8262_v60, %v4888_v33  ;;  %v5732_v37 = vpop.f32.mrb[46].mxu1 }
 0x446   : > { %4982 = vst.msk [vmem:[%s8269_s17 + $0x70] sm:$0xff] %vm4967_vm13, %v4897_v51  ;;  %v4900_v6 = vadd.f32 %v5732_v37, %v8262_v60  ;;  %v4891_v58 = vpop.f32.mrb[47].mxu1 }
 0x447   : > { %4980 = vst.msk [vmem:[%s8269_s17 + $0x60] sm:$0xff] %vm4967_vm13, %v4889_v48  ;;  %v4892_v2 = vadd.f32 %v8262_v60, %v4891_v58 }
 0x448   : > { %4983 = vst.msk [vmem:[%s8269_s17 + $0x78] sm:$0xff] %vm4967_vm13, %v4900_v6 }
 0x449   : > { %4981 = vst.msk [vmem:[%s8269_s17 + $0x68] sm:$0xff] %vm4967_vm13, %v4892_v2 }
 0x44b   : > { %v5735_v7 = vpop.f32.mrb[48].mxu1 }
 0x44c   : > { %v4913_v32 = vadd.f32 %v5735_v7, %v8262_v60  ;;  %v4904_v63 = vpop.f32.mrb[49].mxu1 }
 0x44d   : > { %v4905_v45 = vadd.f32 %v8262_v60, %v4904_v63  ;;  %v5736_v22 = vpop.f32.mrb[50].mxu1 }
 0x44e   : > { %4986 = vst.msk [vmem:[%s8269_s17 + $0x90] sm:$0xff] %vm4967_vm13, %v4913_v32  ;;  %v4916_v55 = vadd.f32 %v5736_v22, %v8262_v60  ;;  %v4907_v50 = vpop.f32.mrb[51].mxu1 }
 0x44f   : > { %4984 = vst.msk [vmem:[%s8269_s17 + $0x80] sm:$0xff] %vm4967_vm13, %v4905_v45  ;;  %v4908_v29 = vadd.f32 %v8262_v60, %v4907_v50 }
 0x450   : > { %4987 = vst.msk [vmem:[%s8269_s17 + $0x98] sm:$0xff] %vm4967_vm13, %v4916_v55 }
 0x451   : > { %4985 = vst.msk [vmem:[%s8269_s17 + $0x88] sm:$0xff] %vm4967_vm13, %v4908_v29 }
 0x453   : > { %v5739_v26 = vpop.f32.mrb[52].mxu1 }
 0x454   : > { %v4929_v31 = vadd.f32 %v5739_v26, %v8262_v60  ;;  %v4920_v16 = vpop.f32.mrb[53].mxu1 }
 0x455   : > { %v4921_v20 = vadd.f32 %v8262_v60, %v4920_v16  ;;  %v5740_v59 = vpop.f32.mrb[54].mxu1 }
 0x456   : > { %4990 = vst.msk [vmem:[%s8269_s17 + $0xb0] sm:$0xff] %vm4967_vm13, %v4929_v31  ;;  %v4932_v17 = vadd.f32 %v5740_v59, %v8262_v60  ;;  %v4923_v18 = vpop.f32.mrb[55].mxu1 }
 0x457   : > { %4988 = vst.msk [vmem:[%s8269_s17 + $0xa0] sm:$0xff] %vm4967_vm13, %v4921_v20  ;;  %v4924_v13 = vadd.f32 %v8262_v60, %v4923_v18 }
 0x458   : > { %4991 = vst.msk [vmem:[%s8269_s17 + $0xb8] sm:$0xff] %vm4967_vm13, %v4932_v17 }
 0x459   : > { %4989 = vst.msk [vmem:[%s8269_s17 + $0xa8] sm:$0xff] %vm4967_vm13, %v4924_v13 }
 0x45b   : > { %v5743_v56 = vpop.f32.mrb[56].mxu1 }
 0x45c   : > { %v4945_v35 = vadd.f32 %v5743_v56, %v8262_v60  ;;  %v4936_v34 = vpop.f32.mrb[57].mxu1 }
 0x45d   : > { %v4937_v11 = vadd.f32 %v8262_v60, %v4936_v34  ;;  %v5744_v41 = vpop.f32.mrb[58].mxu1 }
 0x45e   : > { %4994 = vst.msk [vmem:[%s8269_s17 + $0xd0] sm:$0xff] %vm4967_vm13, %v4945_v35  ;;  %v4948_v24 = vadd.f32 %v5744_v41, %v8262_v60  ;;  %v4939_v19 = vpop.f32.mrb[59].mxu1 }
 0x45f   : > { %4992 = vst.msk [vmem:[%s8269_s17 + $0xc0] sm:$0xff] %vm4967_vm13, %v4937_v11  ;;  %v4940_v10 = vadd.f32 %v8262_v60, %v4939_v19 }
 0x460   : > { %4995 = vst.msk [vmem:[%s8269_s17 + $0xd8] sm:$0xff] %vm4967_vm13, %v4948_v24 }
 0x461   : > { %4993 = vst.msk [vmem:[%s8269_s17 + $0xc8] sm:$0xff] %vm4967_vm13, %v4940_v10 }
 0x463   : > { %v5747_v52 = vpop.f32.mrb[60].mxu1 }
 0x464   : > { %v4961_v5 = vadd.f32 %v5747_v52, %v8262_v60  ;;  %v4952_v47 = vpop.f32.mrb[61].mxu1 }
 0x465   : > { %v4953_v4 = vadd.f32 %v8262_v60, %v4952_v47  ;;  %v5748_v42 = vpop.f32.mrb[62].mxu1 }
 0x466   : > { %4998 = vst.msk [vmem:[%s8269_s17 + $0xf0] sm:$0xff] %vm4967_vm13, %v4961_v5  ;;  %v4964_v36 = vadd.f32 %v5748_v42, %v8262_v60  ;;  %v4955_v40 = vpop.f32.mrb[63].mxu1 }
 0x467   : > { %4996 = vst.msk [vmem:[%s8269_s17 + $0xe0] sm:$0xff] %vm4967_vm13, %v4953_v4  ;;  %v4956_v3 = vadd.f32 %v8262_v60, %v4955_v40 }
 0x468   : > { %4999 = vst.msk [vmem:[%s8269_s17 + $0xf8] sm:$0xff] %vm4967_vm13, %v4964_v36 }
 0x469   : > { %4997 = vst.msk [vmem:[%s8269_s17 + $0xe8] sm:$0xff] %vm4967_vm13, %v4956_v3 }
 0x46a PF: > { %s17_s24 = sadd.s32 1, %s6095_s24  }
 0x46b   : > { %p14_p4 = scmp.ge.s32.totalorder %s17_s24, 4  }
 0x46d   :  { %16 = sbr.rel (!%p14_p4) target bundleno = 1 (0x1), region = 86 }

// kernel: _lambda_.7
= control target key start
LH: loop header
LB: loop body
LE: loop exit
PB: predicated region body
PF: predicated region fallthrough
CT: control target
= control target key end

     0   :  { %s2767_s0 = inlined_call_operand.vmem [shape: f32[2,16,256], index: 0, kind: input, shape index: {}]   ;;  %s2768_s1 = inlined_call_operand.vmem [shape: f32[2,1,8], index: 1, kind: input, shape index: {}]   ;;  %s2769_s2 = inlined_call_operand.vmem [shape: bf16[256,16], index: 2, kind: input, shape index: {}]   ;;  %s2770_s3 = inlined_call_operand.vmem [shape: f32[1,16], index: 3, kind: input, shape index: {}, may-alias: {3,5,13,15,19}]   ;;  %s2771_s4 = inlined_call_operand.vmem [shape: f32[1,16], index: 4, kind: input, shape index: {}, may-alias: {4,14}]   ;;  %s2772_s5 = inlined_call_operand.vmem [shape: f32[1,16], index: 5, kind: input, shape index: {}, may-alias: {3,5,13,15,19}]   ;;  %s2773_s6 = inlined_call_operand.vmem [shape: bf16[2,16,8], index: 6, kind: input, shape index: {}]   ;;  %s2774_s7 = inlined_call_operand.vmem [shape: f32[2,1,8], index: 7, kind: input, shape index: {}, may-alias: {7,9,11}]   ;;  %s2775_s8 = inlined_call_operand.vmem [shape: bf16[2,16,8], index: 8, kind: input, shape index: {}]   ;;  %s2776_s9 = inlined_call_operand.vmem [shape: f32[2,1,8], index: 9, kind: input, shape index: {}, may-alias: {7,9,11}]   ;;  %s2777_s10 = inlined_call_operand.vmem [shape: bf16[2,16,8], index: 10, kind: input, shape index: {}]   ;;  %s2778_s11 = inlined_call_operand.vmem [shape: f32[2,1,8], index: 11, kind: input, shape index: {}, may-alias: {7,9,11}]   ;;  %s2779_s12 = inlined_call_operand.vmem [shape: bf16[2,8,16], index: 12, kind: input, shape index: {}]   ;;  %s2780_s13 = inlined_call_operand.vmem [shape: f32[1,16], index: 13, kind: input, shape index: {}, may-alias: {3,5,13,15,19}]   ;;  %s2781_s14 = inlined_call_operand.vmem [shape: f32[1,16], index: 14, kind: input, shape index: {}, may-alias: {4,14}]   ;;  %s2782_s15 = inlined_call_operand.vmem [shape: f32[1,16], index: 15, kind: input, shape index: {}, may-alias: {3,5,13,15,19}]   ;;  %s2783_s16 = inlined_call_operand.vmem [shape: bf16[16,32], index: 16, kind: input, shape index: {}]   ;;  %s2784_s17 = inlined_call_operand.vmem [shape: f32[1,32], index: 17, kind: input, shape index: {}]   ;;  %s2785_s18 = inlined_call_operand.vmem [shape: bf16[32,16], index: 18, kind: input, shape index: {}]   ;;  %s2786_s19 = inlined_call_operand.vmem [shape: f32[1,16], index: 19, kind: input, shape index: {}, may-alias: {3,5,13,15,19}]   ;;  %s2787_s20 = inlined_call_operand.vmem [shape: f32[16,16], index: 20, kind: input, shape index: {}]   ;;  %s2788_s21 = inlined_call_operand.vmem [shape: bf16[16,48], index: 21, kind: input, shape index: {}]   ;;  %s2789_s22 = inlined_call_operand.vmem [shape: f32[1,48], index: 22, kind: input, shape index: {}]   ;;  %s2790_s23 = inlined_call_operand.vmem [shape: bf16[8,48], index: 23, kind: input, shape index: {}]   ;;  %s2791_s24 = inlined_call_operand.vmem [shape: f32[2,16,48], index: 24, kind: output, shape index: {}]  }
   0x1   :  { %2797 = sst [smem:[#allocation3_spill]] %s2767_s0 }
   0x2   :  { %2798 = sst [smem:[#allocation4_spill]] %s2768_s1 }
   0x3   :  { %2799 = sst [smem:[#allocation5_spill]] %s2769_s2 }
   0x4   :  { %2800 = sst [smem:[#allocation6_spill]] %s2770_s3 }
   0x5   :  { %2801 = sst [smem:[#allocation7_spill]] %s2771_s4 }
   0x6   :  { %2802 = sst [smem:[#allocation8_spill]] %s2772_s5  ;;  %s2479_s5 = smov 0  }
   0x7   :  { %2803 = sst [smem:[#allocation9_spill]] %s2773_s6 }
   0x8   :  { %2804 = sst [smem:[#allocation10_spill]] %s2774_s7 }
   0x9   :  { %2805 = sst [smem:[#allocation11_spill]] %s2775_s8 }
   0xa LB: > { %2806 = sst [smem:[#allocation2_spill]] %s2350_s5  ;;  %s2048_s26 = sadd.s32 4294967295, %s2350_s5   ;;  %s2350_s5 = sphi %s2479_s5, %s34_s5  }
   0xb   : > { %p2052_p0 = scmp.ge.s32.totalorder %s2350_s5, 1  ;;  %p670_p1 = scmp.lt.s32.totalorder %s2350_s5, 3 }
   0xd   : > { %p671_p2 = pnand %p2052_p0, %p670_p1 }
   0xe   : > { %s2807_s6 = sld [smem:[#allocation5_spill]] (!%p671_p2)  ;;  %p739_p3 = scmp.lt.s32.totalorder (!%p671_p2), %s2048_s26, 1  ;;  %vm937_vm0 = vcmask (!%p671_p2), 130048   ;;  %v2352_v45 = vmov (!%p671_p2), 0.0   ;;  %vm2353_vm1 = vmmov (!%p671_p2), 0   ;;  %v2309_v63 = vld [vmem:[%s2777_s10 + $0x8] sm:$0xff] (!%p671_p2)  }
   0xf   : > { %674 = sbr.rel (%p671_p2) target bundleno = 3556 (0xde4), region = 116  ;;  %s2808_s8 = sld [smem:[#allocation3_spill]] (!%p671_p2)  ;;  %2182 = vmatprep.subr.bf16.mxu1 (!%p671_p2), %v2352_v45  ;;  %2184 = vmatprep.mubr.msk.bf16.mxu1 (!%p671_p2), %vm2353_vm1, %v2352_v45  ;;  %vm1155_vm2 = vcmask (!%p671_p2), 64512   ;;  %vm1574_vm3 = vcmask (!%p671_p2), 1043456   ;;  %vm1823_vm4 = vcmask (!%p671_p2), 261120   ;;  %vm1981_vm5 = vcmask (!%p671_p2), 392192  }
  0x10   : > { %s2809_s29 = sld [smem:[#allocation6_spill]] (!%p671_p2)  ;;  %s2810_s7 = sld [smem:[#allocation9_spill]] (!%p671_p2) }
  0x11   : > { %s2811_s25 = sld [smem:[#allocation7_spill]] (!%p671_p2)  ;;  %s2812_s27 = sld [smem:[#allocation8_spill]] (!%p671_p2) }
  0x12   : > { %s2815_s0 = sld [smem:[#allocation4_spill]] (!%p671_p2) }
  0x14   : > { %v2290_v0 = vld [vmem:[%s2807_s6 + $0x40] sm:$0xff] (!%p671_p2)   ;;  %v2292_v2 = vld [vmem:[%s2807_s6 + $0x48] sm:$0xff] (!%p671_p2)   ;;  %v2294_v4 = vld [vmem:[%s2807_s6 + $0x50] sm:$0xff] (!%p671_p2)  }
  0x15   : > { %v2291_v1 = vld [vmem:[%s2807_s6] sm:$0xff] (!%p671_p2)   ;;  %2127 = vmatprep.subr.bf16.mxu0 (!%p671_p2), %v2290_v0  ;;  %v2293_v3 = vld [vmem:[%s2807_s6 + $0x8] sm:$0xff] (!%p671_p2)   ;;  %v2295_v5 = vld [vmem:[%s2807_s6 + $0x10] sm:$0xff] (!%p671_p2)  }
  0x16   : > { %2128 = vmatpush3.bf16.msra.mxu0 %v2291_v1  ;;  %s2818_s26 = smov (!%p739_p3, %s2048_s26), 1  ;;  %v2296_v6 = vld [vmem:[%s2807_s6 + $0x58] sm:$0xff]   ;;  %v2298_v8 = vld [vmem:[%s2807_s6 + $0x60] sm:$0xff]   ;;  %v2300_v10 = vld [vmem:[%s2807_s6 + $0x68] sm:$0xff]  }
  0x17   : > { %2129 = vmatprep.subr.bf16.mxu0 %v2292_v2  ;;  %s2125_s2 = sshll.u32 %s2818_s26, 5  ;;  %v2297_v7 = vld [vmem:[%s2807_s6 + $0x18] sm:$0xff]   ;;  %v2299_v9 = vld [vmem:[%s2807_s6 + $0x20] sm:$0xff]   ;;  %v2301_v13 = vld [vmem:[%s2807_s6 + $0x28] sm:$0xff]   ;;  %s2126_s5 = sshll.u32 %s2818_s26, 4 }
  0x18   : > { %s743_s4 = scalar_lea.vmem %s2808_s8, %s2125_s2  ;;  %v2302_v15 = vld [vmem:[%s2807_s6 + $0x70] sm:$0xff]   ;;  %v2304_v17 = vld [vmem:[%s2807_s6 + $0x78] sm:$0xff]   ;;  %v2057_v23 = vld [vmem:[%s2809_s29] ss:$0 sm:$0xff]  ;;  %s2814_s8 = sld [smem:[#allocation10_spill]] }
  0x19   : > { %v754_v11 = vld [vmem:[%s743_s4 + $0x8] sm:$0xff]  ;;  %v756_v12 = vld [vmem:[%s743_s4 + $0x18] sm:$0xff]  ;;  %v2303_v16 = vld [vmem:[%s2807_s6 + $0x30] sm:$0xff]   ;;  %s746_s30 = scalar_lea.vmem %s2815_s0, %s2818_s26 }
  0x1a   : > { %2130 = vmatpush3.bf16.msra.mxu0 %v2293_v3  ;;  %v790_v14 = vpack.c.bf16 %v756_v12, %v754_v11  ;;  %v2305_v18 = vld [vmem:[%s2807_s6 + $0x38] sm:$0xff]   ;;  %v753_v19 = vld [vmem:[%s743_s4] sm:$0xff]  ;;  %v755_v20 = vld [vmem:[%s743_s4 + $0x10] sm:$0xff]  ;;  %s2813_s4 = sld [smem:[#allocation11_spill]] }
  0x1b   : > { %2131 = vmatprep.subr.bf16.mxu0 %v2294_v4  ;;  %v789_v21 = vpack.c.bf16 %v755_v20, %v753_v19  ;;  %v2306_v43 = vld [vmem:[%s2810_s7] sm:$0xff]   ;;  %v2307_v44 = vld [vmem:[%s2810_s7 + $0x8] sm:$0xff]  }
  0x1c   : > { %926 = vmatprep.mubr.bf16.mxu0 %v790_v14  ;;  %2183 = vmatpush3.bf16.msra.mxu1 %v2306_v43  ;;  %v2074_v54 = vld [vmem:[%s2811_s25] ss:$0 sm:$0xff]  ;;  %v2102_v20 = vld [vmem:[%s2778_s11 + $0x1] ss:$0 sm:$0xff]  ;;  %s751_s25 = scalar_lea.vmem %s2791_s24, %s2126_s5 }
  0x1d   : > { %2188 = vmatprep.subr.bf16.mxu1 %v2352_v45  ;;  %v2075_v58 = vld [vmem:[%s2812_s27] ss:$0 sm:$0xff] }
  0x1e   : > { %2132 = vmatpush3.bf16.msra.mxu0 %v2295_v5  ;;  %v2310_v1 = vld [vmem:[%s2777_s10] sm:$0xff]  }
  0x1f   : > { %2133 = vmatprep.subr.bf16.mxu0 %v2296_v6  ;;  %v2076_v2 = vld [vmem:[%s2814_s8] ss:$0 sm:$0xff]  ;;  %v2090_v4 = vld [vmem:[%s2814_s8 + $0x1] ss:$0 sm:$0xff] }
  0x20   : > { %v2308_v62 = vld [vmem:[%s2813_s4] sm:$0xff]  }
  0x22   : > { %2134 = vmatpush3.bf16.msra.mxu0 %v2297_v7 }
  0x23   : > { %2135 = vmatprep.subr.bf16.mxu0 %v2298_v8 }
  0x26   : > { %2136 = vmatpush3.bf16.msra.mxu0 %v2299_v9 }
  0x27   : > { %2137 = vmatprep.subr.bf16.mxu0 %v2300_v10 }
  0x2a   : > { %2138 = vmatpush3.bf16.msra.mxu0 %v2301_v13 }
  0x2b   : > { %2139 = vmatprep.subr.bf16.mxu0 %v2302_v15 }
  0x2e   : > { %2140 = vmatpush3.bf16.msra.mxu0 %v2303_v16 }
  0x2f   : > { %2141 = vmatprep.subr.bf16.mxu0 %v2304_v17 }
  0x32   : > { %2142 = vmatpush3.bf16.msra.mxu0 %v2305_v18  ;;  %v2079_v18 = vld [vmem:[%s2776_s9] ss:$0 sm:$0xff] }
  0x33   : > { %2212 = vmatprep.subr.bf16.mxu0 %v2352_v45 }
  0x35   : > { %927 = vmatmul.mubr.bf16.vlgmr.msra.gmra.mrb[0].mxu0 %v789_v21 }
  0x36   : > { %2213 = vmatpush3.bf16.msra.mxu0 %v2307_v44  ;;  %2214 = vmatprep.mubr.msk.bf16.mxu0 %vm2353_vm1, %v2352_v45 }
  0x37   : > { %2224 = vmatprep.subr.bf16.mxu0 %v2352_v45 }
 0x108   : > { %v2143_v22 = vpop.f32.mrb[0].mxu0 }
 0x109   : > { %v2144_v24 = vpop.f32.mrb[1].mxu0 }
 0x10a   : > { %v2145_v25 = vadd.f32 %v2144_v24, %v2143_v22  ;;  %v2146_v26 = vpop.f32.mrb[2].mxu0 }
 0x10b   : > { %v2147_v27 = vpop.f32.mrb[3].mxu0 }
 0x10c   : > { %v2544_v28 = vadd.f32 %v2145_v25, %v2057_v23  ;;  %v2148_v29 = vadd.f32 %v2147_v27, %v2146_v26 }
 0x10e   : > { %v2546_v30 = vadd.f32 %v2148_v29, %v2057_v23  ;;  %v938_v31 = vsel %vm937_vm0, %v2544_v28, 0.0 }
 0x10f   : > { %939 = vadd.xlane.f32.xlu0 %v938_v31 }
 0x110   : > { %v941_v32 = vsel %vm937_vm0, %v2546_v30, 0.0 }
 0x113   : > { %942 = vadd.xlane.f32.xlu0 %v941_v32 }
 0x19c   : > { %v940_v33 = vpop.xlane.xlu0 %939 }
 0x19d   : > { %v945_v34 = vmul.f32 0.0625, %v940_v33 }
 0x19f   : > { %v947_v35 = vsub.f32 %v2544_v28, %v945_v34 }
 0x1a0   : > { %v943_v36 = vpop.xlane.xlu0 %942 }
 0x1a1   : > { %v946_v37 = vmul.f32 0.0625, %v943_v36  ;;  %v949_v38 = vmul.f32 %v947_v35, %v947_v35 }
 0x1a3   : > { %v948_v39 = vsub.f32 %v2546_v30, %v946_v37  ;;  %v951_v40 = vsel %vm937_vm0, %v949_v38, 0.0  ;;  %v2082_v37 = vld [vmem:[%s2778_s11] ss:$0 sm:$0xff] }
 0x1a4   : > { %952 = vadd.xlane.f32.xlu1 %v951_v40 }
 0x1a5   : > { %v950_v41 = vmul.f32 %v948_v39, %v948_v39 }
 0x1a7   : > { %v954_v42 = vsel %vm937_vm0, %v950_v41, 0.0 }
 0x1a8   : > { %955 = vadd.xlane.f32.xlu1 %v954_v42 }
 0x231   : > { %v953_v46 = vpop.xlane.xlu1 %952 }
 0x232   : > { %v957_v47 = vmul.f32 0.0625, %v953_v46 }
 0x234   : > { %v959_v48 = vadd.f32 1e-05, %v957_v47 }
 0x235   : > { %v956_v49 = vpop.xlane.xlu1 %955 }
 0x236   : > { %2316 = vrsqrt.f32 %v959_v48  ;;  %v958_v50 = vmul.f32 0.0625, %v956_v49 }
 0x238   : > { %v960_v51 = vadd.f32 1e-05, %v958_v50 }
 0x23a   : > { %2318 = vrsqrt.f32 %v960_v51 }
 0x240   : > { %v2317_v52 = vpop.eup %2316 }
 0x241   : > { %v963_v53 = vmul.f32 %v2317_v52, %v947_v35 }
 0x243   : > { %v971_v56 = vmul.f32 %v2074_v54, %v963_v53 }
 0x244   : > { %v2319_v55 = vpop.eup %2318 }
 0x245   : > { %v964_v57 = vmul.f32 %v2319_v55, %v948_v39  ;;  %v979_v60 = vadd.f32 %v2075_v58, %v971_v56 }
 0x247   : > { %v972_v59 = vmul.f32 %v2074_v54, %v964_v57 }
 0x249   : > { %v980_v61 = vadd.f32 %v2075_v58, %v972_v59 }
 0x24b   : > { %v2582_v0 = vpack.c.bf16 %v980_v61, %v979_v60 }
 0x24d   : > { %2185 = vmatmul.mubr.msk.bf16.vlgmr.msra.gmra.mrb[0].mxu1 %vm937_vm0, %v2582_v0  ;;  %2215 = vmatmul.mubr.msk.bf16.vlgmr.msra.gmra.mrb[4].mxu0 %vm937_vm0, %v2582_v0 }
 0x24e   : > { %2189 = vmatpush3.bf16.msra.mxu1 %v2308_v62  ;;  %2225 = vmatpush3.bf16.msra.mxu0 %v2309_v63 }
 0x24f   : > { %2190 = vmatprep.mubr.msk.bf16.mxu1 %vm2353_vm1, %v2352_v45  ;;  %2226 = vmatprep.mubr.msk.bf16.mxu0 %vm2353_vm1, %v2352_v45 }
 0x250   : > { %2194 = vmatprep.subr.bf16.mxu1 %v2352_v45  ;;  %2236 = vmatprep.subr.bf16.mxu0 %v2352_v45 }
 0x255   : > { %2191 = vmatmul.mubr.msk.bf16.vlgmr.msra.gmra.mrb[4].mxu1 %vm937_vm0, %v2582_v0  ;;  %2227 = vmatmul.mubr.msk.bf16.vlgmr.msra.gmra.mrb[8].mxu0 %vm937_vm0, %v2582_v0 }
 0x256   : > { %2195 = vmatpush3.bf16.msra.mxu1 %v2310_v1  ;;  %2196 = vmatprep.mubr.msk.bf16.mxu1 %vm2353_vm1, %v2352_v45 }
 0x257   : > { %2200 = vmatprep.subr.bf16.mxu1 %v2352_v45  ;;  %2238 = vmatprep.mubr.msk.bf16.mxu0 %vm2353_vm1, %v2352_v45 }
 0x25d   : > { %2197 = vmatmul.mubr.msk.bf16.vlgmr.msra.gmra.mrb[8].mxu1 %vm937_vm0, %v2582_v0 }
 0x25e   : > { %2202 = vmatprep.mubr.msk.bf16.mxu1 %vm2353_vm1, %v2352_v45 }
 0x320   : > { %v1034_v3 = vpop.f32.mrb[0].mxu1  ;;  %v1326_v5 = vpop.f32.mrb[4].mxu0 }
 0x321   : > { %v2186_v6 = vpop.f32.mrb[1].mxu1  ;;  %v2216_v7 = vpop.f32.mrb[5].mxu0  ;;  %v1035_v10 = vadd.f32 %v2076_v2, %v1034_v3  ;;  %v2616_v11 = vadd.f32 %v2090_v4, %v1326_v5 }
 0x322   : > { %v1037_v8 = vpop.f32.mrb[2].mxu1  ;;  %v1329_v9 = vpop.f32.mrb[6].mxu0  ;;  %v2311_v7 = vld [vmem:[%s2813_s4 + $0x8] sm:$0xff]  }
 0x323   : > { %v1038_v12 = vadd.f32 %v2076_v2, %v1037_v8  ;;  %v2618_v13 = vadd.f32 %v2090_v4, %v1329_v9  ;;  %v2187_v14 = vpop.f32.mrb[3].mxu1  ;;  %v2217_v15 = vpop.f32.mrb[7].mxu0 }
 0x325   : > { %v1153_v16 = vpack.c.bf16 %v1038_v12, %v1035_v10  ;;  %v1449_v17 = vpack.c.bf16 %v2618_v13, %v2616_v11 }
 0x328   : > { %v1090_v19 = vpop.f32.mrb[4].mxu1  ;;  %v1442_v21 = vpop.f32.mrb[8].mxu0 }
 0x329   : > { %v2192_v22 = vpop.f32.mrb[5].mxu1  ;;  %v2228_v23 = vpop.f32.mrb[9].mxu0  ;;  %v1091_v26 = vadd.f32 %v2079_v18, %v1090_v19  ;;  %v1443_v27 = vadd.f32 %v2102_v20, %v1442_v21 }
 0x32a   : > { %v1093_v24 = vpop.f32.mrb[6].mxu1  ;;  %v1445_v25 = vpop.f32.mrb[10].mxu0 }
 0x32b   : > { %v1094_v29 = vadd.f32 %v2079_v18, %v1093_v24  ;;  %v1446_v31 = vadd.f32 %v2102_v20, %v1445_v25  ;;  %v2193_v32 = vpop.f32.mrb[7].mxu1  ;;  %v2229_v33 = vpop.f32.mrb[11].mxu0 }
 0x32d   : > { %v1154_v34 = vpack.c.bf16 %v1094_v29, %v1091_v26  ;;  %v1523_v35 = vpack.c.bf16 %v1446_v31, %v1443_v27 }
 0x32f   : > { %2237 = vmatpush3.bf16.msra.mxu0 %v1523_v35  ;;  %v1160_v36 = vsel %vm1155_vm2, %v1154_v34, 0 }
 0x330   : > { %v1146_v38 = vpop.f32.mrb[8].mxu1  ;;  %2201 = vmatpush3.bf16.xpose.msra.mxu1 %v1160_v36  ;;  %2248 = vmatprep.subr.bf16.mxu0 %v2352_v45 }
 0x331   : > { %v2198_v39 = vpop.f32.mrb[9].mxu1  ;;  %2206 = vmatprep.subr.bf16.mxu1 %v2352_v45  ;;  %v1147_v41 = vadd.f32 %v2082_v37, %v1146_v38 }
 0x332   : > { %v1149_v40 = vpop.f32.mrb[10].mxu1 }
 0x333   : > { %v1150_v42 = vadd.f32 %v2082_v37, %v1149_v40  ;;  %v2199_v43 = vpop.f32.mrb[11].mxu1 }
 0x335   : > { %v1228_v44 = vpack.c.bf16 %v1150_v42, %v1147_v41  ;;  %v2107_v42 = vld [vmem:[%s2779_s12 + $0x4] sm:$0xf] }
 0x336   : > { %v1576_v43 = vsel %vm1574_vm3, %v2107_v42, 0  ;;  %v2113_v42 = vld [vmem:[%s2784_s17] ss:$0 sm:$0xff] }
 0x337   : > { %2203 = vmatmul.mubr.msk.bf16.vlgmr.msra.gmra.mrb[12].mxu1 %vm1155_vm2, %v1153_v16  ;;  %v2096_v16 = vld [vmem:[%s2776_s9 + $0x1] ss:$0 sm:$0xff] }
 0x338   : > { %2207 = vmatpush3.bf16.msra.mxu1 %v1228_v44  ;;  %2208 = vmatprep.mubr.msk.bf16.mxu1 %vm2353_vm1, %v2352_v45 }
 0x339   : > { %2218 = vmatprep.subr.bf16.mxu1 %v2352_v45 }
 0x40a   : > { %v1196_v46 = vpop.f32.mrb[12].mxu1 }
 0x40b   : > { %v1203_v47 = vmul.f32 0.35355338, %v1196_v46  ;;  %v2204_v48 = vpop.f32.mrb[13].mxu1 }
 0x40c   : > { %v1199_v49 = vpop.f32.mrb[14].mxu1 }
 0x40d   : > { %v1204_v50 = vmul.f32 0.35355338, %v1199_v49  ;;  %v2205_v51 = vpop.f32.mrb[15].mxu1  ;;  %v1205_v52 = vsel %vm937_vm0, %v1203_v47, -inf  ;;  %v1273_v49 = vld [vmem:[%s2779_s12] sm:$0xf] }
 0x40e   : > { %1206 = vmax.xlane.f32.xlu0 %v1205_v52 }
 0x40f   : > { %v1208_v53 = vsel %vm937_vm0, %v1204_v50, -inf }
 0x410   : > { %1209 = vmax.xlane.f32.xlu1 %v1208_v53  ;;  %v1623_v53 = vsel %vm1574_vm3, %v1273_v49, 0 }
 0x49b   : > { %v1207_v54 = vpop.xlane.xlu0 %1206 }
 0x49c   : > { %v1211_v55 = vsub.f32 %v1203_v47, %v1207_v54 }
 0x49d   : > { %v1210_v56 = vpop.xlane.xlu1 %1209 }
 0x49e   : > { %v1213_v57 = vmul.f32 1.442695, %v1211_v55  ;;  %v1212_v58 = vsub.f32 %v1204_v50, %v1210_v56 }
 0x4a0   : > { %2320 = vpow2.f32 %v1213_v57  ;;  %v1215_v59 = vmul.f32 1.442695, %v1212_v58 }
 0x4a2   : > { %2322 = vpow2.f32 %v1215_v59 }
 0x4aa   : > { %v2321_v60 = vpop.eup %2320 }
 0x4ab   : > { %v1217_v61 = vsel %vm937_vm0, %v2321_v60, 0.0 }
 0x4ac   : > { %v2323_v62 = vpop.eup %2322  ;;  %1218 = vadd.xlane.f32.xlu0 %v1217_v61 }
 0x4ad   : > { %v1220_v63 = vsel %vm937_vm0, %v2323_v62, 0.0 }
 0x4ae   : > { %1221 = vadd.xlane.f32.xlu1 %v1220_v63 }
 0x539   : > { %v1219_v1 = vpop.xlane.xlu0 %1218 }
 0x53a   : > { %2324 = vrcp.f32 %v1219_v1 }
 0x53b   : > { %v1222_v2 = vpop.xlane.xlu1 %1221 }
 0x53c   : > { %2326 = vrcp.f32 %v1222_v2 }
 0x544   : > { %v2325_v3 = vpop.eup %2324 }
 0x545   : > { %v1225_v5 = vmul.f32 %v2325_v3, %v2321_v60  ;;  %v2110_v3 = vld [vmem:[%s2780_s13] ss:$0 sm:$0xff] }
 0x546   : > { %v2327_v4 = vpop.eup %2326 }
 0x547   : > { %v1226_v6 = vmul.f32 %v2327_v4, %v2323_v62 }
 0x549   : > { %v1227_v8 = vpack.c.bf16 %v1226_v6, %v1225_v5 }
 0x54b   : > { %2209 = vmatmul.mubr.msk.bf16.vlgmr.msra.gmra.mrb[16].mxu1 %vm937_vm0, %v1227_v8 }
 0x54c   : > { %2219 = vmatpush3.bf16.msra.mxu1 %v2311_v7  ;;  %2220 = vmatprep.mubr.msk.bf16.mxu1 %vm2353_vm1, %v2352_v45 }
 0x54d   : > { %2230 = vmatprep.subr.bf16.mxu1 %v2352_v45 }
 0x553   : > { %2221 = vmatmul.mubr.msk.bf16.vlgmr.msra.gmra.mrb[20].mxu1 %vm937_vm0, %v2582_v0 }
 0x554   : > { %2232 = vmatprep.mubr.msk.bf16.mxu1 %vm2353_vm1, %v2352_v45 }
 0x61e   : > { %v2653_v9 = vpop.f32.mrb[16].mxu1 }
 0x61f   : > { %v2210_v10 = vpop.f32.mrb[17].mxu1 }
 0x620   : > { %v1269_v12 = vpop.f32.mrb[18].mxu1 }
 0x621   : > { %v1274_v14 = vpack.c.bf16 %v1269_v12, %v2653_v9  ;;  %v2211_v15 = vpop.f32.mrb[19].mxu1 }
 0x626   : > { %v1384_v18 = vpop.f32.mrb[20].mxu1 }
 0x627   : > { %v2222_v19 = vpop.f32.mrb[21].mxu1  ;;  %v1385_v21 = vadd.f32 %v2096_v16, %v1384_v18 }
 0x628   : > { %v1387_v20 = vpop.f32.mrb[22].mxu1 }
 0x629   : > { %v1388_v22 = vadd.f32 %v2096_v16, %v1387_v20  ;;  %v2223_v0 = vpop.f32.mrb[23].mxu1 }
 0x62b   : > { %v1450_v23 = vpack.c.bf16 %v1388_v22, %v1385_v21 }
 0x62d   : > { %v1455_v24 = vsel %vm1155_vm2, %v1450_v23, 0  ;;  %v2312_v23 = vld [vmem:[%s2783_s16] sm:$0xff]  }
 0x62e   : > { %2231 = vmatpush3.bf16.xpose.msra.mxu1 %v1455_v24 }
 0x62f   : > { %2242 = vmatprep.subr.bf16.mxu1 %v2352_v45 }
 0x635   : > { %2233 = vmatmul.mubr.msk.bf16.vlgmr.msra.gmra.mrb[24].mxu1 %vm1155_vm2, %v1449_v17 }
 0x636   : > { %2244 = vmatprep.mubr.msk.bf16.mxu1 %vm2353_vm1, %v2352_v45  ;;  %2243 = vmatpush3.bf16.msra.mxu1 %v1576_v43 }
 0x637   : > { %2254 = vmatprep.subr.bf16.mxu1 %v2352_v45 }
 0x708   : > { %v1491_v25 = vpop.f32.mrb[24].mxu1 }
 0x709   : > { %v1498_v26 = vmul.f32 0.35355338, %v1491_v25  ;;  %v2234_v27 = vpop.f32.mrb[25].mxu1 }
 0x70a   : > { %v1494_v29 = vpop.f32.mrb[26].mxu1 }
 0x70b   : > { %v1499_v31 = vmul.f32 0.35355338, %v1494_v29  ;;  %v2235_v32 = vpop.f32.mrb[27].mxu1  ;;  %v1500_v33 = vsel %vm937_vm0, %v1498_v26, -inf }
 0x70c   : > { %1501 = vmax.xlane.f32.xlu0 %v1500_v33  ;;  %v2111_v33 = vld [vmem:[%s2781_s14] ss:$0 sm:$0xff] }
 0x70d   : > { %v1503_v34 = vsel %vm937_vm0, %v1499_v31, -inf }
 0x70e   : > { %1504 = vmax.xlane.f32.xlu1 %v1503_v34 }
 0x799   : > { %v1502_v35 = vpop.xlane.xlu0 %1501 }
 0x79a   : > { %v1506_v36 = vsub.f32 %v1498_v26, %v1502_v35 }
 0x79b   : > { %v1505_v11 = vpop.xlane.xlu1 %1504 }
 0x79c   : > { %v1508_v13 = vmul.f32 1.442695, %v1506_v36  ;;  %v1507_v17 = vsub.f32 %v1499_v31, %v1505_v11 }
 0x79e   : > { %2328 = vpow2.f32 %v1508_v13  ;;  %v1510_v37 = vmul.f32 1.442695, %v1507_v17  ;;  %v2112_v13 = vld [vmem:[%s2782_s15] ss:$0 sm:$0xff] }
 0x7a0   : > { %2330 = vpow2.f32 %v1510_v37 }
 0x7a8   : > { %v2329_v38 = vpop.eup %2328 }
 0x7a9   : > { %v1512_v39 = vsel %vm937_vm0, %v2329_v38, 0.0 }
 0x7aa   : > { %v2331_v40 = vpop.eup %2330  ;;  %1513 = vadd.xlane.f32.xlu0 %v1512_v39 }
 0x7ab   : > { %v1515_v41 = vsel %vm937_vm0, %v2331_v40, 0.0 }
 0x7ac   : > { %1516 = vadd.xlane.f32.xlu1 %v1515_v41  ;;  %v2314_v41 = vld [vmem:[%s2785_s18 + $0x8] sm:$0xff]  }
 0x837   : > { %v1514_v44 = vpop.xlane.xlu0 %1513 }
 0x838   : > { %2332 = vrcp.f32 %v1514_v44 }
 0x839   : > { %v1517_v46 = vpop.xlane.xlu1 %1516 }
 0x83a   : > { %2334 = vrcp.f32 %v1517_v46 }
 0x842   : > { %v2333_v47 = vpop.eup %2332 }
 0x843   : > { %v1520_v50 = vmul.f32 %v2333_v47, %v2329_v38 }
 0x844   : > { %v2335_v48 = vpop.eup %2334 }
 0x845   : > { %v1521_v51 = vmul.f32 %v2335_v48, %v2331_v40  ;;  %v2313_v40 = vld [vmem:[%s2785_s18] sm:$0xff]  }
 0x847   : > { %v1522_v52 = vpack.c.bf16 %v1521_v51, %v1520_v50 }
 0x849   : > { %2239 = vmatmul.mubr.msk.bf16.vlgmr.msra.gmra.mrb[12].mxu0 %vm937_vm0, %v1522_v52 }
 0x84a   : > { %2249 = vmatpush3.bf16.msra.mxu0 %v1623_v53  ;;  %2250 = vmatprep.mubr.msk.bf16.mxu0 %vm2353_vm1, %v2352_v45 }
 0x84b   : > { %2260 = vmatprep.subr.bf16.mxu0 %v2352_v45 }
 0x851   : > { %2251 = vmatmul.mubr.msk.bf16.vlgmr.msra.gmra.mrb[16].mxu0 %vm1155_vm2, %v1274_v14 }
 0x852   : > { %2264 = vmatprep.mubr.msk.bf16.mxu0 %vm2353_vm1, %v2352_v45  ;;  %2261 = vmatpush3.bf16.msra.mxu0 %v2313_v40 }
 0x853   : > { %2262 = vmatprep.subr.bf16.mxu0 %v2352_v45 }
 0x856   : > { %2263 = vmatpush3.bf16.msra.mxu0 %v2314_v41 }
 0x857   : > { %2274 = vmatprep.subr.bf16.mxu0 %v2352_v45 }
 0x91c   : > { %v1561_v54 = vpop.f32.mrb[12].mxu0 }
 0x91d   : > { %v2240_v55 = vpop.f32.mrb[13].mxu0 }
 0x91e   : > { %v1564_v56 = vpop.f32.mrb[14].mxu0 }
 0x91f   : > { %v1570_v57 = vpack.c.bf16 %v1564_v56, %v1561_v54  ;;  %v2241_v58 = vpop.f32.mrb[15].mxu0 }
 0x921   : > { %2245 = vmatmul.mubr.msk.bf16.vlgmr.msra.gmra.mrb[28].mxu1 %vm1155_vm2, %v1570_v57 }
 0x922   : > { %2256 = vmatprep.mubr.msk.bf16.mxu1 %vm2353_vm1, %v2352_v45  ;;  %2255 = vmatpush3.bf16.msra.mxu1 %v2312_v23 }
 0x923   : > { %2268 = vmatprep.subr.bf16.mxu1 %v2352_v45 }
 0x924   : > { %v1659_v59 = vpop.f32.mrb[16].mxu0 }
 0x925   : > { %v2252_v60 = vpop.f32.mrb[17].mxu0 }
 0x926   : > { %v1662_v61 = vpop.f32.mrb[18].mxu0 }
 0x927   : > { %v2253_v62 = vpop.f32.mrb[19].mxu0 }
 0x9f4   : > { %v1612_v63 = vpop.f32.mrb[28].mxu1 }
 0x9f5   : > { %v1660_v1 = vadd.f32 %v1659_v59, %v1612_v63  ;;  %v2246_v2 = vpop.f32.mrb[29].mxu1 }
 0x9f6   : > { %v1615_v4 = vpop.f32.mrb[30].mxu1 }
 0x9f7   : > { %v1666_v5 = vadd.f32 %v1660_v1, %v2544_v28  ;;  %v1663_v6 = vadd.f32 %v1662_v61, %v1615_v4  ;;  %v2247_v7 = vpop.f32.mrb[31].mxu1 }
 0x9f9   : > { %v2694_v8 = vadd.f32 %v2110_v3, %v1666_v5  ;;  %v1667_v9 = vadd.f32 %v1663_v6, %v2546_v30  ;;  %v1875_v6 = vld [vmem:[%s2790_s23] sm:$0xf] }
 0x9fa   : > { %v1882_v7 = vsel %vm1574_vm3, %v1875_v6, 0 }
 0x9fb   : > { %v2697_v10 = vadd.f32 %v2110_v3, %v1667_v9  ;;  %v1679_v12 = vsel %vm937_vm0, %v2694_v8, 0.0  ;;  %v1874_v9 = vld [vmem:[%s746_s30] sm:$0x1] }
 0x9fc   : > { %1680 = vadd.xlane.f32.xlu0 %v1679_v12  ;;  %v1876_v12 = vpack.c.bf16 %v1874_v9, %v1874_v9 }
 0x9fd   : > { %v1682_v14 = vsel %vm937_vm0, %v2697_v10, 0.0 }
 0x9fe   : > { %1683 = vadd.xlane.f32.xlu1 %v1682_v14  ;;  %v2315_v14 = vld [vmem:[%s2788_s21] sm:$0xff]  }
 0xa89   : > { %v1681_v15 = vpop.xlane.xlu0 %1680 }
 0xa8a   : > { %v1685_v16 = vmul.f32 0.0625, %v1681_v15 }
 0xa8b   : > { %v1684_v18 = vpop.xlane.xlu1 %1683 }
 0xa8c   : > { %v1687_v28 = vsub.f32 %v2694_v8, %v1685_v16  ;;  %v1686_v19 = vmul.f32 0.0625, %v1684_v18 }
 0xa8e   : > { %v1688_v20 = vsub.f32 %v2697_v10, %v1686_v19  ;;  %v1689_v21 = vmul.f32 %v1687_v28, %v1687_v28 }
 0xa90   : > { %v1691_v30 = vsel %vm937_vm0, %v1689_v21, 0.0  ;;  %v1690_v22 = vmul.f32 %v1688_v20, %v1688_v20 }
 0xa91   : > { %1692 = vadd.xlane.f32.xlu0 %v1691_v30  ;;  %v1870_v30 = vld [vmem:[%s2787_s20] sm:$0xff] }
 0xa92   : > { %v1694_v0 = vsel %vm937_vm0, %v1690_v22, 0.0  ;;  %v1871_v22 = vld [vmem:[%s2787_s20 + $0x8] sm:$0xff] }
 0xa93   : > { %1695 = vadd.xlane.f32.xlu1 %v1694_v0 }
 0xb1e   : > { %v1693_v24 = vpop.xlane.xlu0 %1692 }
 0xb1f   : > { %v1697_v25 = vmul.f32 0.0625, %v1693_v24 }
 0xb20   : > { %v1696_v26 = vpop.xlane.xlu1 %1695 }
 0xb21   : > { %v1699_v27 = vadd.f32 1e-05, %v1697_v25  ;;  %v1698_v29 = vmul.f32 0.0625, %v1696_v26 }
 0xb23   : > { %2336 = vrsqrt.f32 %v1699_v27  ;;  %v1700_v31 = vadd.f32 1e-05, %v1698_v29 }
 0xb25   : > { %2338 = vrsqrt.f32 %v1700_v31  ;;  %v1927_v31 = vlaneseq }
 0xb2d   : > { %v2337_v32 = vpop.eup %2336 }
 0xb2e   : > { %v1703_v34 = vmul.f32 %v2337_v32, %v1687_v28  ;;  %v1928_v32 = vshrl.u32 %v1927_v31, 7 }
 0xb2f   : > { %v2339_v35 = vpop.eup %2338 }
 0xb30   : > { %v1711_v36 = vmul.f32 %v2111_v33, %v1703_v34  ;;  %v1704_v11 = vmul.f32 %v2339_v35, %v1688_v20  ;;  %v1929_v35 = vsub.s32 0, %v1928_v32 }
 0xb32   : > { %v1712_v17 = vmul.f32 %v2111_v33, %v1704_v11  ;;  %v1719_v37 = vadd.f32 %v2112_v13, %v1711_v36  ;;  %v1877_v33 = vld [vmem:[%s2789_s22] sm:$0x1] }
 0xb34   : > { %v1720_v38 = vadd.f32 %v2112_v13, %v1712_v17 }
 0xb36   : > { %v1723_v39 = vpack.c.bf16 %v1720_v38, %v1719_v37 }
 0xb38   : > { %2257 = vmatmul.mubr.msk.bf16.vlgmr.msra.gmra.mrb[32].mxu1 %vm937_vm0, %v1723_v39 }
 0xb39   : > { %2270 = vmatprep.mubr.msk.bf16.mxu1 %vm2353_vm1, %v2352_v45  ;;  %2269 = vmatpush3.bf16.msra.mxu1 %v1882_v7 }
 0xb40   : > { %2271 = vmatmul.mubr.msk.bf16.vlgmr.msra.gmra.mrb[36].mxu1 %vm1155_vm2, %v1876_v12 }
 0xc0b   : > { %v1774_v43 = vpop.f32.mrb[32].mxu1 }
 0xc0c   : > { %v1775_v44 = vadd.f32 %v2113_v42, %v1774_v43  ;;  %v2258_v46 = vpop.f32.mrb[33].mxu1 }
 0xc0d   : > { %v1777_v47 = vpop.f32.mrb[34].mxu1 }
 0xc0e   : > { %v1781_v48 = vmul.f32 %v1775_v44, %v1775_v44  ;;  %v1778_v49 = vadd.f32 %v2113_v42, %v1777_v47  ;;  %v2259_v50 = vpop.f32.mrb[35].mxu1 }
 0xc10   : > { %v1783_v51 = vmul.f32 %v1781_v48, %v1775_v44  ;;  %v1782_v52 = vmul.f32 %v1778_v49, %v1778_v49 }
 0xc12   : > { %v1785_v53 = vmul.f32 0.044715, %v1783_v51  ;;  %v1784_v54 = vmul.f32 %v1782_v52, %v1778_v49 }
 0xc13   : > { %v1918_v26 = vpop.f32.mrb[36].mxu1 }
 0xc14   : > { %v1787_v55 = vadd.f32 %v1785_v53, %v1775_v44  ;;  %v1786_v56 = vmul.f32 0.044715, %v1784_v54  ;;  %v1919_v34 = vadd.f32 %v1918_v26, %v1877_v33 }
 0xc16   : > { %v1789_v57 = vmul.f32 0.7978846, %v1787_v55  ;;  %v1788_v58 = vadd.f32 %v1786_v56, %v1778_v49  ;;  %v1930_v36 = vrot.slane %v1919_v34, %v1929_v35 }
 0xc18   : > { %2340 = vtanh.f32 %v1789_v57  ;;  %v1790_v59 = vmul.f32 0.7978846, %v1788_v58 }
 0xc1a   : > { %2342 = vtanh.f32 %v1790_v59 }
 0xc22   : > { %v2341_v60 = vpop.eup %2340 }
 0xc23   : > { %v1793_v61 = vadd.f32 1.0, %v2341_v60 }
 0xc24   : > { %v2343_v62 = vpop.eup %2342 }
 0xc25   : > { %v1795_v63 = vmul.f32 0.5, %v1793_v61  ;;  %v1794_v1 = vadd.f32 1.0, %v2343_v62 }
 0xc27   : > { %v1796_v2 = vmul.f32 0.5, %v1794_v1  ;;  %v1797_v3 = vmul.f32 %v1795_v63, %v1775_v44 }
 0xc29   : > { %v1798_v4 = vmul.f32 %v1796_v2, %v1778_v49 }
 0xc2b   : > { %v1803_v5 = vpack.c.bf16 %v1798_v4, %v1797_v3 }
 0xc2d   : > { %2265 = vmatmul.mubr.msk.bf16.vlgmr.msra.gmra.mrb[20].mxu0 %vm1823_vm4, %v1803_v5 }
 0xc2e   : > { %2276 = vmatprep.mubr.msk.bf16.mxu0 %vm2353_vm1, %v2352_v45  ;;  %2275 = vmatpush3.bf16.msra.mxu0 %v2315_v14  ;;  %v2116_v45 = vld [vmem:[%s2786_s19] ss:$0 sm:$0xff] }
 0xd00   : > { %v1861_v15 = vpop.f32.mrb[20].mxu0 }
 0xd01   : > { %v1862_v16 = vadd.f32 %v2116_v45, %v1861_v15  ;;  %v2266_v18 = vpop.f32.mrb[21].mxu0 }
 0xd02   : > { %v1864_v28 = vpop.f32.mrb[22].mxu0 }
 0xd03   : > { %v1868_v19 = vadd.f32 %v1862_v16, %v2694_v8  ;;  %v1865_v20 = vadd.f32 %v2116_v45, %v1864_v28  ;;  %v2267_v21 = vpop.f32.mrb[23].mxu0  ;;  %v2272_v8 = vpop.f32.mrb[37].mxu1 }
 0xd04   : > { %v1921_v27 = vpop.f32.mrb[38].mxu1 }
 0xd05   : > { %v1869_v0 = vadd.f32 %v1865_v20, %v2697_v10  ;;  %v1872_v23 = vadd.f32 %v1870_v30, %v1868_v19  ;;  %v2273_v29 = vpop.f32.mrb[39].mxu1 }
 0xd07   : > { %v1873_v24 = vadd.f32 %v1871_v22, %v1869_v0 }
 0xd09   : > { %v1926_v25 = vpack.c.bf16 %v1873_v24, %v1872_v23 }
 0xd0b   : > { %2277 = vmatmul.mubr.msk.bf16.vlgmr.msra.gmra.mrb[24].mxu0 %vm937_vm0, %v1926_v25 }
 0xdde   : > { %v1974_v10 = vpop.f32.mrb[24].mxu0 }
 0xddf   : > { %v1975_v11 = vadd.f32 %v1974_v10, %v1930_v36  ;;  %v2278_v13 = vpop.f32.mrb[25].mxu0 }
 0xde0   : > { %v1977_v17 = vpop.f32.mrb[26].mxu0 }
 0xde1   : > { %1982 = vst.msk [vmem:[%s751_s25] sm:$0xff] %vm1981_vm5, %v1975_v11  ;;  %v1978_v37 = vadd.f32 %v1977_v17, %v1930_v36  ;;  %v2279_v38 = vpop.f32.mrb[27].mxu0 }
 0xde3   : > { %1983 = vst.msk [vmem:[%s751_s25 + $0x8] sm:$0xff] %vm1981_vm5, %v1978_v37 }
 0xde4 PF: > { %s2816_s1 = sld [smem:[#allocation2_spill]] }
 0xdea   : > { %s34_s5 = sadd.s32 1, %s2816_s1  }
 0xdeb   : > { %p31_p4 = scmp.ge.s32.totalorder %s34_s5, 4  }
 0xded   :  { %33 = sbr.rel (!%p31_p4) target bundleno = 10 (0xa), region = 156 }

</bundles_post_ra>
